<compile_context>
chip_gen: v6e
topology: v6e:2x2x1
jax: 0.10.0
libtpu: 0.0.40
codegen_flags: <defaults>
</compile_context>

<pallas_src>
import functools

import numpy as np
import jax
import jax.numpy as jnp
from jax.experimental import pallas as pl
from jax.experimental.pallas import tpu as pltpu

_VMEM = pl.BlockSpec(memory_space=pltpu.MemorySpace.VMEM)

CP = 128                                     # lane-padded channel width
CHANNELS = [3, 6, 12, 24, 24, 24, 24, 24, 24, 24, 24]
CONF_THRESH = [0.02, 0.03, 0.09, 0.01, 0.09, 0.04, 0.02,
               0.016, 0.015, 0.014, 0.005]
BN_EPS = 1e-5
COS_EPS = 1e-8


# ---------------------------------------------------------------------------
# Pallas kernels
# ---------------------------------------------------------------------------
def _ternary_batch_kernel(w_ref, cnt_ref, sub_ref, o_ref):
    """TernaryQuantize for a batch of flattened weight tensors (one per row).

    Row r holds cnt[r] valid elements (rest is zero padding).  sub[r]==1 selects
    the conv path (subtract the per-tensor mean first); sub[r]==0 is the Linear
    path.  Thresholds are the per-tensor global min/max thirds.
    """
    w = w_ref[...]                                            # [G, L] f32
    g, l = w.shape
    col = jax.lax.broadcasted_iota(jnp.int32, (g, l), 1)
    valid = col < cnt_ref[...]                                # [G, L]
    cnt_f = cnt_ref[...].astype(jnp.float32)
    mean = jnp.sum(jnp.where(valid, w, 0.0), axis=1, keepdims=True) / cnt_f
    w_adj = w - sub_ref[...] * mean
    wmax = jnp.max(jnp.where(valid, w_adj, -jnp.inf), axis=1, keepdims=True)
    wmin = jnp.min(jnp.where(valid, w_adj, jnp.inf), axis=1, keepdims=True)
    third = (wmax - wmin) / 3.0
    lower = wmin + third
    higher = wmax - third
    o_ref[...] = jnp.where(w_adj < lower, -1.0,
                           jnp.where(w_adj > higher, 1.0, 0.0))


def _mm_bn_kernel(p_ref, w_ref, scale_ref, shift_ref, o_ref, *, relu):
    """out = maybe_relu((patches @ W) * scale + shift); bf16 MXU, f32 epilogue."""
    acc = jnp.dot(p_ref[...].astype(jnp.bfloat16), w_ref[...],
                  preferred_element_type=jnp.float32)
    out = acc * scale_ref[...] + shift_ref[...]
    if relu:
        out = jnp.maximum(out, 0.0)
    o_ref[...] = out


def _block_kernel(x_ref, s_ref, w1_ref, w2_ref, a1_ref, b1_ref, a2_ref, b2_ref,
                  cen_ref, icn_ref, fcw_ref, fcb_ref,
                  feat_ref, sim_ref, fc_ref, *, ntaps, use_s):
    """Fused BasicBlock + per-stage classifier head.

    3x3 pad-1 convs are evaluated as sum_t (S_t @ x) @ W_t with static 0/1 tap
    selection matrices S_t, so the intermediate activation `h` never leaves VMEM.
    Also emits sims = cosine(avg-pooled feature, semantic centers) and the ternary
    fc head applied to the same pooled vector (only stage 11's fc output is used).
    """
    hw, cp = x_ref.shape

    def conv3x3(act_bf16, w_ref_):
        acc = jnp.zeros((hw, cp), jnp.float32)
        for t in range(ntaps):
            if use_s:
                s_t = s_ref[t * hw:(t + 1) * hw, :]
                tap = jnp.dot(s_t, act_bf16,
                              preferred_element_type=jnp.float32
                              ).astype(jnp.bfloat16)
            else:                      # 1x1 spatial: only the centre tap survives
                tap = act_bf16
            acc = acc + jnp.dot(tap, w_ref_[t * cp:(t + 1) * cp, :],
                                preferred_element_type=jnp.float32)
        return acc

    xb = x_ref[...].astype(jnp.bfloat16)
    # conv1 + BN1 + ReLU  (kept in VMEM/vregs, never written to HBM)
    h = jnp.maximum(conv3x3(xb, w1_ref) * a1_ref[...] + b1_ref[...], 0.0)
    # conv2 + BN2 + residual + ReLU
    out = jnp.maximum(
        h + conv3x3(h.astype(jnp.bfloat16), w2_ref) * a2_ref[...] + b2_ref[...],
        0.0)
    feat_ref[...] = out

    # classifier: adaptive_avg_pool2d((1,1)) + cosine similarity (batch == 1).
    sv = jnp.mean(out, axis=0, keepdims=True)                       # [1, CP]
    dots = jnp.dot(sv, cen_ref[...], preferred_element_type=jnp.float32)
    sv_norm = jnp.sqrt(jnp.sum(sv * sv, axis=1, keepdims=True))
    inv_sv = 1.0 / jnp.maximum(sv_norm, COS_EPS)
    sim_ref[...] = dots * icn_ref[...] * inv_sv

    # ternary-linear head reusing the same pooled vector (avgpool fused; no
    # extra kernel launch on the fall-through path).
    fc_ref[...] = (jnp.dot(sv, fcw_ref[...], preferred_element_type=jnp.float32)
                   + fcb_ref[...])


# ---------------------------------------------------------------------------
# Pallas wrappers
# ---------------------------------------------------------------------------
def mm_bn(patches, w, scale, shift, *, relu):
    m = patches.shape[0]
    n = w.shape[1]
    return pl.pallas_call(
        functools.partial(_mm_bn_kernel, relu=relu),
        out_shape=jax.ShapeDtypeStruct((m, n), jnp.float32),
        in_specs=[_VMEM] * 4,
        out_specs=_VMEM,
    )(patches, w, scale, shift)


def basic_block_call(x, bp, fcw, fcb):
    hw, cp = x.shape
    s = bp["S"]
    ntaps = s.shape[0] // hw
    use_s = hw > 1
    return pl.pallas_call(
        functools.partial(_block_kernel, ntaps=ntaps, use_s=use_s),
        out_shape=(jax.ShapeDtypeStruct((hw, cp), jnp.float32),   # block output
                   jax.ShapeDtypeStruct((1, cp), jnp.float32),    # cosine sims
                   jax.ShapeDtypeStruct((1, cp), jnp.float32)),   # fc head
        in_specs=[_VMEM] * 12,
        out_specs=(_VMEM, _VMEM, _VMEM),
    )(x, s, bp["w1"], bp["w2"], bp["scale1"], bp["shift1"],
      bp["scale2"], bp["shift2"], bp["censT"], bp["inv_cn"], fcw, fcb)


# ---------------------------------------------------------------------------
# XLA glue (all inside the single jit)
# ---------------------------------------------------------------------------
def extract_patches(x, kh, kw, stride, padding):
    """im2col glue, used only for the 7x7 stem (3x3 convs are done in-kernel)."""
    n, h, w, c = x.shape
    xp = jnp.pad(x, ((0, 0), (padding, padding), (padding, padding), (0, 0)))
    oh = (h + 2 * padding - kh) // stride + 1
    ow = (w + 2 * padding - kw) // stride + 1
    cols = [xp[:, i:i + stride * (oh - 1) + 1:stride,
               j:j + stride * (ow - 1) + 1:stride, :]
            for i in range(kh) for j in range(kw)]
    patches = jnp.stack(cols, axis=3).reshape(n, oh, ow, kh * kw * c)
    return patches, oh, ow


def maxpool_glue(x, k=3, stride=2, padding=1):
    """nn.MaxPool2d(3, 2, 1); XLA handles this for free inside the jit."""
    n, h, w, c = x.shape
    xp = jnp.pad(x, ((0, 0), (padding, padding), (padding, padding), (0, 0)),
                 constant_values=-jnp.inf)
    oh = (h + 2 * padding - k) // stride + 1
    ow = (w + 2 * padding - k) // stride + 1
    cols = [xp[:, i:i + stride * (oh - 1) + 1:stride,
               j:j + stride * (ow - 1) + 1:stride, :]
            for i in range(k) for j in range(k)]
    return jnp.max(jnp.stack(cols, axis=0), axis=0)


# ---------------------------------------------------------------------------
# Whole-network device forward (single jit, single host readback afterwards)
# ---------------------------------------------------------------------------
def forward_device(x_nchw, prep):
    assert x_nchw.shape[0] == 1, "early-exit classifier assumes batch == 1"
    x = jnp.transpose(x_nchw.astype(jnp.float32), (0, 2, 3, 1))     # NCHW -> NHWC

    # --- stem: 7x7/s2 ternary conv + BN + ReLU, then 3x3/s2 maxpool -----------
    patches, oh, ow = extract_patches(x, 7, 7, 2, 3)
    a = mm_bn(patches.reshape(oh * ow, -1), prep["stem_w"],
              prep["stem_scale"], prep["stem_shift"], relu=True)    # [oh*ow, CP]
    a = maxpool_glue(a.reshape(1, oh, ow, CP))
    hw = (a.shape[1], a.shape[2])
    feats = a.reshape(hw[0] * hw[1], CP)

    # TODO(synk): the noise-injection path of NoisedTriConv2d / NoisedTriLinear
    # is only active when noise != 0 (it is 0 in this module); not implemented.
    sims_list, feats_list, fc_out = [], [], None
    for stage in range(11):
        if stage in (1, 2, 3):     # 1x1/s2 downsample conv + BN before layer2/3/4
            h, w = hw
            xs = feats.reshape(h, w, CP)[::2, ::2, :]
            hw = (xs.shape[0], xs.shape[1])
            feats = mm_bn(xs.reshape(hw[0] * hw[1], CP),
                          prep[f"down{stage + 1}_w"],
                          prep[f"down{stage + 1}_scale"],
                          prep[f"down{stage + 1}_shift"], relu=False)
        feats, sims, fc_out = basic_block_call(feats, prep["blocks"][stage],
                                               prep["fc_w"], prep["fc_b"])
        sims_list.append(sims[:, :10])
        c = CHANNELS[stage]
        feats_list.append(feats[:, :c].reshape(1, hw[0], hw[1], c))

    # per-stage acceptance criterion, computed on device (AC_calculate).
    sims_all = jnp.concatenate(sims_list, axis=0)                   # [11, 10]
    top2, _ = jax.lax.top_k(sims_all, 2)
    acs = (top2[:, 0] - top2[:, 1]) / top2[:, 1]
    labels = jnp.argmax(sims_all, axis=1)
    fc_logits = fc_out[:, :10]                                      # [1, 10]
    return acs, labels, fc_logits, feats_list


forward_jit = jax.jit(forward_device)


def resnet_predict(x_nchw, prep):
    # All 11 stages are evaluated in one jitted call; the early-exit selection
    # happens afterwards from ONE tiny host readback (no per-stage device sync).
    acs, labels, fc_logits, feats_list = forward_jit(x_nchw, prep)
    acs_np = np.asarray(acs)
    labels_np = np.asarray(labels)
    for stage in range(11):
        if float(acs_np[stage]) >= CONF_THRESH[stage]:
            return (stage, int(labels_np[stage]), True, float(acs_np[stage]),
                    feats_list[stage])
    logits_np = np.asarray(fc_logits)
    ans = int(np.argmax(logits_np, axis=1)[0])
    return (11, ans, False, np.argmax(logits_np, axis=1), fc_logits)


# ---------------------------------------------------------------------------
# One-time model preparation (ternary quantization, BN folding, padding, S mats)
# ---------------------------------------------------------------------------
def stage_resolutions(h, w):
    h = (h + 6 - 7) // 2 + 1          # stem conv 7x7 s2 p3
    w = (w + 6 - 7) // 2 + 1
    h = (h + 2 - 3) // 2 + 1          # maxpool 3x3 s2 p1
    w = (w + 2 - 3) // 2 + 1
    res = [(h, w)]
    for _ in range(3):                # 1x1 s2 downsample before layer2/3/4
        h = (h - 1) // 2 + 1
        w = (w - 1) // 2 + 1
        res.append((h, w))
    return res + [res[-1]] * 7        # layers 5..11 keep the resolution


def _build_taps_and_s(h, w):
    """Static 0/1 tap-selection matrices for a 3x3 pad-1 stride-1 conv at HxW."""
    hw = h * w
    taps, mats = [], []
    for ki in range(3):
        for kj in range(3):
            s = np.zeros((hw, hw), np.float32)
            for p in range(hw):
                i, j = divmod(p, w)
                ii, jj = i + ki - 1, j + kj - 1
                if 0 <= ii < h and 0 <= jj < w:
                    s[p, ii * w + jj] = 1.0
            if s.any():
                taps.append((ki, kj))
                mats.append(s)
    return taps, jnp.asarray(np.concatenate(mats, axis=0), jnp.bfloat16)


def _conv3x3_to_mat(w, taps):
    cout, cin = w.shape[0], w.shape[1]
    out = np.zeros((len(taps) * CP, CP), np.float32)
    for t, (ki, kj) in enumerate(taps):
        out[t * CP:t * CP + cin, :cout] = w[:, :, ki, kj].T
    return jnp.asarray(out, jnp.bfloat16)


def _fold_bn(bn):
    g, b, rm, rv = [np.asarray(t, np.float32) for t in bn]
    scale = g / np.sqrt(rv + BN_EPS)
    shift = b - rm * scale
    s = np.zeros((1, CP), np.float32); s[0, :scale.size] = scale
    t = np.zeros((1, CP), np.float32); t[0, :shift.size] = shift
    return jnp.asarray(s), jnp.asarray(t)


def prepare_params(params, centers, input_hw):
    """Off the hot path: ternary-quantize every weight in ONE batched pallas_call,
    fold BN, pad to 128 lanes, precompute center norms and static S matrices."""
    # ---- 1) batched TernaryQuantize -----------------------------------------
    items = [("conv1_w", params["conv1_w"], True)]
    for i in (2, 3, 4):
        items.append((f"conv{i}_w", params[f"conv{i}_w"], True))
    for i in range(1, 12):
        bp = params[f"layer{i}"]
        items.append((f"layer{i}.conv1", bp["conv1_w"], True))
        items.append((f"layer{i}.conv2", bp["conv2_w"], True))
    items.append(("fc_w", params["fc_w"], False))       # Linear: no mean-sub

    sizes = [int(np.prod(a.shape)) for _, a, _ in items]
    g, l = len(items), max(sizes)
    packed = np.zeros((g, l), np.float32)
    for r, (_, a, _) in enumerate(items):
        packed[r, :sizes[r]] = np.asarray(a, np.float32).reshape(-1)
    cnt = np.asarray(sizes, np.int32).reshape(g, 1)
    sub = np.asarray([1.0 if s else 0.0 for _, _, s in items],
                     np.float32).reshape(g, 1)
    q = pl.pallas_call(
        _ternary_batch_kernel,
        out_shape=jax.ShapeDtypeStruct((g, l), jnp.float32),
        in_specs=[_VMEM] * 3,
        out_specs=_VMEM,
    )(jnp.asarray(packed), jnp.asarray(cnt), jnp.asarray(sub))
    q = np.asarray(jax.device_get(q))
    qw = {name: q[r, :sizes[r]].reshape(items[r][1].shape)
          for r, (name, _, _) in enumerate(items)}

    prep = {}

    # ---- 2) stem (7x7) weight as an im2col matmul matrix, Cout padded to 128 --
    wst = np.transpose(qw["conv1_w"], (2, 3, 1, 0)).reshape(49, 3)
    stem_w = np.zeros((49, CP), np.float32); stem_w[:, :3] = wst
    prep["stem_w"] = jnp.asarray(stem_w, jnp.bfloat16)
    prep["stem_scale"], prep["stem_shift"] = _fold_bn(params["bn1"])

    # ---- 3) downsample 1x1/s2 convs -------------------------------------------
    for i in (2, 3, 4):
        wd = qw[f"conv{i}_w"][:, :, 0, 0]                # [Cout, Cin]
        m = np.zeros((CP, CP), np.float32)
        m[:wd.shape[1], :wd.shape[0]] = wd.T
        prep[f"down{i}_w"] = jnp.asarray(m, jnp.bfloat16)
        prep[f"down{i}_scale"], prep[f"down{i}_shift"] = _fold_bn(params[f"bn{i}"])

    # ---- 4) basic blocks + per-stage classifier constants ---------------------
    res = stage_resolutions(*input_hw)
    s_cache, blocks = {}, []
    for i in range(1, 12):
        hw = res[i - 1]
        if hw not in s_cache:
            s_cache[hw] = _build_taps_and_s(*hw)
        taps, s_mat = s_cache[hw]
        bp = params[f"layer{i}"]
        c = np.asarray(centers[i - 1], np.float32)       # [10, C]
        censt = np.zeros((CP, CP), np.float32); censt[:c.shape[1], :10] = c.T
        icn = np.zeros((1, CP), np.float32)
        icn[0, :10] = 1.0 / np.maximum(np.linalg.norm(c, axis=1), COS_EPS)
        s1, t1 = _fold_bn(bp["bn1"])
        s2, t2 = _fold_bn(bp["bn2"])
        blocks.append(dict(
            S=s_mat,
            w1=_conv3x3_to_mat(qw[f"layer{i}.conv1"], taps),
            w2=_conv3x3_to_mat(qw[f"layer{i}.conv2"], taps),
            scale1=s1, shift1=t1, scale2=s2, shift2=t2,
            censT=jnp.asarray(censt), inv_cn=jnp.asarray(icn)))
    prep["blocks"] = blocks

    # ---- 5) ternary fc head (fused into the block kernel epilogue) ------------
    fcw = np.zeros((CP, CP), np.float32); fcw[:24, :10] = qw["fc_w"].T
    fcb = np.zeros((1, CP), np.float32)
    fcb[0, :10] = np.asarray(params["fc_b"], np.float32)
    prep["fc_w"] = jnp.asarray(fcw)
    prep["fc_b"] = jnp.asarray(fcb)
    return prep


# ---------------------------------------------------------------------------
# Deterministic parameter / semantic-center construction
# ---------------------------------------------------------------------------
def init_params(key):
    ks = iter(jax.random.split(key, 100))

    def conv_w(cout, cin, k):
        return 0.1 * jax.random.normal(next(ks), (cout, cin, k, k), jnp.float32)

    def bn(c):
        gm = 1.0 + 0.1 * jax.random.normal(next(ks), (c,), jnp.float32)
        bt = 0.1 * jax.random.normal(next(ks), (c,), jnp.float32)
        # inference-mode running stats (prediction script)
        return (gm, bt, jnp.zeros((c,), jnp.float32), jnp.ones((c,), jnp.float32))

    def block(c):
        return dict(conv1_w=conv_w(c, c, 3), bn1=bn(c),
                    conv2_w=conv_w(c, c, 3), bn2=bn(c))

    p = dict(
        conv1_w=conv_w(3, 1, 7), bn1=bn(3),
        conv2_w=conv_w(6, 3, 1), bn2=bn(6),
        conv3_w=conv_w(12, 6, 1), bn3=bn(12),
        conv4_w=conv_w(24, 12, 1), bn4=bn(24),
        fc_w=0.1 * jax.random.normal(next(ks), (10, 24), jnp.float32),
        fc_b=0.1 * jax.random.normal(next(ks), (10,), jnp.float32),
    )
    for i, c in zip(range(1, 12), CHANNELS):
        p[f"layer{i}"] = block(c)
    return p


def init_centers(key):
    # TODO(synk): the original loads semantic_center_mnist.pth; synthesized here.
    keys = jax.random.split(key, len(CHANNELS))
    return [jax.random.normal(k, (10, c), jnp.float32)
            for k, c in zip(keys, CHANNELS)]


# ---------------------------------------------------------------------------
if __name__ == "__main__":
    key = jax.random.PRNGKey(0)
    kx, kp, kc = jax.random.split(key, 3)

    # MNIST-style single-channel input; batch=1 is required by the early-exit logic.
    x = jax.random.normal(kx, (1, 1, 28, 28), jnp.float32)        # NCHW like PyTorch
    params = init_params(kp)
    centers = init_centers(kc)

    prep = prepare_params(params, centers, input_hw=(28, 28))     # one-time prep
    result = resnet_predict(x, prep)

    for r in result:
        if isinstance(r, jax.Array):
            jax.block_until_ready(r)
    print("KERNEL_OK")
</pallas_src>

<mosaic_0001>
module attributes {stable_mosaic.version = 11 : i64} {
  func.func @_ternary_batch_kernel(%arg0: memref<27x5184xf32, #tpu.memory_space<vmem>>, %arg1: memref<27x1xi32, #tpu.memory_space<vmem>>, %arg2: memref<27x1xf32, #tpu.memory_space<vmem>>, %arg3: memref<27x5184xf32, #tpu.memory_space<vmem>>) attributes {dimension_semantics = [], scalar_prefetch = 0 : i64, scratch_operands = 0 : i64, tpu.core_type = #tpu.core_type<tc>} {
    %c0 = arith.constant 0 : index
    %c0_0 = arith.constant 0 : index
    %0 = vector.load %arg0[%c0, %c0_0] : memref<27x5184xf32, #tpu.memory_space<vmem>>, vector<27x5184xf32>
    %1 = tpu.iota {dimensions = array<i32: 1>} : vector<27x5184xi32>
    %c0_1 = arith.constant 0 : index
    %c0_2 = arith.constant 0 : index
    %2 = vector.load %arg1[%c0_1, %c0_2] : memref<27x1xi32, #tpu.memory_space<vmem>>, vector<27x1xi32>
    %3 = vector.broadcast %2 : vector<27x1xi32> to vector<27x5184xi32>
    %4 = arith.cmpi slt, %1, %3 : vector<27x5184xi32>
    %c0_3 = arith.constant 0 : index
    %c0_4 = arith.constant 0 : index
    %5 = vector.load %arg1[%c0_3, %c0_4] : memref<27x1xi32, #tpu.memory_space<vmem>>, vector<27x1xi32>
    %6 = arith.sitofp %5 : vector<27x1xi32> to vector<27x1xf32>
    %cst = arith.constant 0.000000e+00 : f32
    %7 = vector.broadcast %cst : f32 to vector<27x5184xf32>
    %8 = arith.select %4, %0, %7 : vector<27x5184xi1>, vector<27x5184xf32>
    %cst_5 = arith.constant dense<0.000000e+00> : vector<27xf32>
    %9 = vector.multi_reduction <add>, %8, %cst_5 [1] : vector<27x5184xf32> to vector<27xf32>
    %10 = vector.shape_cast %9 : vector<27xf32> to vector<27x1xf32>
    %11 = arith.divf %10, %6 : vector<27x1xf32>
    %c0_6 = arith.constant 0 : index
    %c0_7 = arith.constant 0 : index
    %12 = vector.load %arg2[%c0_6, %c0_7] : memref<27x1xf32, #tpu.memory_space<vmem>>, vector<27x1xf32>
    %13 = arith.mulf %12, %11 : vector<27x1xf32>
    %14 = vector.broadcast %13 : vector<27x1xf32> to vector<27x5184xf32>
    %15 = arith.subf %0, %14 : vector<27x5184xf32>
    %cst_8 = arith.constant 0xFF800000 : f32
    %16 = vector.broadcast %cst_8 : f32 to vector<27x5184xf32>
    %17 = arith.select %4, %15, %16 : vector<27x5184xi1>, vector<27x5184xf32>
    %cst_9 = arith.constant dense<0xFF800000> : vector<27xf32>
    %18 = vector.multi_reduction <maximumf>, %17, %cst_9 [1] : vector<27x5184xf32> to vector<27xf32>
    %19 = vector.shape_cast %18 : vector<27xf32> to vector<27x1xf32>
    %cst_10 = arith.constant 0x7F800000 : f32
    %20 = vector.broadcast %cst_10 : f32 to vector<27x5184xf32>
    %21 = arith.select %4, %15, %20 : vector<27x5184xi1>, vector<27x5184xf32>
    %cst_11 = arith.constant dense<0x7F800000> : vector<27xf32>
    %22 = vector.multi_reduction <minimumf>, %21, %cst_11 [1] : vector<27x5184xf32> to vector<27xf32>
    %23 = vector.shape_cast %22 : vector<27xf32> to vector<27x1xf32>
    %24 = arith.subf %19, %23 : vector<27x1xf32>
    %cst_12 = arith.constant 3.000000e+00 : f32
    %25 = vector.broadcast %cst_12 : f32 to vector<27x1xf32>
    %26 = arith.divf %24, %25 : vector<27x1xf32>
    %27 = arith.addf %23, %26 : vector<27x1xf32>
    %28 = arith.subf %19, %26 : vector<27x1xf32>
    %29 = vector.broadcast %27 : vector<27x1xf32> to vector<27x5184xf32>
    %30 = arith.cmpf olt, %15, %29 : vector<27x5184xf32>
    %31 = vector.broadcast %28 : vector<27x1xf32> to vector<27x5184xf32>
    %32 = arith.cmpf ogt, %15, %31 : vector<27x5184xf32>
    %cst_13 = arith.constant 1.000000e+00 : f32
    %cst_14 = arith.constant 0.000000e+00 : f32
    %33 = vector.broadcast %cst_13 : f32 to vector<27x5184xf32>
    %34 = vector.broadcast %cst_14 : f32 to vector<27x5184xf32>
    %35 = arith.select %32, %33, %34 : vector<27x5184xi1>, vector<27x5184xf32>
    %cst_15 = arith.constant -1.000000e+00 : f32
    %36 = vector.broadcast %cst_15 : f32 to vector<27x5184xf32>
    %37 = arith.select %30, %36, %35 : vector<27x5184xi1>, vector<27x5184xf32>
    %c0_16 = arith.constant 0 : index
    %c0_17 = arith.constant 0 : index
    %38 = vector.load %arg3[%c0_16, %c0_17] : memref<27x5184xf32, #tpu.memory_space<vmem>>, vector<27x5184xf32>
    tpu.vector_store %arg3[%c0_16, %c0_17], %37 {strides = array<i32>} : memref<27x5184xf32, #tpu.memory_space<vmem>>, vector<27x5184xf32>,
    return
  }
}

</mosaic_0001>

<bundles_post_ra>
// kernel: tpu_custom_call.1
= control target key start
LH: loop header
LB: loop body
LE: loop exit
PB: predicated region body
PF: predicated region fallthrough
CT: control target
= control target key end

     0   :  { %8 = vsyncpa [#allocation3], 0  ;;  %s8596_s0 = inlined_call_operand.hbm [shape: f32[27,5184], index: 0, kind: input, shape index: {}]   ;;  %s8597_s1 = inlined_call_operand.vmem [shape: s32[27,1], index: 1, kind: input, shape index: {}]   ;;  %s8598_s2 = inlined_call_operand.vmem [shape: f32[27,1], index: 2, kind: input, shape index: {}]   ;;  %s8599_s3 = inlined_call_operand.hbm [shape: f32[27,5184], index: 3, kind: output, shape index: {}]  }
   0x1   :  { %9 = vsyncpa [#allocation4], 0  ;;  %s2819_s12 = smov [#allocation2]  }
   0x2   :  { %s15_s13 = sshll.u32 %s2819_s12, 4  ;;  %s16_s13 = int_to_ptr.vmem [resolvable:$true] %s15_s13 }
   0x3   :  { %s2783_s14 = scalar_lea.vmem %s16_s13, 20992  ;;  %p2788_p1 = scmp.lt.s32.totalorder %s16_s13, %s16_s13 }
   0x4   :  { %p2784_p0 = scmp.ne.s32.totalorder %s16_s13, %s2783_s14  ;;  %p2789_p2 = scmp.lt.s32.totalorder %s2783_s14, %s2783_s14 }
   0x6   :  { %p2790_p3 = por %p2789_p2, %p2788_p1 }
   0x8   :  { %p2791_p4 = pnand %p2790_p3, %p2784_p0 }
   0xa   :  { %2794 = shalt.err (!%p2791_p4)
}
   0xb   :  { %s2820_s15 = smov 5248   ;;  %s2821_s16 = smov 328  }
   0xc   :  { %21 = dma.hbm_to_vmem [thread:$0]  %s8596_s0, 20992, %s16_s13, [#allocation3], %s2820_s15, %s2820_s15, %s2821_s16  }
   0xd   :  { %2815 = dma.done.wait [#allocation3], 20992  }
   0xe   :  { %2816 = vsyncadd [#allocation3], 4294946304  ;;  %v2822_v0 = vmov 0   ;;  %v238_v1 = vld [vmem:[%s8597_s1 + $0x18] sm:$0x7]  ;;  %v236_v2 = vld [vmem:[%s8597_s1 + $0x8] sm:$0xff]  ;;  %v193_v5 = vlaneseq }
   0xf   :  { %2611 = vset.pattern.permute.xlu1 %v2822_v0  ;;  %2610 = vset.pattern.permute.xlu0 %v2822_v0  ;;  %v237_v3 = vld [vmem:[%s8597_s1 + $0x10] sm:$0xff]  ;;  %v235_v4 = vld [vmem:[%s8597_s1] sm:$0xff]  ;;  %v70_v9 = vld [vmem:[#allocation2 + $0x148] sm:$0xff] }
  0x10   :  { %249 = vperm.xlu0 %2610, %v238_v1   ;;  %243 = vperm.xlu1 %2611, %v236_v2   ;;  %v2863_v6 = vand.u32 127, %v193_v5  ;;  %v71_v10 = vld [vmem:[#allocation2 + $0x150] sm:$0xff]  ;;  %v72_v15 = vld [vmem:[#allocation2 + $0x158] sm:$0xff]  ;;  %v73_v17 = vld [vmem:[#allocation2 + $0x160] sm:$0xff] }
  0x11   :  { %v74_v21 = vld [vmem:[#allocation2 + $0x168] sm:$0xff]  ;;  %v75_v25 = vld [vmem:[#allocation2 + $0x170] sm:$0xff]  ;;  %v76_v29 = vld [vmem:[#allocation2 + $0x178] sm:$0xff] }
  0x12   :  { %9255 = vst [vmem:[#allocation8_spill] sm:$0xff] %v2863_v6  ;;  %v2866_v7 = vadd.s32 128, %v2863_v6  ;;  %v2871_v11 = vadd.s32 256, %v2863_v6  ;;  %v2878_v12 = vadd.s32 384, %v2863_v6  ;;  %v2887_v16 = vadd.s32 512, %v2863_v6  ;;  %v77_v33 = vld [vmem:[#allocation2 + $0x180] sm:$0xff] }
  0x13   :  { %v2892_v18 = vadd.s32 640, %v2863_v6  ;;  %v2900_v22 = vadd.s32 768, %v2863_v6  ;;  %v2908_v26 = vadd.s32 896, %v2863_v6  ;;  %v2916_v30 = vadd.s32 1024, %v2863_v6  ;;  %v78_v39 = vld [vmem:[#allocation2 + $0x188] sm:$0xff]  ;;  %v79_v47 = vld [vmem:[#allocation2 + $0x190] sm:$0xff] }
  0x14   :  { %246 = vperm.xlu1 %2611, %v237_v3   ;;  %240 = vperm.xlu0 %2610, %v235_v4   ;;  %9256 = vst [vmem:[#allocation9_spill] sm:$0xff] %v2866_v7  ;;  %9258 = vst [vmem:[#allocation11_spill] sm:$0xff] %v2871_v11  ;;  %v2924_v34 = vadd.s32 1152, %v2863_v6  ;;  %v2929_v36 = vadd.s32 1280, %v2863_v6  ;;  %v2932_v37 = vadd.s32 1408, %v2863_v6  ;;  %v2938_v40 = vadd.s32 1536, %v2863_v6 }
  0x15   :  { %9259 = vst [vmem:[#allocation12_spill] sm:$0xff] %v2878_v12  ;;  %9260 = vst [vmem:[#allocation13_spill] sm:$0xff] %v2887_v16  ;;  %v2941_v41 = vadd.s32 1664, %v2863_v6  ;;  %v2946_v43 = vadd.s32 1792, %v2863_v6  ;;  %v2949_v44 = vadd.s32 1920, %v2863_v6  ;;  %v2952_v45 = vadd.s32 2048, %v2863_v6 }
  0x16   :  { %9261 = vst [vmem:[#allocation14_spill] sm:$0xff] %v2892_v18  ;;  %9262 = vst [vmem:[#allocation15_spill] sm:$0xff] %v2900_v22  ;;  %v2958_v48 = vadd.s32 2176, %v2863_v6  ;;  %v2961_v49 = vadd.s32 2304, %v2863_v6  ;;  %v2966_v51 = vadd.s32 2432, %v2863_v6  ;;  %v2969_v52 = vadd.s32 2560, %v2863_v6 }
  0x17   :  { %9263 = vst [vmem:[#allocation16_spill] sm:$0xff] %v2908_v26  ;;  %9264 = vst [vmem:[#allocation17_spill] sm:$0xff] %v2916_v30  ;;  %v2972_v53 = vadd.s32 2688, %v2863_v6  ;;  %v80_v55 = vld [vmem:[#allocation2 + $0x198] sm:$0xff]  ;;  %v2978_v56 = vadd.s32 2816, %v2863_v6  ;;  %v2981_v57 = vadd.s32 2944, %v2863_v6 }
  0x18   :  { %9265 = vst [vmem:[#allocation18_spill] sm:$0xff] %v2924_v34  ;;  %9266 = vst [vmem:[#allocation19_spill] sm:$0xff] %v2929_v36  ;;  %v2988_v60 = vadd.s32 3072, %v2863_v6  ;;  %v2991_v61 = vadd.s32 3200, %v2863_v6  ;;  %v2994_v62 = vadd.s32 3328, %v2863_v6  ;;  %v81_v0 = vld [vmem:[#allocation2 + $0x1a0] sm:$0xff] }
  0x19   :  { %9267 = vst [vmem:[#allocation20_spill] sm:$0xff] %v2932_v37  ;;  %9268 = vst [vmem:[#allocation21_spill] sm:$0xff] %v2938_v40  ;;  %v3000_v1 = vadd.s32 3456, %v2863_v6  ;;  %v3003_v2 = vadd.s32 3584, %v2863_v6  ;;  %v3008_v4 = vadd.s32 3712, %v2863_v6  ;;  %v3011_v5 = vadd.s32 3840, %v2863_v6 }
  0x1a   :  { %9269 = vst [vmem:[#allocation22_spill] sm:$0xff] %v2941_v41  ;;  %9270 = vst [vmem:[#allocation23_spill] sm:$0xff] %v2946_v43 }
  0x1b   :  { %9271 = vst [vmem:[#allocation24_spill] sm:$0xff] %v2949_v44  ;;  %9272 = vst [vmem:[#allocation25_spill] sm:$0xff] %v2952_v45 }
  0x1c   :  { %9273 = vst [vmem:[#allocation26_spill] sm:$0xff] %v2958_v48  ;;  %9274 = vst [vmem:[#allocation27_spill] sm:$0xff] %v2961_v49 }
  0x1d   :  { %9275 = vst [vmem:[#allocation28_spill] sm:$0xff] %v2966_v51  ;;  %9276 = vst [vmem:[#allocation29_spill] sm:$0xff] %v2969_v52 }
  0x1e   :  { %9277 = vst [vmem:[#allocation30_spill] sm:$0xff] %v2972_v53  ;;  %9278 = vst [vmem:[#allocation31_spill] sm:$0xff] %v2978_v56 }
  0x1f   :  { %9279 = vst [vmem:[#allocation32_spill] sm:$0xff] %v2981_v57  ;;  %9281 = vst [vmem:[#allocation34_spill] sm:$0xff] %v2988_v60 }
  0x20   :  { %9282 = vst [vmem:[#allocation35_spill] sm:$0xff] %v2991_v61  ;;  %9283 = vst [vmem:[#allocation36_spill] sm:$0xff] %v2994_v62 }
  0x21   :  { %9284 = vst [vmem:[#allocation37_spill] sm:$0xff] %v3000_v1  ;;  %9285 = vst [vmem:[#allocation38_spill] sm:$0xff] %v3003_v2 }
  0x22   :  { %9286 = vst [vmem:[#allocation39_spill] sm:$0xff] %v3008_v4  ;;  %9287 = vst [vmem:[#allocation40_spill] sm:$0xff] %v3011_v5 }
  0x8b   :  { %v2868_v8 = vpop.permute.xlu1 %243  ;;  %v2985_v59 = vpop.permute.xlu0 %249 }
  0x8c   :  { %9257 = vst [vmem:[#allocation10_spill] sm:$0xff] %v2868_v8  ;;  %vm8634_vm0 = vcmp.lt.s32.totalorder %v2863_v6, %v2868_v8  ;;  %vm8631_vm1 = vcmp.lt.s32.totalorder %v2866_v7, %v2868_v8  ;;  %vm8630_vm2 = vcmp.lt.s32.totalorder %v2871_v11, %v2868_v8  ;;  %vm8627_vm3 = vcmp.lt.s32.totalorder %v2878_v12, %v2868_v8 }
  0x8d   :  { %v460_v13 = vsel %vm8634_vm0, %v70_v9, 0.0  ;;  %v461_v14 = vsel %vm8631_vm1, %v71_v10, 0.0  ;;  %v462_v20 = vsel %vm8630_vm2, %v72_v15, 0.0  ;;  %vm8624_vm4 = vcmp.lt.s32.totalorder %v2887_v16, %v2868_v8  ;;  %9280 = vst [vmem:[#allocation33_spill] sm:$0xff] %v2985_v59  ;;  %v152_v15 = vld [vmem:[#allocation2 + $0x3d8] sm:$0x7] }
  0x8e   :  { %v627_v19 = vadd.f32 %v461_v14, %v460_v13  ;;  %v463_v24 = vsel %vm8627_vm3, %v73_v17, 0.0  ;;  %vm8621_vm5 = vcmp.lt.s32.totalorder %v2892_v18, %v2868_v8  ;;  %v464_v28 = vsel %vm8624_vm4, %v74_v21, 0.0  ;;  %v82_v13 = vld [vmem:[#allocation2 + $0x1a8] sm:$0xff]  ;;  %v153_v17 = vld [vmem:[#allocation2 + $0x3e0] sm:$0x7] }
  0x8f   :  { %vm8618_vm6 = vcmp.lt.s32.totalorder %v2900_v22, %v2868_v8  ;;  %v465_v32 = vsel %vm8621_vm5, %v75_v25, 0.0  ;;  %vm8615_vm7 = vcmp.lt.s32.totalorder %v2908_v26, %v2868_v8  ;;  %vm8612_vm8 = vcmp.lt.s32.totalorder %v2916_v30, %v2868_v8 }
  0x90   :  { %v628_v23 = vadd.f32 %v627_v19, %v462_v20  ;;  %v466_v38 = vsel %vm8618_vm6, %v76_v29, 0.0  ;;  %v467_v46 = vsel %vm8615_vm7, %v77_v33, 0.0  ;;  %vm8602_vm9 = vcmp.lt.s32.totalorder %v2924_v34, %v2868_v8  ;;  %v84_v33 = vld [vmem:[#allocation2 + $0x1b8] sm:$0xff] }
  0x91   :  { %v468_v54 = vsel %vm8612_vm8, %v78_v39, 0.0  ;;  %vm8600_vm10 = vcmp.lt.s32.totalorder %v2929_v36, %v2868_v8  ;;  %v469_v63 = vsel %vm8602_vm9, %v79_v47, 0.0  ;;  %vm8601_vm11 = vcmp.lt.s32.totalorder %v2932_v37, %v2868_v8  ;;  %v155_v39 = vld [vmem:[#allocation2 + $0x3f0] sm:$0x7] }
  0x92   :  { %v629_v27 = vadd.f32 %v628_v23, %v463_v24  ;;  %v3014_v9 = vadd.s32 3968, %v2863_v6  ;;  %v470_v10 = vsel %vm8600_vm10, %v80_v55, 0.0  ;;  %vm8603_vm12 = vcmp.lt.s32.totalorder %v2938_v40, %v2868_v8  ;;  %v83_v24 = vld [vmem:[#allocation2 + $0x1b0] sm:$0xff]  ;;  %v156_v55 = vld [vmem:[#allocation2 + $0x3f8] sm:$0x7] }
  0x93   :  { %vm8604_vm13 = vcmp.lt.s32.totalorder %v2863_v6, %v2985_v59  ;;  %vm8605_vm14 = vcmp.lt.s32.totalorder %v2866_v7, %v2985_v59  ;;  %v3026_v19 = vadd.s32 4096, %v2863_v6  ;;  %v3029_v20 = vadd.s32 4224, %v2863_v6 }
  0x94   :  { %v630_v31 = vadd.f32 %v629_v27, %v464_v28  ;;  %9288 = vst [vmem:[#allocation41_spill] sm:$0xff] %v3014_v9  ;;  %v3032_v21 = vadd.s32 4352, %v2863_v6  ;;  %v471_v23 = vsel %vm8601_vm11, %v81_v0, 0.0  ;;  %v3038_v25 = vadd.s32 4480, %v2863_v6  ;;  %v154_v28 = vld [vmem:[#allocation2 + $0x3e8] sm:$0x7] }
  0x95   :  { %9289 = vst [vmem:[#allocation42_spill] sm:$0xff] %v3026_v19  ;;  %9290 = vst [vmem:[#allocation43_spill] sm:$0xff] %v3029_v20  ;;  %vm8607_vm15 = vcmp.lt.s32.totalorder %v2941_v41, %v2868_v8  ;;  %vm8606_vm10 = vcmp.lt.s32.totalorder %v2871_v11, %v2985_v59  ;;  %v472_v29 = vsel %vm8603_vm12, %v82_v13, 0.0  ;;  %vm713_vm11 = vcmask 1042432  }
  0x96   :  { %v631_v35 = vadd.f32 %v630_v31, %v465_v32  ;;  %9291 = vst [vmem:[#allocation44_spill] sm:$0xff] %v3032_v21  ;;  %9292 = vst [vmem:[#allocation45_spill] sm:$0xff] %v3038_v25  ;;  %v542_v31 = vsel %vm8604_vm13, %v152_v15, 0.0  ;;  %v543_v32 = vsel %vm8605_vm14, %v153_v17, 0.0  ;;  %vm8609_vm9 = vcmp.lt.s32.totalorder %v2946_v43, %v2868_v8  ;;  %v157_v17 = vld [vmem:[#allocation2 + $0x400] sm:$0x7] }
  0x97   :  { %vm8608_vm12 = vcmp.lt.s32.totalorder %v2878_v12, %v2985_v59  ;;  %vm8611_vm13 = vcmp.lt.s32.totalorder %v2949_v44, %v2868_v8  ;;  %v544_v47 = vsel %vm8606_vm10, %v154_v28, 0.0  ;;  %vm8610_vm14 = vcmp.lt.s32.totalorder %v2887_v16, %v2985_v59 }
  0x98   :  { %v632_v42 = vadd.f32 %v631_v35, %v466_v38  ;;  %v3054_v35 = vadd.s32 4608, %v2863_v6  ;;  %v3076_v0 = vadd.s32 4864, %v2863_v6  ;;  %vm8614_vm10 = vcmp.lt.s32.totalorder %v2952_v45, %v2868_v8 }
  0x99   :  { %v546_v28 = vsel %vm8610_vm14, %v156_v55, 0.0  ;;  %vm8620_vm14 = vcmp.lt.s32.totalorder %v2961_v49, %v2868_v8  ;;  %vm8623_vm8 = vcmp.lt.s32.totalorder %v2966_v51, %v2868_v8  ;;  %vm8628_vm7 = vcmp.lt.s32.totalorder %v2972_v53, %v2868_v8 }
  0x9a   :  { %v633_v50 = vadd.f32 %v632_v42, %v467_v46  ;;  %9293 = vst [vmem:[#allocation46_spill] sm:$0xff] %v3054_v35  ;;  %v3061_v42 = vadd.s32 4736, %v2863_v6  ;;  %v473_v46 = vsel %vm8607_vm15, %v83_v24, 0.0  ;;  %9295 = vst [vmem:[#allocation48_spill] sm:$0xff] %v3076_v0  ;;  %vm8613_vm15 = vcmp.lt.s32.totalorder %v2892_v18, %v2985_v59 }
  0x9b   :  { %v3090_v24 = vadd.s32 4992, %v2863_v6  ;;  %vm8636_vm6 = vcmp.lt.s32.totalorder %v2981_v57, %v2868_v8  ;;  %vm8639_vm5 = vcmp.lt.s32.totalorder %v2991_v61, %v2868_v8  ;;  %vm319_vm4 = vcmp.lt.s32.totalorder %v3000_v1, %v2868_v8 }
  0x9c   :  { %v634_v58 = vadd.f32 %v633_v50, %v468_v54  ;;  %9294 = vst [vmem:[#allocation47_spill] sm:$0xff] %v3061_v42  ;;  %v85_v50 = vld [vmem:[#allocation2 + $0x1c0] sm:$0xff]  ;;  %vm8635_vm3 = vcmp.lt.s32.totalorder %v2938_v40, %v2985_v59  ;;  %vm8683_vm2 = vcmp.lt.s32.totalorder %v3026_v19, %v2868_v8  ;;  %vm8638_vm1 = vcmp.lt.s32.totalorder %v2941_v41, %v2985_v59  ;;  %v110_v41 = vld [vmem:[#allocation2 + $0x288] sm:$0xff] }
  0x9d   :  { %9296 = vst [vmem:[#allocation49_spill] sm:$0xff] %v3090_v24  ;;  %vm8640_vm0 = vcmp.lt.s32.totalorder %v2946_v43, %v2985_v59  ;;  %v106_v43 = vld [vmem:[#allocation2 + $0x268] sm:$0xff] }
  0x9e   :  { %v635_v3 = vadd.f32 %v634_v58, %v469_v63  ;;  %v714_v58 = vsel %vm713_vm11, %v542_v31, 0.0  ;;  %v715_v63 = vsel %vm713_vm11, %v543_v32, 0.0  ;;  %v87_v31 = vld [vmem:[#allocation2 + $0x1d0] sm:$0xff] }
  0x9f   :  { %v716_v13 = vadd.f32 %v715_v63, %v714_v58  ;;  %v159_v58 = vld [vmem:[#allocation2 + $0x410] sm:$0x7]  ;;  %v721_v63 = vsel %vm713_vm11, %v546_v28, 0.0 }
  0xa0   :  { %v636_v14 = vadd.f32 %v635_v3, %v470_v10  ;;  %v474_v3 = vsel %vm8609_vm9, %v84_v33, 0.0  ;;  %v545_v10 = vsel %vm8608_vm12, %v155_v39, 0.0  ;;  %vm8617_vm12 = vcmp.lt.s32.totalorder %v2958_v48, %v2868_v8  ;;  %v158_v33 = vld [vmem:[#allocation2 + $0x408] sm:$0x7] }
  0xa1   :  { %vm8616_vm9 = vcmp.lt.s32.totalorder %v2900_v22, %v2985_v59  ;;  %v3104_v39 = vadd.s32 5120, %v2863_v6 }
  0xa2   :  { %v637_v27 = vadd.f32 %v636_v14, %v471_v23  ;;  %v86_v14 = vld [vmem:[#allocation2 + $0x1c8] sm:$0xff]  ;;  %v717_v23 = vsel %vm713_vm11, %v544_v47, 0.0  ;;  %v547_v47 = vsel %vm8613_vm15, %v157_v17, 0.0  ;;  %vm8626_vm15 = vcmp.lt.s32.totalorder %v2969_v52, %v2868_v8  ;;  %v160_v17 = vld [vmem:[#allocation2 + $0x418] sm:$0x7] }
  0xa3   :  { %9297 = vst [vmem:[#allocation50_spill] sm:$0xff] %v3104_v39 }
  0xa4   :  { %v638_v38 = vadd.f32 %v637_v27, %v472_v29  ;;  %v475_v27 = vsel %vm8611_vm13, %v85_v50, 0.0  ;;  %v718_v29 = vadd.f32 %v717_v23, %v716_v13  ;;  %vm8619_vm13 = vcmp.lt.s32.totalorder %v2908_v26, %v2985_v59 }
  0xa5   :  { %v723_v23 = vsel %vm713_vm11, %v547_v47, 0.0  ;;  %v549_v28 = vsel %vm8619_vm13, %v159_v58, 0.0  ;;  %vm8637_vm13 = vcmp.lt.s32.totalorder %v2988_v60, %v2868_v8  ;;  %v162_v58 = vld [vmem:[#allocation2 + $0x428] sm:$0x7] }
  0xa6   :  { %v639_v54 = vadd.f32 %v638_v38, %v473_v46  ;;  %v719_v38 = vsel %vm713_vm11, %v545_v10, 0.0  ;;  %v476_v46 = vsel %vm8614_vm10, %v86_v14, 0.0  ;;  %v548_v10 = vsel %vm8616_vm9, %v158_v33, 0.0  ;;  %v89_v14 = vld [vmem:[#allocation2 + $0x1e0] sm:$0xff] }
  0xa7   :  { %v720_v50 = vadd.f32 %v719_v38, %v718_v29  ;;  %vm8622_vm10 = vcmp.lt.s32.totalorder %v2916_v30, %v2985_v59  ;;  %vm8632_vm9 = vcmp.lt.s32.totalorder %v2978_v56, %v2868_v8  ;;  %v161_v33 = vld [vmem:[#allocation2 + $0x420] sm:$0x7]  ;;  %v725_v38 = vsel %vm713_vm11, %v548_v10, 0.0 }
  0xa8   :  { %v640_v15 = vadd.f32 %v639_v54, %v474_v3  ;;  %v88_v54 = vld [vmem:[#allocation2 + $0x1d8] sm:$0xff]  ;;  %v477_v3 = vsel %vm8617_vm12, %v87_v31, 0.0  ;;  %v90_v31 = vld [vmem:[#allocation2 + $0x1e8] sm:$0xff]  ;;  %vm8625_vm12 = vcmp.lt.s32.totalorder %v2924_v34, %v2985_v59  ;;  %v550_v47 = vsel %vm8622_vm10, %v160_v17, 0.0  ;;  %v163_v17 = vld [vmem:[#allocation2 + $0x430] sm:$0x7] }
  0xa9   :  { %v722_v13 = vadd.f32 %v721_v63, %v720_v50  ;;  %v727_v63 = vsel %vm713_vm11, %v549_v28, 0.0  ;;  %v551_v10 = vsel %vm8625_vm12, %v161_v33, 0.0  ;;  %vm318_vm10 = vcmp.lt.s32.totalorder %v2994_v62, %v2868_v8  ;;  %v164_v33 = vld [vmem:[#allocation2 + $0x438] sm:$0x7] }
  0xaa   :  { %v641_v32 = vadd.f32 %v640_v15, %v475_v27  ;;  %v478_v27 = vsel %vm8620_vm14, %v88_v54, 0.0  ;;  %v91_v54 = vld [vmem:[#allocation2 + $0x1f0] sm:$0xff]  ;;  %vm8629_vm14 = vcmp.lt.s32.totalorder %v2929_v36, %v2985_v59  ;;  %vm320_vm12 = vcmp.lt.s32.totalorder %v3003_v2, %v2868_v8 }
  0xab   :  { %v724_v29 = vadd.f32 %v723_v23, %v722_v13  ;;  %v729_v23 = vsel %vm713_vm11, %v550_v47, 0.0  ;;  %v552_v28 = vsel %vm8629_vm14, %v162_v58, 0.0  ;;  %vm8649_vm14 = vcmp.lt.s32.totalorder %v3014_v9, %v2868_v8  ;;  %v165_v58 = vld [vmem:[#allocation2 + $0x440] sm:$0x7] }
  0xac   :  { %v642_v55 = vadd.f32 %v641_v32, %v476_v46  ;;  %v479_v46 = vsel %vm8623_vm8, %v89_v14, 0.0  ;;  %v92_v14 = vld [vmem:[#allocation2 + $0x1f8] sm:$0xff]  ;;  %vm8633_vm8 = vcmp.lt.s32.totalorder %v2932_v37, %v2985_v59 }
  0xad   :  { %v726_v50 = vadd.f32 %v725_v38, %v724_v29  ;;  %v731_v38 = vsel %vm713_vm11, %v551_v10, 0.0  ;;  %v553_v47 = vsel %vm8633_vm8, %v163_v17, 0.0  ;;  %v554_v10 = vsel %vm8635_vm3, %v164_v33, 0.0  ;;  %v166_v17 = vld [vmem:[#allocation2 + $0x448] sm:$0x7] }
  0xae   :  { %v643_v15 = vadd.f32 %v642_v55, %v477_v3  ;;  %v480_v3 = vsel %vm8626_vm15, %v90_v31, 0.0  ;;  %v93_v31 = vld [vmem:[#allocation2 + $0x200] sm:$0xff]  ;;  %vm8689_vm15 = vcmp.lt.s32.totalorder %v3008_v4, %v2868_v8  ;;  %vm8668_vm8 = vcmp.lt.s32.totalorder %v3032_v21, %v2868_v8  ;;  %v167_v33 = vld [vmem:[#allocation2 + $0x450] sm:$0x7] }
  0xaf   :  { %v728_v13 = vadd.f32 %v727_v63, %v726_v50  ;;  %v733_v63 = vsel %vm713_vm11, %v552_v28, 0.0  ;;  %v555_v28 = vsel %vm8638_vm1, %v165_v58, 0.0  ;;  %v99_v58 = vld [vmem:[#allocation2 + $0x230] sm:$0xff]  ;;  %vm8646_vm3 = vcmp.lt.s32.totalorder %v2952_v45, %v2985_v59 }
  0xb0   :  { %v644_v32 = vadd.f32 %v643_v15, %v478_v27  ;;  %v481_v27 = vsel %vm8628_vm7, %v91_v54, 0.0  ;;  %vm8686_vm7 = vcmp.lt.s32.totalorder %v3011_v5, %v2868_v8  ;;  %v94_v54 = vld [vmem:[#allocation2 + $0x208] sm:$0xff]  ;;  %vm9192_vm1 = vcmask 523264   ;;  %v171_v45 = vld [vmem:[#allocation2 + $0x470] sm:$0x7] }
  0xb1   :  { %v730_v29 = vadd.f32 %v729_v23, %v728_v13  ;;  %v735_v23 = vsel %vm713_vm11, %v553_v47, 0.0 }
  0xb2   :  { %v645_v55 = vadd.f32 %v644_v32, %v479_v46  ;;  %v482_v46 = vsel %vm8632_vm9, %v92_v14, 0.0  ;;  %v95_v14 = vld [vmem:[#allocation2 + $0x210] sm:$0xff]  ;;  %vm8662_vm9 = vcmp.lt.s32.totalorder %v3038_v25, %v2868_v8 }
  0xb3   :  { %v732_v50 = vadd.f32 %v731_v38, %v730_v29  ;;  %v737_v38 = vsel %vm713_vm11, %v554_v10, 0.0  ;;  %v485_v47 = vsel %vm8639_vm5, %v95_v14, 0.0  ;;  %v739_v10 = vsel %vm713_vm11, %v555_v28, 0.0 }
  0xb4   :  { %v646_v15 = vadd.f32 %v645_v55, %v480_v3  ;;  %v483_v3 = vsel %vm8636_vm6, %v93_v31, 0.0  ;;  %v96_v31 = vld [vmem:[#allocation2 + $0x218] sm:$0xff]  ;;  %vm8643_vm6 = vcmp.lt.s32.totalorder %v2949_v44, %v2985_v59  ;;  %vm8652_vm5 = vcmp.lt.s32.totalorder %v2958_v48, %v2985_v59  ;;  %v170_v44 = vld [vmem:[#allocation2 + $0x468] sm:$0x7]  ;;  %v29_v48 = vld [vmem:[#allocation2] sm:$0xff] }
  0xb5   :  { %v734_v13 = vadd.f32 %v733_v63, %v732_v50  ;;  %v556_v50 = vsel %vm8640_vm0, %v166_v17, 0.0  ;;  %vm8670_vm0 = vcmp.lt.s32.totalorder %v3104_v39, %v2868_v8  ;;  %v486_v14 = vsel %vm318_vm10, %v96_v31, 0.0  ;;  %v103_v31 = vld [vmem:[#allocation2 + $0x250] sm:$0xff] }
  0xb6   :  { %v647_v32 = vadd.f32 %v646_v15, %v481_v27  ;;  %v484_v27 = vsel %vm8637_vm13, %v94_v54, 0.0  ;;  %vm8661_vm13 = vcmp.lt.s32.totalorder %v3061_v42, %v2868_v8 }
  0xb7   :  { %v736_v29 = vadd.f32 %v735_v23, %v734_v13  ;;  %v100_v13 = vld [vmem:[#allocation2 + $0x238] sm:$0xff]  ;;  %v101_v23 = vld [vmem:[#allocation2 + $0x240] sm:$0xff] }
  0xb8   :  { %v648_v55 = vadd.f32 %v647_v32, %v482_v46  ;;  %v97_v46 = vld [vmem:[#allocation2 + $0x220] sm:$0xff] }
  0xb9   :  { %v738_v54 = vadd.f32 %v737_v38, %v736_v29  ;;  %v487_v28 = vsel %vm319_vm4, %v97_v46, 0.0  ;;  %v741_v38 = vsel %vm713_vm11, %v556_v50, 0.0  ;;  %v490_v50 = vsel %vm8686_vm7, %v100_v13, 0.0 }
  0xba   :  { %v649_v15 = vadd.f32 %v648_v55, %v483_v3  ;;  %v98_v55 = vld [vmem:[#allocation2 + $0x228] sm:$0xff]  ;;  %v168_v3 = vld [vmem:[#allocation2 + $0x458] sm:$0x7]  ;;  %vm8697_vm7 = vcmp.lt.s32.totalorder %v3061_v42, %v2985_v59 }
  0xbb   :  { %v740_v17 = vadd.f32 %v739_v10, %v738_v54  ;;  %v558_v46 = vsel %vm8646_vm3, %v168_v3, 0.0  ;;  %v105_v10 = vld [vmem:[#allocation2 + $0x260] sm:$0xff]  ;;  %vm9298_vm3 = vcmp.lt.s32.totalorder %v3029_v20, %v2868_v8 }
  0xbc   :  { %v650_v32 = vadd.f32 %v649_v15, %v484_v27  ;;  %v557_v15 = vsel %vm8643_vm6, %v167_v33, 0.0  ;;  %v102_v27 = vld [vmem:[#allocation2 + $0x248] sm:$0xff]  ;;  %v488_v33 = vsel %vm320_vm12, %v98_v55, 0.0  ;;  %vm8653_vm6 = vcmp.lt.s32.totalorder %v2961_v49, %v2985_v59 }
  0xbd   :  { %v742_v54 = vadd.f32 %v741_v38, %v740_v17  ;;  %v743_v55 = vsel %vm713_vm11, %v557_v15, 0.0  ;;  %v492_v3 = vsel %vm8683_vm2, %v102_v27, 0.0  ;;  %v493_v15 = vsel %vm9298_vm3, %v103_v31, 0.0 }
  0xbe   :  { %v651_v63 = vadd.f32 %v650_v32, %v485_v47  ;;  %v169_v32 = vld [vmem:[#allocation2 + $0x460] sm:$0x7]  ;;  %v489_v47 = vsel %vm8689_vm15, %v99_v58, 0.0  ;;  %v491_v58 = vsel %vm8649_vm14, %v101_v23, 0.0  ;;  %vm8660_vm14 = vcmp.lt.s32.totalorder %v2966_v51, %v2985_v59  ;;  %v30_v51 = vld [vmem:[#allocation2 + $0x8] sm:$0xff] }
  0xbf   :  { %v559_v13 = vsel %vm8652_vm5, %v169_v32, 0.0  ;;  %v744_v17 = vadd.f32 %v743_v55, %v742_v54  ;;  %v745_v23 = vsel %vm713_vm11, %v558_v46, 0.0  ;;  %v3290_v32 = vsel %vm8662_vm9, %v105_v10, 0.0  ;;  %v3295_v54 = vpop.permute.xlu0 %240  ;;  %v172_v55 = vld [vmem:[#allocation2 + $0x478] sm:$0x7]  ;;  %v109_v10 = vld [vmem:[#allocation2 + $0x280] sm:$0xff] }
  0xc0   :  { %v652_v29 = vadd.f32 %v651_v63, %v486_v14  ;;  %v104_v63 = vld [vmem:[#allocation2 + $0x258] sm:$0xff]  ;;  %v560_v31 = vsel %vm8653_vm6, %v170_v44, 0.0  ;;  %9299 = vst [vmem:[#allocation51_spill] sm:$0xff] %v3295_v54  ;;  %vm9300_vm3 = vcmp.lt.s32.totalorder %v3054_v35, %v2868_v8  ;;  %vm8663_vm5 = vcmp.lt.s32.totalorder %v2969_v52, %v2985_v59 }
  0xc1   :  { %v494_v27 = vsel %vm8668_vm8, %v104_v63, 0.0  ;;  %v3300_v46 = vsel %vm9300_vm3, %v106_v43, 0.0  ;;  %v747_v63 = vsel %vm713_vm11, %v559_v13, 0.0  ;;  %vm9301_vm6 = vcmp.lt.s32.totalorder %v3076_v0, %v2868_v8 }
  0xc2   :  { %v653_v14 = vadd.f32 %v652_v29, %v487_v28  ;;  %v107_v28 = vld [vmem:[#allocation2 + $0x270] sm:$0xff]  ;;  %v108_v29 = vld [vmem:[#allocation2 + $0x278] sm:$0xff]  ;;  %v561_v43 = vsel %vm8660_vm14, %v171_v45, 0.0  ;;  %v500_v13 = vsel %vm8670_vm0, %v110_v41, 0.0  ;;  %vm8664_vm3 = vcmp.lt.s32.totalorder %v2972_v53, %v2985_v59 }
  0xc3   :  { %v3308_v44 = vsel %vm8661_vm13, %v107_v28, 0.0  ;;  %v749_v28 = vsel %vm713_vm11, %v560_v31, 0.0  ;;  %vm8666_vm14 = vcmp.lt.s32.totalorder %v2866_v7, %v3295_v54  ;;  %vm9302_vm13 = vcmp.lt.s32.totalorder %v3090_v24, %v2868_v8 }
  0xc4   :  { %v654_v38 = vadd.f32 %v653_v14, %v488_v33  ;;  %v746_v33 = vadd.f32 %v745_v23, %v744_v17  ;;  %v3313_v17 = vsel %vm9301_vm6, %v108_v29, 0.0  ;;  %v173_v23 = vld [vmem:[#allocation2 + $0x480] sm:$0x7]  ;;  %v562_v29 = vsel %vm8663_vm5, %v172_v55, 0.0 }
  0xc5   :  { %vm8665_vm6 = vcmp.lt.s32.totalorder %v2863_v6, %v3295_v54  ;;  %v3334_v41 = vsel %vm9302_vm13, %v109_v10, 0.0  ;;  %vm8667_vm9 = vcmp.lt.s32.totalorder %v2978_v56, %v2985_v59  ;;  %v751_v31 = vsel %vm713_vm11, %v561_v43, 0.0  ;;  %v175_v10 = vld [vmem:[#allocation2 + $0x490] sm:$0x7] }
  0xc6   :  { %v655_v14 = vadd.f32 %v654_v38, %v489_v47  ;;  %v748_v47 = vadd.f32 %v747_v63, %v746_v33  ;;  %v3340_v33 = vsel %vm9192_vm1, %v500_v13, 0.0  ;;  %vm8669_vm5 = vcmp.lt.s32.totalorder %v2981_v57, %v2985_v59 }
  0xc7   :  { %v420_v43 = vsel %vm8666_vm14, %v30_v51, 0.0  ;;  %vm8672_vm13 = vcmp.lt.s32.totalorder %v2988_v60, %v2985_v59  ;;  %vm8676_vm14 = vcmp.lt.s32.totalorder %v2994_v62, %v2985_v59  ;;  %v565_v51 = vsel %vm8669_vm5, %v175_v10, 0.0  ;;  %v33_v10 = vld [vmem:[#allocation2 + $0x20] sm:$0xff] }
  0xc8   :  { %v656_v38 = vadd.f32 %v655_v14, %v490_v50  ;;  %v750_v49 = vadd.f32 %v749_v28, %v748_v47  ;;  %v174_v50 = vld [vmem:[#allocation2 + $0x488] sm:$0x7]  ;;  %v563_v14 = vsel %vm8664_vm3, %v173_v23, 0.0  ;;  %v419_v47 = vsel %vm8665_vm6, %v29_v48, 0.0  ;;  %v176_v23 = vld [vmem:[#allocation2 + $0x498] sm:$0x7] }
  0xc9   :  { %v564_v13 = vsel %vm8667_vm9, %v174_v50, 0.0  ;;  %vm8671_vm3 = vcmp.lt.s32.totalorder %v2871_v11, %v3295_v54  ;;  %vm8674_vm6 = vcmp.lt.s32.totalorder %v2991_v61, %v2985_v59  ;;  %v755_v48 = vsel %vm713_vm11, %v563_v14, 0.0  ;;  %v177_v50 = vld [vmem:[#allocation2 + $0x4a0] sm:$0x7] }
  0xca   :  { %v657_v45 = vadd.f32 %v656_v38, %v491_v58  ;;  %v752_v55 = vadd.f32 %v751_v31, %v750_v49  ;;  %v753_v58 = vsel %vm713_vm11, %v562_v29, 0.0  ;;  %v32_v29 = vld [vmem:[#allocation2 + $0x18] sm:$0xff]  ;;  %vm8673_vm9 = vcmp.lt.s32.totalorder %v2878_v12, %v3295_v54 }
  0xcb   :  { %vm8678_vm8 = vcmp.lt.s32.totalorder %v3000_v1, %v2985_v59  ;;  %v757_v31 = vsel %vm713_vm11, %v564_v13, 0.0  ;;  %vm8675_vm5 = vcmp.lt.s32.totalorder %v2887_v16, %v3295_v54  ;;  %vm8680_vm0 = vcmp.lt.s32.totalorder %v3003_v2, %v2985_v59 }
  0xcc   :  { %v658_v63 = vadd.f32 %v657_v45, %v492_v3  ;;  %v754_v49 = vadd.f32 %v753_v58, %v752_v55  ;;  %v31_v3 = vld [vmem:[#allocation2 + $0x10] sm:$0xff]  ;;  %v583_v45 = vadd.f32 %v420_v43, %v419_v47  ;;  %v566_v55 = vsel %vm8672_vm13, %v176_v23, 0.0  ;;  %v178_v47 = vld [vmem:[#allocation2 + $0x4a8] sm:$0x7] }
  0xcd   :  { %v421_v14 = vsel %vm8671_vm3, %v31_v3, 0.0  ;;  %v759_v43 = vsel %vm713_vm11, %v565_v51, 0.0  ;;  %v422_v13 = vsel %vm8673_vm9, %v32_v29, 0.0  ;;  %vm8677_vm3 = vcmp.lt.s32.totalorder %v2892_v18, %v3295_v54 }
  0xce   :  { %v659_v38 = vadd.f32 %v658_v63, %v493_v15  ;;  %v756_v28 = vadd.f32 %v755_v48, %v754_v49  ;;  %v567_v49 = vsel %vm8674_vm6, %v177_v50, 0.0  ;;  %v179_v48 = vld [vmem:[#allocation2 + $0x4b0] sm:$0x7]  ;;  %vm8682_vm13 = vcmp.lt.s32.totalorder %v3008_v4, %v2985_v59 }
  0xcf   :  { %v761_v51 = vsel %vm713_vm11, %v566_v55, 0.0  ;;  %v568_v29 = vsel %vm8676_vm14, %v178_v47, 0.0  ;;  %vm8679_vm9 = vcmp.lt.s32.totalorder %v2900_v22, %v3295_v54  ;;  %vm8685_vm6 = vcmp.lt.s32.totalorder %v3011_v5, %v2985_v59  ;;  %v181_v47 = vld [vmem:[#allocation2 + $0x4c0] sm:$0x7] }
  0xd0   :  { %v660_v15 = vadd.f32 %v659_v38, %v494_v27  ;;  %v758_v63 = vadd.f32 %v757_v31, %v756_v28  ;;  %v584_v27 = vadd.f32 %v583_v45, %v421_v14  ;;  %v34_v38 = vld [vmem:[#allocation2 + $0x28] sm:$0xff]  ;;  %v423_v28 = vsel %vm8675_vm5, %v33_v10, 0.0  ;;  %v180_v31 = vld [vmem:[#allocation2 + $0x4b8] sm:$0x7] }
  0xd1   :  { %v763_v14 = vsel %vm713_vm11, %v567_v49, 0.0  ;;  %v424_v55 = vsel %vm8677_vm3, %v34_v38, 0.0  ;;  %vm8681_vm5 = vcmp.lt.s32.totalorder %v2908_v26, %v3295_v54  ;;  %vm8688_vm14 = vcmp.lt.s32.totalorder %v3014_v9, %v2985_v59  ;;  %v37_v38 = vld [vmem:[#allocation2 + $0x40] sm:$0xff] }
  0xd2   :  { %v661_v58 = vadd.f32 %v660_v15, %v3290_v32  ;;  %v760_v3 = vadd.f32 %v759_v43, %v758_v63  ;;  %v585_v32 = vadd.f32 %v584_v27, %v422_v13  ;;  %v35_v15 = vld [vmem:[#allocation2 + $0x30] sm:$0xff]  ;;  %v569_v63 = vsel %vm8678_vm8, %v179_v48, 0.0  ;;  %v36_v27 = vld [vmem:[#allocation2 + $0x38] sm:$0xff] }
  0xd3   :  { %v765_v43 = vsel %vm713_vm11, %v568_v29, 0.0  ;;  %v425_v13 = vsel %vm8679_vm9, %v35_v15, 0.0  ;;  %v570_v49 = vsel %vm8680_vm0, %v180_v31, 0.0  ;;  %vm8684_vm3 = vcmp.lt.s32.totalorder %v2916_v30, %v3295_v54 }
  0xd4   :  { %v662_v23 = vadd.f32 %v661_v58, %v3300_v46  ;;  %v762_v45 = vadd.f32 %v761_v51, %v760_v3  ;;  %v586_v46 = vadd.f32 %v585_v32, %v423_v28  ;;  %vm8691_vm8 = vcmp.lt.s32.totalorder %v3026_v19, %v2985_v59 }
  0xd5   :  { %v767_v48 = vsel %vm713_vm11, %v569_v63, 0.0  ;;  %v426_v51 = vsel %vm8681_vm5, %v36_v27, 0.0  ;;  %v571_v28 = vsel %vm8682_vm13, %v181_v47, 0.0  ;;  %vm8687_vm9 = vcmp.lt.s32.totalorder %v2924_v34, %v3295_v54  ;;  %v39_v63 = vld [vmem:[#allocation2 + $0x50] sm:$0xff] }
  0xd6   :  { %v663_v50 = vadd.f32 %v662_v23, %v3308_v44  ;;  %v764_v10 = vadd.f32 %v763_v14, %v762_v45  ;;  %v587_v44 = vadd.f32 %v586_v46, %v424_v55  ;;  %v182_v23 = vld [vmem:[#allocation2 + $0x4c8] sm:$0x7]  ;;  %v183_v46 = vld [vmem:[#allocation2 + $0x4d0] sm:$0x7]  ;;  %vm407_vm0 = vcmp.lt.s32.totalorder %v3029_v20, %v2985_v59 }
  0xd7   :  { %v38_v45 = vld [vmem:[#allocation2 + $0x48] sm:$0xff]  ;;  %v427_v31 = vsel %vm8684_vm3, %v37_v38, 0.0  ;;  %v572_v14 = vsel %vm8685_vm6, %v182_v23, 0.0  ;;  %vm8690_vm5 = vcmp.lt.s32.totalorder %v2929_v36, %v3295_v54  ;;  %vm408_vm13 = vcmp.lt.s32.totalorder %v3032_v21, %v2985_v59 }
  0xd8   :  { %v664_v58 = vadd.f32 %v663_v50, %v3313_v17  ;;  %v766_v3 = vadd.f32 %v765_v43, %v764_v10  ;;  %v588_v17 = vadd.f32 %v587_v44, %v425_v13  ;;  %v769_v50 = vsel %vm713_vm11, %v570_v49, 0.0  ;;  %v184_v10 = vld [vmem:[#allocation2 + $0x4d8] sm:$0x7]  ;;  %v185_v49 = vld [vmem:[#allocation2 + $0x4e0] sm:$0x7] }
  0xd9   :  { %vm8694_vm2 = vcmp.lt.s32.totalorder %v3038_v25, %v2985_v59  ;;  %v771_v27 = vsel %vm713_vm11, %v571_v28, 0.0  ;;  %v428_v44 = vsel %vm8687_vm9, %v38_v45, 0.0  ;;  %v40_v43 = vld [vmem:[#allocation2 + $0x58] sm:$0xff]  ;;  %vm8692_vm3 = vcmp.lt.s32.totalorder %v2932_v37, %v3295_v54  ;;  %v187_v28 = vld [vmem:[#allocation2 + $0x4f0] sm:$0x7] }
  0xda   :  { %v665_v32 = vadd.f32 %v664_v58, %v3334_v41  ;;  %v768_v29 = vadd.f32 %v767_v48, %v766_v3  ;;  %v589_v41 = vadd.f32 %v588_v17, %v426_v51  ;;  %v573_v58 = vsel %vm8688_vm14, %v183_v46, 0.0  ;;  %v186_v17 = vld [vmem:[#allocation2 + $0x4e8] sm:$0x7]  ;;  %v41_v48 = vld [vmem:[#allocation2 + $0x60] sm:$0xff] }
  0xdb   :  { %vm8695_vm6 = vcmp.lt.s32.totalorder %v3054_v35, %v2985_v59  ;;  %v773_v3 = vsel %vm713_vm11, %v572_v14, 0.0  ;;  %v429_v38 = vsel %vm8690_vm5, %v39_v63, 0.0  ;;  %vm8693_vm9 = vcmp.lt.s32.totalorder %v2938_v40, %v3295_v54 }
  0xdc   :  { %v667_v15 = vadd.f32 %v3340_v33, %v665_v32  ;;  %v770_v55 = vadd.f32 %v769_v50, %v768_v29  ;;  %v590_v33 = vadd.f32 %v589_v41, %v427_v31  ;;  %v574_v32 = vsel %vm8691_vm8, %v184_v10, 0.0  ;;  %v188_v41 = vld [vmem:[#allocation2 + $0x4f8] sm:$0x7]  ;;  %v42_v50 = vld [vmem:[#allocation2 + $0x68] sm:$0xff]  ;;  %v9303_v31 = vld [vmem:[#allocation22_spill] sm:$0xff] }
  0xdd   :  { %vm8699_vm14 = vcmp.lt.s32.totalorder %v3076_v0, %v2985_v59  ;;  %vm8698_vm15 = vcmp.lt.s32.totalorder %v3090_v24, %v2985_v59  ;;  %v775_v29 = vsel %vm713_vm11, %v573_v58, 0.0  ;;  %v430_v45 = vsel %vm8692_vm3, %v40_v43, 0.0  ;;  %v43_v43 = vld [vmem:[#allocation2 + $0x70] sm:$0xff] }
  0xde   :  { %668 = vadd.xlane.f32.xlu0 %v667_v15  ;;  %v772_v47 = vadd.f32 %v771_v27, %v770_v55  ;;  %v591_v13 = vadd.f32 %v590_v33, %v428_v44  ;;  %v575_v15 = vsel %vm407_vm0, %v185_v49, 0.0  ;;  %vm8696_vm5 = vcmp.lt.s32.totalorder %v9303_v31, %v3295_v54  ;;  %v3493_v55 = vpop.permute.xlu1 %246  ;;  %v189_v27 = vld [vmem:[#allocation2 + $0x500] sm:$0x7]  ;;  %v190_v44 = vld [vmem:[#allocation2 + $0x508] sm:$0x7] }
  0xdf   :  { %9304 = vst [vmem:[#allocation52_spill] sm:$0xff] %v3493_v55  ;;  %vm8704_vm8 = vcmp.lt.s32.totalorder %v3104_v39, %v2985_v59  ;;  %v576_v63 = vsel %vm408_vm13, %v186_v17, 0.0  ;;  %v777_v33 = vsel %vm713_vm11, %v574_v32, 0.0  ;;  %v431_v10 = vsel %vm8693_vm9, %v41_v48, 0.0  ;;  %v9306_v32 = vld [vmem:[#allocation24_spill] sm:$0xff] }
  0xe0   :  { %v774_v23 = vadd.f32 %v773_v3, %v772_v47  ;;  %v592_v51 = vadd.f32 %v591_v13, %v429_v38  ;;  %v577_v58 = vsel %vm8694_vm2, %v187_v28, 0.0  ;;  %v9305_v13 = vld [vmem:[#allocation23_spill] sm:$0xff]  ;;  %v191_v3 = vld [vmem:[#allocation2 + $0x510] sm:$0x7]  ;;  %v578_v38 = vsel %vm8695_vm6, %v188_v41, 0.0 }
  0xe1   :  { %vm265_vm3 = vcmp.lt.s32.totalorder %v9305_v13, %v3295_v54  ;;  %v779_v17 = vsel %vm713_vm11, %v575_v15, 0.0  ;;  %vm8706_vm9 = vcmp.lt.s32.totalorder %v9306_v32, %v3295_v54  ;;  %vm8700_vm2 = vcmp.lt.s32.totalorder %v2863_v6, %v3493_v55 }
  0xe2   :  { %v776_v46 = vadd.f32 %v775_v29, %v774_v23  ;;  %v593_v14 = vadd.f32 %v592_v51, %v430_v45  ;;  %v432_v23 = vsel %vm8696_vm5, %v42_v50, 0.0  ;;  %v44_v51 = vld [vmem:[#allocation2 + $0x78] sm:$0xff]  ;;  %v111_v29 = vld [vmem:[#allocation2 + $0x290] sm:$0xff]  ;;  %vm8701_vm6 = vcmp.lt.s32.totalorder %v2866_v7, %v3493_v55 }
  0xe3   :  { %v112_v45 = vld [vmem:[#allocation2 + $0x298] sm:$0xff]  ;;  %v579_v41 = vsel %vm8697_vm7, %v189_v27, 0.0  ;;  %v580_v15 = vsel %vm8699_vm14, %v190_v44, 0.0  ;;  %v433_v50 = vsel %vm265_vm3, %v43_v43, 0.0  ;;  %vm8712_vm5 = vcmask 518144   ;;  %v9307_v27 = vld [vmem:[#allocation25_spill] sm:$0xff] }
  0xe4   :  { %v778_v47 = vadd.f32 %v777_v33, %v776_v46  ;;  %v594_v49 = vadd.f32 %v593_v14, %v431_v10  ;;  %v781_v46 = vsel %vm713_vm11, %v576_v63, 0.0  ;;  %v192_v14 = vld [vmem:[#allocation2 + $0x518] sm:$0x7]  ;;  %v581_v33 = vsel %vm8698_vm15, %v191_v3, 0.0 }
  0xe5   :  { %vm8705_vm7 = vcmp.lt.s32.totalorder %v9307_v27, %v3295_v54  ;;  %v783_v44 = vsel %vm713_vm11, %v577_v58, 0.0  ;;  %v434_v63 = vsel %vm8706_vm9, %v44_v51, 0.0  ;;  %v501_v43 = vsel %vm8700_vm2, %v111_v29, 0.0  ;;  %v9309_v29 = vld [vmem:[#allocation27_spill] sm:$0xff] }
  0xe6   :  { %v780_v48 = vadd.f32 %v779_v17, %v778_v47  ;;  %v595_v28 = vadd.f32 %v594_v49, %v432_v23  ;;  %v45_v47 = vld [vmem:[#allocation2 + $0x80] sm:$0xff]  ;;  %v502_v3 = vsel %vm8701_vm6, %v112_v45, 0.0  ;;  %v46_v23 = vld [vmem:[#allocation2 + $0x88] sm:$0xff]  ;;  %vm8707_vm14 = vcmp.lt.s32.totalorder %v2871_v11, %v3493_v55 }
  0xe7   :  { %v582_v58 = vsel %vm8704_vm8, %v192_v14, 0.0  ;;  %v785_v51 = vsel %vm713_vm11, %v578_v38, 0.0  ;;  %vm8710_vm2 = vcmp.lt.s32.totalorder %v9309_v29, %v3295_v54  ;;  %v435_v45 = vsel %vm8705_vm7, %v45_v47, 0.0  ;;  %v9310_v14 = vld [vmem:[#allocation28_spill] sm:$0xff] }
  0xe8   :  { %v782_v10 = vadd.f32 %v781_v46, %v780_v48  ;;  %v596_v49 = vadd.f32 %v595_v28, %v433_v50  ;;  %v9308_v48 = vld [vmem:[#allocation26_spill] sm:$0xff]  ;;  %v113_v46 = vld [vmem:[#allocation2 + $0x2a0] sm:$0xff]  ;;  %vm8709_vm6 = vcmp.lt.s32.totalorder %v2878_v12, %v3493_v55  ;;  %v787_v59 = vsel %vm713_vm11, %v579_v41, 0.0 }
  0xe9   :  { %vm8708_vm15 = vcmp.lt.s32.totalorder %v9308_v48, %v3295_v54  ;;  %vm270_vm8 = vcmp.lt.s32.totalorder %v9310_v14, %v3295_v54  ;;  %v503_v47 = vsel %vm8707_vm14, %v113_v46, 0.0  ;;  %vm8711_vm7 = vcmp.lt.s32.totalorder %v2887_v16, %v3493_v55  ;;  %v49_v46 = vld [vmem:[#allocation2 + $0xa0] sm:$0xff] }
  0xea   :  { %v784_v17 = vadd.f32 %v783_v44, %v782_v10  ;;  %v597_v28 = vadd.f32 %v596_v49, %v434_v63  ;;  %v47_v10 = vld [vmem:[#allocation2 + $0x90] sm:$0xff]  ;;  %v114_v44 = vld [vmem:[#allocation2 + $0x2a8] sm:$0xff]  ;;  %v670_v63 = vadd.f32 %v502_v3, %v501_v43  ;;  %v436_v38 = vsel %vm8708_vm15, %v46_v23, 0.0 }
  0xeb   :  { %v789_v41 = vsel %vm713_vm11, %v580_v15, 0.0  ;;  %vm8748_vm9 = vcmp.lt.s32.totalorder %v2969_v52, %v3295_v54  ;;  %v437_v3 = vsel %vm8710_vm2, %v47_v10, 0.0  ;;  %vm8713_vm14 = vcmp.lt.s32.totalorder %v2892_v18, %v3493_v55 }
  0xec   :  { %v786_v50 = vadd.f32 %v785_v51, %v784_v17  ;;  %v598_v49 = vadd.f32 %v597_v28, %v435_v45  ;;  %v48_v28 = vld [vmem:[#allocation2 + $0x98] sm:$0xff]  ;;  %v115_v45 = vld [vmem:[#allocation2 + $0x2b0] sm:$0xff]  ;;  %v671_v43 = vadd.f32 %v670_v63, %v503_v47  ;;  %v791_v15 = vsel %vm713_vm11, %v581_v33, 0.0  ;;  %v50_v47 = vld [vmem:[#allocation2 + $0xa8] sm:$0xff] }
  0xed   :  { %vm8715_vm15 = vcmp.lt.s32.totalorder %v2972_v53, %v3295_v54  ;;  %v438_v10 = vsel %vm270_vm8, %v48_v28, 0.0  ;;  %v794_v33 = vsel %vm8712_vm5, %v582_v58, 0.0  ;;  %vm8717_vm2 = vcmp.lt.s32.totalorder %v2978_v56, %v3295_v54 }
  0xee   :  { %v788_v17 = vadd.f32 %v787_v59, %v786_v50  ;;  %v599_v51 = vadd.f32 %v598_v49, %v436_v38  ;;  %v504_v59 = vsel %vm8709_vm6, %v114_v44, 0.0  ;;  %v116_v49 = vld [vmem:[#allocation2 + $0x2b8] sm:$0xff]  ;;  %v505_v44 = vsel %vm8711_vm7, %v115_v45, 0.0 }
  0xef   :  { %v672_v63 = vadd.f32 %v671_v43, %v504_v59  ;;  %vm8714_vm6 = vcmp.lt.s32.totalorder %v2900_v22, %v3493_v55  ;;  %v439_v28 = vsel %vm8748_vm9, %v49_v46, 0.0  ;;  %v506_v45 = vsel %vm8713_vm14, %v116_v49, 0.0 }
  0xf0   :  { %v790_v23 = vadd.f32 %v789_v41, %v788_v17  ;;  %v600_v50 = vadd.f32 %v599_v51, %v437_v3  ;;  %v117_v51 = vld [vmem:[#allocation2 + $0x2c0] sm:$0xff]  ;;  %v51_v3 = vld [vmem:[#allocation2 + $0xb0] sm:$0xff]  ;;  %vm8716_vm7 = vcmp.lt.s32.totalorder %v2908_v26, %v3493_v55  ;;  %v440_v58 = vsel %vm8715_vm15, %v50_v47, 0.0 }
  0xf1   :  { %v673_v43 = vadd.f32 %v672_v63, %v505_v44  ;;  %v507_v46 = vsel %vm8714_vm6, %v117_v51, 0.0  ;;  %v52_v63 = vld [vmem:[#allocation2 + $0xb8] sm:$0xff]  ;;  %vm8719_vm5 = vcmp.lt.s32.totalorder %v2981_v57, %v3295_v54  ;;  %vm8718_vm14 = vcmp.lt.s32.totalorder %v2916_v30, %v3493_v55  ;;  %v53_v47 = vld [vmem:[#allocation2 + $0xc0] sm:$0xff] }
  0xf2   :  { %v792_v38 = vadd.f32 %v791_v15, %v790_v23  ;;  %v601_v17 = vadd.f32 %v600_v50, %v438_v10  ;;  %v118_v23 = vld [vmem:[#allocation2 + $0x2c8] sm:$0xff]  ;;  %v119_v15 = vld [vmem:[#allocation2 + $0x2d0] sm:$0xff]  ;;  %v441_v44 = vsel %vm8717_vm2, %v51_v3, 0.0  ;;  %vm8721_vm6 = vcmp.lt.s32.totalorder %v2988_v60, %v3295_v54  ;;  %v120_v51 = vld [vmem:[#allocation2 + $0x2d8] sm:$0xff] }
  0xf3   :  { %v674_v50 = vadd.f32 %v673_v43, %v506_v45  ;;  %vm8720_vm15 = vcmp.lt.s32.totalorder %v2924_v34, %v3493_v55  ;;  %v54_v45 = vld [vmem:[#allocation2 + $0xc8] sm:$0xff]  ;;  %v121_v3 = vld [vmem:[#allocation2 + $0x2e0] sm:$0xff]  ;;  %vm8722_vm2 = vcmp.lt.s32.totalorder %v2929_v36, %v3493_v55  ;;  %vm8758_vm9 = vcmp.lt.s32.totalorder %v2988_v60, %v3493_v55 }
  0xf4   :  { %v795_v41 = vadd.f32 %v794_v33, %v792_v38  ;;  %v602_v59 = vadd.f32 %v601_v17, %v439_v28  ;;  %v508_v38 = vsel %vm8716_vm7, %v118_v23, 0.0  ;;  %v442_v33 = vsel %vm8719_vm5, %v52_v63, 0.0  ;;  %v122_v63 = vld [vmem:[#allocation2 + $0x2e8] sm:$0xff] }
  0xf5   :  { %v675_v10 = vadd.f32 %v674_v50, %v507_v46  ;;  %v509_v28 = vsel %vm8718_vm14, %v119_v15, 0.0  ;;  %vm8723_vm7 = vcmp.lt.s32.totalorder %v2991_v61, %v3295_v54  ;;  %v443_v23 = vsel %vm8721_vm6, %v53_v47, 0.0  ;;  %v123_v47 = vld [vmem:[#allocation2 + $0x2f0] sm:$0xff] }
  0xf6   :  { %796 = vadd.xlane.f32.xlu0 %v795_v41  ;;  %v603_v49 = vadd.f32 %v602_v59, %v440_v58  ;;  %v510_v50 = vsel %vm8720_vm15, %v120_v51, 0.0  ;;  %v55_v58 = vld [vmem:[#allocation2 + $0xd0] sm:$0xff]  ;;  %vm8725_vm14 = vcmp.lt.s32.totalorder %v2994_v62, %v3295_v54  ;;  %vm8724_vm5 = vcmp.lt.s32.totalorder %v2932_v37, %v3493_v55 }
  0xf7   :  { %v676_v43 = vadd.f32 %v675_v10, %v508_v38  ;;  %v444_v15 = vsel %vm8723_vm7, %v54_v45, 0.0  ;;  %v511_v10 = vsel %vm8722_vm2, %v121_v3, 0.0  ;;  %vm8727_vm15 = vcmp.lt.s32.totalorder %v3000_v1, %v3295_v54  ;;  %v124_v45 = vld [vmem:[#allocation2 + $0x2f8] sm:$0xff] }
  0xf8   :  { %v604_v17 = vadd.f32 %v603_v49, %v441_v44  ;;  %v56_v44 = vld [vmem:[#allocation2 + $0xd8] sm:$0xff]  ;;  %vm8726_vm6 = vcmp.lt.s32.totalorder %v2938_v40, %v3493_v55  ;;  %v445_v51 = vsel %vm8725_vm14, %v55_v58, 0.0  ;;  %vm8729_vm2 = vcmp.lt.s32.totalorder %v3003_v2, %v3295_v54  ;;  %v125_v58 = vld [vmem:[#allocation2 + $0x300] sm:$0xff] }
  0xf9   :  { %v677_v59 = vadd.f32 %v676_v43, %v509_v28  ;;  %v512_v43 = vsel %vm8724_vm5, %v122_v63, 0.0  ;;  %vm8728_vm7 = vcmp.lt.s32.totalorder %v9303_v31, %v3493_v55  ;;  %v446_v3 = vsel %vm8727_vm15, %v56_v44, 0.0  ;;  %v126_v44 = vld [vmem:[#allocation2 + $0x308] sm:$0xff] }
  0xfa   :  { %v605_v41 = vadd.f32 %v604_v17, %v442_v33  ;;  %v3662_v33 = vld [vmem:[#allocation2 + $0xe0] sm:$0xff]  ;;  %vm8731_vm5 = vcmp.lt.s32.totalorder %v3008_v4, %v3295_v54  ;;  %vm8730_vm14 = vcmp.lt.s32.totalorder %v9305_v13, %v3493_v55  ;;  %vm8732_vm15 = vcmp.lt.s32.totalorder %v9306_v32, %v3493_v55 }
  0xfb   :  { %v678_v49 = vadd.f32 %v677_v59, %v510_v50  ;;  %9311 = vst [vmem:[#allocation53_spill] sm:$0xff] %v3662_v33  ;;  %v513_v59 = vsel %vm8726_vm6, %v123_v47, 0.0  ;;  %v447_v63 = vsel %vm8729_vm2, %v3662_v33, 0.0  ;;  %vm8733_vm6 = vcmp.lt.s32.totalorder %v3011_v5, %v3295_v54  ;;  %v2635_v33 = vld [vmem:[#allocation2 + $0x1a0] sm:$0xff] }
  0xfc   :  { %v606_v46 = vadd.f32 %v605_v41, %v443_v23  ;;  %v3674_v23 = vld [vmem:[#allocation2 + $0xe8] sm:$0xff]  ;;  %vm8734_vm2 = vcmp.lt.s32.totalorder %v9307_v27, %v3493_v55 }
  0xfd   :  { %v679_v17 = vadd.f32 %v678_v49, %v511_v10  ;;  %9312 = vst [vmem:[#allocation54_spill] sm:$0xff] %v3674_v23  ;;  %v514_v49 = vsel %vm8728_vm7, %v124_v45, 0.0  ;;  %v448_v47 = vsel %vm8731_vm5, %v3674_v23, 0.0  ;;  %vm8735_vm7 = vcmp.lt.s32.totalorder %v3014_v9, %v3295_v54 }
  0xfe   :  { %v607_v38 = vadd.f32 %v606_v46, %v444_v15  ;;  %v3687_v15 = vld [vmem:[#allocation2 + $0xf0] sm:$0xff]  ;;  %vm8736_vm5 = vcmp.lt.s32.totalorder %v9308_v48, %v3493_v55 }
  0xff   :  { %v680_v41 = vadd.f32 %v679_v17, %v512_v43  ;;  %9313 = vst [vmem:[#allocation55_spill] sm:$0xff] %v3687_v15  ;;  %v515_v17 = vsel %vm8730_vm14, %v125_v58, 0.0  ;;  %vm8737_vm14 = vcmp.lt.s32.totalorder %v3026_v19, %v3295_v54  ;;  %v128_v58 = vld [vmem:[#allocation2 + $0x318] sm:$0xff] }
 0x100   :  { %v608_v28 = vadd.f32 %v607_v38, %v445_v51  ;;  %v3700_v51 = vld [vmem:[#allocation2 + $0xf8] sm:$0xff] }
 0x101   :  { %v681_v46 = vadd.f32 %v680_v41, %v513_v59  ;;  %9314 = vst [vmem:[#allocation56_spill] sm:$0xff] %v3700_v51  ;;  %v449_v41 = vsel %vm8733_vm6, %v3687_v15, 0.0  ;;  %v3713_v59 = vld [vmem:[#allocation2 + $0x100] sm:$0xff]  ;;  %vm8738_vm6 = vcmp.lt.s32.totalorder %v9309_v29, %v3493_v55  ;;  %v2634_v15 = vld [vmem:[#allocation2 + $0x198] sm:$0xff] }
 0x102   :  { %v609_v50 = vadd.f32 %v608_v28, %v446_v3  ;;  %v127_v28 = vld [vmem:[#allocation2 + $0x310] sm:$0xff]  ;;  %v516_v3 = vsel %vm8732_vm15, %v126_v44, 0.0  ;;  %9315 = vst [vmem:[#allocation57_spill] sm:$0xff] %v3713_v59  ;;  %vm8739_vm15 = vcmp.lt.s32.totalorder %v3029_v20, %v3295_v54 }
 0x103   :  { %v682_v38 = vadd.f32 %v681_v46, %v514_v49  ;;  %v517_v49 = vsel %vm8734_vm2, %v127_v28, 0.0  ;;  %v3739_v28 = vld [vmem:[#allocation2 + $0x110] sm:$0xff]  ;;  %vm8741_vm2 = vcmp.lt.s32.totalorder %v3032_v21, %v3295_v54 }
 0x104   :  { %v610_v10 = vadd.f32 %v609_v50, %v447_v63  ;;  %v450_v63 = vsel %vm8735_vm7, %v3700_v51, 0.0  ;;  %9317 = vst [vmem:[#allocation59_spill] sm:$0xff] %v3739_v28  ;;  %vm8740_vm7 = vcmp.lt.s32.totalorder %v9310_v14, %v3493_v55 }
 0x105   :  { %v683_v45 = vadd.f32 %v682_v38, %v515_v17  ;;  %v129_v38 = vld [vmem:[#allocation2 + $0x320] sm:$0xff]  ;;  %v451_v17 = vsel %vm8737_vm14, %v3713_v59, 0.0  ;;  %vm8743_vm14 = vcmp.lt.s32.totalorder %v2969_v52, %v3493_v55  ;;  %v2632_v59 = vld [vmem:[#allocation2 + $0x188] sm:$0xff] }
 0x106   :  { %v611_v43 = vadd.f32 %v610_v10, %v448_v47  ;;  %v3726_v10 = vld [vmem:[#allocation2 + $0x108] sm:$0xff] }
 0x107   :  { %v684_v46 = vadd.f32 %v683_v45, %v516_v3  ;;  %9316 = vst [vmem:[#allocation58_spill] sm:$0xff] %v3726_v10 }
 0x108   :  { %v612_v50 = vadd.f32 %v611_v43, %v449_v41  ;;  %v518_v43 = vsel %vm8736_vm5, %v128_v58, 0.0  ;;  %v130_v41 = vld [vmem:[#allocation2 + $0x328] sm:$0xff]  ;;  %v519_v58 = vsel %vm8738_vm6, %v129_v38, 0.0  ;;  %vm8744_vm5 = vcmp.lt.s32.totalorder %v3038_v25, %v3295_v54 }
 0x109   :  { %v685_v47 = vadd.f32 %v684_v46, %v517_v49  ;;  %v3752_v46 = vld [vmem:[#allocation2 + $0x118] sm:$0xff]  ;;  %v131_v49 = vld [vmem:[#allocation2 + $0x330] sm:$0xff]  ;;  %v520_v38 = vsel %vm8740_vm7, %v130_v41, 0.0  ;;  %vm8745_vm6 = vcmp.lt.s32.totalorder %v3054_v35, %v3295_v54  ;;  %vm288_vm7 = vcmp.lt.s32.totalorder %v3061_v42, %v3295_v54 }
 0x10a   :  { %v613_v44 = vadd.f32 %v612_v50, %v450_v63  ;;  %v452_v50 = vsel %vm8739_vm15, %v3726_v10, 0.0  ;;  %9318 = vst [vmem:[#allocation60_spill] sm:$0xff] %v3752_v46  ;;  %vm8747_vm15 = vcmp.lt.s32.totalorder %v2972_v53, %v3493_v55  ;;  %v521_v41 = vsel %vm8743_vm14, %v131_v49, 0.0  ;;  %v137_v10 = vld [vmem:[#allocation2 + $0x360] sm:$0xff] }
 0x10b   :  { %v686_v3 = vadd.f32 %v685_v47, %v518_v43  ;;  %v453_v47 = vsel %vm8741_vm2, %v3739_v28, 0.0  ;;  %vm8751_vm2 = vcmp.lt.s32.totalorder %v2978_v56, %v3493_v55  ;;  %vm8769_vm14 = vcmp.lt.s32.totalorder %v3076_v0, %v3295_v54 }
 0x10c   :  { %v614_v45 = vadd.f32 %v613_v44, %v451_v17  ;;  %v3765_v17 = vld [vmem:[#allocation2 + $0x120] sm:$0xff] }
 0x10d   :  { %v687_v44 = vadd.f32 %v686_v3, %v519_v58  ;;  %9319 = vst [vmem:[#allocation61_spill] sm:$0xff] %v3765_v17  ;;  %v3778_v58 = vld [vmem:[#allocation2 + $0x128] sm:$0xff] }
 0x10e   :  { %v615_v63 = vadd.f32 %v614_v45, %v452_v50  ;;  %v132_v45 = vld [vmem:[#allocation2 + $0x338] sm:$0xff]  ;;  %v454_v50 = vsel %vm8744_vm5, %v3752_v46, 0.0  ;;  %9320 = vst [vmem:[#allocation62_spill] sm:$0xff] %v3778_v58  ;;  %v3791_v46 = vld [vmem:[#allocation2 + $0x130] sm:$0xff]  ;;  %vm8754_vm5 = vcmp.lt.s32.totalorder %v2981_v57, %v3493_v55 }
 0x10f   :  { %v688_v3 = vadd.f32 %v687_v44, %v520_v38  ;;  %v455_v38 = vsel %vm8745_vm6, %v3765_v17, 0.0  ;;  %v522_v49 = vsel %vm8747_vm15, %v132_v45, 0.0  ;;  %9321 = vst [vmem:[#allocation63_spill] sm:$0xff] %v3791_v46  ;;  %vm291_vm6 = vcmp.lt.s32.totalorder %v3104_v39, %v3295_v54 }
 0x110   :  { %v616_v43 = vadd.f32 %v615_v63, %v453_v47  ;;  %v133_v47 = vld [vmem:[#allocation2 + $0x340] sm:$0xff]  ;;  %v456_v45 = vsel %vm288_vm7, %v3778_v58, 0.0  ;;  %vm8756_vm15 = vcmp.lt.s32.totalorder %v3090_v24, %v3295_v54  ;;  %v457_v58 = vsel %vm8769_vm14, %v3791_v46, 0.0  ;;  %v2638_v54 = vld [vmem:[#allocation2 + $0x1b8] sm:$0xff] }
 0x111   :  { %v689_v44 = vadd.f32 %v688_v3, %v521_v41  ;;  %v3797_v41 = vld [vmem:[#allocation2 + $0x140] sm:$0xff]  ;;  %v523_v17 = vsel %vm8751_vm2, %v133_v47, 0.0  ;;  %vm8759_vm2 = vcmp.lt.s32.totalorder %v2991_v61, %v3493_v55  ;;  %vm8773_vm14 = vcmp.lt.s32.totalorder %v3104_v39, %v3493_v55 }
 0x112   :  { %v617_v63 = vadd.f32 %v616_v43, %v454_v50  ;;  %v134_v50 = vld [vmem:[#allocation2 + $0x348] sm:$0xff]  ;;  %9322 = vst [vmem:[#allocation64_spill] sm:$0xff] %v3797_v41  ;;  %v459_v28 = vsel %vm291_vm6, %v3797_v41, 0.0 }
 0x113   :  { %v690_v3 = vadd.f32 %v689_v44, %v522_v49  ;;  %v524_v47 = vsel %vm8754_vm5, %v134_v50, 0.0  ;;  %vm8760_vm5 = vcmp.lt.s32.totalorder %v2994_v62, %v3493_v55  ;;  %v138_v41 = vld [vmem:[#allocation2 + $0x368] sm:$0xff]  ;;  %v2654_v62 = vld [vmem:[#allocation2 + $0x238] sm:$0xff] }
 0x114   :  { %v618_v43 = vadd.f32 %v617_v63, %v455_v38  ;;  %v3808_v63 = vld [vmem:[#allocation2 + $0x138] sm:$0xff]  ;;  %v135_v38 = vld [vmem:[#allocation2 + $0x350] sm:$0xff] }
 0x115   :  { %9323 = vst [vmem:[#allocation65_spill] sm:$0xff] %v3808_v63  ;;  %v691_v49 = vadd.f32 %v690_v3, %v523_v17  ;;  %v458_v3 = vsel %vm8756_vm15, %v3808_v63, 0.0  ;;  %v525_v50 = vsel %vm8758_vm9, %v135_v38, 0.0  ;;  %vm8761_vm15 = vcmp.lt.s32.totalorder %v3000_v1, %v3493_v55 }
 0x116   :  { %v619_v44 = vadd.f32 %v618_v43, %v456_v45  ;;  %v136_v45 = vld [vmem:[#allocation2 + $0x358] sm:$0xff]  ;;  %v527_v38 = vsel %vm8760_vm5, %v137_v10, 0.0  ;;  %vm8762_vm9 = vcmp.lt.s32.totalorder %v3003_v2, %v3493_v55  ;;  %v141_v10 = vld [vmem:[#allocation2 + $0x380] sm:$0xff]  ;;  %vm8764_vm5 = vcmp.lt.s32.totalorder %v3011_v5, %v3493_v55 }
 0x117   :  { %v692_v17 = vadd.f32 %v691_v49, %v524_v47  ;;  %v526_v49 = vsel %vm8759_vm2, %v136_v45, 0.0  ;;  %v528_v45 = vsel %vm8761_vm15, %v138_v41, 0.0  ;;  %vm8763_vm2 = vcmp.lt.s32.totalorder %v3008_v4, %v3493_v55  ;;  %v2650_v2 = vld [vmem:[#allocation2 + $0x218] sm:$0xff] }
 0x118   :  { %v620_v43 = vadd.f32 %v619_v44, %v457_v58  ;;  %v623_v44 = vsel %vm9192_vm1, %v459_v28, 0.0  ;;  %vm8765_vm15 = vcmp.lt.s32.totalorder %v3014_v9, %v3493_v55  ;;  %v2648_v9 = vld [vmem:[#allocation2 + $0x208] sm:$0xff] }
 0x119   :  { %v693_v58 = vadd.f32 %v692_v17, %v525_v50 }
 0x11a   :  { %v621_v46 = vadd.f32 %v620_v43, %v458_v3  ;;  %v139_v43 = vld [vmem:[#allocation2 + $0x370] sm:$0xff] }
 0x11b   :  { %v694_v63 = vadd.f32 %v693_v58, %v526_v49  ;;  %v529_v3 = vsel %vm8762_vm9, %v139_v43, 0.0  ;;  %v142_v58 = vld [vmem:[#allocation2 + $0x388] sm:$0xff]  ;;  %v143_v49 = vld [vmem:[#allocation2 + $0x390] sm:$0xff]  ;;  %vm8766_vm9 = vcmp.lt.s32.totalorder %v3026_v19, %v3493_v55  ;;  %v144_v43 = vld [vmem:[#allocation2 + $0x398] sm:$0xff] }
 0x11c   :  { %v624_v47 = vadd.f32 %v623_v44, %v621_v46  ;;  %v140_v46 = vld [vmem:[#allocation2 + $0x378] sm:$0xff]  ;;  %v531_v44 = vsel %vm8764_vm5, %v141_v10, 0.0  ;;  %vm8768_vm5 = vcmp.lt.s32.totalorder %v3032_v21, %v3493_v55  ;;  %v146_v10 = vld [vmem:[#allocation2 + $0x3a8] sm:$0xff] }
 0x11d   :  { %v695_v28 = vadd.f32 %v694_v63, %v527_v38  ;;  %v530_v63 = vsel %vm8763_vm2, %v140_v46, 0.0  ;;  %v532_v38 = vsel %vm8765_vm15, %v142_v58, 0.0  ;;  %vm8767_vm2 = vcmp.lt.s32.totalorder %v3029_v20, %v3493_v55  ;;  %v145_v46 = vld [vmem:[#allocation2 + $0x3a0] sm:$0xff]  ;;  %v147_v58 = vld [vmem:[#allocation2 + $0x3b0] sm:$0xff]  ;;  %v2644_v21 = vld [vmem:[#allocation2 + $0x1e8] sm:$0xff] }
 0x11e   :  { %625 = vadd.xlane.f32.xlu1 %v624_v47  ;;  %vm8770_vm15 = vcmp.lt.s32.totalorder %v3038_v25, %v3493_v55  ;;  %v2641_v25 = vld [vmem:[#allocation2 + $0x1d0] sm:$0xff] }
 0x11f   :  { %v696_v17 = vadd.f32 %v695_v28, %v528_v45  ;;  %v533_v45 = vsel %vm8766_vm9, %v143_v49, 0.0  ;;  %vm8842_vm9 = vcmp.lt.s32.totalorder %v3054_v35, %v3493_v55  ;;  %v148_v49 = vld [vmem:[#allocation2 + $0x3b8] sm:$0xff] }
 0x121   :  { %v697_v50 = vadd.f32 %v696_v17, %v529_v3  ;;  %v534_v3 = vsel %vm8767_vm2, %v144_v43, 0.0  ;;  %vm8841_vm2 = vcmp.lt.s32.totalorder %v3061_v42, %v3493_v55  ;;  %v149_v43 = vld [vmem:[#allocation2 + $0x3c0] sm:$0xff]  ;;  %v2640_v42 = vld [vmem:[#allocation2 + $0x1c8] sm:$0xff] }
 0x123   :  { %v698_v41 = vadd.f32 %v697_v50, %v530_v63  ;;  %v535_v63 = vsel %vm8768_vm5, %v145_v46, 0.0  ;;  %vm8772_vm5 = vcmp.lt.s32.totalorder %v3076_v0, %v3493_v55  ;;  %v538_v46 = vsel %vm8841_vm2, %v148_v49, 0.0 }
 0x124   :  { %vm9384_vm2 = vcmp.lt.s32.totalorder %v9305_v13, %v2868_v8 }
 0x125   :  { %v699_v47 = vadd.f32 %v698_v41, %v531_v44  ;;  %v536_v44 = vsel %vm8770_vm15, %v146_v10, 0.0  ;;  %vm8771_vm15 = vcmp.lt.s32.totalorder %v3090_v24, %v3493_v55  ;;  %v539_v10 = vsel %vm8772_vm5, %v149_v43, 0.0 }
 0x126   :  { %vm9328_vm5 = vcmp.lt.s32.totalorder %v2866_v7, %v2868_v8 }
 0x127   :  { %v700_v28 = vadd.f32 %v699_v47, %v532_v38  ;;  %v537_v38 = vsel %vm8842_vm9, %v147_v58, 0.0  ;;  %vm9386_vm9 = vcmp.lt.s32.totalorder %v9306_v32, %v2868_v8 }
 0x129   :  { %v701_v17 = vadd.f32 %v700_v28, %v533_v45  ;;  %v151_v45 = vld [vmem:[#allocation2 + $0x3d0] sm:$0xff] }
 0x12b   :  { %v702_v50 = vadd.f32 %v701_v17, %v534_v3  ;;  %v150_v17 = vld [vmem:[#allocation2 + $0x3c8] sm:$0xff] }
 0x12c   :  { %v540_v58 = vsel %vm8771_vm15, %v150_v17, 0.0  ;;  %v2621_v17 = vld [vmem:[%s8597_s1 + $0x18] sm:$0x7]  ;;  %vm9327_vm15 = vcmp.lt.s32.totalorder %v2863_v6, %v2868_v8 }
 0x12d   :  { %v703_v41 = vadd.f32 %v702_v50, %v535_v63  ;;  %v541_v50 = vsel %vm8773_vm14, %v151_v45, 0.0  ;;  %vm9331_vm14 = vcmp.lt.s32.totalorder %v2871_v11, %v2868_v8 }
 0x12f   :  { %v704_v47 = vadd.f32 %v703_v41, %v536_v44  ;;  %v709_v44 = vsel %vm9192_vm1, %v541_v50, 0.0 }
 0x131   :  { %v705_v28 = vadd.f32 %v704_v47, %v537_v38  ;;  %v2620_v47 = vld [vmem:[%s8597_s1 + $0x8] sm:$0xff] }
 0x132   :  { %v416_v38 = vcvt.s32.f32 %v2620_v47 }
 0x133   :  { %v706_v3 = vadd.f32 %v705_v28, %v538_v46  ;;  %v807_v28 = vld [vmem:[%s8598_s2 + $0x8] sm:$0xff] }
 0x134   :  { %2612 = vrcp.f32 %v416_v38 }
 0x135   :  { %v707_v63 = vadd.f32 %v706_v3, %v539_v10  ;;  %v418_v10 = vcvt.s32.f32 %v2621_v17 }
 0x137   :  { %v708_v41 = vadd.f32 %v707_v63, %v540_v58  ;;  %2614 = vrcp.f32 %v418_v10  ;;  %v809_v63 = vld [vmem:[%s8598_s2 + $0x18] sm:$0x7] }
 0x139   :  { %v710_v49 = vadd.f32 %v709_v44, %v708_v41 }
 0x13b   :  { %711 = vadd.xlane.f32.xlu0 %v710_v49  ;;  %v2622_v49 = vld [vmem:[%s8597_s1] sm:$0xff] }
 0x13c   :  { %v415_v47 = vcvt.s32.f32 %v2622_v49  ;;  %v2624_v49 = vld [vmem:[#allocation2 + $0x148] sm:$0xff] }
 0x13e   :  { %2616 = vrcp.f32 %v415_v47 }
 0x141   :  { %v2613_v43 = vpop.eup %2612 }
 0x144   :  { %v2615_v50 = vpop.eup %2614 }
 0x14b   :  { %v2617_v38 = vpop.eup %2616 }
 0x167   :  { %v669_v45 = vpop.xlane.xlu0 %668 }
 0x168   :  { %v801_v46 = vmul.f32 %v2613_v43, %v669_v45  ;;  %v806_v43 = vld [vmem:[%s8598_s2] sm:$0xff] }
 0x16a   :  { %v811_v3 = vmul.f32 %v807_v28, %v801_v46 }
 0x16c   :  { %821 = vperm.xlu1 %2611, %v811_v3   ;;  %v2623_v3 = vld [vmem:[%s8597_s1 + $0x10] sm:$0xff]  ;;  %s2824_s1 = smov [#allocation5]  }
 0x16d   :  { %v417_v17 = vcvt.s32.f32 %v2623_v3 }
 0x16f   :  { %2618 = vrcp.f32 %v417_v17  ;;  %v2627_v17 = vld [vmem:[#allocation2 + $0x160] sm:$0xff] }
 0x17c   :  { %v2619_v10 = vpop.eup %2618 }
 0x17f   :  { %v797_v58 = vpop.xlane.xlu0 %796 }
 0x180   :  { %v805_v41 = vmul.f32 %v2615_v50, %v797_v58  ;;  %v808_v50 = vld [vmem:[%s8598_s2 + $0x10] sm:$0xff]  ;;  %s2592_s2 = sshll.u32 %s2824_s1, 4  ;;  %s2593_s2 = int_to_ptr.vmem [resolvable:$true] %s2592_s2 }
 0x181   :  { %s2795_s17 = scalar_lea.vmem %s2593_s2, 20992  ;;  %p2800_p6 = scmp.lt.s32.totalorder %s2593_s2, %s2593_s2 }
 0x182   :  { %v813_v44 = vmul.f32 %v809_v63, %v805_v41  ;;  %p2796_p5 = scmp.ne.s32.totalorder %s2593_s2, %s2795_s17  ;;  %p2801_p7 = scmp.lt.s32.totalorder %s2795_s17, %s2795_s17 }
 0x184   :  { %831 = vperm.xlu1 %2611, %v813_v44   ;;  %p2802_p8 = por %p2801_p7, %p2800_p6 }
 0x186   :  { %p2803_p9 = pnand %p2802_p8, %p2796_p5 }
 0x1a7   :  { %v626_v28 = vpop.xlane.xlu1 %625 }
 0x1a8   :  { %v799_v45 = vmul.f32 %v2617_v38, %v626_v28  ;;  %v2625_v38 = vld [vmem:[#allocation2 + $0x150] sm:$0xff]  ;;  %v2626_v28 = vld [vmem:[#allocation2 + $0x158] sm:$0xff] }
 0x1aa   :  { %v810_v46 = vmul.f32 %v806_v43, %v799_v45 }
 0x1ac   :  { %816 = vperm.xlu0 %2610, %v810_v46  }
 0x1c4   :  { %v712_v63 = vpop.xlane.xlu0 %711 }
 0x1c5   :  { %v803_v58 = vmul.f32 %v2619_v10, %v712_v63  ;;  %v2628_v63 = vld [vmem:[#allocation2 + $0x168] sm:$0xff] }
 0x1c7   :  { %v812_v41 = vmul.f32 %v808_v50, %v803_v58 }
 0x1c9   :  { %826 = vperm.xlu1 %2611, %v812_v41  }
 0x1e7   :  { %v3938_v44 = vpop.permute.xlu1 %821 }
 0x1e8   :  { %v3941_v47 = vsub.f32 %v2624_v49, %v3938_v44  ;;  %v3944_v43 = vsub.f32 %v2625_v38, %v3938_v44  ;;  %v3947_v45 = vsub.f32 %v2626_v28, %v3938_v44  ;;  %v3958_v10 = vsub.f32 %v2627_v17, %v3938_v44  ;;  %v2629_v38 = vld [vmem:[#allocation2 + $0x170] sm:$0xff] }
 0x1e9   :  { %v3961_v58 = vsub.f32 %v2628_v63, %v3938_v44  ;;  %v3968_v28 = vsub.f32 %v2629_v38, %v3938_v44  ;;  %v2631_v63 = vld [vmem:[#allocation2 + $0x180] sm:$0xff]  ;;  %v2633_v38 = vld [vmem:[#allocation2 + $0x190] sm:$0xff]  ;;  %v3987_v23 = vsub.f32 %v2634_v15, %v3938_v44  ;;  %v4003_v15 = vsub.f32 %v2638_v54, %v3938_v44  ;;  %v2642_v54 = vld [vmem:[#allocation2 + $0x1d8] sm:$0xff] }
 0x1ea   :  { %9324 = vst [vmem:[#allocation66_spill] sm:$0xff] %v3941_v47  ;;  %9325 = vst [vmem:[#allocation67_spill] sm:$0xff] %v3944_v43  ;;  %v1039_v46 = vsel %vm9327_vm15, %v3941_v47, -inf  ;;  %v1040_v3 = vsel %vm9328_vm5, %v3944_v43, -inf  ;;  %v1041_v41 = vsel %vm9331_vm14, %v3947_v45, -inf  ;;  %vm9333_vm5 = vcmp.lt.s32.totalorder %v2878_v12, %v2868_v8 }
 0x1eb   :  { %9326 = vst [vmem:[#allocation68_spill] sm:$0xff] %v3947_v45  ;;  %9329 = vst [vmem:[#allocation69_spill] sm:$0xff] %v3958_v10  ;;  %v1205_v50 = vmax.f32 %v1039_v46, %v1040_v3  ;;  %v1042_v17 = vsel %vm9333_vm5, %v3958_v10, -inf  ;;  %v2630_v46 = vld [vmem:[#allocation2 + $0x178] sm:$0xff]  ;;  %v3978_v55 = vsub.f32 %v2631_v63, %v3938_v44  ;;  %v3984_v51 = vsub.f32 %v2633_v38, %v3938_v44 }
 0x1ec   :  { %9330 = vst [vmem:[#allocation70_spill] sm:$0xff] %v3961_v58  ;;  %9332 = vst [vmem:[#allocation71_spill] sm:$0xff] %v3968_v28  ;;  %v3975_v3 = vsub.f32 %v2630_v46, %v3938_v44  ;;  %v3990_v46 = vsub.f32 %v2635_v33, %v3938_v44  ;;  %vm9340_vm14 = vcmp.lt.s32.totalorder %v2887_v16, %v2868_v8  ;;  %v2639_v33 = vld [vmem:[#allocation2 + $0x1c0] sm:$0xff] }
 0x1ed   :  { %v1206_v49 = vmax.f32 %v1205_v50, %v1041_v41  ;;  %9335 = vst [vmem:[#allocation73_spill] sm:$0xff] %v3978_v55  ;;  %v3981_v50 = vsub.f32 %v2632_v59, %v3938_v44  ;;  %9337 = vst [vmem:[#allocation75_spill] sm:$0xff] %v3984_v51  ;;  %v1043_v63 = vsel %vm9340_vm14, %v3961_v58, -inf  ;;  %v2636_v59 = vld [vmem:[#allocation2 + $0x1a8] sm:$0xff]  ;;  %v4006_v0 = vsub.f32 %v2639_v33, %v3938_v44 }
 0x1ee   :  { %9334 = vst [vmem:[#allocation72_spill] sm:$0xff] %v3975_v3  ;;  %9338 = vst [vmem:[#allocation76_spill] sm:$0xff] %v3987_v23  ;;  %v4009_v35 = vsub.f32 %v2640_v42, %v3938_v44  ;;  %vm9347_vm15 = vcmp.lt.s32.totalorder %v2892_v18, %v2868_v8  ;;  %v4025_v42 = vsub.f32 %v2644_v21, %v3938_v44 }
 0x1ef   :  { %9336 = vst [vmem:[#allocation74_spill] sm:$0xff] %v3981_v50  ;;  %v1207_v41 = vmax.f32 %v1206_v49, %v1042_v17  ;;  %9339 = vst [vmem:[#allocation77_spill] sm:$0xff] %v3990_v46  ;;  %v3997_v49 = vsub.f32 %v2636_v59, %v3938_v44  ;;  %v2637_v17 = vld [vmem:[#allocation2 + $0x1b0] sm:$0xff]  ;;  %v4012_v59 = vsub.f32 %v2641_v25, %v3938_v44 }
 0x1f0   :  { %v4000_v38 = vsub.f32 %v2637_v17, %v3938_v44  ;;  %9343 = vst [vmem:[#allocation80_spill] sm:$0xff] %v4003_v15  ;;  %9344 = vst [vmem:[#allocation81_spill] sm:$0xff] %v4006_v0  ;;  %v1044_v17 = vsel %vm9347_vm15, %v3968_v28, -inf  ;;  %v2645_v25 = vld [vmem:[#allocation2 + $0x1f0] sm:$0xff]  ;;  %vm9352_vm5 = vcmp.lt.s32.totalorder %v2900_v22, %v2868_v8  ;;  %vm9353_vm14 = vcmp.lt.s32.totalorder %v2863_v6, %v2868_v8 }
 0x1f1   :  { %9341 = vst [vmem:[#allocation78_spill] sm:$0xff] %v3997_v49  ;;  %v1208_v24 = vmax.f32 %v1207_v41, %v1043_v63  ;;  %9345 = vst [vmem:[#allocation82_spill] sm:$0xff] %v4009_v35  ;;  %v4019_v41 = vsub.f32 %v2642_v54, %v3938_v44  ;;  %v2643_v63 = vld [vmem:[#allocation2 + $0x1e0] sm:$0xff]  ;;  %v4028_v39 = vsub.f32 %v2645_v25, %v3938_v44  ;;  %v1045_v19 = vsel %vm9352_vm5, %v3975_v3, -inf  ;;  %v2649_v6 = vld [vmem:[#allocation2 + $0x210] sm:$0xff] }
 0x1f2   :  { %9342 = vst [vmem:[#allocation79_spill] sm:$0xff] %v4000_v38  ;;  %9346 = vst [vmem:[#allocation83_spill] sm:$0xff] %v4012_v59  ;;  %v4022_v33 = vsub.f32 %v2643_v63, %v3938_v44  ;;  %v1415_v54 = vsel %vm9353_vm14, %v3941_v47, inf  ;;  %vm9354_vm15 = vcmp.lt.s32.totalorder %v2866_v7, %v2868_v8  ;;  %v2647_v63 = vld [vmem:[#allocation2 + $0x200] sm:$0xff]  ;;  %v4049_v5 = vsub.f32 %v2648_v9, %v3938_v44  ;;  %v2652_v9 = vld [vmem:[#allocation2 + $0x228] sm:$0xff] }
 0x1f3   :  { %9348 = vst [vmem:[#allocation84_spill] sm:$0xff] %v4019_v41  ;;  %9350 = vst [vmem:[#allocation86_spill] sm:$0xff] %v4025_v42  ;;  %v1209_v20 = vmax.f32 %v1208_v24, %v1044_v17  ;;  %v1416_v21 = vsel %vm9354_vm15, %v3944_v43, inf  ;;  %v2646_v24 = vld [vmem:[#allocation2 + $0x1f8] sm:$0xff]  ;;  %v4046_v25 = vsub.f32 %v2647_v63, %v3938_v44  ;;  %v4052_v47 = vsub.f32 %v2649_v6, %v3938_v44  ;;  %v2651_v7 = vld [vmem:[#allocation2 + $0x220] sm:$0xff] }
 0x1f4   :  { %9349 = vst [vmem:[#allocation85_spill] sm:$0xff] %v4022_v33  ;;  %9351 = vst [vmem:[#allocation87_spill] sm:$0xff] %v4028_v39  ;;  %v4043_v17 = vsub.f32 %v2646_v24, %v3938_v44  ;;  %v4055_v43 = vsub.f32 %v2650_v2, %v3938_v44  ;;  %v4058_v24 = vsub.f32 %v2651_v7, %v3938_v44  ;;  %v2655_v7 = vld [vmem:[#allocation2 + $0x240] sm:$0xff] }
 0x1f5   :  { %9356 = vst [vmem:[#allocation89_spill] sm:$0xff] %v4046_v25  ;;  %9357 = vst [vmem:[#allocation90_spill] sm:$0xff] %v4049_v5  ;;  %v1210_v4 = vmax.f32 %v1209_v20, %v1045_v19  ;;  %vm9361_vm5 = vcmp.lt.s32.totalorder %v2908_v26, %v2868_v8  ;;  %v4065_v19 = vsub.f32 %v2652_v9, %v3938_v44  ;;  %v2653_v20 = vld [vmem:[#allocation2 + $0x230] sm:$0xff]  ;;  %v2658_v26 = vld [vmem:[#allocation2 + $0x258] sm:$0xff] }
 0x1f6   :  { %9355 = vst [vmem:[#allocation88_spill] sm:$0xff] %v4043_v17  ;;  %9358 = vst [vmem:[#allocation91_spill] sm:$0xff] %v4052_v47  ;;  %v1046_v63 = vsel %vm9361_vm5, %v3978_v55, -inf  ;;  %v4068_v6 = vsub.f32 %v2653_v20, %v3938_v44  ;;  %v1581_v2 = vmin.f32 %v1415_v54, %v1416_v21  ;;  %vm9366_vm14 = vcmp.lt.s32.totalorder %v2916_v30, %v2868_v8  ;;  %v2659_v30 = vld [vmem:[#allocation2 + $0x260] sm:$0xff] }
 0x1f7   :  { %9359 = vst [vmem:[#allocation92_spill] sm:$0xff] %v4055_v43  ;;  %9360 = vst [vmem:[#allocation93_spill] sm:$0xff] %v4058_v24  ;;  %v1211_v1 = vmax.f32 %v1210_v4, %v1046_v63  ;;  %v4071_v43 = vsub.f32 %v2654_v62, %v3938_v44  ;;  %v4074_v24 = vsub.f32 %v2655_v7, %v3938_v44  ;;  %v1047_v9 = vsel %vm9366_vm14, %v3981_v50, -inf  ;;  %v2656_v4 = vld [vmem:[#allocation2 + $0x248] sm:$0xff]  ;;  %v2657_v62 = vld [vmem:[#allocation2 + $0x250] sm:$0xff] }
 0x1f8   :  { %9362 = vst [vmem:[#allocation94_spill] sm:$0xff] %v4065_v19  ;;  %9363 = vst [vmem:[#allocation95_spill] sm:$0xff] %v4068_v6  ;;  %vm9367_vm15 = vcmp.lt.s32.totalorder %v2871_v11, %v2868_v8  ;;  %v4085_v54 = vsub.f32 %v2656_v4, %v3938_v44  ;;  %v4088_v21 = vsub.f32 %v2657_v62, %v3938_v44 }
 0x1f9   :  { %9364 = vst [vmem:[#allocation96_spill] sm:$0xff] %v4071_v43  ;;  %9365 = vst [vmem:[#allocation97_spill] sm:$0xff] %v4074_v24  ;;  %v1417_v20 = vsel %vm9367_vm15, %v3947_v45, inf  ;;  %v1212_v63 = vmax.f32 %v1211_v1, %v1047_v9  ;;  %v4091_v55 = vsub.f32 %v2658_v26, %v3938_v44  ;;  %v4094_v50 = vsub.f32 %v2659_v30, %v3938_v44  ;;  %v2660_v1 = vld [vmem:[#allocation2 + $0x268] sm:$0xff]  ;;  %v2661_v26 = vld [vmem:[#allocation2 + $0x270] sm:$0xff] }
 0x1fa   :  { %9368 = vst [vmem:[#allocation98_spill] sm:$0xff] %v4085_v54  ;;  %9369 = vst [vmem:[#allocation99_spill] sm:$0xff] %v4088_v21  ;;  %v1582_v7 = vmin.f32 %v1581_v2, %v1417_v20  ;;  %vm9372_vm5 = vcmp.lt.s32.totalorder %v2924_v34, %v2868_v8  ;;  %vm9373_vm14 = vcmp.lt.s32.totalorder %v2878_v12, %v2868_v8  ;;  %v2662_v45 = vld [vmem:[#allocation2 + $0x278] sm:$0xff]  ;;  %v2663_v34 = vld [vmem:[#allocation2 + $0x280] sm:$0xff] }
 0x1fb   :  { %9370 = vst [vmem:[#allocation100_spill] sm:$0xff] %v4091_v55  ;;  %9371 = vst [vmem:[#allocation101_spill] sm:$0xff] %v4094_v50  ;;  %v1048_v4 = vsel %vm9372_vm5, %v3984_v51, -inf  ;;  %v1418_v62 = vsel %vm9373_vm14, %v3958_v10, inf  ;;  %v4105_v2 = vsub.f32 %v2660_v1, %v3938_v44  ;;  %v4108_v9 = vsub.f32 %v2661_v26, %v3938_v44 }
 0x1fc   :  { %v1213_v30 = vmax.f32 %v1212_v63, %v1048_v4  ;;  %v1583_v20 = vmin.f32 %v1582_v7, %v1418_v62  ;;  %v4111_v11 = vsub.f32 %v2662_v45, %v3938_v44  ;;  %v4114_v51 = vsub.f32 %v2663_v34, %v3938_v44  ;;  %v2664_v63 = vld [vmem:[#allocation2 + $0x288] sm:$0xff] }
 0x1fd   :  { %9374 = vst [vmem:[#allocation102_spill] sm:$0xff] %v4105_v2  ;;  %9375 = vst [vmem:[#allocation103_spill] sm:$0xff] %v4108_v9  ;;  %vm9378_vm15 = vcmp.lt.s32.totalorder %v2929_v36, %v2868_v8  ;;  %vm9379_vm5 = vcmp.lt.s32.totalorder %v2887_v16, %v2868_v8  ;;  %v4125_v7 = vsub.f32 %v2664_v63, %v3938_v44  ;;  %v1053_v44 = vsel %vm9384_vm2, %v4003_v15, -inf }
 0x1fe   :  { %9376 = vst [vmem:[#allocation104_spill] sm:$0xff] %v4111_v11  ;;  %9377 = vst [vmem:[#allocation105_spill] sm:$0xff] %v4114_v51  ;;  %v1049_v1 = vsel %vm9378_vm15, %v3987_v23, -inf  ;;  %v1419_v26 = vsel %vm9379_vm5, %v3961_v58, inf  ;;  %vm9381_vm14 = vcmp.lt.s32.totalorder %v2932_v37, %v2868_v8  ;;  %vm9382_vm15 = vcmp.lt.s32.totalorder %v2938_v40, %v2868_v8 }
 0x1ff   :  { %9380 = vst [vmem:[#allocation106_spill] sm:$0xff] %v4125_v7  ;;  %v1050_v34 = vsel %vm9381_vm14, %v3990_v46, -inf  ;;  %v1214_v45 = vmax.f32 %v1213_v30, %v1049_v1  ;;  %v1584_v4 = vmin.f32 %v1583_v20, %v1419_v26  ;;  %v1051_v62 = vsel %vm9382_vm15, %v3997_v49, -inf }
 0x200   :  { %vm9383_vm5 = vcmp.lt.s32.totalorder %v9303_v31, %v2868_v8  ;;  %vm9385_vm14 = vcmp.lt.s32.totalorder %v2892_v18, %v2868_v8  ;;  %v1054_v20 = vsel %vm9386_vm9, %v4006_v0, -inf  ;;  %vm9387_vm15 = vcmp.lt.s32.totalorder %v9307_v27, %v2868_v8 }
 0x201   :  { %v1052_v58 = vsel %vm9383_vm5, %v4000_v38, -inf  ;;  %v1420_v30 = vsel %vm9385_vm14, %v3968_v28, inf  ;;  %v1055_v1 = vsel %vm9387_vm15, %v4009_v35, -inf  ;;  %v1215_v26 = vmax.f32 %v1214_v45, %v1050_v34 }
 0x202   :  { %v1585_v63 = vmin.f32 %v1584_v4, %v1420_v30  ;;  %vm9388_vm2 = vcmp.lt.s32.totalorder %v9308_v48, %v2868_v8  ;;  %vm9389_vm5 = vcmp.lt.s32.totalorder %v9309_v29, %v2868_v8  ;;  %vm9390_vm9 = vcmp.lt.s32.totalorder %v9310_v14, %v2868_v8 }
 0x203   :  { %v1056_v10 = vsel %vm9388_vm2, %v4012_v59, -inf  ;;  %v1057_v28 = vsel %vm9389_vm5, %v4019_v41, -inf  ;;  %v4167_v18 = vsel %vm9390_vm9, %v4022_v33, -inf  ;;  %vm9392_vm14 = vcmp.lt.s32.totalorder %v2900_v22, %v2868_v8 }
 0x204   :  { %9391 = vst [vmem:[#allocation107_spill] sm:$0xff] %v4167_v18  ;;  %v1421_v34 = vsel %vm9392_vm14, %v3975_v3, inf  ;;  %vm9393_vm15 = vcmp.lt.s32.totalorder %v2969_v52, %v2868_v8  ;;  %vm9395_vm2 = vcmp.lt.s32.totalorder %v2972_v53, %v2868_v8  ;;  %v1216_v30 = vmax.f32 %v1215_v26, %v1051_v62  ;;  %v9405_v26 = vld [vmem:[#allocation92_spill] sm:$0xff] }
 0x205   :  { %v4177_v45 = vsel %vm9393_vm15, %v4025_v42, -inf  ;;  %v4183_v4 = vsel %vm9395_vm2, %v4028_v39, -inf  ;;  %v1586_v16 = vmin.f32 %v1585_v63, %v1421_v34  ;;  %vm9397_vm5 = vcmp.lt.s32.totalorder %v2978_v56, %v2868_v8 }
 0x206   :  { %9394 = vst [vmem:[#allocation108_spill] sm:$0xff] %v4177_v45  ;;  %9396 = vst [vmem:[#allocation109_spill] sm:$0xff] %v4183_v4  ;;  %v4189_v22 = vsel %vm9397_vm5, %v4043_v17, -inf  ;;  %vm9399_vm9 = vcmp.lt.s32.totalorder %v2981_v57, %v2868_v8  ;;  %vm9401_vm14 = vcmp.lt.s32.totalorder %v2988_v60, %v2868_v8  ;;  %vm9403_vm15 = vcmp.lt.s32.totalorder %v2991_v61, %v2868_v8 }
 0x207   :  { %9398 = vst [vmem:[#allocation110_spill] sm:$0xff] %v4189_v22  ;;  %v4195_v3 = vsel %vm9399_vm9, %v4046_v25, -inf  ;;  %v4201_v12 = vsel %vm9401_vm14, %v4049_v5, -inf  ;;  %v4207_v62 = vsel %vm9403_vm15, %v4052_v47, -inf  ;;  %v4213_v34 = vsel %vm318_vm10, %v9405_v26, -inf  ;;  %v9408_v22 = vld [vmem:[#allocation93_spill] sm:$0xff] }
 0x208   :  { %9400 = vst [vmem:[#allocation111_spill] sm:$0xff] %v4195_v3  ;;  %9402 = vst [vmem:[#allocation112_spill] sm:$0xff] %v4201_v12  ;;  %v4219_v4 = vsel %vm319_vm4, %v9408_v22, -inf  ;;  %v4225_v45 = vsel %vm320_vm12, %v4065_v19, -inf  ;;  %v1217_v18 = vmax.f32 %v1216_v30, %v1052_v58  ;;  %v9423_v58 = vld [vmem:[#allocation16_spill] sm:$0xff] }
 0x209   :  { %9404 = vst [vmem:[#allocation113_spill] sm:$0xff] %v4207_v62  ;;  %9407 = vst [vmem:[#allocation114_spill] sm:$0xff] %v4213_v34  ;;  %v9413_v62 = vld [vmem:[#allocation39_spill] sm:$0xff]  ;;  %v9416_v34 = vld [vmem:[#allocation40_spill] sm:$0xff]  ;;  %vm9424_vm14 = vcmp.lt.s32.totalorder %v9423_v58, %v2868_v8 }
 0x20a   :  { %9410 = vst [vmem:[#allocation115_spill] sm:$0xff] %v4219_v4  ;;  %9412 = vst [vmem:[#allocation116_spill] sm:$0xff] %v4225_v45  ;;  %vm9414_vm2 = vcmp.lt.s32.totalorder %v9413_v62, %v2868_v8  ;;  %vm9417_vm5 = vcmp.lt.s32.totalorder %v9416_v34, %v2868_v8  ;;  %v9419_v4 = vld [vmem:[#allocation41_spill] sm:$0xff]  ;;  %v9425_v62 = vld [vmem:[#allocation42_spill] sm:$0xff] }
 0x20b   :  { %v4231_v63 = vsel %vm9414_vm2, %v4068_v6, -inf  ;;  %v4237_v3 = vsel %vm9417_vm5, %v4071_v43, -inf  ;;  %vm9420_vm9 = vcmp.lt.s32.totalorder %v9419_v4, %v2868_v8  ;;  %v9422_v45 = vld [vmem:[#allocation73_spill] sm:$0xff]  ;;  %vm9426_vm15 = vcmp.lt.s32.totalorder %v9425_v62, %v2868_v8  ;;  %v9428_v34 = vld [vmem:[#allocation50_spill] sm:$0xff] }
 0x20c   :  { %9415 = vst [vmem:[#allocation117_spill] sm:$0xff] %v4231_v63  ;;  %9418 = vst [vmem:[#allocation118_spill] sm:$0xff] %v4237_v3  ;;  %v4243_v12 = vsel %vm9420_vm9, %v4074_v24, -inf  ;;  %v1422_v30 = vsel %vm9424_vm14, %v9422_v45, inf  ;;  %v4253_v63 = vsel %vm9426_vm15, %v4085_v54, -inf  ;;  %vm9429_vm2 = vcmp.lt.s32.totalorder %v9428_v34, %v2868_v8  ;;  %v9433_v45 = vld [vmem:[#allocation44_spill] sm:$0xff] }
 0x20d   :  { %9421 = vst [vmem:[#allocation119_spill] sm:$0xff] %v4243_v12  ;;  %9427 = vst [vmem:[#allocation120_spill] sm:$0xff] %v4253_v63  ;;  %v1079_v3 = vsel %vm9429_vm2, %v4125_v7, -inf  ;;  %v1218_v43 = vmax.f32 %v1217_v18, %v1053_v44  ;;  %v1587_v4 = vmin.f32 %v1586_v16, %v1422_v30  ;;  %v9430_v12 = vld [vmem:[#allocation43_spill] sm:$0xff]  ;;  %vm9434_vm9 = vcmp.lt.s32.totalorder %v9433_v45, %v2868_v8  ;;  %v9436_v63 = vld [vmem:[#allocation45_spill] sm:$0xff] }
 0x20e   :  { %vm9431_vm5 = vcmp.lt.s32.totalorder %v9430_v12, %v2868_v8  ;;  %v4269_v58 = vsel %vm9434_vm9, %v4091_v55, -inf  ;;  %vm9437_vm14 = vcmp.lt.s32.totalorder %v9436_v63, %v2868_v8  ;;  %v9439_v16 = vld [vmem:[#allocation46_spill] sm:$0xff]  ;;  %v9442_v44 = vld [vmem:[#allocation47_spill] sm:$0xff]  ;;  %v9445_v7 = vld [vmem:[#allocation48_spill] sm:$0xff] }
 0x20f   :  { %v4263_v24 = vsel %vm9431_vm5, %v4088_v21, -inf  ;;  %9435 = vst [vmem:[#allocation122_spill] sm:$0xff] %v4269_v58  ;;  %v4275_v34 = vsel %vm9437_vm14, %v4094_v50, -inf  ;;  %vm9440_vm15 = vcmp.lt.s32.totalorder %v9439_v16, %v2868_v8  ;;  %vm9443_vm2 = vcmp.lt.s32.totalorder %v9442_v44, %v2868_v8  ;;  %v9453_v44 = vld [vmem:[#allocation17_spill] sm:$0xff]  ;;  %v9456_v63 = vld [vmem:[#allocation18_spill] sm:$0xff] }
 0x210   :  { %9432 = vst [vmem:[#allocation121_spill] sm:$0xff] %v4263_v24  ;;  %9438 = vst [vmem:[#allocation123_spill] sm:$0xff] %v4275_v34  ;;  %v4281_v18 = vsel %vm9440_vm15, %v4105_v2, -inf  ;;  %v4287_v30 = vsel %vm9443_vm2, %v4108_v9, -inf  ;;  %vm9446_vm5 = vcmp.lt.s32.totalorder %v9445_v7, %v2868_v8  ;;  %v9448_v34 = vld [vmem:[#allocation49_spill] sm:$0xff]  ;;  %v1219_v16 = vmax.f32 %v1218_v43, %v1054_v20  ;;  %v9452_v2 = vld [vmem:[#allocation74_spill] sm:$0xff] }
 0x211   :  { %9441 = vst [vmem:[#allocation124_spill] sm:$0xff] %v4281_v18  ;;  %9444 = vst [vmem:[#allocation125_spill] sm:$0xff] %v4287_v30  ;;  %v4293_v58 = vsel %vm9446_vm5, %v4111_v11, -inf  ;;  %vm9449_vm9 = vcmp.lt.s32.totalorder %v9448_v34, %v2868_v8  ;;  %v4302_v18 = vsel %vm9192_vm1, %v1079_v3, -inf  ;;  %vm9454_vm14 = vcmp.lt.s32.totalorder %v9453_v44, %v2868_v8  ;;  %v9455_v9 = vld [vmem:[#allocation75_spill] sm:$0xff] }
 0x212   :  { %9447 = vst [vmem:[#allocation126_spill] sm:$0xff] %v4293_v58  ;;  %v4299_v24 = vsel %vm9449_vm9, %v4114_v51, -inf  ;;  %9451 = vst [vmem:[#allocation128_spill] sm:$0xff] %v4302_v18  ;;  %v1423_v30 = vsel %vm9454_vm14, %v9452_v2, inf  ;;  %vm9457_vm15 = vcmp.lt.s32.totalorder %v9456_v63, %v2868_v8  ;;  %vm9458_vm2 = vcmp.lt.s32.totalorder %v2929_v36, %v2868_v8  ;;  %v9496_v2 = vld [vmem:[#allocation40_spill] sm:$0xff] }
 0x213   :  { %9450 = vst [vmem:[#allocation127_spill] sm:$0xff] %v4299_v24  ;;  %v1424_v58 = vsel %vm9457_vm15, %v9455_v9, inf  ;;  %v1425_v51 = vsel %vm9458_vm2, %v3987_v23, inf  ;;  %v1220_v34 = vmax.f32 %v1219_v16, %v1055_v1  ;;  %vm9459_vm5 = vcmp.lt.s32.totalorder %v2932_v37, %v2868_v8  ;;  %v9495_v23 = vld [vmem:[#allocation96_spill] sm:$0xff] }
 0x214   :  { %v4320_v43 = vsel %vm9459_vm5, %v3990_v46, inf  ;;  %vm9460_vm9 = vcmp.lt.s32.totalorder %v2938_v40, %v2868_v8  ;;  %v1588_v20 = vmin.f32 %v1587_v4, %v1423_v30  ;;  %vm9461_vm14 = vcmp.lt.s32.totalorder %v9303_v31, %v2868_v8 }
 0x215   :  { %v4326_v3 = vsel %vm9460_vm9, %v3997_v49, inf  ;;  %v4332_v9 = vsel %vm9461_vm14, %v4000_v38, inf  ;;  %vm9462_vm15 = vcmp.lt.s32.totalorder %v9305_v13, %v2868_v8  ;;  %vm9463_vm2 = vcmp.lt.s32.totalorder %v9306_v32, %v2868_v8 }
 0x216   :  { %v4338_v1 = vsel %vm9462_vm15, %v4003_v15, inf  ;;  %v4344_v16 = vsel %vm9463_vm2, %v4006_v0, inf  ;;  %vm9464_vm5 = vcmp.lt.s32.totalorder %v9307_v27, %v2868_v8  ;;  %v1221_v30 = vmax.f32 %v1220_v34, %v1056_v10 }
 0x217   :  { %v4350_v4 = vsel %vm9464_vm5, %v4009_v35, inf  ;;  %vm9466_vm9 = vcmp.lt.s32.totalorder %v9308_v48, %v2868_v8  ;;  %vm9468_vm14 = vcmp.lt.s32.totalorder %v9309_v29, %v2868_v8  ;;  %vm9470_vm15 = vcmp.lt.s32.totalorder %v9310_v14, %v2868_v8  ;;  %v9484_v35 = vld [vmem:[#allocation36_spill] sm:$0xff] }
 0x218   :  { %9465 = vst [vmem:[#allocation17_spill] sm:$0xff] %v4350_v4  ;;  %v4356_v38 = vsel %vm9466_vm9, %v4012_v59, inf  ;;  %v4362_v15 = vsel %vm9468_vm14, %v4019_v41, inf  ;;  %v4368_v0 = vsel %vm9470_vm15, %v4022_v33, inf  ;;  %vm9472_vm2 = vcmp.lt.s32.totalorder %v2969_v52, %v2868_v8  ;;  %v9550_v4 = vld [vmem:[#allocation112_spill] sm:$0xff] }
 0x219   :  { %9467 = vst [vmem:[#allocation18_spill] sm:$0xff] %v4356_v38  ;;  %9469 = vst [vmem:[#allocation129_spill] sm:$0xff] %v4362_v15  ;;  %v4374_v10 = vsel %vm9472_vm2, %v4025_v42, inf  ;;  %vm9474_vm5 = vcmp.lt.s32.totalorder %v2972_v53, %v2868_v8  ;;  %vm9476_vm9 = vcmp.lt.s32.totalorder %v2978_v56, %v2868_v8  ;;  %vm9478_vm14 = vcmp.lt.s32.totalorder %v2981_v57, %v2868_v8  ;;  %v2678_v15 = vld [vmem:[#allocation2 + $0x440] sm:$0x7] }
 0x21a   :  { %9471 = vst [vmem:[#allocation130_spill] sm:$0xff] %v4368_v0  ;;  %9473 = vst [vmem:[#allocation131_spill] sm:$0xff] %v4374_v10  ;;  %v4380_v34 = vsel %vm9474_vm5, %v4028_v39, inf  ;;  %v4386_v41 = vsel %vm9476_vm9, %v4043_v17, inf  ;;  %v4392_v33 = vsel %vm9478_vm14, %v4046_v25, inf  ;;  %v1222_v42 = vmax.f32 %v1221_v30, %v1057_v28 }
 0x21b   :  { %9475 = vst [vmem:[#allocation132_spill] sm:$0xff] %v4380_v34  ;;  %9477 = vst [vmem:[#allocation133_spill] sm:$0xff] %v4386_v41  ;;  %vm9480_vm15 = vcmp.lt.s32.totalorder %v2988_v60, %v2868_v8  ;;  %vm9482_vm2 = vcmp.lt.s32.totalorder %v2991_v61, %v2868_v8  ;;  %v1589_v17 = vmin.f32 %v1588_v20, %v1424_v58  ;;  %v4410_v25 = vsel %vm318_vm10, %v9405_v26, inf  ;;  %v9490_v58 = vld [vmem:[#allocation39_spill] sm:$0xff]  ;;  %v4430_v26 = vpop.permute.xlu1 %831  ;;  %v9535_v41 = vld [vmem:[#allocation110_spill] sm:$0xff] }
 0x21c   :  { %9479 = vst [vmem:[#allocation134_spill] sm:$0xff] %v4392_v33  ;;  %v4398_v59 = vsel %vm9480_vm15, %v4049_v5, inf  ;;  %v4404_v39 = vsel %vm9482_vm2, %v4052_v47, inf  ;;  %9485 = vst [vmem:[#allocation137_spill] sm:$0xff] %v4410_v25  ;;  %v4416_v30 = vsel %vm319_vm4, %v9408_v22, inf  ;;  %v4422_v49 = vsel %vm320_vm12, %v4065_v19, inf }
 0x21d   :  { %9481 = vst [vmem:[#allocation135_spill] sm:$0xff] %v4398_v59  ;;  %9483 = vst [vmem:[#allocation136_spill] sm:$0xff] %v4404_v39  ;;  %vm9491_vm5 = vcmp.lt.s32.totalorder %v9490_v58, %v2868_v8  ;;  %v9494_v47 = vld [vmem:[#allocation107_spill] sm:$0xff]  ;;  %vm9497_vm4 = vcmp.lt.s32.totalorder %v9496_v2, %v2868_v8  ;;  %v9500_v25 = vld [vmem:[#allocation41_spill] sm:$0xff]  ;;  %vm9503_vm12 = vcmp.lt.s32.totalorder %v9425_v62, %v2868_v8 }
 0x21e   :  { %9487 = vst [vmem:[#allocation138_spill] sm:$0xff] %v4416_v30  ;;  %9489 = vst [vmem:[#allocation139_spill] sm:$0xff] %v4422_v49  ;;  %v4428_v20 = vsel %vm9491_vm5, %v4068_v6, inf  ;;  %v1223_v46 = vmax.f32 %v1222_v42, %v9494_v47  ;;  %v4437_v22 = vsel %vm9497_vm4, %v9495_v23, inf  ;;  %v9499_v30 = vld [vmem:[#allocation97_spill] sm:$0xff]  ;;  %vm9501_vm10 = vcmp.lt.s32.totalorder %v9500_v25, %v2868_v8 }
 0x21f   :  { %9492 = vst [vmem:[#allocation140_spill] sm:$0xff] %v4428_v20  ;;  %9493 = vst [vmem:[#allocation141_spill] sm:$0xff] %v4430_v26  ;;  %v4443_v19 = vsel %vm9501_vm10, %v9499_v30, inf  ;;  %v4449_v6 = vsel %vm9503_vm12, %v4085_v54, inf  ;;  %vm9505_vm9 = vcmp.lt.s32.totalorder %v9430_v12, %v2868_v8  ;;  %vm9507_vm14 = vcmp.lt.s32.totalorder %v9433_v45, %v2868_v8  ;;  %v9509_v30 = vld [vmem:[#allocation45_spill] sm:$0xff]  ;;  %v9512_v54 = vld [vmem:[#allocation102_spill] sm:$0xff] }
 0x220   :  { %9498 = vst [vmem:[#allocation107_spill] sm:$0xff] %v4437_v22  ;;  %9502 = vst [vmem:[#allocation142_spill] sm:$0xff] %v4443_v19  ;;  %v4455_v47 = vsel %vm9505_vm9, %v4088_v21, inf  ;;  %v4461_v42 = vsel %vm9507_vm14, %v4091_v55, inf  ;;  %vm9510_vm15 = vcmp.lt.s32.totalorder %v9509_v30, %v2868_v8  ;;  %v9516_v21 = vld [vmem:[#allocation108_spill] sm:$0xff]  ;;  %v9517_v22 = vld [vmem:[#allocation103_spill] sm:$0xff]  ;;  %vm9521_vm4 = vcmp.lt.s32.totalorder %v9445_v7, %v2868_v8 }
 0x221   :  { %9504 = vst [vmem:[#allocation143_spill] sm:$0xff] %v4449_v6  ;;  %9506 = vst [vmem:[#allocation144_spill] sm:$0xff] %v4455_v47  ;;  %v4467_v23 = vsel %vm9510_vm15, %v4094_v50, inf  ;;  %v9513_v6 = vld [vmem:[#allocation46_spill] sm:$0xff]  ;;  %v1224_v47 = vmax.f32 %v1223_v46, %v9516_v21  ;;  %v9518_v20 = vld [vmem:[#allocation47_spill] sm:$0xff]  ;;  %v4486_v50 = vsel %vm9521_vm4, %v4111_v11, inf }
 0x222   :  { %9508 = vst [vmem:[#allocation145_spill] sm:$0xff] %v4461_v42  ;;  %9511 = vst [vmem:[#allocation146_spill] sm:$0xff] %v4467_v23  ;;  %vm9514_vm2 = vcmp.lt.s32.totalorder %v9513_v6, %v2868_v8  ;;  %vm9519_vm5 = vcmp.lt.s32.totalorder %v9518_v20, %v2868_v8  ;;  %v1590_v23 = vmin.f32 %v1589_v17, %v1425_v51  ;;  %v2665_v42 = vld [vmem:[#allocation2 + $0x3d8] sm:$0x7]  ;;  %v2667_v21 = vld [vmem:[#allocation2 + $0x3e8] sm:$0x7] }
 0x223   :  { %v4473_v19 = vsel %vm9514_vm2, %v9512_v54, inf  ;;  %v4480_v55 = vsel %vm9519_vm5, %v9517_v22, inf  ;;  %9522 = vst [vmem:[#allocation148_spill] sm:$0xff] %v4486_v50  ;;  %v4489_v49 = vsub.f32 %v2665_v42, %v4430_v26  ;;  %v2666_v54 = vld [vmem:[#allocation2 + $0x3e0] sm:$0x7]  ;;  %v9527_v8 = vld [vmem:[#allocation109_spill] sm:$0xff] }
 0x224   :  { %9515 = vst [vmem:[#allocation147_spill] sm:$0xff] %v4473_v19  ;;  %9520 = vst [vmem:[#allocation108_spill] sm:$0xff] %v4480_v55  ;;  %v4492_v46 = vsub.f32 %v2666_v54, %v4430_v26  ;;  %v4495_v19 = vsub.f32 %v2667_v21, %v4430_v26  ;;  %v2668_v22 = vld [vmem:[#allocation2 + $0x3f0] sm:$0x7]  ;;  %v1225_v11 = vmax.f32 %v1224_v47, %v9527_v8  ;;  %v2669_v50 = vld [vmem:[#allocation2 + $0x3f8] sm:$0x7] }
 0x225   :  { %9523 = vst [vmem:[#allocation149_spill] sm:$0xff] %v4489_v49  ;;  %v4498_v55 = vsub.f32 %v2668_v22, %v4430_v26  ;;  %v4502_v51 = vsub.f32 %v2669_v50, %v4430_v26  ;;  %v2670_v17 = vld [vmem:[#allocation2 + $0x400] sm:$0x7]  ;;  %v2671_v54 = vld [vmem:[#allocation2 + $0x408] sm:$0x7] }
 0x226   :  { %9524 = vst [vmem:[#allocation150_spill] sm:$0xff] %v4492_v46  ;;  %9525 = vst [vmem:[#allocation151_spill] sm:$0xff] %v4495_v19  ;;  %v4505_v42 = vsub.f32 %v2670_v17, %v4430_v26  ;;  %v4508_v39 = vsub.f32 %v2671_v54, %v4430_v26  ;;  %v2672_v21 = vld [vmem:[#allocation2 + $0x410] sm:$0x7]  ;;  %v2673_v22 = vld [vmem:[#allocation2 + $0x418] sm:$0x7]  ;;  %v1226_v34 = vmax.f32 %v1225_v11, %v9535_v41 }
 0x227   :  { %9526 = vst [vmem:[#allocation152_spill] sm:$0xff] %v4498_v55  ;;  %9528 = vst [vmem:[#allocation109_spill] sm:$0xff] %v4502_v51  ;;  %v4511_v59 = vsub.f32 %v2672_v21, %v4430_v26  ;;  %v4514_v33 = vsub.f32 %v2673_v22, %v4430_v26  ;;  %v2674_v8 = vld [vmem:[#allocation2 + $0x420] sm:$0x7]  ;;  %v2675_v47 = vld [vmem:[#allocation2 + $0x428] sm:$0x7]  ;;  %v1591_v54 = vmin.f32 %v1590_v23, %v4320_v43 }
 0x228   :  { %9529 = vst [vmem:[#allocation153_spill] sm:$0xff] %v4505_v42  ;;  %9530 = vst [vmem:[#allocation154_spill] sm:$0xff] %v4508_v39  ;;  %v4517_v50 = vsub.f32 %v2674_v8, %v4430_v26  ;;  %v4520_v17 = vsub.f32 %v2675_v47, %v4430_v26  ;;  %v2676_v10 = vld [vmem:[#allocation2 + $0x430] sm:$0x7]  ;;  %v2677_v0 = vld [vmem:[#allocation2 + $0x438] sm:$0x7]  ;;  %v4531_v8 = vsub.f32 %v2678_v15, %v4430_v26 }
 0x229   :  { %9531 = vst [vmem:[#allocation155_spill] sm:$0xff] %v4511_v59  ;;  %9532 = vst [vmem:[#allocation156_spill] sm:$0xff] %v4514_v33  ;;  %v4525_v21 = vsub.f32 %v2676_v10, %v4430_v26  ;;  %v4528_v22 = vsub.f32 %v2677_v0, %v4430_v26  ;;  %v2679_v7 = vld [vmem:[#allocation2 + $0x448] sm:$0x7]  ;;  %v2680_v20 = vld [vmem:[#allocation2 + $0x450] sm:$0x7] }
 0x22a   :  { %9533 = vst [vmem:[#allocation157_spill] sm:$0xff] %v4517_v50  ;;  %9534 = vst [vmem:[#allocation158_spill] sm:$0xff] %v4520_v17  ;;  %v4534_v47 = vsub.f32 %v2679_v7, %v4430_v26  ;;  %v4537_v11 = vsub.f32 %v2680_v20, %v4430_v26  ;;  %v2681_v23 = vld [vmem:[#allocation2 + $0x458] sm:$0x7]  ;;  %v2682_v0 = vld [vmem:[#allocation2 + $0x460] sm:$0x7] }
 0x22b   :  { %9536 = vst [vmem:[#allocation110_spill] sm:$0xff] %v4525_v21  ;;  %9537 = vst [vmem:[#allocation159_spill] sm:$0xff] %v4528_v22  ;;  %v4540_v41 = vsub.f32 %v2681_v23, %v4430_v26  ;;  %v9542_v43 = vld [vmem:[#allocation111_spill] sm:$0xff]  ;;  %v4544_v6 = vsub.f32 %v2682_v0, %v4430_v26  ;;  %v2683_v15 = vld [vmem:[#allocation2 + $0x468] sm:$0x7] }
 0x22c   :  { %9538 = vst [vmem:[#allocation160_spill] sm:$0xff] %v4531_v8  ;;  %9539 = vst [vmem:[#allocation161_spill] sm:$0xff] %v4534_v47  ;;  %v1227_v10 = vmax.f32 %v1226_v34, %v9542_v43  ;;  %v4547_v18 = vsub.f32 %v2683_v15, %v4430_v26  ;;  %v2684_v7 = vld [vmem:[#allocation2 + $0x470] sm:$0x7]  ;;  %v2685_v20 = vld [vmem:[#allocation2 + $0x478] sm:$0x7] }
 0x22d   :  { %9540 = vst [vmem:[#allocation162_spill] sm:$0xff] %v4537_v11  ;;  %9541 = vst [vmem:[#allocation163_spill] sm:$0xff] %v4540_v41  ;;  %v4550_v24 = vsub.f32 %v2684_v7, %v4430_v26  ;;  %v4553_v38 = vsub.f32 %v2685_v20, %v4430_v26  ;;  %v2686_v23 = vld [vmem:[#allocation2 + $0x480] sm:$0x7]  ;;  %v2687_v34 = vld [vmem:[#allocation2 + $0x488] sm:$0x7]  ;;  %v1592_v7 = vmin.f32 %v1591_v54, %v4326_v3 }
 0x22e   :  { %9543 = vst [vmem:[#allocation111_spill] sm:$0xff] %v4544_v6  ;;  %9544 = vst [vmem:[#allocation164_spill] sm:$0xff] %v4547_v18  ;;  %v4556_v30 = vsub.f32 %v2686_v23, %v4430_v26  ;;  %v4559_v43 = vsub.f32 %v2687_v34, %v4430_v26  ;;  %v2688_v0 = vld [vmem:[#allocation2 + $0x490] sm:$0x7]  ;;  %v1228_v45 = vmax.f32 %v1227_v10, %v9550_v4  ;;  %v2689_v12 = vld [vmem:[#allocation2 + $0x498] sm:$0x7] }
 0x22f   :  { %9545 = vst [vmem:[#allocation165_spill] sm:$0xff] %v4550_v24  ;;  %9546 = vst [vmem:[#allocation166_spill] sm:$0xff] %v4553_v38  ;;  %v4562_v15 = vsub.f32 %v2688_v0, %v4430_v26  ;;  %v4567_v20 = vsub.f32 %v2689_v12, %v4430_v26  ;;  %v2690_v62 = vld [vmem:[#allocation2 + $0x4a0] sm:$0x7]  ;;  %v2691_v25 = vld [vmem:[#allocation2 + $0x4a8] sm:$0x7] }
 0x230   :  { %9547 = vst [vmem:[#allocation167_spill] sm:$0xff] %v4556_v30  ;;  %9548 = vst [vmem:[#allocation168_spill] sm:$0xff] %v4559_v43  ;;  %v4570_v23 = vsub.f32 %v2690_v62, %v4430_v26  ;;  %v4573_v34 = vsub.f32 %v2691_v25, %v4430_v26  ;;  %v2692_v2 = vld [vmem:[#allocation2 + $0x4b0] sm:$0x7]  ;;  %v2693_v58 = vld [vmem:[#allocation2 + $0x4b8] sm:$0x7] }
 0x231   :  { %9549 = vst [vmem:[#allocation169_spill] sm:$0xff] %v4562_v15  ;;  %9551 = vst [vmem:[#allocation112_spill] sm:$0xff] %v4567_v20  ;;  %v4576_v0 = vsub.f32 %v2692_v2, %v4430_v26  ;;  %v4579_v4 = vsub.f32 %v2693_v58, %v4430_v26  ;;  %v2694_v3 = vld [vmem:[#allocation2 + $0x4c0] sm:$0x7]  ;;  %v9557_v54 = vld [vmem:[#allocation113_spill] sm:$0xff] }
 0x232   :  { %9552 = vst [vmem:[#allocation170_spill] sm:$0xff] %v4570_v23  ;;  %9553 = vst [vmem:[#allocation171_spill] sm:$0xff] %v4573_v34  ;;  %v4582_v12 = vsub.f32 %v2694_v3, %v4430_v26  ;;  %v1229_v10 = vmax.f32 %v1228_v45, %v9557_v54  ;;  %v2695_v62 = vld [vmem:[#allocation2 + $0x4c8] sm:$0x7]  ;;  %v2696_v25 = vld [vmem:[#allocation2 + $0x4d0] sm:$0x7] }
 0x233   :  { %9554 = vst [vmem:[#allocation172_spill] sm:$0xff] %v4576_v0  ;;  %9555 = vst [vmem:[#allocation173_spill] sm:$0xff] %v4579_v4  ;;  %v4586_v5 = vsub.f32 %v2695_v62, %v4430_v26  ;;  %v4589_v28 = vsub.f32 %v2696_v25, %v4430_v26  ;;  %v2697_v2 = vld [vmem:[#allocation2 + $0x4d8] sm:$0x7]  ;;  %v2698_v58 = vld [vmem:[#allocation2 + $0x4e0] sm:$0x7] }
 0x234   :  { %9556 = vst [vmem:[#allocation174_spill] sm:$0xff] %v4582_v12  ;;  %v4592_v0 = vsub.f32 %v2697_v2, %v4430_v26  ;;  %v4595_v4 = vsub.f32 %v2698_v58, %v4430_v26  ;;  %v2699_v3 = vld [vmem:[#allocation2 + $0x4e8] sm:$0x7]  ;;  %v2700_v45 = vld [vmem:[#allocation2 + $0x4f0] sm:$0x7]  ;;  %v1593_v2 = vmin.f32 %v1592_v7, %v4332_v9 }
 0x235   :  { %9558 = vst [vmem:[#allocation113_spill] sm:$0xff] %v4586_v5  ;;  %9559 = vst [vmem:[#allocation175_spill] sm:$0xff] %v4589_v28  ;;  %v4598_v12 = vsub.f32 %v2699_v3, %v4430_v26  ;;  %v4601_v54 = vsub.f32 %v2700_v45, %v4430_v26  ;;  %v2701_v62 = vld [vmem:[#allocation2 + $0x4f8] sm:$0x7]  ;;  %v9565_v28 = vld [vmem:[#allocation114_spill] sm:$0xff] }
 0x236   :  { %9560 = vst [vmem:[#allocation176_spill] sm:$0xff] %v4592_v0  ;;  %9561 = vst [vmem:[#allocation177_spill] sm:$0xff] %v4595_v4  ;;  %v4604_v25 = vsub.f32 %v2701_v62, %v4430_v26  ;;  %v1230_v5 = vmax.f32 %v1229_v10, %v9565_v28  ;;  %v9566_v0 = vld [vmem:[#allocation8_spill] sm:$0xff]  ;;  %v9567_v58 = vld [vmem:[#allocation33_spill] sm:$0xff] }
 0x237   :  { %9562 = vst [vmem:[#allocation178_spill] sm:$0xff] %v4598_v12  ;;  %9563 = vst [vmem:[#allocation179_spill] sm:$0xff] %v4601_v54  ;;  %vm9568_vm10 = vcmp.lt.s32.totalorder %v9566_v0, %v9567_v58  ;;  %v9569_v3 = vld [vmem:[#allocation9_spill] sm:$0xff]  ;;  %v9571_v45 = vld [vmem:[#allocation11_spill] sm:$0xff] }
 0x238   :  { %9564 = vst [vmem:[#allocation180_spill] sm:$0xff] %v4604_v25  ;;  %v1121_v4 = vsel %vm9568_vm10, %v4489_v49, -inf  ;;  %vm9570_vm12 = vcmp.lt.s32.totalorder %v9569_v3, %v9567_v58  ;;  %vm9572_vm9 = vcmp.lt.s32.totalorder %v9571_v45, %v9567_v58  ;;  %v9573_v25 = vld [vmem:[#allocation12_spill] sm:$0xff]  ;;  %v9575_v28 = vld [vmem:[#allocation13_spill] sm:$0xff]  ;;  %v9577_v10 = vld [vmem:[#allocation14_spill] sm:$0xff]  ;;  %vm9584_vm10 = vcmp.lt.s32.totalorder %v9453_v44, %v9567_v58 }
 0x239   :  { %v1122_v12 = vsel %vm9570_vm12, %v4492_v46, -inf  ;;  %v1123_v62 = vsel %vm9572_vm9, %v4495_v19, -inf  ;;  %vm9574_vm14 = vcmp.lt.s32.totalorder %v9573_v25, %v9567_v58  ;;  %vm9576_vm15 = vcmp.lt.s32.totalorder %v9575_v28, %v9567_v58  ;;  %v9579_v46 = vld [vmem:[#allocation115_spill] sm:$0xff]  ;;  %v9582_v25 = vld [vmem:[#allocation16_spill] sm:$0xff] }
 0x23a   :  { %v1124_v9 = vsel %vm9574_vm14, %v4498_v55, -inf  ;;  %v1125_v7 = vsel %vm9576_vm15, %v4502_v51, -inf  ;;  %vm9578_vm2 = vcmp.lt.s32.totalorder %v9577_v10, %v9567_v58  ;;  %v1231_v49 = vmax.f32 %v1230_v5, %v9579_v46  ;;  %v9580_v45 = vld [vmem:[#allocation15_spill] sm:$0xff] }
 0x23b   :  { %v1126_v26 = vsel %vm9578_vm2, %v4505_v42, -inf  ;;  %vm9581_vm5 = vcmp.lt.s32.totalorder %v9580_v45, %v9567_v58  ;;  %vm9583_vm4 = vcmp.lt.s32.totalorder %v9582_v25, %v9567_v58  ;;  %v1129_v51 = vsel %vm9584_vm10, %v4514_v33, -inf }
 0x23c   :  { %v1127_v19 = vsel %vm9581_vm5, %v4508_v39, -inf  ;;  %v1128_v55 = vsel %vm9583_vm4, %v4511_v59, -inf  ;;  %vm9585_vm12 = vcmp.lt.s32.totalorder %v9456_v63, %v9567_v58  ;;  %vm9586_vm9 = vcmp.lt.s32.totalorder %v2929_v36, %v9567_v58  ;;  %v9591_v39 = vld [vmem:[#allocation116_spill] sm:$0xff] }
 0x23d   :  { %v1130_v5 = vsel %vm9585_vm12, %v4517_v50, -inf  ;;  %v1131_v46 = vsel %vm9586_vm9, %v4520_v17, -inf  ;;  %vm9587_vm14 = vcmp.lt.s32.totalorder %v2932_v37, %v9567_v58  ;;  %vm9589_vm15 = vcmp.lt.s32.totalorder %v2938_v40, %v9567_v58 }
 0x23e   :  { %v4657_v59 = vsel %vm9587_vm14, %v4525_v21, -inf  ;;  %v4663_v33 = vsel %vm9589_vm15, %v4528_v22, -inf  ;;  %v1232_v42 = vmax.f32 %v1231_v49, %v9591_v39  ;;  %v1594_v50 = vmin.f32 %v1593_v2, %v4338_v1  ;;  %v9604_v2 = vld [vmem:[#allocation117_spill] sm:$0xff] }
 0x23f   :  { %9588 = vst [vmem:[#allocation114_spill] sm:$0xff] %v4657_v59  ;;  %9590 = vst [vmem:[#allocation115_spill] sm:$0xff] %v4663_v33  ;;  %vm9592_vm2 = vcmp.lt.s32.totalorder %v9303_v31, %v9567_v58  ;;  %vm9594_vm5 = vcmp.lt.s32.totalorder %v9305_v13, %v9567_v58  ;;  %vm9596_vm4 = vcmp.lt.s32.totalorder %v9306_v32, %v9567_v58  ;;  %v2706_v33 = vld [vmem:[#allocation2 + $0x20] sm:$0xff] }
 0x240   :  { %v4671_v17 = vsel %vm9592_vm2, %v4531_v8, -inf  ;;  %v4677_v21 = vsel %vm9594_vm5, %v4534_v47, -inf  ;;  %v4683_v22 = vsel %vm9596_vm4, %v4537_v11, -inf  ;;  %vm9598_vm10 = vcmp.lt.s32.totalorder %v9307_v27, %v9567_v58 }
 0x241   :  { %9593 = vst [vmem:[#allocation116_spill] sm:$0xff] %v4671_v17  ;;  %9595 = vst [vmem:[#allocation181_spill] sm:$0xff] %v4677_v21  ;;  %v4689_v39 = vsel %vm9598_vm10, %v4540_v41, -inf  ;;  %vm9600_vm12 = vcmp.lt.s32.totalorder %v9308_v48, %v9567_v58  ;;  %vm9602_vm9 = vcmp.lt.s32.totalorder %v9309_v29, %v9567_v58  ;;  %v1233_v11 = vmax.f32 %v1232_v42, %v9604_v2 }
 0x242   :  { %9597 = vst [vmem:[#allocation182_spill] sm:$0xff] %v4683_v22  ;;  %9599 = vst [vmem:[#allocation183_spill] sm:$0xff] %v4689_v39  ;;  %v4695_v49 = vsel %vm9600_vm12, %v4544_v6, -inf  ;;  %v4701_v1 = vsel %vm9602_vm9, %v4547_v18, -inf  ;;  %vm9605_vm14 = vcmp.lt.s32.totalorder %v9310_v14, %v9567_v58  ;;  %vm9607_vm15 = vcmp.lt.s32.totalorder %v2969_v52, %v9567_v58  ;;  %v2750_v14 = vld [vmem:[#allocation2 + $0x330] sm:$0xff] }
 0x243   :  { %9601 = vst [vmem:[#allocation184_spill] sm:$0xff] %v4695_v49  ;;  %9603 = vst [vmem:[#allocation185_spill] sm:$0xff] %v4701_v1  ;;  %v4708_v41 = vsel %vm9605_vm14, %v4550_v24, -inf  ;;  %v4714_v6 = vsel %vm9607_vm15, %v4553_v38, -inf  ;;  %vm9609_vm2 = vcmp.lt.s32.totalorder %v2972_v53, %v9567_v58  ;;  %vm9611_vm5 = vcmp.lt.s32.totalorder %v2978_v56, %v9567_v58  ;;  %v9619_v24 = vld [vmem:[#allocation118_spill] sm:$0xff]  ;;  %v2721_v1 = vld [vmem:[#allocation2 + $0x98] sm:$0xff] }
 0x244   :  { %9606 = vst [vmem:[#allocation117_spill] sm:$0xff] %v4708_v41  ;;  %9608 = vst [vmem:[#allocation186_spill] sm:$0xff] %v4714_v6  ;;  %v4720_v18 = vsel %vm9609_vm2, %v4556_v30, -inf  ;;  %v4726_v42 = vsel %vm9611_vm5, %v4559_v43, -inf  ;;  %vm9613_vm4 = vcmp.lt.s32.totalorder %v2981_v57, %v9567_v58  ;;  %vm9615_vm10 = vcmp.lt.s32.totalorder %v2988_v60, %v9567_v58  ;;  %v4746_v43 = vpop.permute.xlu0 %816 }
 0x245   :  { %9610 = vst [vmem:[#allocation187_spill] sm:$0xff] %v4720_v18  ;;  %9612 = vst [vmem:[#allocation188_spill] sm:$0xff] %v4726_v42  ;;  %v4732_v2 = vsel %vm9613_vm4, %v4562_v15, -inf  ;;  %v4738_v38 = vsel %vm9615_vm10, %v4567_v20, -inf  ;;  %vm9617_vm12 = vcmp.lt.s32.totalorder %v2991_v61, %v9567_v58  ;;  %v1234_v47 = vmax.f32 %v1233_v11, %v9619_v24  ;;  %v9622_v20 = vld [vmem:[#allocation172_spill] sm:$0xff]  ;;  %v9630_v24 = vld [vmem:[#allocation174_spill] sm:$0xff] }
 0x246   :  { %9614 = vst [vmem:[#allocation189_spill] sm:$0xff] %v4732_v2  ;;  %9616 = vst [vmem:[#allocation190_spill] sm:$0xff] %v4738_v38  ;;  %v4744_v30 = vsel %vm9617_vm12, %v4570_v23, -inf  ;;  %v1595_v8 = vmin.f32 %v1594_v50, %v4344_v16  ;;  %vm9620_vm9 = vcmp.lt.s32.totalorder %v9484_v35, %v9567_v58  ;;  %v9623_v38 = vld [vmem:[#allocation37_spill] sm:$0xff]  ;;  %v9631_v16 = vld [vmem:[#allocation39_spill] sm:$0xff]  ;;  %v1291_v11 = vsel %vm713_vm11, %v1121_v4, -inf }
 0x247   :  { %9618 = vst [vmem:[#allocation191_spill] sm:$0xff] %v4744_v30  ;;  %v4754_v15 = vsel %vm9620_vm9, %v4573_v34, -inf  ;;  %vm9624_vm14 = vcmp.lt.s32.totalorder %v9623_v38, %v9567_v58  ;;  %v9626_v23 = vld [vmem:[#allocation173_spill] sm:$0xff]  ;;  %v9627_v30 = vld [vmem:[#allocation38_spill] sm:$0xff]  ;;  %vm9632_vm2 = vcmp.lt.s32.totalorder %v9631_v16, %v9567_v58  ;;  %v1292_v34 = vsel %vm713_vm11, %v1122_v12, -inf  ;;  %v2702_v12 = vld [vmem:[#allocation2] sm:$0xff] }
 0x248   :  { %9621 = vst [vmem:[#allocation118_spill] sm:$0xff] %v4754_v15  ;;  %v4760_v2 = vsel %vm9624_vm14, %v9622_v20, -inf  ;;  %vm9628_vm15 = vcmp.lt.s32.totalorder %v9627_v30, %v9567_v58  ;;  %v4772_v50 = vsel %vm9632_vm2, %v9630_v24, -inf  ;;  %v9634_v15 = vld [vmem:[#allocation119_spill] sm:$0xff]  ;;  %v9635_v20 = vld [vmem:[#allocation113_spill] sm:$0xff]  ;;  %v9643_v24 = vld [vmem:[#allocation176_spill] sm:$0xff]  ;;  %v1293_v17 = vmax.f32 %v1291_v11, %v1292_v34 }
 0x249   :  { %9625 = vst [vmem:[#allocation192_spill] sm:$0xff] %v4760_v2  ;;  %v4766_v42 = vsel %vm9628_vm15, %v9626_v23, -inf  ;;  %9633 = vst [vmem:[#allocation194_spill] sm:$0xff] %v4772_v50  ;;  %v1235_v18 = vmax.f32 %v1234_v47, %v9634_v15  ;;  %v9636_v2 = vld [vmem:[#allocation40_spill] sm:$0xff]  ;;  %v9639_v23 = vld [vmem:[#allocation175_spill] sm:$0xff]  ;;  %v4796_v47 = vsub.f32 %v2702_v12, %v4746_v43  ;;  %v4841_v34 = vsel %vm713_vm11, %v1129_v51, -inf }
 0x24a   :  { %9629 = vst [vmem:[#allocation193_spill] sm:$0xff] %v4766_v42  ;;  %vm9637_vm5 = vcmp.lt.s32.totalorder %v9636_v2, %v9567_v58  ;;  %v9640_v42 = vld [vmem:[#allocation41_spill] sm:$0xff]  ;;  %v9644_v50 = vld [vmem:[#allocation42_spill] sm:$0xff]  ;;  %9667 = vst [vmem:[#allocation205_spill] sm:$0xff] %v4841_v34  ;;  %v4869_v59 = vsub.f32 %v2706_v33, %v4746_v43 }
 0x24b   :  { %v4781_v6 = vsel %vm9637_vm5, %v9635_v20, -inf  ;;  %vm9641_vm4 = vcmp.lt.s32.totalorder %v9640_v42, %v9567_v58  ;;  %vm9645_vm10 = vcmp.lt.s32.totalorder %v9644_v50, %v9567_v58  ;;  %9647 = vst [vmem:[#allocation197_spill] sm:$0xff] %v4796_v47  ;;  %v2703_v15 = vld [vmem:[#allocation2 + $0x8] sm:$0xff]  ;;  %v2722_v50 = vld [vmem:[#allocation2 + $0xa0] sm:$0xff]  ;;  %v2728_v61 = vld [vmem:[#allocation2 + $0xd0] sm:$0xff] }
 0x24c   :  { %9638 = vst [vmem:[#allocation119_spill] sm:$0xff] %v4781_v6  ;;  %v4787_v41 = vsel %vm9641_vm4, %v9639_v23, -inf  ;;  %v4793_v4 = vsel %vm9645_vm10, %v9643_v24, -inf  ;;  %v4799_v20 = vsub.f32 %v2703_v15, %v4746_v43  ;;  %v9649_v6 = vld [vmem:[#allocation177_spill] sm:$0xff]  ;;  %9678 = vst [vmem:[#allocation209_spill] sm:$0xff] %v4869_v59  ;;  %v4928_v42 = vsub.f32 %v2722_v50, %v4746_v43  ;;  %v2726_v30 = vld [vmem:[#allocation2 + $0xc0] sm:$0xff] }
 0x24d   :  { %9642 = vst [vmem:[#allocation195_spill] sm:$0xff] %v4787_v41  ;;  %9646 = vst [vmem:[#allocation196_spill] sm:$0xff] %v4793_v4  ;;  %v4805_v23 = vsel %vm407_vm0, %v9649_v6, -inf  ;;  %v9652_v41 = vld [vmem:[#allocation178_spill] sm:$0xff]  ;;  %v9655_v4 = vld [vmem:[#allocation120_spill] sm:$0xff]  ;;  %v1294_v6 = vsel %vm713_vm11, %v1123_v62, -inf }
 0x24e   :  { %9648 = vst [vmem:[#allocation198_spill] sm:$0xff] %v4799_v20  ;;  %9651 = vst [vmem:[#allocation199_spill] sm:$0xff] %v4805_v23  ;;  %v4811_v24 = vsel %vm408_vm13, %v9652_v41, -inf  ;;  %v1236_v39 = vmax.f32 %v1235_v18, %v9655_v4  ;;  %v9656_v12 = vld [vmem:[#allocation17_spill] sm:$0xff]  ;;  %v4825_v23 = vsel %vm713_vm11, %v1124_v9, -inf  ;;  %v4828_v41 = vsel %vm713_vm11, %v1125_v7, -inf }
 0x24f   :  { %9654 = vst [vmem:[#allocation200_spill] sm:$0xff] %v4811_v24  ;;  %v4815_v22 = vmin.f32 %v1595_v8, %v9656_v12  ;;  %v9658_v15 = vld [vmem:[#allocation45_spill] sm:$0xff]  ;;  %9661 = vst [vmem:[#allocation201_spill] sm:$0xff] %v4825_v23  ;;  %v4831_v18 = vsel %vm713_vm11, %v1126_v26, -inf  ;;  %v4835_v12 = vsel %vm713_vm11, %v1127_v19, -inf  ;;  %v2704_v62 = vld [vmem:[#allocation2 + $0x10] sm:$0xff] }
 0x250   :  { %vm9659_vm12 = vcmp.lt.s32.totalorder %v9658_v15, %v9567_v58  ;;  %9662 = vst [vmem:[#allocation202_spill] sm:$0xff] %v4828_v41  ;;  %9663 = vst [vmem:[#allocation203_spill] sm:$0xff] %v4831_v18  ;;  %v9664_v8 = vld [vmem:[#allocation121_spill] sm:$0xff]  ;;  %v4844_v9 = vsub.f32 %v2704_v62, %v4746_v43  ;;  %v9669_v7 = vld [vmem:[#allocation51_spill] sm:$0xff]  ;;  %v4860_v62 = vmax.f32 %v1293_v17, %v1294_v6 }
 0x251   :  { %9657 = vst [vmem:[#allocation120_spill] sm:$0xff] %v4815_v22  ;;  %v4821_v21 = vsel %vm9659_vm12, %v4601_v54, -inf  ;;  %v1237_v4 = vmax.f32 %v1236_v39, %v9664_v8  ;;  %9665 = vst [vmem:[#allocation121_spill] sm:$0xff] %v4835_v12  ;;  %v4838_v54 = vsel %vm713_vm11, %v1128_v55, -inf  ;;  %vm9670_vm9 = vcmp.lt.s32.totalorder %v9566_v0, %v9669_v7  ;;  %v9673_v39 = vld [vmem:[#allocation122_spill] sm:$0xff]  ;;  %v2705_v24 = vld [vmem:[#allocation2 + $0x18] sm:$0xff] }
 0x252   :  { %9660 = vst [vmem:[#allocation17_spill] sm:$0xff] %v4821_v21  ;;  %9666 = vst [vmem:[#allocation204_spill] sm:$0xff] %v4838_v54  ;;  %v998_v26 = vsel %vm9670_vm9, %v4796_v47, -inf  ;;  %vm9671_vm14 = vcmp.lt.s32.totalorder %v9569_v3, %v9669_v7  ;;  %v4855_v55 = vsel %vm713_vm11, %v1130_v5, -inf  ;;  %v4863_v21 = vsel %vm713_vm11, %v1131_v46, -inf  ;;  %v2707_v5 = vld [vmem:[#allocation2 + $0x28] sm:$0xff] }
 0x253   :  { %9668 = vst [vmem:[#allocation206_spill] sm:$0xff] %v4844_v9  ;;  %v999_v19 = vsel %vm9671_vm14, %v4799_v20, -inf  ;;  %9672 = vst [vmem:[#allocation51_spill] sm:$0xff] %v4855_v55  ;;  %v1238_v51 = vmax.f32 %v1237_v4, %v9673_v39  ;;  %v4866_v58 = vsub.f32 %v2705_v24, %v4746_v43  ;;  %v4872_v55 = vsub.f32 %v2707_v5, %v4746_v43  ;;  %v2708_v4 = vld [vmem:[#allocation2 + $0x30] sm:$0xff]  ;;  %v9681_v6 = vld [vmem:[#allocation123_spill] sm:$0xff] }
 0x254   :  { %9675 = vst [vmem:[#allocation122_spill] sm:$0xff] %v4860_v62  ;;  %9676 = vst [vmem:[#allocation207_spill] sm:$0xff] %v4863_v21  ;;  %v4875_v39 = vsub.f32 %v2708_v4, %v4746_v43  ;;  %v2709_v46 = vld [vmem:[#allocation2 + $0x38] sm:$0xff]  ;;  %v2710_v24 = vld [vmem:[#allocation2 + $0x40] sm:$0xff]  ;;  %v1162_v33 = vmax.f32 %v998_v26, %v999_v19  ;;  %vm9703_vm5 = vcmp.lt.s32.totalorder %v9575_v28, %v9669_v7 }
 0x255   :  { %9677 = vst [vmem:[#allocation208_spill] sm:$0xff] %v4866_v58  ;;  %9679 = vst [vmem:[#allocation210_spill] sm:$0xff] %v4872_v55  ;;  %v1239_v17 = vmax.f32 %v1238_v51, %v9681_v6  ;;  %v4879_v8 = vsub.f32 %v2709_v46, %v4746_v43  ;;  %v4882_v21 = vsub.f32 %v2710_v24, %v4746_v43  ;;  %v2711_v34 = vld [vmem:[#allocation2 + $0x48] sm:$0xff]  ;;  %v2712_v5 = vld [vmem:[#allocation2 + $0x50] sm:$0xff] }
 0x256   :  { %9680 = vst [vmem:[#allocation211_spill] sm:$0xff] %v4875_v39  ;;  %v4885_v54 = vsub.f32 %v2711_v34, %v4746_v43  ;;  %v4888_v12 = vsub.f32 %v2712_v5, %v4746_v43  ;;  %v2713_v4 = vld [vmem:[#allocation2 + $0x58] sm:$0xff]  ;;  %v9689_v24 = vld [vmem:[#allocation124_spill] sm:$0xff]  ;;  %v2715_v34 = vld [vmem:[#allocation2 + $0x68] sm:$0xff]  ;;  %vm9710_vm4 = vcmp.lt.s32.totalorder %v9577_v10, %v9669_v7  ;;  %vm9721_vm10 = vcmp.lt.s32.totalorder %v9580_v45, %v9669_v7 }
 0x257   :  { %9682 = vst [vmem:[#allocation123_spill] sm:$0xff] %v4879_v8  ;;  %9683 = vst [vmem:[#allocation212_spill] sm:$0xff] %v4882_v21  ;;  %v4891_v51 = vsub.f32 %v2713_v4, %v4746_v43  ;;  %v9687_v6 = vld [vmem:[#allocation11_spill] sm:$0xff]  ;;  %v1240_v18 = vmax.f32 %v1239_v17, %v9689_v24  ;;  %v2714_v26 = vld [vmem:[#allocation2 + $0x60] sm:$0xff]  ;;  %v4902_v41 = vsub.f32 %v2715_v34, %v4746_v43 }
 0x258   :  { %9684 = vst [vmem:[#allocation213_spill] sm:$0xff] %v4885_v54  ;;  %9685 = vst [vmem:[#allocation214_spill] sm:$0xff] %v4888_v12  ;;  %vm9688_vm15 = vcmp.lt.s32.totalorder %v9687_v6, %v9669_v7  ;;  %v4899_v19 = vsub.f32 %v2714_v26, %v4746_v43  ;;  %v2716_v62 = vld [vmem:[#allocation2 + $0x70] sm:$0xff]  ;;  %v2717_v23 = vld [vmem:[#allocation2 + $0x78] sm:$0xff]  ;;  %vm9729_vm12 = vcmp.lt.s32.totalorder %v9582_v25, %v9669_v7 }
 0x259   :  { %9686 = vst [vmem:[#allocation215_spill] sm:$0xff] %v4891_v51  ;;  %v1000_v46 = vsel %vm9688_vm15, %v4844_v9, -inf  ;;  %9691 = vst [vmem:[#allocation216_spill] sm:$0xff] %v4902_v41  ;;  %v4905_v4 = vsub.f32 %v2716_v62, %v4746_v43  ;;  %v4908_v11 = vsub.f32 %v2717_v23, %v4746_v43  ;;  %v2718_v22 = vld [vmem:[#allocation2 + $0x80] sm:$0xff]  ;;  %v9697_v34 = vld [vmem:[#allocation125_spill] sm:$0xff]  ;;  %v1005_v45 = vsel %vm9729_vm12, %v4879_v8, -inf }
 0x25a   :  { %9690 = vst [vmem:[#allocation124_spill] sm:$0xff] %v4899_v19  ;;  %v1163_v5 = vmax.f32 %v1162_v33, %v1000_v46  ;;  %v4911_v17 = vsub.f32 %v2718_v22, %v4746_v43  ;;  %v9695_v24 = vld [vmem:[#allocation12_spill] sm:$0xff]  ;;  %v1241_v15 = vmax.f32 %v1240_v18, %v9697_v34  ;;  %v2719_v33 = vld [vmem:[#allocation2 + $0x88] sm:$0xff]  ;;  %v2720_v62 = vld [vmem:[#allocation2 + $0x90] sm:$0xff]  ;;  %v4925_v22 = vsub.f32 %v2721_v1, %v4746_v43 }
 0x25b   :  { %9692 = vst [vmem:[#allocation217_spill] sm:$0xff] %v4905_v4  ;;  %9693 = vst [vmem:[#allocation218_spill] sm:$0xff] %v4908_v11  ;;  %vm9696_vm2 = vcmp.lt.s32.totalorder %v9695_v24, %v9669_v7  ;;  %v4919_v46 = vsub.f32 %v2719_v33, %v4746_v43  ;;  %v4922_v49 = vsub.f32 %v2720_v62, %v4746_v43  ;;  %v2723_v2 = vld [vmem:[#allocation2 + $0xa8] sm:$0xff]  ;;  %v1002_v34 = vsel %vm9703_vm5, %v4869_v59, -inf  ;;  %v9704_v33 = vld [vmem:[#allocation126_spill] sm:$0xff] }
 0x25c   :  { %9694 = vst [vmem:[#allocation219_spill] sm:$0xff] %v4911_v17  ;;  %v1001_v26 = vsel %vm9696_vm2, %v4866_v58, -inf  ;;  %9700 = vst [vmem:[#allocation221_spill] sm:$0xff] %v4925_v22  ;;  %v4931_v18 = vsub.f32 %v2723_v2, %v4746_v43  ;;  %v1242_v62 = vmax.f32 %v1241_v15, %v9704_v33  ;;  %v2725_v1 = vld [vmem:[#allocation2 + $0xb8] sm:$0xff]  ;;  %v4945_v2 = vsub.f32 %v2726_v30, %v4746_v43  ;;  %v2727_v38 = vld [vmem:[#allocation2 + $0xc8] sm:$0xff] }
 0x25d   :  { %9698 = vst [vmem:[#allocation125_spill] sm:$0xff] %v4919_v46  ;;  %9699 = vst [vmem:[#allocation220_spill] sm:$0xff] %v4922_v49  ;;  %v1164_v23 = vmax.f32 %v1163_v5, %v1001_v26  ;;  %v2724_v5 = vld [vmem:[#allocation2 + $0xb0] sm:$0xff]  ;;  %v4942_v16 = vsub.f32 %v2725_v1, %v4746_v43  ;;  %v4948_v35 = vsub.f32 %v2727_v38, %v4746_v43  ;;  %v1003_v33 = vsel %vm9710_vm4, %v4872_v55, -inf  ;;  %v9713_v30 = vld [vmem:[#allocation53_spill] sm:$0xff] }
 0x25e   :  { %9701 = vst [vmem:[#allocation222_spill] sm:$0xff] %v4928_v42  ;;  %9702 = vst [vmem:[#allocation223_spill] sm:$0xff] %v4931_v18  ;;  %v4939_v26 = vsub.f32 %v2724_v5, %v4746_v43  ;;  %v4951_v15 = vsub.f32 %v2728_v61, %v4746_v43  ;;  %v9711_v5 = vld [vmem:[#allocation127_spill] sm:$0xff]  ;;  %v4963_v60 = vsub.f32 %v9713_v30, %v4746_v43  ;;  %v9719_v10 = vld [vmem:[#allocation56_spill] sm:$0xff] }
 0x25f   :  { %9706 = vst [vmem:[#allocation224_spill] sm:$0xff] %v4942_v16  ;;  %v1165_v50 = vmax.f32 %v1164_v23, %v1002_v34  ;;  %9707 = vst [vmem:[#allocation225_spill] sm:$0xff] %v4945_v2  ;;  %v1243_v1 = vmax.f32 %v1242_v62, %v9711_v5  ;;  %v2729_v23 = vld [vmem:[#allocation2 + $0xd8] sm:$0xff]  ;;  %v4975_v62 = vsub.f32 %v9719_v10, %v4746_v43  ;;  %v1004_v5 = vsel %vm9721_vm10, %v4875_v39, -inf }
 0x260   :  { %9705 = vst [vmem:[#allocation126_spill] sm:$0xff] %v4939_v26  ;;  %9708 = vst [vmem:[#allocation226_spill] sm:$0xff] %v4948_v35  ;;  %v4959_v34 = vsub.f32 %v2729_v23, %v4746_v43  ;;  %v9715_v35 = vld [vmem:[#allocation54_spill] sm:$0xff]  ;;  %v9722_v23 = vld [vmem:[#allocation128_spill] sm:$0xff]  ;;  %vm9742_vm15 = vcmp.lt.s32.totalorder %v9453_v44, %v9669_v7  ;;  %vm9743_vm2 = vcmp.lt.s32.totalorder %v9456_v63, %v9669_v7 }
 0x261   :  { %9709 = vst [vmem:[#allocation227_spill] sm:$0xff] %v4951_v15  ;;  %9714 = vst [vmem:[#allocation53_spill] sm:$0xff] %v4963_v60  ;;  %v1166_v38 = vmax.f32 %v1165_v50, %v1003_v33  ;;  %v4967_v61 = vsub.f32 %v9715_v35, %v4746_v43  ;;  %v9717_v15 = vld [vmem:[#allocation55_spill] sm:$0xff]  ;;  %v1245_v30 = vmax.f32 %v1243_v1, %v9722_v23  ;;  %v9723_v50 = vld [vmem:[#allocation57_spill] sm:$0xff]  ;;  %v1374_v1 = vsel %vm9670_vm9, %v4796_v47, inf }
 0x262   :  { %9712 = vst [vmem:[#allocation127_spill] sm:$0xff] %v4959_v34  ;;  %v4971_v2 = vsub.f32 %v9717_v15, %v4746_v43  ;;  %9720 = vst [vmem:[#allocation56_spill] sm:$0xff] %v4975_v62  ;;  %v4984_v33 = vsub.f32 %v9723_v50, %v4746_v43  ;;  %v9725_v35 = vld [vmem:[#allocation58_spill] sm:$0xff]  ;;  %v1375_v23 = vsel %vm9671_vm14, %v4799_v20, inf  ;;  %v9736_v47 = vld [vmem:[#allocation63_spill] sm:$0xff]  ;;  %vm9744_vm5 = vcmp.lt.s32.totalorder %v2929_v36, %v9669_v7 }
 0x263   :  { %9716 = vst [vmem:[#allocation54_spill] sm:$0xff] %v4967_v61  ;;  %v4988_v61 = vsub.f32 %v9725_v35, %v4746_v43  ;;  %v1167_v15 = vmax.f32 %v1166_v38, %v1004_v5  ;;  %1246 = vmax.xlane.f32.xlu1 %v1245_v30  ;;  %v9730_v38 = vld [vmem:[#allocation60_spill] sm:$0xff]  ;;  %v9732_v5 = vld [vmem:[#allocation61_spill] sm:$0xff]  ;;  %v9734_v35 = vld [vmem:[#allocation62_spill] sm:$0xff]  ;;  %v5020_v8 = vsub.f32 %v9736_v47, %v4746_v43 }
 0x264   :  { %9718 = vst [vmem:[#allocation55_spill] sm:$0xff] %v4971_v2  ;;  %9724 = vst [vmem:[#allocation128_spill] sm:$0xff] %v4984_v33  ;;  %v9727_v2 = vld [vmem:[#allocation59_spill] sm:$0xff]  ;;  %v5012_v50 = vsub.f32 %v9732_v5, %v4746_v43  ;;  %v5016_v25 = vsub.f32 %v9734_v35, %v4746_v43  ;;  %v9738_v20 = vld [vmem:[#allocation65_spill] sm:$0xff]  ;;  %v1006_v5 = vsel %vm9742_vm15, %v4882_v21, -inf  ;;  %vm9745_vm4 = vcmp.lt.s32.totalorder %v2932_v37, %v9669_v7 }
 0x265   :  { %9726 = vst [vmem:[#allocation57_spill] sm:$0xff] %v4988_v61  ;;  %v4992_v10 = vsub.f32 %v9727_v2, %v4746_v43  ;;  %v5008_v2 = vsub.f32 %v9730_v38, %v4746_v43  ;;  %v1168_v0 = vmax.f32 %v1167_v15, %v1005_v45  ;;  %9737 = vst [vmem:[#allocation62_spill] sm:$0xff] %v5020_v8  ;;  %v9740_v38 = vld [vmem:[#allocation64_spill] sm:$0xff]  ;;  %v1007_v45 = vsel %vm9743_vm2, %v4885_v54, -inf }
 0x266   :  { %9733 = vst [vmem:[#allocation60_spill] sm:$0xff] %v5012_v50  ;;  %9735 = vst [vmem:[#allocation61_spill] sm:$0xff] %v5016_v25  ;;  %v5024_v30 = vsub.f32 %v9738_v20, %v4746_v43  ;;  %v5028_v3 = vsub.f32 %v9740_v38, %v4746_v43  ;;  %v1008_v20 = vsel %vm9744_vm5, %v4888_v12, -inf  ;;  %v1538_v15 = vmin.f32 %v1374_v1, %v1375_v23 }
 0x267   :  { %9728 = vst [vmem:[#allocation58_spill] sm:$0xff] %v4992_v10  ;;  %9731 = vst [vmem:[#allocation59_spill] sm:$0xff] %v5008_v2  ;;  %v1169_v47 = vmax.f32 %v1168_v0, %v1006_v5  ;;  %v1009_v43 = vsel %vm9745_vm4, %v4891_v51, -inf  ;;  %vm9746_vm10 = vcmp.lt.s32.totalorder %v2938_v40, %v9669_v7  ;;  %vm9747_vm12 = vcmp.lt.s32.totalorder %v9303_v31, %v9669_v7 }
 0x268   :  { %9739 = vst [vmem:[#allocation63_spill] sm:$0xff] %v5024_v30  ;;  %9741 = vst [vmem:[#allocation65_spill] sm:$0xff] %v5028_v3  ;;  %v1010_v35 = vsel %vm9746_vm10, %v4899_v19, -inf  ;;  %v1011_v38 = vsel %vm9747_vm12, %v4902_v41, -inf  ;;  %vm9748_vm9 = vcmp.lt.s32.totalorder %v9687_v6, %v9669_v7  ;;  %v1012_v1 = vsel %vm265_vm3, %v4905_v4, -inf }
 0x269   :  { %v1376_v0 = vsel %vm9748_vm9, %v4844_v9, inf  ;;  %vm9749_vm14 = vcmp.lt.s32.totalorder %v9306_v32, %v9669_v7  ;;  %v1170_v5 = vmax.f32 %v1169_v47, %v1007_v45  ;;  %vm9750_vm15 = vcmp.lt.s32.totalorder %v9307_v27, %v9669_v7 }
 0x26a   :  { %v1013_v23 = vsel %vm9749_vm14, %v4908_v11, -inf  ;;  %v1539_v40 = vmin.f32 %v1538_v15, %v1376_v0  ;;  %v1014_v31 = vsel %vm9750_vm15, %v4911_v17, -inf  ;;  %vm9751_vm2 = vcmp.lt.s32.totalorder %v9308_v48, %v9669_v7 }
 0x26b   :  { %v5074_v9 = vsel %vm9751_vm2, %v4919_v46, -inf  ;;  %vm9753_vm5 = vcmp.lt.s32.totalorder %v9309_v29, %v9669_v7  ;;  %vm9755_vm4 = vcmp.lt.s32.totalorder %v9695_v24, %v9669_v7  ;;  %v5090_v47 = vsel %vm270_vm8, %v4925_v22, -inf }
 0x26c   :  { %9752 = vst [vmem:[#allocation64_spill] sm:$0xff] %v5074_v9  ;;  %v5080_v6 = vsel %vm9753_vm5, %v4922_v49, -inf  ;;  %v1377_v45 = vsel %vm9755_vm4, %v4866_v58, inf  ;;  %9756 = vst [vmem:[#allocation229_spill] sm:$0xff] %v5090_v47  ;;  %vm9757_vm10 = vcmp.lt.s32.totalorder %v2969_v52, %v9669_v7  ;;  %v1171_v0 = vmax.f32 %v1170_v5, %v1008_v20  ;;  %v9766_v20 = vld [vmem:[#allocation225_spill] sm:$0xff]  ;;  %v9767_v5 = vld [vmem:[#allocation34_spill] sm:$0xff] }
 0x26d   :  { %9754 = vst [vmem:[#allocation228_spill] sm:$0xff] %v5080_v6  ;;  %v5096_v15 = vsel %vm9757_vm10, %v4928_v42, -inf  ;;  %v1540_v9 = vmin.f32 %v1539_v40, %v1377_v45  ;;  %vm9759_vm12 = vcmp.lt.s32.totalorder %v2972_v53, %v9669_v7  ;;  %vm9761_vm9 = vcmp.lt.s32.totalorder %v2978_v56, %v9669_v7 }
 0x26e   :  { %9758 = vst [vmem:[#allocation230_spill] sm:$0xff] %v5096_v15  ;;  %v5102_v24 = vsel %vm9759_vm12, %v4931_v18, -inf  ;;  %v5108_v58 = vsel %vm9761_vm9, %v4939_v26, -inf  ;;  %vm9763_vm14 = vcmp.lt.s32.totalorder %v2981_v57, %v9669_v7  ;;  %vm9765_vm15 = vcmp.lt.s32.totalorder %v9575_v28, %v9669_v7  ;;  %v9771_v15 = vld [vmem:[#allocation35_spill] sm:$0xff] }
 0x26f   :  { %9760 = vst [vmem:[#allocation231_spill] sm:$0xff] %v5102_v24  ;;  %9762 = vst [vmem:[#allocation232_spill] sm:$0xff] %v5108_v58  ;;  %v5114_v47 = vsel %vm9763_vm14, %v4942_v16, -inf  ;;  %v1378_v40 = vsel %vm9765_vm15, %v4869_v59, inf  ;;  %vm9768_vm2 = vcmp.lt.s32.totalorder %v9767_v5, %v9669_v7  ;;  %v9770_v24 = vld [vmem:[#allocation226_spill] sm:$0xff]  ;;  %vm9772_vm5 = vcmp.lt.s32.totalorder %v9771_v15, %v9669_v7  ;;  %v9775_v16 = vld [vmem:[#allocation36_spill] sm:$0xff] }
 0x270   :  { %9764 = vst [vmem:[#allocation233_spill] sm:$0xff] %v5114_v47  ;;  %v5124_v45 = vsel %vm9768_vm2, %v9766_v20, -inf  ;;  %v5130_v58 = vsel %vm9772_vm5, %v9770_v24, -inf  ;;  %v1172_v6 = vmax.f32 %v1171_v0, %v1009_v43  ;;  %v1541_v57 = vmin.f32 %v1540_v9, %v1378_v40  ;;  %v9774_v47 = vld [vmem:[#allocation227_spill] sm:$0xff]  ;;  %v9778_v59 = vld [vmem:[#allocation37_spill] sm:$0xff]  ;;  %v9784_v9 = vld [vmem:[#allocation14_spill] sm:$0xff] }
 0x271   :  { %9769 = vst [vmem:[#allocation234_spill] sm:$0xff] %v5124_v45  ;;  %9773 = vst [vmem:[#allocation235_spill] sm:$0xff] %v5130_v58  ;;  %vm9776_vm4 = vcmp.lt.s32.totalorder %v9775_v16, %v9669_v7  ;;  %vm9779_vm10 = vcmp.lt.s32.totalorder %v9778_v59, %v9669_v7  ;;  %v9781_v45 = vld [vmem:[#allocation38_spill] sm:$0xff]  ;;  %vm9785_vm9 = vcmp.lt.s32.totalorder %v9784_v9, %v9669_v7  ;;  %v9787_v40 = vld [vmem:[#allocation39_spill] sm:$0xff] }
 0x272   :  { %v5136_v28 = vsel %vm9776_vm4, %v9774_v47, -inf  ;;  %v5142_v5 = vsel %vm9779_vm10, %v4959_v34, -inf  ;;  %vm9782_vm12 = vcmp.lt.s32.totalorder %v9781_v45, %v9669_v7  ;;  %v1379_v43 = vsel %vm9785_vm9, %v4872_v55, inf  ;;  %v9786_v0 = vld [vmem:[#allocation54_spill] sm:$0xff]  ;;  %v9790_v58 = vld [vmem:[#allocation55_spill] sm:$0xff]  ;;  %v9791_v59 = vld [vmem:[#allocation40_spill] sm:$0xff] }
 0x273   :  { %9777 = vst [vmem:[#allocation236_spill] sm:$0xff] %v5136_v28  ;;  %9780 = vst [vmem:[#allocation237_spill] sm:$0xff] %v5142_v5  ;;  %v5148_v15 = vsel %vm9782_vm12, %v4963_v60, -inf  ;;  %vm9788_vm14 = vcmp.lt.s32.totalorder %v9787_v40, %v9669_v7  ;;  %vm9792_vm15 = vcmp.lt.s32.totalorder %v9791_v59, %v9669_v7  ;;  %v1173_v45 = vmax.f32 %v1172_v6, %v1010_v35  ;;  %v9797_v55 = vld [vmem:[#allocation42_spill] sm:$0xff]  ;;  %v9805_v35 = vld [vmem:[#allocation44_spill] sm:$0xff] }
 0x274   :  { %9783 = vst [vmem:[#allocation238_spill] sm:$0xff] %v5148_v15  ;;  %v5158_v28 = vsel %vm9788_vm14, %v9786_v0, -inf  ;;  %v5164_v5 = vsel %vm9792_vm15, %v9790_v58, -inf  ;;  %v1542_v60 = vmin.f32 %v1541_v57, %v1379_v43  ;;  %v9794_v15 = vld [vmem:[#allocation41_spill] sm:$0xff]  ;;  %vm9798_vm5 = vcmp.lt.s32.totalorder %v9797_v55, %v9669_v7  ;;  %v9803_v57 = vld [vmem:[#allocation15_spill] sm:$0xff] }
 0x275   :  { %9789 = vst [vmem:[#allocation239_spill] sm:$0xff] %v5158_v28  ;;  %9793 = vst [vmem:[#allocation240_spill] sm:$0xff] %v5164_v5  ;;  %vm9795_vm2 = vcmp.lt.s32.totalorder %v9794_v15, %v9669_v7  ;;  %v5176_v40 = vsel %vm9798_vm5, %v4984_v33, -inf  ;;  %v9800_v28 = vld [vmem:[#allocation43_spill] sm:$0xff]  ;;  %vm9804_vm10 = vcmp.lt.s32.totalorder %v9803_v57, %v9669_v7  ;;  %vm9806_vm12 = vcmp.lt.s32.totalorder %v9805_v35, %v9669_v7 }
 0x276   :  { %v5170_v9 = vsel %vm9795_vm2, %v4975_v62, -inf  ;;  %9799 = vst [vmem:[#allocation242_spill] sm:$0xff] %v5176_v40  ;;  %vm9801_vm4 = vcmp.lt.s32.totalorder %v9800_v28, %v9669_v7  ;;  %v1380_v6 = vsel %vm9804_vm10, %v4875_v39, inf  ;;  %v5192_v43 = vsel %vm9806_vm12, %v4992_v10, -inf  ;;  %v9812_v39 = vld [vmem:[#allocation46_spill] sm:$0xff] }
 0x277   :  { %9796 = vst [vmem:[#allocation241_spill] sm:$0xff] %v5170_v9  ;;  %v5182_v59 = vsel %vm9801_vm4, %v4988_v61, -inf  ;;  %9807 = vst [vmem:[#allocation244_spill] sm:$0xff] %v5192_v43  ;;  %v1038_v40 = vsel %vm291_vm6, %v5028_v3, -inf  ;;  %v1174_v5 = vmax.f32 %v1173_v45, %v1011_v38  ;;  %v1543_v28 = vmin.f32 %v1542_v60, %v1380_v6  ;;  %v9817_v38 = vld [vmem:[#allocation123_spill] sm:$0xff]  ;;  %v9818_v60 = vld [vmem:[#allocation16_spill] sm:$0xff] }
 0x278   :  { %9802 = vst [vmem:[#allocation243_spill] sm:$0xff] %v5182_v59  ;;  %v9809_v59 = vld [vmem:[#allocation45_spill] sm:$0xff]  ;;  %vm9813_vm14 = vcmp.lt.s32.totalorder %v9812_v39, %v9669_v7  ;;  %v5214_v35 = vsel %vm288_vm7, %v5016_v25, -inf  ;;  %vm9819_vm15 = vcmp.lt.s32.totalorder %v9818_v60, %v9669_v7  ;;  %v9820_v6 = vld [vmem:[#allocation48_spill] sm:$0xff]  ;;  %vm9827_vm4 = vcmp.lt.s32.totalorder %v9453_v44, %v9669_v7 }
 0x279   :  { %vm9810_vm9 = vcmp.lt.s32.totalorder %v9809_v59, %v9669_v7  ;;  %v5208_v57 = vsel %vm9813_vm14, %v5012_v50, -inf  ;;  %9816 = vst [vmem:[#allocation247_spill] sm:$0xff] %v5214_v35  ;;  %v1381_v45 = vsel %vm9819_vm15, %v9817_v38, inf  ;;  %vm9821_vm2 = vcmp.lt.s32.totalorder %v9820_v6, %v9669_v7  ;;  %v9823_v39 = vld [vmem:[#allocation49_spill] sm:$0xff] }
 0x27a   :  { %v5202_v61 = vsel %vm9810_vm9, %v5008_v2, -inf  ;;  %9814 = vst [vmem:[#allocation246_spill] sm:$0xff] %v5208_v57  ;;  %vm9824_vm5 = vcmp.lt.s32.totalorder %v9823_v39, %v9669_v7  ;;  %v1175_v43 = vmax.f32 %v1174_v5, %v1012_v1  ;;  %v1544_v25 = vmin.f32 %v1543_v28, %v1381_v45  ;;  %v9831_v5 = vld [vmem:[#allocation21_spill] sm:$0xff] }
 0x27b   :  { %9811 = vst [vmem:[#allocation245_spill] sm:$0xff] %v5202_v61  ;;  %v5224_v61 = vsel %vm9821_vm2, %v5020_v8, -inf  ;;  %v5230_v57 = vsel %vm9824_vm5, %v5024_v30, -inf  ;;  %v5233_v35 = vsel %vm9192_vm1, %v1038_v40, -inf  ;;  %v1382_v38 = vsel %vm9827_vm4, %v4882_v21, inf  ;;  %v9833_v21 = vld [vmem:[#allocation22_spill] sm:$0xff] }
 0x27c   :  { %9822 = vst [vmem:[#allocation16_spill] sm:$0xff] %v5224_v61  ;;  %9825 = vst [vmem:[#allocation248_spill] sm:$0xff] %v5230_v57  ;;  %vm9828_vm10 = vcmp.lt.s32.totalorder %v9456_v63, %v9669_v7  ;;  %vm9829_vm12 = vcmp.lt.s32.totalorder %v2929_v36, %v9669_v7  ;;  %v1176_v1 = vmax.f32 %v1175_v43, %v1013_v23  ;;  %v1388_v23 = vsel %vm265_vm3, %v4905_v4, inf }
 0x27d   :  { %9826 = vst [vmem:[#allocation249_spill] sm:$0xff] %v5233_v35  ;;  %v1383_v61 = vsel %vm9828_vm10, %v4885_v54, inf  ;;  %v1384_v57 = vsel %vm9829_vm12, %v4888_v12, inf  ;;  %vm9830_vm9 = vcmp.lt.s32.totalorder %v2932_v37, %v9669_v7  ;;  %vm9832_vm14 = vcmp.lt.s32.totalorder %v9831_v5, %v9669_v7  ;;  %v2746_v35 = vld [vmem:[#allocation2 + $0x310] sm:$0xff] }
 0x27e   :  { %v1385_v28 = vsel %vm9830_vm9, %v4891_v51, inf  ;;  %v1386_v40 = vsel %vm9832_vm14, %v4899_v19, inf  ;;  %v1545_v45 = vmin.f32 %v1544_v25, %v1382_v38  ;;  %vm9834_vm15 = vcmp.lt.s32.totalorder %v9833_v21, %v9669_v7  ;;  %v5287_v19 = vpop.permute.xlu1 %826  ;;  %v9846_v51 = vld [vmem:[#allocation34_spill] sm:$0xff] }
 0x27f   :  { %v1387_v54 = vsel %vm9834_vm15, %v4902_v41, inf  ;;  %vm9835_vm2 = vcmp.lt.s32.totalorder %v9306_v32, %v9669_v7  ;;  %vm9836_vm5 = vcmp.lt.s32.totalorder %v9307_v27, %v9669_v7  ;;  %v1177_v38 = vmax.f32 %v1176_v1, %v1014_v31 }
 0x280   :  { %v5267_v43 = vsel %vm9835_vm2, %v4908_v11, inf  ;;  %v5273_v25 = vsel %vm9836_vm5, %v4911_v17, inf  ;;  %vm9837_vm4 = vcmp.lt.s32.totalorder %v9308_v48, %v9669_v7  ;;  %vm9838_vm3 = vcmp.lt.s32.totalorder %v9309_v29, %v9669_v7  ;;  %v9844_v17 = vld [vmem:[#allocation32_spill] sm:$0xff] }
 0x281   :  { %v5279_v41 = vsel %vm9837_vm4, %v4919_v46, inf  ;;  %v5285_v4 = vsel %vm9838_vm3, %v4922_v49, inf  ;;  %v1546_v11 = vmin.f32 %v1545_v45, %v1383_v61  ;;  %v5293_v31 = vsel %vm270_vm8, %v4925_v22, inf  ;;  %v9842_v45 = vld [vmem:[#allocation64_spill] sm:$0xff] }
 0x282   :  { %vm9839_vm10 = vcmp.lt.s32.totalorder %v2969_v52, %v9669_v7  ;;  %vm9840_vm12 = vcmp.lt.s32.totalorder %v2972_v53, %v9669_v7  ;;  %vm9841_vm9 = vcmp.lt.s32.totalorder %v2978_v56, %v9669_v7  ;;  %v1178_v22 = vmax.f32 %v1177_v38, %v9842_v45  ;;  %v9843_v46 = vld [vmem:[#allocation224_spill] sm:$0xff]  ;;  %v9848_v53 = vld [vmem:[#allocation35_spill] sm:$0xff]  ;;  %v9851_v45 = vld [vmem:[#allocation37_spill] sm:$0xff] }
 0x283   :  { %v5299_v1 = vsel %vm9839_vm10, %v4928_v42, inf  ;;  %v5305_v49 = vsel %vm9840_vm12, %v4931_v18, inf  ;;  %v5311_v61 = vsel %vm9841_vm9, %v4939_v26, inf  ;;  %vm9845_vm8 = vcmp.lt.s32.totalorder %v9844_v17, %v9669_v7  ;;  %v2730_v17 = vld [vmem:[#allocation2 + $0x290] sm:$0xff] }
 0x284   :  { %v5318_v42 = vsel %vm9845_vm8, %v9843_v46, inf  ;;  %vm9847_vm14 = vcmp.lt.s32.totalorder %v9846_v51, %v9669_v7  ;;  %v1547_v12 = vmin.f32 %v1546_v11, %v1384_v57  ;;  %vm9849_vm15 = vcmp.lt.s32.totalorder %v9848_v53, %v9669_v7  ;;  %v9854_v11 = vld [vmem:[#allocation38_spill] sm:$0xff] }
 0x285   :  { %v5324_v18 = vsel %vm9847_vm14, %v9766_v20, inf  ;;  %v5330_v26 = vsel %vm9849_vm15, %v9770_v24, inf  ;;  %vm9850_vm2 = vcmp.lt.s32.totalorder %v9775_v16, %v9669_v7  ;;  %vm9852_vm5 = vcmp.lt.s32.totalorder %v9851_v45, %v9669_v7  ;;  %v9853_v20 = vld [vmem:[#allocation53_spill] sm:$0xff]  ;;  %v9856_v24 = vld [vmem:[#allocation228_spill] sm:$0xff] }
 0x286   :  { %v5336_v38 = vsel %vm9850_vm2, %v9774_v47, inf  ;;  %v5342_v46 = vsel %vm9852_vm5, %v4959_v34, inf  ;;  %vm9855_vm4 = vcmp.lt.s32.totalorder %v9854_v11, %v9669_v7  ;;  %v1179_v53 = vmax.f32 %v1178_v22, %v9856_v24  ;;  %v2731_v47 = vld [vmem:[#allocation2 + $0x298] sm:$0xff]  ;;  %v9868_v22 = vld [vmem:[#allocation229_spill] sm:$0xff] }
 0x287   :  { %v5348_v57 = vsel %vm9855_vm4, %v9853_v20, inf  ;;  %v1548_v51 = vmin.f32 %v1547_v12, %v1385_v28  ;;  %v5352_v16 = vsub.f32 %v2730_v17, %v5287_v19  ;;  %v5355_v56 = vsub.f32 %v2731_v47, %v5287_v19  ;;  %v9859_v34 = vld [vmem:[#allocation39_spill] sm:$0xff]  ;;  %v9861_v20 = vld [vmem:[#allocation40_spill] sm:$0xff]  ;;  %v9869_v28 = vld [vmem:[#allocation57_spill] sm:$0xff] }
 0x288   :  { %vm9860_vm3 = vcmp.lt.s32.totalorder %v9859_v34, %v9669_v7  ;;  %vm9862_vm10 = vcmp.lt.s32.totalorder %v9861_v20, %v9669_v7  ;;  %vm9864_vm12 = vcmp.lt.s32.totalorder %v9794_v15, %v9669_v7  ;;  %vm9866_vm9 = vcmp.lt.s32.totalorder %v9797_v55, %v9669_v7  ;;  %v9873_v20 = vld [vmem:[#allocation44_spill] sm:$0xff] }
 0x289   :  { %9857 = vst [vmem:[#allocation64_spill] sm:$0xff] %v5352_v16  ;;  %9858 = vst [vmem:[#allocation228_spill] sm:$0xff] %v5355_v56  ;;  %v5361_v45 = vsel %vm9860_vm3, %v9786_v0, inf  ;;  %v5367_v24 = vsel %vm9862_vm10, %v9790_v58, inf  ;;  %v5373_v12 = vsel %vm9864_vm12, %v4975_v62, inf  ;;  %v5379_v17 = vsel %vm9866_vm9, %v4984_v33, inf }
 0x28a   :  { %9863 = vst [vmem:[#allocation250_spill] sm:$0xff] %v5367_v24  ;;  %9865 = vst [vmem:[#allocation251_spill] sm:$0xff] %v5373_v12  ;;  %v1180_v47 = vmax.f32 %v1179_v53, %v9868_v22  ;;  %v9870_v0 = vld [vmem:[#allocation43_spill] sm:$0xff]  ;;  %v1414_v62 = vsel %vm291_vm6, %v5028_v3, inf  ;;  %v1549_v15 = vmin.f32 %v1548_v51, %v1386_v40  ;;  %vm9874_vm14 = vcmp.lt.s32.totalorder %v9873_v20, %v9669_v7  ;;  %v9878_v22 = vld [vmem:[#allocation46_spill] sm:$0xff] }
 0x28b   :  { %9867 = vst [vmem:[#allocation252_spill] sm:$0xff] %v5379_v17  ;;  %vm9871_vm8 = vcmp.lt.s32.totalorder %v9870_v0, %v9669_v7  ;;  %v5396_v33 = vsel %vm9874_vm14, %v4992_v10, inf  ;;  %vm9876_vm15 = vcmp.lt.s32.totalorder %v9809_v59, %v9669_v7  ;;  %vm9879_vm2 = vcmp.lt.s32.totalorder %v9878_v22, %v9669_v7  ;;  %v2732_v3 = vld [vmem:[#allocation2 + $0x2a0] sm:$0xff]  ;;  %v9882_v40 = vld [vmem:[#allocation230_spill] sm:$0xff]  ;;  %v9888_v22 = vld [vmem:[#allocation61_spill] sm:$0xff] }
 0x28c   :  { %v5386_v58 = vsel %vm9871_vm8, %v9869_v28, inf  ;;  %9875 = vst [vmem:[#allocation253_spill] sm:$0xff] %v5396_v33  ;;  %v5402_v53 = vsel %vm9876_vm15, %v5008_v2, inf  ;;  %v5408_v28 = vsel %vm9879_vm2, %v5012_v50, inf  ;;  %v5411_v51 = vsub.f32 %v2732_v3, %v5287_v19  ;;  %v9883_v20 = vld [vmem:[#allocation8_spill] sm:$0xff]  ;;  %v9886_v2 = vld [vmem:[#allocation9_spill] sm:$0xff] }
 0x28d   :  { %9872 = vst [vmem:[#allocation229_spill] sm:$0xff] %v5386_v58  ;;  %9877 = vst [vmem:[#allocation254_spill] sm:$0xff] %v5402_v53  ;;  %v1181_v9 = vmax.f32 %v1180_v47, %v9882_v40  ;;  %v1550_v10 = vmin.f32 %v1549_v15, %v1387_v54  ;;  %v9884_v0 = vld [vmem:[#allocation52_spill] sm:$0xff]  ;;  %v5426_v34 = vsel %vm288_vm7, %v9888_v22, inf  ;;  %vm9891_vm4 = vcmp.lt.s32.totalorder %v9820_v6, %v9669_v7  ;;  %v9896_v47 = vld [vmem:[#allocation231_spill] sm:$0xff] }
 0x28e   :  { %9880 = vst [vmem:[#allocation255_spill] sm:$0xff] %v5408_v28  ;;  %9881 = vst [vmem:[#allocation256_spill] sm:$0xff] %v5411_v51  ;;  %vm9885_vm6 = vcmp.lt.s32.totalorder %v9883_v20, %v9884_v0  ;;  %vm9887_vm5 = vcmp.lt.s32.totalorder %v9886_v2, %v9884_v0  ;;  %v5432_v54 = vsel %vm9891_vm4, %v5020_v8, inf  ;;  %vm9893_vm3 = vcmp.lt.s32.totalorder %v9823_v39, %v9669_v7  ;;  %v2733_v22 = vld [vmem:[#allocation2 + $0x2a8] sm:$0xff]  ;;  %v2735_v6 = vld [vmem:[#allocation2 + $0x2b8] sm:$0xff] }
 0x28f   :  { %v1456_v59 = vsel %vm9885_vm6, %v5352_v16, inf  ;;  %v1457_v55 = vsel %vm9887_vm5, %v5355_v56, inf  ;;  %9890 = vst [vmem:[#allocation230_spill] sm:$0xff] %v5426_v34  ;;  %9892 = vst [vmem:[#allocation52_spill] sm:$0xff] %v5432_v54  ;;  %v5438_v3 = vsel %vm9893_vm3, %v5024_v30, inf  ;;  %v5441_v15 = vsel %vm9192_vm1, %v1414_v62, inf }
 0x290   :  { %9894 = vst [vmem:[#allocation257_spill] sm:$0xff] %v5438_v3  ;;  %9895 = vst [vmem:[#allocation258_spill] sm:$0xff] %v5441_v15  ;;  %v1182_v40 = vmax.f32 %v1181_v9, %v9896_v47  ;;  %v1551_v50 = vmin.f32 %v1550_v10, %v1388_v23  ;;  %v5445_v11 = vsub.f32 %v2733_v22, %v5287_v19  ;;  %v2734_v34 = vld [vmem:[#allocation2 + $0x2b0] sm:$0xff]  ;;  %v2736_v7 = vld [vmem:[#allocation2 + $0x2c0] sm:$0xff] }
 0x291   :  { %v5448_v8 = vsub.f32 %v2734_v34, %v5287_v19  ;;  %v5451_v54 = vsub.f32 %v2735_v6, %v5287_v19  ;;  %v5454_v30 = vsub.f32 %v2736_v7, %v5287_v19  ;;  %v2737_v62 = vld [vmem:[#allocation2 + $0x2c8] sm:$0xff]  ;;  %v1624_v10 = vmin.f32 %v1456_v59, %v1457_v55  ;;  %v9902_v23 = vld [vmem:[#allocation232_spill] sm:$0xff]  ;;  %v2738_v39 = vld [vmem:[#allocation2 + $0x2d0] sm:$0xff] }
 0x292   :  { %9897 = vst [vmem:[#allocation231_spill] sm:$0xff] %v5445_v11  ;;  %v5457_v9 = vsub.f32 %v2737_v62, %v5287_v19  ;;  %v1183_v22 = vmax.f32 %v1182_v40, %v9902_v23  ;;  %v1552_v47 = vmin.f32 %v1551_v50, %v5267_v43  ;;  %v5462_v34 = vsub.f32 %v2738_v39, %v5287_v19  ;;  %v9904_v6 = vld [vmem:[#allocation11_spill] sm:$0xff]  ;;  %v2740_v62 = vld [vmem:[#allocation2 + $0x2e0] sm:$0xff]  ;;  %v2741_v55 = vld [vmem:[#allocation2 + $0x2e8] sm:$0xff] }
 0x293   :  { %9898 = vst [vmem:[#allocation259_spill] sm:$0xff] %v5448_v8  ;;  %9899 = vst [vmem:[#allocation260_spill] sm:$0xff] %v5451_v54  ;;  %vm9905_vm7 = vcmp.lt.s32.totalorder %v9904_v6, %v9884_v0  ;;  %v2739_v7 = vld [vmem:[#allocation2 + $0x2d8] sm:$0xff]  ;;  %v5472_v59 = vsub.f32 %v2740_v62, %v5287_v19  ;;  %v5475_v50 = vsub.f32 %v2741_v55, %v5287_v19  ;;  %v9909_v39 = vld [vmem:[#allocation233_spill] sm:$0xff] }
 0x294   :  { %9900 = vst [vmem:[#allocation261_spill] sm:$0xff] %v5454_v30  ;;  %9901 = vst [vmem:[#allocation262_spill] sm:$0xff] %v5457_v9  ;;  %v1458_v15 = vsel %vm9905_vm7, %v5411_v51, inf  ;;  %v5469_v3 = vsub.f32 %v2739_v7, %v5287_v19  ;;  %v1184_v40 = vmax.f32 %v1183_v22, %v9909_v39  ;;  %v1553_v23 = vmin.f32 %v1552_v47, %v5273_v25  ;;  %v2742_v28 = vld [vmem:[#allocation2 + $0x2f0] sm:$0xff]  ;;  %v9911_v7 = vld [vmem:[#allocation12_spill] sm:$0xff] }
 0x295   :  { %9903 = vst [vmem:[#allocation232_spill] sm:$0xff] %v5462_v34  ;;  %9907 = vst [vmem:[#allocation263_spill] sm:$0xff] %v5472_v59  ;;  %v1625_v43 = vmin.f32 %v1624_v10, %v1458_v15  ;;  %v5480_v53 = vsub.f32 %v2742_v28, %v5287_v19  ;;  %vm9912_vm10 = vcmp.lt.s32.totalorder %v9911_v7, %v9884_v0  ;;  %v2743_v62 = vld [vmem:[#allocation2 + $0x2f8] sm:$0xff]  ;;  %v2744_v55 = vld [vmem:[#allocation2 + $0x300] sm:$0xff] }
 0x296   :  { %9906 = vst [vmem:[#allocation11_spill] sm:$0xff] %v5469_v3  ;;  %9908 = vst [vmem:[#allocation264_spill] sm:$0xff] %v5475_v50  ;;  %v1459_v33 = vsel %vm9912_vm10, %v5445_v11, inf  ;;  %v5487_v58 = vsub.f32 %v2743_v62, %v5287_v19  ;;  %v5490_v15 = vsub.f32 %v2744_v55, %v5287_v19  ;;  %v2745_v10 = vld [vmem:[#allocation2 + $0x308] sm:$0xff]  ;;  %v9916_v28 = vld [vmem:[#allocation234_spill] sm:$0xff]  ;;  %v1554_v39 = vmin.f32 %v1553_v23, %v5279_v41 }
 0x297   :  { %9910 = vst [vmem:[#allocation233_spill] sm:$0xff] %v5480_v53  ;;  %v5493_v25 = vsub.f32 %v2745_v10, %v5287_v19  ;;  %v1626_v22 = vmin.f32 %v1625_v43, %v1459_v33  ;;  %v1185_v47 = vmax.f32 %v1184_v40, %v9916_v28  ;;  %v5498_v52 = vsub.f32 %v2746_v35, %v5287_v19  ;;  %v9918_v62 = vld [vmem:[#allocation13_spill] sm:$0xff]  ;;  %v2747_v55 = vld [vmem:[#allocation2 + $0x318] sm:$0xff]  ;;  %v2748_v10 = vld [vmem:[#allocation2 + $0x320] sm:$0xff] }
 0x298   :  { %9913 = vst [vmem:[#allocation12_spill] sm:$0xff] %v5487_v58  ;;  %9914 = vst [vmem:[#allocation265_spill] sm:$0xff] %v5490_v15  ;;  %vm9919_vm12 = vcmp.lt.s32.totalorder %v9918_v62, %v9884_v0  ;;  %v5505_v12 = vsub.f32 %v2747_v55, %v5287_v19  ;;  %v5508_v33 = vsub.f32 %v2748_v10, %v5287_v19  ;;  %v2749_v43 = vld [vmem:[#allocation2 + $0x328] sm:$0xff]  ;;  %v9923_v35 = vld [vmem:[#allocation235_spill] sm:$0xff] }
 0x299   :  { %9915 = vst [vmem:[#allocation266_spill] sm:$0xff] %v5493_v25  ;;  %9917 = vst [vmem:[#allocation234_spill] sm:$0xff] %v5498_v52  ;;  %v1460_v17 = vsel %vm9919_vm12, %v5448_v8, inf  ;;  %v5511_v41 = vsub.f32 %v2749_v43, %v5287_v19  ;;  %v1186_v23 = vmax.f32 %v1185_v47, %v9923_v35  ;;  %v1555_v28 = vmin.f32 %v1554_v39, %v5285_v4  ;;  %v9925_v55 = vld [vmem:[#allocation14_spill] sm:$0xff]  ;;  %v2751_v10 = vld [vmem:[#allocation2 + $0x338] sm:$0xff] }
 0x29a   :  { %9920 = vst [vmem:[#allocation13_spill] sm:$0xff] %v5505_v12  ;;  %9921 = vst [vmem:[#allocation267_spill] sm:$0xff] %v5508_v33  ;;  %v1627_v40 = vmin.f32 %v1626_v22, %v1460_v17  ;;  %v5516_v29 = vsub.f32 %v2750_v14, %v5287_v19  ;;  %vm9926_vm9 = vcmp.lt.s32.totalorder %v9925_v55, %v9884_v0  ;;  %v2752_v43 = vld [vmem:[#allocation2 + $0x340] sm:$0xff]  ;;  %v2753_v22 = vld [vmem:[#allocation2 + $0x348] sm:$0xff] }
 0x29b   :  { %9922 = vst [vmem:[#allocation268_spill] sm:$0xff] %v5511_v41  ;;  %v1461_v24 = vsel %vm9926_vm9, %v5451_v54, inf  ;;  %v5523_v33 = vsub.f32 %v2751_v10, %v5287_v19  ;;  %v5526_v17 = vsub.f32 %v2752_v43, %v5287_v19  ;;  %v5529_v4 = vsub.f32 %v2753_v22, %v5287_v19  ;;  %v9930_v14 = vld [vmem:[#allocation236_spill] sm:$0xff]  ;;  %v9932_v10 = vld [vmem:[#allocation15_spill] sm:$0xff]  ;;  %v9961_v2 = vld [vmem:[#allocation241_spill] sm:$0xff] }
 0x29c   :  { %9924 = vst [vmem:[#allocation235_spill] sm:$0xff] %v5516_v29  ;;  %v1628_v47 = vmin.f32 %v1627_v40, %v1461_v24  ;;  %v1187_v39 = vmax.f32 %v1186_v23, %v9930_v14  ;;  %v1556_v35 = vmin.f32 %v1555_v28, %v5293_v31  ;;  %v2754_v29 = vld [vmem:[#allocation2 + $0x350] sm:$0xff]  ;;  %vm9933_vm8 = vcmp.lt.s32.totalorder %v9932_v10, %v9884_v0  ;;  %v2755_v43 = vld [vmem:[#allocation2 + $0x358] sm:$0xff]  ;;  %v2756_v22 = vld [vmem:[#allocation2 + $0x360] sm:$0xff] }
 0x29d   :  { %9927 = vst [vmem:[#allocation14_spill] sm:$0xff] %v5523_v33  ;;  %9928 = vst [vmem:[#allocation269_spill] sm:$0xff] %v5526_v17  ;;  %v5534_v41 = vsub.f32 %v2754_v29, %v5287_v19  ;;  %v1462_v33 = vsel %vm9933_vm8, %v5454_v30, inf  ;;  %v5541_v17 = vsub.f32 %v2755_v43, %v5287_v19  ;;  %v5544_v24 = vsub.f32 %v2756_v22, %v5287_v19  ;;  %v2757_v40 = vld [vmem:[#allocation2 + $0x368] sm:$0xff]  ;;  %v2759_v22 = vld [vmem:[#allocation2 + $0x378] sm:$0xff] }
 0x29e   :  { %9929 = vst [vmem:[#allocation270_spill] sm:$0xff] %v5529_v4  ;;  %v5547_v31 = vsub.f32 %v2757_v40, %v5287_v19  ;;  %v1629_v23 = vmin.f32 %v1628_v47, %v1462_v33  ;;  %v9937_v29 = vld [vmem:[#allocation237_spill] sm:$0xff]  ;;  %v1557_v14 = vmin.f32 %v1556_v35, %v5299_v1  ;;  %vm9939_vm14 = vcmp.lt.s32.totalorder %v9818_v60, %v9884_v0  ;;  %v2760_v40 = vld [vmem:[#allocation2 + $0x380] sm:$0xff] }
 0x29f   :  { %9931 = vst [vmem:[#allocation236_spill] sm:$0xff] %v5534_v41  ;;  %9934 = vst [vmem:[#allocation15_spill] sm:$0xff] %v5541_v17  ;;  %v1188_v28 = vmax.f32 %v1187_v39, %v9937_v29  ;;  %v2758_v41 = vld [vmem:[#allocation2 + $0x370] sm:$0xff]  ;;  %v1463_v43 = vsel %vm9939_vm14, %v5457_v9, inf  ;;  %v5562_v33 = vsub.f32 %v2760_v40, %v5287_v19  ;;  %v2761_v47 = vld [vmem:[#allocation2 + $0x388] sm:$0xff]  ;;  %vm9945_vm15 = vcmp.lt.s32.totalorder %v9453_v44, %v9884_v0 }
 0x2a0   :  { %9935 = vst [vmem:[#allocation271_spill] sm:$0xff] %v5544_v24  ;;  %9936 = vst [vmem:[#allocation272_spill] sm:$0xff] %v5547_v31  ;;  %v5552_v4 = vsub.f32 %v2758_v41, %v5287_v19  ;;  %v5559_v24 = vsub.f32 %v2759_v22, %v5287_v19  ;;  %v5565_v1 = vsub.f32 %v2761_v47, %v5287_v19  ;;  %v9943_v41 = vld [vmem:[#allocation238_spill] sm:$0xff]  ;;  %v1464_v22 = vsel %vm9945_vm15, %v5462_v34, inf  ;;  %v2763_v40 = vld [vmem:[#allocation2 + $0x398] sm:$0xff] }
 0x2a1   :  { %9941 = vst [vmem:[#allocation274_spill] sm:$0xff] %v5562_v33  ;;  %v1630_v39 = vmin.f32 %v1629_v23, %v1463_v43  ;;  %v1189_v35 = vmax.f32 %v1188_v28, %v9943_v41  ;;  %v1558_v29 = vmin.f32 %v1557_v14, %v5305_v49  ;;  %v5577_v33 = vsub.f32 %v2763_v40, %v5287_v19  ;;  %v2764_v47 = vld [vmem:[#allocation2 + $0x3a0] sm:$0xff]  ;;  %v9949_v28 = vld [vmem:[#allocation239_spill] sm:$0xff] }
 0x2a2   :  { %9938 = vst [vmem:[#allocation237_spill] sm:$0xff] %v5552_v4  ;;  %9940 = vst [vmem:[#allocation273_spill] sm:$0xff] %v5559_v24  ;;  %v2762_v4 = vld [vmem:[#allocation2 + $0x390] sm:$0xff]  ;;  %v5580_v23 = vsub.f32 %v2764_v47, %v5287_v19  ;;  %vm9948_vm2 = vcmp.lt.s32.totalorder %v9456_v63, %v9884_v0  ;;  %v1080_v41 = vsel %vm9885_vm6, %v5352_v16, -inf  ;;  %v1081_v40 = vsel %vm9887_vm5, %v5355_v56, -inf  ;;  %v2765_v47 = vld [vmem:[#allocation2 + $0x3a8] sm:$0xff] }
 0x2a3   :  { %9942 = vst [vmem:[#allocation275_spill] sm:$0xff] %v5565_v1  ;;  %v5570_v31 = vsub.f32 %v2762_v4, %v5287_v19  ;;  %9946 = vst [vmem:[#allocation276_spill] sm:$0xff] %v5577_v33  ;;  %v1465_v49 = vsel %vm9948_vm2, %v5469_v3, inf  ;;  %v1631_v4 = vmin.f32 %v1630_v39, %v1464_v22  ;;  %v1190_v14 = vmax.f32 %v1189_v35, %v9949_v28  ;;  %v2766_v33 = vld [vmem:[#allocation2 + $0x3b0] sm:$0xff]  ;;  %v2767_v35 = vld [vmem:[#allocation2 + $0x3b8] sm:$0xff] }
 0x2a4   :  { %9947 = vst [vmem:[#allocation277_spill] sm:$0xff] %v5580_v23  ;;  %v1559_v43 = vmin.f32 %v1558_v29, %v5311_v61  ;;  %v5597_v23 = vsub.f32 %v2765_v47, %v5287_v19  ;;  %v5600_v39 = vsub.f32 %v2766_v33, %v5287_v19  ;;  %v5603_v61 = vsub.f32 %v2767_v35, %v5287_v19  ;;  %v9953_v22 = vld [vmem:[#allocation240_spill] sm:$0xff] }
 0x2a5   :  { %9944 = vst [vmem:[#allocation238_spill] sm:$0xff] %v5570_v31  ;;  %v1632_v29 = vmin.f32 %v1631_v4, %v1465_v49  ;;  %v1191_v28 = vmax.f32 %v1190_v14, %v9953_v22  ;;  %v2768_v20 = vld [vmem:[#allocation2 + $0x3c0] sm:$0xff]  ;;  %vm9955_vm4 = vcmp.lt.s32.totalorder %v2929_v36, %v9884_v0  ;;  %vm9956_vm3 = vcmp.lt.s32.totalorder %v2932_v37, %v9884_v0  ;;  %v9957_v4 = vld [vmem:[#allocation129_spill] sm:$0xff]  ;;  %v9959_v22 = vld [vmem:[#allocation18_spill] sm:$0xff] }
 0x2a6   :  { %9950 = vst [vmem:[#allocation239_spill] sm:$0xff] %v5597_v23  ;;  %9951 = vst [vmem:[#allocation278_spill] sm:$0xff] %v5600_v39  ;;  %v1560_v16 = vmin.f32 %v1559_v43, %v5318_v42  ;;  %v5608_v56 = vsub.f32 %v2768_v20, %v5287_v19  ;;  %v1466_v47 = vsel %vm9955_vm4, %v5472_v59, inf  ;;  %v1467_v33 = vsel %vm9956_vm3, %v5475_v50, inf  ;;  %v9958_v14 = vld [vmem:[#allocation120_spill] sm:$0xff]  ;;  %v9962_v39 = vld [vmem:[#allocation201_spill] sm:$0xff] }
 0x2a7   :  { %9952 = vst [vmem:[#allocation279_spill] sm:$0xff] %v5603_v61  ;;  %v1633_v35 = vmin.f32 %v1632_v29, %v1466_v47  ;;  %v1248_v49 = vmax.f32 %v1080_v41, %v1081_v40  ;;  %v9960_v42 = vmin.f32 %v9958_v14, %v9959_v22  ;;  %v1192_v20 = vmax.f32 %v1191_v28, %v9961_v2  ;;  %v9963_v23 = vld [vmem:[#allocation122_spill] sm:$0xff]  ;;  %v9971_v22 = vld [vmem:[#allocation243_spill] sm:$0xff] }
 0x2a8   :  { %9954 = vst [vmem:[#allocation240_spill] sm:$0xff] %v5608_v56  ;;  %v1561_v56 = vmin.f32 %v1560_v16, %v5324_v18  ;;  %v1082_v61 = vsel %vm9905_vm7, %v5411_v51, -inf  ;;  %v1297_v31 = vmax.f32 %v9963_v23, %v9962_v39  ;;  %vm9964_vm10 = vcmp.lt.s32.totalorder %v9831_v5, %v9884_v0  ;;  %v9965_v47 = vld [vmem:[#allocation130_spill] sm:$0xff] }
 0x2a9   :  { %v1598_v43 = vmin.f32 %v9960_v42, %v9957_v4  ;;  %v1468_v41 = vsel %vm9964_vm10, %v5480_v53, inf  ;;  %v1634_v40 = vmin.f32 %v1633_v35, %v1467_v33  ;;  %v1249_v29 = vmax.f32 %v1248_v49, %v1082_v61  ;;  %v9966_v2 = vld [vmem:[#allocation242_spill] sm:$0xff]  ;;  %v9970_v35 = vld [vmem:[#allocation131_spill] sm:$0xff] }
 0x2aa   :  { %v1193_v28 = vmax.f32 %v1192_v20, %v9966_v2  ;;  %v1562_v16 = vmin.f32 %v1561_v56, %v5330_v26  ;;  %vm9967_vm12 = vcmp.lt.s32.totalorder %v9911_v7, %v9884_v0  ;;  %v9968_v14 = vld [vmem:[#allocation202_spill] sm:$0xff]  ;;  %vm9969_vm9 = vcmp.lt.s32.totalorder %v9833_v21, %v9884_v0 }
 0x2ab   :  { %v1599_v4 = vmin.f32 %v1598_v43, %v9965_v47  ;;  %v1083_v18 = vsel %vm9967_vm12, %v5445_v11, -inf  ;;  %v1299_v23 = vmax.f32 %v1297_v31, %v9968_v14  ;;  %v1469_v39 = vsel %vm9969_vm9, %v5487_v58, inf  ;;  %v9973_v43 = vld [vmem:[#allocation203_spill] sm:$0xff]  ;;  %v10059_v51 = vld [vmem:[#allocation38_spill] sm:$0xff] }
 0x2ac   :  { %v1635_v33 = vmin.f32 %v1634_v40, %v1468_v41  ;;  %v1250_v61 = vmax.f32 %v1249_v29, %v1083_v18  ;;  %v1194_v42 = vmax.f32 %v1193_v28, %v9971_v22  ;;  %v1563_v56 = vmin.f32 %v1562_v16, %v5336_v38  ;;  %v9975_v29 = vld [vmem:[#allocation132_spill] sm:$0xff]  ;;  %v9978_v16 = vld [vmem:[#allocation121_spill] sm:$0xff] }
 0x2ad   :  { %v1600_v49 = vmin.f32 %v1599_v4, %v9970_v35  ;;  %vm9972_vm8 = vcmp.lt.s32.totalorder %v9918_v62, %v9884_v0  ;;  %v1301_v31 = vmax.f32 %v1299_v23, %v9973_v43  ;;  %vm9974_vm14 = vcmp.lt.s32.totalorder %v9305_v13, %v9884_v0  ;;  %v9976_v4 = vld [vmem:[#allocation244_spill] sm:$0xff] }
 0x2ae   :  { %v1084_v26 = vsel %vm9972_vm8, %v5448_v8, -inf  ;;  %v1470_v20 = vsel %vm9974_vm14, %v5490_v15, inf  ;;  %v1636_v41 = vmin.f32 %v1635_v33, %v1469_v39  ;;  %v1195_v2 = vmax.f32 %v1194_v42, %v9976_v4  ;;  %v9983_v42 = vld [vmem:[#allocation204_spill] sm:$0xff]  ;;  %v10054_v8 = vld [vmem:[#allocation37_spill] sm:$0xff] }
 0x2af   :  { %v1251_v40 = vmax.f32 %v1250_v61, %v1084_v26  ;;  %v1601_v47 = vmin.f32 %v1600_v49, %v9975_v29  ;;  %v1564_v38 = vmin.f32 %v1563_v56, %v5342_v46  ;;  %vm9977_vm15 = vcmp.lt.s32.totalorder %v9925_v55, %v9884_v0  ;;  %v9981_v46 = vld [vmem:[#allocation245_spill] sm:$0xff] }
 0x2b0   :  { %v1085_v28 = vsel %vm9977_vm15, %v5451_v54, -inf  ;;  %v1303_v18 = vmax.f32 %v1301_v31, %v9978_v16  ;;  %vm9979_vm2 = vcmp.lt.s32.totalorder %v9306_v32, %v9884_v0  ;;  %v1637_v23 = vmin.f32 %v1636_v41, %v1470_v20  ;;  %v9982_v49 = vld [vmem:[#allocation133_spill] sm:$0xff]  ;;  %v10052_v54 = vld [vmem:[#allocation138_spill] sm:$0xff] }
 0x2b1   :  { %v1471_v14 = vsel %vm9979_vm2, %v5493_v25, inf  ;;  %vm9980_vm6 = vcmp.lt.s32.totalorder %v9932_v10, %v9884_v0  ;;  %v1252_v33 = vmax.f32 %v1251_v40, %v1085_v28  ;;  %v1196_v61 = vmax.f32 %v1195_v2, %v9981_v46  ;;  %v2769_v26 = vld [vmem:[#allocation2 + $0x3c8] sm:$0xff]  ;;  %v9986_v40 = vld [vmem:[#allocation246_spill] sm:$0xff] }
 0x2b2   :  { %v1086_v39 = vsel %vm9980_vm6, %v5454_v30, -inf  ;;  %v1565_v35 = vmin.f32 %v1564_v38, %v5348_v57  ;;  %v1602_v22 = vmin.f32 %v1601_v47, %v9982_v49  ;;  %v1305_v56 = vmax.f32 %v1303_v18, %v9983_v42  ;;  %v9988_v47 = vld [vmem:[#allocation205_spill] sm:$0xff]  ;;  %v9995_v49 = vld [vmem:[#allocation267_spill] sm:$0xff] }
 0x2b3   :  { %v5679_v43 = vsub.f32 %v2769_v26, %v5287_v19  ;;  %vm9985_vm5 = vcmp.lt.s32.totalorder %v9307_v27, %v9884_v0  ;;  %v1638_v20 = vmin.f32 %v1637_v23, %v1471_v14  ;;  %v1253_v41 = vmax.f32 %v1252_v33, %v1086_v39  ;;  %v9992_v23 = vld [vmem:[#allocation250_spill] sm:$0xff]  ;;  %v9996_v42 = vld [vmem:[#allocation27_spill] sm:$0xff]  ;;  %v9998_v26 = vld [vmem:[#allocation268_spill] sm:$0xff] }
 0x2b4   :  { %v1472_v31 = vsel %vm9985_vm5, %v5498_v52, inf  ;;  %v1197_v29 = vmax.f32 %v1196_v61, %v9986_v40  ;;  %v1566_v4 = vmin.f32 %v1565_v35, %v5361_v45  ;;  %vm9987_vm4 = vcmp.lt.s32.totalorder %v9818_v60, %v9884_v0  ;;  %v9991_v45 = vld [vmem:[#allocation247_spill] sm:$0xff]  ;;  %v9993_v33 = vld [vmem:[#allocation134_spill] sm:$0xff] }
 0x2b5   :  { %9984 = vst [vmem:[#allocation129_spill] sm:$0xff] %v5679_v43  ;;  %v1087_v57 = vsel %vm9987_vm4, %v5457_v9, -inf  ;;  %v1307_v2 = vmax.f32 %v1305_v56, %v9988_v47  ;;  %vm9989_vm3 = vcmp.lt.s32.totalorder %v9308_v48, %v9884_v0  ;;  %v1639_v28 = vmin.f32 %v1638_v20, %v1472_v31  ;;  %v9994_v61 = vld [vmem:[#allocation51_spill] sm:$0xff]  ;;  %v9999_v31 = vld [vmem:[#allocation28_spill] sm:$0xff]  ;;  %v10011_v9 = vld [vmem:[#allocation29_spill] sm:$0xff] }
 0x2b6   :  { %v1473_v38 = vsel %vm9989_vm3, %v5505_v12, inf  ;;  %vm9990_vm7 = vcmp.lt.s32.totalorder %v9453_v44, %v9884_v0  ;;  %v1254_v18 = vmax.f32 %v1253_v41, %v1087_v57  ;;  %v1198_v14 = vmax.f32 %v1197_v29, %v9991_v45  ;;  %v10001_v57 = vld [vmem:[#allocation16_spill] sm:$0xff]  ;;  %v10002_v47 = vld [vmem:[#allocation251_spill] sm:$0xff] }
 0x2b7   :  { %v1088_v16 = vsel %vm9990_vm7, %v5462_v34, -inf  ;;  %v1567_v39 = vmin.f32 %v1566_v4, %v9992_v23  ;;  %v1603_v46 = vmin.f32 %v1602_v22, %v9993_v33  ;;  %v1309_v35 = vmax.f32 %v1307_v2, %v9994_v61  ;;  %v10004_v2 = vld [vmem:[#allocation207_spill] sm:$0xff] }
 0x2b8   :  { %vm9997_vm10 = vcmp.lt.s32.totalorder %v9996_v42, %v9884_v0  ;;  %vm10000_vm12 = vcmp.lt.s32.totalorder %v9999_v31, %v9884_v0  ;;  %v1640_v40 = vmin.f32 %v1639_v28, %v1473_v38  ;;  %v1255_v41 = vmax.f32 %v1254_v18, %v1088_v16  ;;  %v10006_v38 = vld [vmem:[#allocation114_spill] sm:$0xff]  ;;  %v10007_v16 = vld [vmem:[#allocation248_spill] sm:$0xff] }
 0x2b9   :  { %v1474_v56 = vsel %vm9997_vm10, %v9995_v49, inf  ;;  %v1475_v20 = vsel %vm10000_vm12, %v9998_v26, inf  ;;  %v1199_v29 = vmax.f32 %v1198_v14, %v10001_v57  ;;  %v1568_v4 = vmin.f32 %v1567_v39, %v10002_v47  ;;  %v10008_v14 = vld [vmem:[#allocation252_spill] sm:$0xff]  ;;  %v10009_v57 = vld [vmem:[#allocation135_spill] sm:$0xff] }
 0x2ba   :  { %vm10003_vm9 = vcmp.lt.s32.totalorder %v9456_v63, %v9884_v0  ;;  %v1311_v45 = vmax.f32 %v1309_v35, %v10004_v2  ;;  %v1641_v23 = vmin.f32 %v1640_v40, %v1474_v56  ;;  %vm10005_vm8 = vcmp.lt.s32.totalorder %v2929_v36, %v9884_v0  ;;  %v10013_v2 = vld [vmem:[#allocation115_spill] sm:$0xff] }
 0x2bb   :  { %v1089_v22 = vsel %vm10003_vm9, %v5469_v3, -inf  ;;  %v1090_v33 = vsel %vm10005_vm8, %v5472_v59, -inf  ;;  %v1312_v28 = vsel %vm713_vm11, %v10006_v38, -inf  ;;  %v1200_v18 = vmax.f32 %v1199_v29, %v10007_v16  ;;  %v10010_v3 = vld [vmem:[#allocation235_spill] sm:$0xff]  ;;  %v10015_v38 = vld [vmem:[#allocation229_spill] sm:$0xff] }
 0x2bc   :  { %v1256_v61 = vmax.f32 %v1255_v41, %v1089_v22  ;;  %v1569_v39 = vmin.f32 %v1568_v4, %v10008_v14  ;;  %v1604_v47 = vmin.f32 %v1603_v46, %v10009_v57  ;;  %v1313_v34 = vmax.f32 %v1311_v45, %v1312_v28  ;;  %v10014_v22 = vld [vmem:[#allocation249_spill] sm:$0xff]  ;;  %v10017_v4 = vld [vmem:[#allocation14_spill] sm:$0xff] }
 0x2bd   :  { %vm10012_vm14 = vcmp.lt.s32.totalorder %v10011_v9, %v9884_v0  ;;  %v1642_v56 = vmin.f32 %v1641_v23, %v1475_v20  ;;  %v1314_v41 = vsel %vm713_vm11, %v10013_v2, -inf  ;;  %v1202_v59 = vmax.f32 %v1200_v18, %v10014_v22  ;;  %v10018_v45 = vld [vmem:[#allocation30_spill] sm:$0xff]  ;;  %v10021_v16 = vld [vmem:[#allocation253_spill] sm:$0xff] }
 0x2be   :  { %v1476_v35 = vsel %vm10012_vm14, %v10010_v3, inf  ;;  %v1257_v40 = vmax.f32 %v1256_v61, %v1090_v33  ;;  %v1570_v30 = vmin.f32 %v1569_v39, %v10015_v38  ;;  %vm10016_vm15 = vcmp.lt.s32.totalorder %v2932_v37, %v9884_v0  ;;  %v10020_v33 = vld [vmem:[#allocation116_spill] sm:$0xff]  ;;  %v2770_v2 = vld [vmem:[#allocation2 + $0x3d0] sm:$0xff]  ;;  %v10088_v37 = vld [vmem:[#allocation45_spill] sm:$0xff] }
 0x2bf   :  { %v1091_v46 = vsel %vm10016_vm15, %v5475_v50, -inf  ;;  %v1315_v29 = vmax.f32 %v1313_v34, %v1314_v41  ;;  %vm10019_vm2 = vcmp.lt.s32.totalorder %v10018_v45, %v9884_v0  ;;  %v1643_v20 = vmin.f32 %v1642_v56, %v1476_v35  ;;  %1203 = vmax.xlane.f32.xlu0 %v1202_v59  ;;  %v10023_v39 = vld [vmem:[#allocation136_spill] sm:$0xff]  ;;  %v10026_v59 = vld [vmem:[#allocation254_spill] sm:$0xff] }
 0x2c0   :  { %v1477_v28 = vsel %vm10019_vm2, %v10017_v4, inf  ;;  %v1258_v23 = vmax.f32 %v1257_v40, %v1091_v46  ;;  %v1316_v61 = vsel %vm713_vm11, %v10020_v33, -inf  ;;  %v1571_v18 = vmin.f32 %v1570_v30, %v10021_v16  ;;  %v10025_v40 = vld [vmem:[#allocation181_spill] sm:$0xff]  ;;  %v10028_v46 = vld [vmem:[#allocation31_spill] sm:$0xff]  ;;  %v10034_v16 = vld [vmem:[#allocation182_spill] sm:$0xff] }
 0x2c1   :  { %vm10022_vm6 = vcmp.lt.s32.totalorder %v9831_v5, %v9884_v0  ;;  %v1605_v34 = vmin.f32 %v1604_v47, %v10023_v39  ;;  %v1317_v57 = vmax.f32 %v1315_v29, %v1316_v61  ;;  %v5753_v41 = vsub.f32 %v2770_v2, %v5287_v19  ;;  %v10027_v30 = vld [vmem:[#allocation269_spill] sm:$0xff]  ;;  %v10031_v19 = vld [vmem:[#allocation270_spill] sm:$0xff]  ;;  %v10032_v61 = vld [vmem:[#allocation32_spill] sm:$0xff] }
 0x2c2   :  { %v1092_v14 = vsel %vm10022_vm6, %v5480_v53, -inf  ;;  %v1644_v35 = vmin.f32 %v1643_v20, %v1477_v28  ;;  %v1318_v22 = vsel %vm713_vm11, %v10025_v40, -inf  ;;  %v1572_v38 = vmin.f32 %v1571_v18, %v10026_v59  ;;  %v10037_v40 = vld [vmem:[#allocation137_spill] sm:$0xff]  ;;  %v10087_v5 = vld [vmem:[#allocation239_spill] sm:$0xff] }
 0x2c3   :  { %10024 = vst [vmem:[#allocation120_spill] sm:$0xff] %v5753_v41  ;;  %v1259_v56 = vmax.f32 %v1258_v23, %v1092_v14  ;;  %vm10029_vm5 = vcmp.lt.s32.totalorder %v10028_v46, %v9884_v0  ;;  %vm10030_vm4 = vcmp.lt.s32.totalorder %v9833_v21, %v9884_v0  ;;  %v1319_v29 = vmax.f32 %v1317_v57, %v1318_v22  ;;  %v10035_v14 = vld [vmem:[#allocation255_spill] sm:$0xff]  ;;  %v10038_v22 = vld [vmem:[#allocation236_spill] sm:$0xff] }
 0x2c4   :  { %v1478_v33 = vsel %vm10029_vm5, %v10027_v30, inf  ;;  %v1093_v47 = vsel %vm10030_vm4, %v5487_v58, -inf  ;;  %vm10033_vm3 = vcmp.lt.s32.totalorder %v10032_v61, %v9884_v0  ;;  %v1320_v18 = vsel %vm713_vm11, %v10034_v16, -inf  ;;  %v10039_v58 = vld [vmem:[#allocation34_spill] sm:$0xff] }
 0x2c5   :  { %v1479_v28 = vsel %vm10033_vm3, %v10031_v19, inf  ;;  %v1645_v20 = vmin.f32 %v1644_v35, %v1478_v33  ;;  %v1260_v23 = vmax.f32 %v1259_v56, %v1093_v47  ;;  %v1573_v39 = vmin.f32 %v1572_v38, %v10035_v14  ;;  %v10041_v33 = vld [vmem:[#allocation183_spill] sm:$0xff]  ;;  %v10042_v16 = vld [vmem:[#allocation230_spill] sm:$0xff] }
 0x2c6   :  { %vm10036_vm7 = vcmp.lt.s32.totalorder %v9305_v13, %v9884_v0  ;;  %v1606_v59 = vmin.f32 %v1605_v34, %v10037_v40  ;;  %v1321_v57 = vmax.f32 %v1319_v29, %v1320_v18  ;;  %vm10040_vm10 = vcmp.lt.s32.totalorder %v10039_v58, %v9884_v0  ;;  %v10043_v14 = vld [vmem:[#allocation35_spill] sm:$0xff]  ;;  %v10047_v40 = vld [vmem:[#allocation36_spill] sm:$0xff] }
 0x2c7   :  { %v1094_v2 = vsel %vm10036_vm7, %v5490_v15, -inf  ;;  %v1480_v53 = vsel %vm10040_vm10, %v10038_v22, inf  ;;  %v1646_v35 = vmin.f32 %v1645_v20, %v1479_v28  ;;  %v1322_v47 = vsel %vm713_vm11, %v10041_v33, -inf  ;;  %v10046_v18 = vld [vmem:[#allocation271_spill] sm:$0xff]  ;;  %v10050_v33 = vld [vmem:[#allocation52_spill] sm:$0xff] }
 0x2c8   :  { %v1261_v56 = vmax.f32 %v1260_v23, %v1094_v2  ;;  %v1574_v38 = vmin.f32 %v1573_v39, %v10042_v16  ;;  %vm10044_vm12 = vcmp.lt.s32.totalorder %v10043_v14, %v9884_v0  ;;  %vm10045_vm9 = vcmp.lt.s32.totalorder %v9306_v32, %v9884_v0  ;;  %v10049_v2 = vld [vmem:[#allocation184_spill] sm:$0xff] }
 0x2c9   :  { %v1481_v15 = vsel %vm10044_vm12, %v5541_v17, inf  ;;  %v1095_v34 = vsel %vm10045_vm9, %v5493_v25, -inf  ;;  %v1323_v29 = vmax.f32 %v1321_v57, %v1322_v47  ;;  %vm10048_vm8 = vcmp.lt.s32.totalorder %v10047_v40, %v9884_v0  ;;  %v10053_v47 = vld [vmem:[#allocation272_spill] sm:$0xff] }
 0x2ca   :  { %v1482_v28 = vsel %vm10048_vm8, %v10046_v18, inf  ;;  %v1647_v20 = vmin.f32 %v1646_v35, %v1480_v53  ;;  %v1262_v23 = vmax.f32 %v1261_v56, %v1095_v34  ;;  %v1324_v39 = vsel %vm713_vm11, %v10049_v2, -inf  ;;  %v10056_v56 = vld [vmem:[#allocation185_spill] sm:$0xff]  ;;  %v10083_v13 = vld [vmem:[#allocation44_spill] sm:$0xff] }
 0x2cb   :  { %v1575_v16 = vmin.f32 %v1574_v38, %v10050_v33  ;;  %vm10051_vm14 = vcmp.lt.s32.totalorder %v9307_v27, %v9884_v0  ;;  %v1607_v25 = vmin.f32 %v1606_v59, %v10052_v54  ;;  %v1325_v57 = vmax.f32 %v1323_v29, %v1324_v39  ;;  %v10057_v2 = vld [vmem:[#allocation257_spill] sm:$0xff]  ;;  %v10062_v29 = vld [vmem:[#allocation39_spill] sm:$0xff]  ;;  %v10069_v27 = vld [vmem:[#allocation40_spill] sm:$0xff] }
 0x2cc   :  { %v1096_v50 = vsel %vm10051_vm14, %v5498_v52, -inf  ;;  %vm10055_vm15 = vcmp.lt.s32.totalorder %v10054_v8, %v9884_v0  ;;  %v1648_v53 = vmin.f32 %v1647_v20, %v1481_v15  ;;  %v1326_v34 = vsel %vm713_vm11, %v10056_v56, -inf  ;;  %v10058_v33 = vld [vmem:[#allocation237_spill] sm:$0xff] }
 0x2cd   :  { %v1483_v11 = vsel %vm10055_vm15, %v10053_v47, inf  ;;  %v1263_v35 = vmax.f32 %v1262_v23, %v1096_v50  ;;  %v1576_v38 = vmin.f32 %v1575_v16, %v10057_v2  ;;  %vm10060_vm2 = vcmp.lt.s32.totalorder %v10059_v51, %v9884_v0  ;;  %v10064_v23 = vld [vmem:[#allocation117_spill] sm:$0xff]  ;;  %v10065_v16 = vld [vmem:[#allocation258_spill] sm:$0xff] }
 0x2ce   :  { %v1484_v52 = vsel %vm10060_vm2, %v10058_v33, inf  ;;  %vm10061_vm6 = vcmp.lt.s32.totalorder %v9308_v48, %v9884_v0  ;;  %v1327_v59 = vmax.f32 %v1325_v57, %v1326_v34  ;;  %vm10063_vm5 = vcmp.lt.s32.totalorder %v10062_v29, %v9884_v0  ;;  %v10067_v48 = vld [vmem:[#allocation139_spill] sm:$0xff]  ;;  %v10068_v34 = vld [vmem:[#allocation274_spill] sm:$0xff] }
 0x2cf   :  { %v1097_v54 = vsel %vm10061_vm6, %v5505_v12, -inf  ;;  %v1485_v50 = vsel %vm10063_vm5, %v5559_v24, inf  ;;  %v1649_v15 = vmin.f32 %v1648_v53, %v1482_v28  ;;  %v1328_v39 = vsel %vm713_vm11, %v10064_v23, -inf }
 0x2d0   :  { %v1264_v20 = vmax.f32 %v1263_v35, %v1097_v54  ;;  %v1578_v56 = vmin.f32 %v1576_v38, %v10065_v16  ;;  %vm10066_vm4 = vcmp.lt.s32.totalorder %v9996_v42, %v9884_v0  ;;  %v1608_v12 = vmin.f32 %v1607_v25, %v10067_v48  ;;  %v10071_v35 = vld [vmem:[#allocation186_spill] sm:$0xff]  ;;  %v10072_v38 = vld [vmem:[#allocation41_spill] sm:$0xff] }
 0x2d1   :  { %v1098_v2 = vsel %vm10066_vm4, %v9995_v49, -inf  ;;  %v1329_v57 = vmax.f32 %v1327_v59, %v1328_v39  ;;  %vm10070_vm3 = vcmp.lt.s32.totalorder %v10069_v27, %v9884_v0  ;;  %v1650_v28 = vmin.f32 %v1649_v15, %v1483_v11  ;;  %v10074_v16 = vld [vmem:[#allocation238_spill] sm:$0xff]  ;;  %v10078_v59 = vld [vmem:[#allocation276_spill] sm:$0xff]  ;;  %v10079_v15 = vld [vmem:[#allocation43_spill] sm:$0xff] }
 0x2d2   :  { %v1486_v32 = vsel %vm10070_vm3, %v10068_v34, inf  ;;  %v1265_v53 = vmax.f32 %v1264_v20, %v1098_v2  ;;  %v1330_v54 = vsel %vm713_vm11, %v10071_v35, -inf  ;;  %1579 = vmin.xlane.f32.xlu1 %v1578_v56  ;;  %vm10073_vm7 = vcmp.lt.s32.totalorder %v10072_v38, %v9884_v0  ;;  %v10075_v49 = vld [vmem:[#allocation42_spill] sm:$0xff]  ;;  %v10081_v2 = vld [vmem:[#allocation187_spill] sm:$0xff]  ;;  %v10082_v42 = vld [vmem:[#allocation277_spill] sm:$0xff] }
 0x2d3   :  { %v1487_v23 = vsel %vm10073_vm7, %v5565_v1, inf  ;;  %vm10076_vm10 = vcmp.lt.s32.totalorder %v10075_v49, %v9884_v0  ;;  %vm10077_vm12 = vcmp.lt.s32.totalorder %v9999_v31, %v9884_v0  ;;  %v1331_v25 = vmax.f32 %v1329_v57, %v1330_v54  ;;  %v10086_v54 = vld [vmem:[#allocation140_spill] sm:$0xff] }
 0x2d4   :  { %v1488_v48 = vsel %vm10076_vm10, %v10074_v16, inf  ;;  %v1099_v11 = vsel %vm10077_vm12, %v9998_v26, -inf  ;;  %vm10080_vm9 = vcmp.lt.s32.totalorder %v10079_v15, %v9884_v0  ;;  %v1651_v39 = vmin.f32 %v1650_v28, %v1484_v52 }
 0x2d5   :  { %v1489_v20 = vsel %vm10080_vm9, %v10078_v59, inf  ;;  %v1266_v56 = vmax.f32 %v1265_v53, %v1099_v11  ;;  %v1332_v35 = vsel %vm713_vm11, %v10081_v2, -inf  ;;  %vm10084_vm8 = vcmp.lt.s32.totalorder %v10083_v13, %v9884_v0  ;;  %v10090_v11 = vld [vmem:[#allocation188_spill] sm:$0xff]  ;;  %v10091_v13 = vld [vmem:[#allocation278_spill] sm:$0xff] }
 0x2d6   :  { %v1490_v21 = vsel %vm10084_vm8, %v10082_v42, inf  ;;  %vm10085_vm14 = vcmp.lt.s32.totalorder %v10011_v9, %v9884_v0  ;;  %v1609_v26 = vmin.f32 %v1608_v12, %v10086_v54  ;;  %v1333_v31 = vmax.f32 %v1331_v25, %v1332_v35  ;;  %v10092_v42 = vld [vmem:[#allocation46_spill] sm:$0xff]  ;;  %v10094_v9 = vld [vmem:[#allocation279_spill] sm:$0xff]  ;;  %v10100_v54 = vld [vmem:[#allocation189_spill] sm:$0xff] }
 0x2d7   :  { %v1100_v57 = vsel %vm10085_vm14, %v10010_v3, -inf  ;;  %vm10089_vm15 = vcmp.lt.s32.totalorder %v10088_v37, %v9884_v0  ;;  %v1652_v28 = vmin.f32 %v1651_v39, %v1485_v50  ;;  %v1334_v2 = vsel %vm713_vm11, %v10090_v11, -inf  ;;  %v10095_v3 = vld [vmem:[#allocation47_spill] sm:$0xff]  ;;  %v10098_v39 = vld [vmem:[#allocation50_spill] sm:$0xff] }
 0x2d8   :  { %v1491_v52 = vsel %vm10089_vm15, %v10087_v5, inf  ;;  %v1267_v53 = vmax.f32 %v1266_v56, %v1100_v57  ;;  %vm10093_vm2 = vcmp.lt.s32.totalorder %v10092_v42, %v9884_v0  ;;  %vm10096_vm6 = vcmp.lt.s32.totalorder %v10095_v3, %v9884_v0  ;;  %v10102_v3 = vld [vmem:[#allocation48_spill] sm:$0xff] }
 0x2d9   :  { %v1492_v36 = vsel %vm10093_vm2, %v10091_v13, inf  ;;  %v5879_v12 = vsel %vm10096_vm6, %v10094_v9, inf  ;;  %vm10097_vm5 = vcmp.lt.s32.totalorder %v10018_v45, %v9884_v0  ;;  %v1335_v25 = vmax.f32 %v1333_v31, %v1334_v2  ;;  %v10101_v13 = vld [vmem:[#allocation240_spill] sm:$0xff]  ;;  %v10105_v2 = vld [vmem:[#allocation107_spill] sm:$0xff] }
 0x2da   :  { %v1101_v50 = vsel %vm10097_vm5, %v10017_v4, -inf  ;;  %vm10099_vm4 = vcmp.lt.s32.totalorder %v10098_v39, %v9884_v0  ;;  %v1653_v35 = vmin.f32 %v1652_v28, %v1486_v32  ;;  %v1336_v11 = vsel %vm713_vm11, %v10100_v54, -inf  ;;  %v10106_v39 = vld [vmem:[#allocation49_spill] sm:$0xff] }
 0x2db   :  { %v1496_v56 = vsel %vm10099_vm4, %v5753_v41, inf  ;;  %v1268_v57 = vmax.f32 %v1267_v53, %v1101_v50  ;;  %vm10103_vm3 = vcmp.lt.s32.totalorder %v10102_v3, %v9884_v0  ;;  %vm10104_vm7 = vcmp.lt.s32.totalorder %v10028_v46, %v9884_v0  ;;  %v10108_v50 = vld [vmem:[#allocation190_spill] sm:$0xff] }
 0x2dc   :  { %v1494_v9 = vsel %vm10103_vm3, %v10101_v13, inf  ;;  %v1102_v31 = vsel %vm10104_vm7, %v10027_v30, -inf  ;;  %v1610_v4 = vmin.f32 %v1609_v26, %v10105_v2  ;;  %v1337_v45 = vmax.f32 %v1335_v25, %v1336_v11 }
 0x2dd   :  { %vm10107_vm10 = vcmp.lt.s32.totalorder %v10106_v39, %v9884_v0  ;;  %v1654_v28 = vmin.f32 %v1653_v35, %v1487_v23  ;;  %v1269_v53 = vmax.f32 %v1268_v57, %v1102_v31  ;;  %v1338_v54 = vsel %vm713_vm11, %v10108_v50, -inf  ;;  %v10114_v50 = vld [vmem:[#allocation142_spill] sm:$0xff] }
 0x2de   :  { %v5904_v32 = vsel %vm10107_vm10, %v5679_v43, inf  ;;  %v5909_v41 = vsel %vm9192_vm1, %v1496_v56, inf  ;;  %vm10109_vm12 = vcmp.lt.s32.totalorder %v10032_v61, %v9884_v0  ;;  %vm10110_vm9 = vcmp.lt.s32.totalorder %v10039_v58, %v9884_v0  ;;  %v10112_v56 = vld [vmem:[#allocation191_spill] sm:$0xff] }
 0x2df   :  { %v1103_v26 = vsel %vm10109_vm12, %v10031_v19, -inf  ;;  %v1104_v25 = vsel %vm10110_vm9, %v10038_v22, -inf  ;;  %v1339_v11 = vmax.f32 %v1337_v45, %v1338_v54  ;;  %v1655_v2 = vmin.f32 %v1654_v28, %v1488_v48  ;;  %v10115_v22 = vld [vmem:[#allocation118_spill] sm:$0xff]  ;;  %v10116_v54 = vld [vmem:[#allocation149_spill] sm:$0xff] }
 0x2e0   :  { %vm10111_vm8 = vcmp.lt.s32.totalorder %v10043_v14, %v9884_v0  ;;  %v1270_v35 = vmax.f32 %v1269_v53, %v1103_v26  ;;  %v1340_v57 = vsel %vm713_vm11, %v10112_v56, -inf  ;;  %vm10113_vm14 = vcmp.lt.s32.totalorder %v10047_v40, %v9884_v0  ;;  %v10117_v14 = vld [vmem:[#allocation8_spill] sm:$0xff]  ;;  %v10120_v26 = vld [vmem:[#allocation150_spill] sm:$0xff]  ;;  %v10121_v56 = vld [vmem:[#allocation9_spill] sm:$0xff] }
 0x2e1   :  { %v1105_v23 = vsel %vm10111_vm8, %v5541_v17, -inf  ;;  %v1106_v31 = vsel %vm10113_vm14, %v10046_v18, -inf  ;;  %v1611_v19 = vmin.f32 %v1610_v4, %v10114_v50  ;;  %v1341_v30 = vmax.f32 %v1339_v11, %v1340_v57  ;;  %v10118_v17 = vld [vmem:[#allocation33_spill] sm:$0xff]  ;;  %v10127_v50 = vld [vmem:[#allocation151_spill] sm:$0xff] }
 0x2e2   :  { %v1342_v45 = vsel %vm713_vm11, %v10115_v22, -inf  ;;  %v1656_v48 = vmin.f32 %v1655_v2, %v1489_v20  ;;  %v1271_v28 = vmax.f32 %v1270_v35, %v1104_v25  ;;  %vm10119_vm15 = vcmp.lt.s32.totalorder %v10117_v14, %v10118_v17  ;;  %v10125_v25 = vld [vmem:[#allocation192_spill] sm:$0xff]  ;;  %v10126_v35 = vld [vmem:[#allocation193_spill] sm:$0xff] }
 0x2e3   :  { %v1497_v53 = vsel %vm10119_vm15, %v10116_v54, inf  ;;  %vm10122_vm2 = vcmp.lt.s32.totalorder %v10121_v56, %v10118_v17  ;;  %vm10123_vm6 = vcmp.lt.s32.totalorder %v10054_v8, %v9884_v0  ;;  %vm10124_vm5 = vcmp.lt.s32.totalorder %v10059_v51, %v9884_v0 }
 0x2e4   :  { %v1498_v58 = vsel %vm10122_vm2, %v10120_v26, inf  ;;  %v1107_v4 = vsel %vm10123_vm6, %v10053_v47, -inf  ;;  %v1108_v22 = vsel %vm10124_vm5, %v10058_v33, -inf  ;;  %v1343_v20 = vmax.f32 %v1341_v30, %v1342_v45  ;;  %v10129_v26 = vld [vmem:[#allocation143_spill] sm:$0xff] }
 0x2e5   :  { %v1344_v14 = vsel %vm713_vm11, %v10125_v25, -inf  ;;  %v1657_v11 = vmin.f32 %v1656_v48, %v1490_v21  ;;  %v1272_v2 = vmax.f32 %v1271_v28, %v1105_v23  ;;  %v1346_v57 = vsel %vm713_vm11, %v10126_v35, -inf  ;;  %v10130_v25 = vld [vmem:[#allocation152_spill] sm:$0xff] }
 0x2e6   :  { %vm10128_vm4 = vcmp.lt.s32.totalorder %v9904_v6, %v10118_v17  ;;  %v1612_v54 = vmin.f32 %v1611_v19, %v10129_v26  ;;  %v1345_v47 = vmax.f32 %v1343_v20, %v1344_v14  ;;  %v1667_v18 = vsel %vm713_vm11, %v1497_v53, inf  ;;  %v10133_v19 = vld [vmem:[#allocation194_spill] sm:$0xff] }
 0x2e7   :  { %v1499_v56 = vsel %vm10128_vm4, %v10127_v50, inf  ;;  %v1668_v30 = vsel %vm713_vm11, %v1498_v58, inf  ;;  %v1658_v45 = vmin.f32 %v1657_v11, %v1491_v52  ;;  %v1273_v33 = vmax.f32 %v1272_v2, %v1106_v31  ;;  %v10134_v31 = vld [vmem:[#allocation109_spill] sm:$0xff]  ;;  %v10137_v11 = vld [vmem:[#allocation119_spill] sm:$0xff] }
 0x2e8   :  { %vm10131_vm3 = vcmp.lt.s32.totalorder %v9911_v7, %v10118_v17  ;;  %v1669_v23 = vmin.f32 %v1667_v18, %v1668_v30  ;;  %vm10132_vm7 = vcmp.lt.s32.totalorder %v10062_v29, %v9884_v0  ;;  %v1347_v48 = vmax.f32 %v1345_v47, %v1346_v57  ;;  %v10136_v18 = vld [vmem:[#allocation144_spill] sm:$0xff] }
 0x2e9   :  { %v1500_v21 = vsel %vm10131_vm3, %v10130_v25, inf  ;;  %v1109_v6 = vsel %vm10132_vm7, %v5559_v24, -inf  ;;  %v1348_v28 = vsel %vm713_vm11, %v10133_v19, -inf  ;;  %v1670_v53 = vsel %vm713_vm11, %v1499_v56, inf  ;;  %v10138_v56 = vld [vmem:[#allocation153_spill] sm:$0xff] }
 0x2ea   :  { %v1659_v58 = vmin.f32 %v1658_v45, %v1492_v36  ;;  %v1274_v52 = vmax.f32 %v1273_v33, %v1107_v4  ;;  %vm10135_vm10 = vcmp.lt.s32.totalorder %v9918_v62, %v10118_v17  ;;  %v1671_v26 = vmin.f32 %v1669_v23, %v1670_v53  ;;  %v10141_v4 = vld [vmem:[#allocation195_spill] sm:$0xff]  ;;  %v10145_v53 = vld [vmem:[#allocation196_spill] sm:$0xff] }
 0x2eb   :  { %v1501_v7 = vsel %vm10135_vm10, %v10134_v31, inf  ;;  %v1613_v20 = vmin.f32 %v1612_v54, %v10136_v18  ;;  %v1349_v14 = vmax.f32 %v1347_v48, %v1348_v28  ;;  %v1350_v2 = vsel %vm713_vm11, %v10137_v11, -inf  ;;  %v10144_v48 = vld [vmem:[#allocation145_spill] sm:$0xff]  ;;  %v2774_v31 = vld [vmem:[#allocation2 + $0x518] sm:$0x7] }
 0x2ec   :  { %v1672_v47 = vsel %vm713_vm11, %v1500_v21, inf  ;;  %v1660_v35 = vmin.f32 %v1659_v58, %v5879_v12  ;;  %v1275_v57 = vmax.f32 %v1274_v52, %v1108_v22  ;;  %vm10139_vm12 = vcmp.lt.s32.totalorder %v9925_v55, %v10118_v17  ;;  %v10142_v22 = vld [vmem:[#allocation154_spill] sm:$0xff] }
 0x2ed   :  { %v1502_v36 = vsel %vm10139_vm12, %v10138_v56, inf  ;;  %v1673_v33 = vmin.f32 %v1671_v26, %v1672_v47  ;;  %vm10140_vm9 = vcmp.lt.s32.totalorder %v10069_v27, %v9884_v0  ;;  %v1351_v54 = vmax.f32 %v1349_v14, %v1350_v2  ;;  %v10149_v14 = vld [vmem:[#allocation199_spill] sm:$0xff] }
 0x2ee   :  { %v1110_v62 = vsel %vm10140_vm9, %v10068_v34, -inf  ;;  %v1352_v30 = vsel %vm713_vm11, %v10141_v4, -inf  ;;  %v1674_v45 = vsel %vm713_vm11, %v1501_v7, inf  ;;  %v1661_v21 = vmin.f32 %v1660_v35, %v1494_v9  ;;  %v10146_v7 = vld [vmem:[#allocation155_spill] sm:$0xff]  ;;  %v10150_v35 = vld [vmem:[#allocation156_spill] sm:$0xff] }
 0x2ef   :  { %v1276_v12 = vmax.f32 %v1275_v57, %v1109_v6  ;;  %vm10143_vm8 = vcmp.lt.s32.totalorder %v9932_v10, %v10118_v17  ;;  %v1675_v23 = vmin.f32 %v1673_v33, %v1674_v45  ;;  %v1614_v19 = vmin.f32 %v1613_v20, %v10144_v48  ;;  %v10158_v48 = vld [vmem:[#allocation141_spill] sm:$0xff] }
 0x2f0   :  { %v1503_v55 = vsel %vm10143_vm8, %v10142_v22, inf  ;;  %v1353_v28 = vmax.f32 %v1351_v54, %v1352_v30  ;;  %v1354_v58 = vsel %vm713_vm11, %v10145_v53, -inf  ;;  %v1676_v52 = vsel %vm713_vm11, %v1502_v36, inf  ;;  %v10154_v30 = vld [vmem:[#allocation146_spill] sm:$0xff]  ;;  %v10203_v22 = vld [vmem:[#allocation148_spill] sm:$0xff] }
 0x2f1   :  { %v1662_v26 = vmin.f32 %v1661_v21, %v5904_v32  ;;  %v1277_v18 = vmax.f32 %v1276_v12, %v1110_v62  ;;  %vm10147_vm14 = vcmp.lt.s32.totalorder %v9818_v60, %v10118_v17  ;;  %v1677_v6 = vmin.f32 %v1675_v23, %v1676_v52  ;;  %v10153_v62 = vld [vmem:[#allocation200_spill] sm:$0xff]  ;;  %v10155_v21 = vld [vmem:[#allocation157_spill] sm:$0xff] }
 0x2f2   :  { %v1504_v9 = vsel %vm10147_vm14, %v10146_v7, inf  ;;  %vm10148_vm15 = vcmp.lt.s32.totalorder %v10072_v38, %v9884_v0  ;;  %v1355_v20 = vmax.f32 %v1353_v28, %v1354_v58  ;;  %v1356_v11 = vsel %vm713_vm11, %v10149_v14, -inf  ;;  %v2771_v23 = vld [vmem:[#allocation2 + $0x500] sm:$0x7] }
 0x2f3   :  { %v1111_v10 = vsel %vm10148_vm15, %v5565_v1, -inf  ;;  %v1678_v2 = vsel %vm713_vm11, %v1503_v55, inf  ;;  %v1664_v32 = vmin.f32 %v1662_v26, %v5909_v41  ;;  %vm10151_vm2 = vcmp.lt.s32.totalorder %v9453_v44, %v10118_v17  ;;  %v10162_v26 = vld [vmem:[#allocation158_spill] sm:$0xff] }
 0x2f4   :  { %v1278_v47 = vmax.f32 %v1277_v18, %v1111_v10  ;;  %v1505_v60 = vsel %vm10151_vm2, %v10150_v35, inf  ;;  %v1679_v57 = vmin.f32 %v1677_v6, %v1678_v2  ;;  %vm10152_vm6 = vcmp.lt.s32.totalorder %v10075_v49, %v9884_v0  ;;  %v10163_v18 = vld [vmem:[#allocation19_spill] sm:$0xff]  ;;  %v10165_v10 = vld [vmem:[#allocation277_spill] sm:$0xff]  ;;  %v10201_v35 = vld [vmem:[#allocation24_spill] sm:$0xff] }
 0x2f5   :  { %v1112_v36 = vsel %vm10152_vm6, %v10074_v16, -inf  ;;  %v1357_v33 = vmax.f32 %v1355_v20, %v1356_v11  ;;  %v1358_v54 = vsel %vm713_vm11, %v10153_v62, -inf  ;;  %v1680_v4 = vsel %vm713_vm11, %v1504_v9, inf  ;;  %1665 = vmin.xlane.f32.xlu1 %v1664_v32  ;;  %v10166_v20 = vld [vmem:[#allocation44_spill] sm:$0xff]  ;;  %v10168_v11 = vld [vmem:[#allocation17_spill] sm:$0xff]  ;;  %v10169_v32 = vld [vmem:[#allocation110_spill] sm:$0xff] }
 0x2f6   :  { %v1279_v41 = vmax.f32 %v1278_v47, %v1112_v36  ;;  %v1615_v45 = vmin.f32 %v1614_v19, %v10154_v30  ;;  %vm10156_vm5 = vcmp.lt.s32.totalorder %v9456_v63, %v10118_v17  ;;  %v1681_v12 = vmin.f32 %v1679_v57, %v1680_v4  ;;  %v10160_v19 = vld [vmem:[#allocation180_spill] sm:$0xff]  ;;  %v10174_v30 = vld [vmem:[#allocation105_spill] sm:$0xff] }
 0x2f7   :  { %v1506_v44 = vsel %vm10156_vm5, %v10155_v21, inf  ;;  %vm10157_vm4 = vcmp.lt.s32.totalorder %v10079_v15, %v9884_v0  ;;  %v6032_v28 = vsub.f32 %v2771_v23, %v10158_v48  ;;  %v1359_v53 = vmax.f32 %v1357_v33, %v1358_v54  ;;  %v10170_v47 = vld [vmem:[#allocation20_spill] sm:$0xff]  ;;  %v10172_v33 = vld [vmem:[#allocation147_spill] sm:$0xff]  ;;  %v2772_v23 = vld [vmem:[#allocation2 + $0x508] sm:$0x7] }
 0x2f8   :  { %v1113_v55 = vsel %vm10157_vm4, %v10078_v59, -inf  ;;  %v1682_v58 = vsel %vm713_vm11, %v1505_v60, inf  ;;  %vm10161_vm3 = vcmp.lt.s32.totalorder %v10092_v42, %v10118_v17  ;;  %vm10164_vm7 = vcmp.lt.s32.totalorder %v10163_v18, %v10118_v17  ;;  %v10180_v18 = vld [vmem:[#allocation159_spill] sm:$0xff]  ;;  %v2773_v21 = vld [vmem:[#allocation2 + $0x510] sm:$0x7] }
 0x2f9   :  { %10159 = vst [vmem:[#allocation18_spill] sm:$0xff] %v6032_v28  ;;  %v1280_v52 = vmax.f32 %v1279_v41, %v1113_v55  ;;  %v1157_v63 = vsel %vm10161_vm3, %v10160_v19, -inf  ;;  %v1507_v9 = vsel %vm10164_vm7, %v10162_v26, inf  ;;  %v1683_v6 = vmin.f32 %v1681_v12, %v1682_v58  ;;  %v10175_v12 = vld [vmem:[#allocation10_spill] sm:$0xff] }
 0x2fa   :  { %vm10167_vm10 = vcmp.lt.s32.totalorder %v10166_v20, %v9884_v0  ;;  %v1360_v2 = vsel %vm713_vm11, %v10168_v11, -inf  ;;  %vm10171_vm12 = vcmp.lt.s32.totalorder %v10170_v47, %v10118_v17  ;;  %v1684_v57 = vsel %vm713_vm11, %v1506_v44, inf }
 0x2fb   :  { %v1114_v14 = vsel %vm10167_vm10, %v10165_v10, -inf  ;;  %v1508_v60 = vsel %vm10171_vm12, %v10169_v32, inf  ;;  %v1616_v62 = vmin.f32 %v1615_v45, %v10172_v33  ;;  %v1361_v54 = vmax.f32 %v1359_v53, %v1360_v2  ;;  %v10178_v45 = vld [vmem:[#allocation47_spill] sm:$0xff]  ;;  %v10183_v2 = vld [vmem:[#allocation278_spill] sm:$0xff]  ;;  %v10188_v32 = vld [vmem:[#allocation108_spill] sm:$0xff] }
 0x2fc   :  { %v1281_v36 = vmax.f32 %v1280_v52, %v1114_v14  ;;  %v1685_v4 = vmin.f32 %v1683_v6, %v1684_v57  ;;  %vm10173_vm9 = vcmp.lt.s32.totalorder %v10088_v37, %v9884_v0  ;;  %vm10176_vm8 = vcmp.lt.s32.totalorder %v10106_v39, %v10175_v12  ;;  %v10181_v6 = vld [vmem:[#allocation21_spill] sm:$0xff] }
 0x2fd   :  { %v1115_v41 = vsel %vm10173_vm9, %v10087_v5, -inf  ;;  %v1454_v55 = vsel %vm10176_vm8, %v10174_v30, inf  ;;  %v6064_v58 = vsub.f32 %v2772_v23, %v10158_v48  ;;  %v1686_v44 = vsel %vm713_vm11, %v1507_v9, inf  ;;  %v10185_v9 = vld [vmem:[#allocation160_spill] sm:$0xff] }
 0x2fe   :  { %v1282_v52 = vmax.f32 %v1281_v36, %v1115_v41  ;;  %vm10179_vm14 = vcmp.lt.s32.totalorder %v10178_v45, %v10118_v17  ;;  %vm10182_vm15 = vcmp.lt.s32.totalorder %v10181_v6, %v10118_v17  ;;  %v1687_v11 = vmin.f32 %v1685_v4, %v1686_v44  ;;  %v10186_v36 = vld [vmem:[#allocation22_spill] sm:$0xff]  ;;  %v10189_v4 = vld [vmem:[#allocation279_spill] sm:$0xff] }
 0x2ff   :  { %10177 = vst [vmem:[#allocation241_spill] sm:$0xff] %v6064_v58  ;;  %v1158_v53 = vsel %vm10179_vm14, %v6032_v28, -inf  ;;  %v1509_v14 = vsel %vm10182_vm15, %v10180_v18, inf  ;;  %vm10184_vm2 = vcmp.lt.s32.totalorder %v10092_v42, %v9884_v0  ;;  %v1362_v57 = vsel %vm713_vm11, %v1157_v63, -inf }
 0x300   :  { %v1116_v47 = vsel %vm10184_vm2, %v10183_v2, -inf  ;;  %vm10187_vm6 = vcmp.lt.s32.totalorder %v10186_v36, %v10118_v17  ;;  %v1688_v41 = vsel %vm713_vm11, %v1508_v60, inf  ;;  %v1617_v26 = vmin.f32 %v1616_v62, %v10188_v32 }
 0x301   :  { %v1510_v33 = vsel %vm10187_vm6, %v10185_v9, inf  ;;  %v1283_v23 = vmax.f32 %v1282_v52, %v1116_v47  ;;  %v1363_v6 = vmax.f32 %v1361_v54, %v1362_v57  ;;  %v1689_v18 = vmin.f32 %v1687_v11, %v1688_v41  ;;  %v10194_v54 = vld [vmem:[#allocation161_spill] sm:$0xff]  ;;  %v10195_v52 = vld [vmem:[#allocation23_spill] sm:$0xff]  ;;  %v10197_v47 = vld [vmem:[#allocation120_spill] sm:$0xff] }
 0x302   :  { %vm10190_vm5 = vcmp.lt.s32.totalorder %v10178_v45, %v9884_v0  ;;  %v6091_v63 = vsub.f32 %v2773_v21, %v10158_v48  ;;  %vm10192_vm4 = vcmp.lt.s32.totalorder %v10102_v3, %v10118_v17  ;;  %v1690_v60 = vsel %vm713_vm11, %v1509_v14, inf  ;;  %v10198_v57 = vld [vmem:[#allocation50_spill] sm:$0xff] }
 0x303   :  { %v1117_v44 = vsel %vm10190_vm5, %v10189_v4, -inf  ;;  %v1159_v36 = vsel %vm10192_vm4, %v6064_v58, -inf  ;;  %vm10193_vm3 = vcmp.lt.s32.totalorder %v10102_v3, %v9884_v0  ;;  %vm10196_vm7 = vcmp.lt.s32.totalorder %v10195_v52, %v10118_v17  ;;  %v10200_v14 = vld [vmem:[#allocation162_spill] sm:$0xff] }
 0x304   :  { %10191 = vst [vmem:[#allocation201_spill] sm:$0xff] %v6091_v63  ;;  %v1118_v32 = vsel %vm10193_vm3, %v10101_v13, -inf  ;;  %v1284_v62 = vmax.f32 %v1283_v23, %v1117_v44  ;;  %v1511_v11 = vsel %vm10196_vm7, %v10194_v54, inf  ;;  %v1691_v21 = vmin.f32 %v1689_v18, %v1690_v60  ;;  %v10205_v60 = vld [vmem:[#allocation106_spill] sm:$0xff] }
 0x305   :  { %vm10199_vm10 = vcmp.lt.s32.totalorder %v10198_v57, %v9884_v0  ;;  %v1364_v9 = vsel %vm713_vm11, %v1158_v53, -inf  ;;  %vm10202_vm12 = vcmp.lt.s32.totalorder %v10201_v35, %v10118_v17  ;;  %v1692_v23 = vsel %vm713_vm11, %v1510_v33, inf }
 0x306   :  { %v1120_v41 = vsel %vm10199_vm10, %v10197_v47, -inf  ;;  %v1512_v7 = vsel %vm10202_vm12, %v10200_v14, inf  ;;  %v1285_v44 = vmax.f32 %v1284_v62, %v1118_v32  ;;  %v1618_v56 = vmin.f32 %v1617_v26, %v10203_v22  ;;  %v10209_v26 = vld [vmem:[#allocation163_spill] sm:$0xff] }
 0x307   :  { %v1365_v52 = vmax.f32 %v1363_v6, %v1364_v9  ;;  %v1693_v54 = vmin.f32 %v1691_v21, %v1692_v23  ;;  %vm10204_vm9 = vcmp.lt.s32.totalorder %v10106_v39, %v9884_v0  ;;  %vm10206_vm8 = vcmp.lt.s32.totalorder %v10198_v57, %v10175_v12  ;;  %v10210_v0 = vld [vmem:[#allocation25_spill] sm:$0xff] }
 0x308   :  { %v1119_v18 = vsel %vm10204_vm9, %v5679_v43, -inf  ;;  %v1455_v53 = vsel %vm10206_vm8, %v10205_v60, inf  ;;  %v6126_v35 = vsub.f32 %v2774_v31, %v10158_v48  ;;  %v1694_v33 = vsel %vm713_vm11, %v1511_v11, inf  ;;  %v10212_v31 = vld [vmem:[#allocation111_spill] sm:$0xff]  ;;  %v10213_v48 = vld [vmem:[#allocation26_spill] sm:$0xff] }
 0x309   :  { %v1286_v32 = vmax.f32 %v1285_v44, %v1119_v18  ;;  %vm10208_vm14 = vcmp.lt.s32.totalorder %v10106_v39, %v10118_v17  ;;  %vm10211_vm15 = vcmp.lt.s32.totalorder %v10210_v0, %v10118_v17  ;;  %v1695_v6 = vmin.f32 %v1693_v54, %v1694_v33  ;;  %v10215_v0 = vld [vmem:[#allocation164_spill] sm:$0xff]  ;;  %v10216_v54 = vld [vmem:[#allocation27_spill] sm:$0xff] }
 0x30a   :  { %10207 = vst [vmem:[#allocation122_spill] sm:$0xff] %v6126_v35  ;;  %v1160_v22 = vsel %vm10208_vm14, %v6091_v63, -inf  ;;  %v1513_v9 = vsel %vm10211_vm15, %v10209_v26, inf  ;;  %v1287_v12 = vsel %vm9192_vm1, %v1120_v41, -inf  ;;  %v1366_v62 = vsel %vm713_vm11, %v1159_v36, -inf }
 0x30b   :  { %vm10214_vm2 = vcmp.lt.s32.totalorder %v10213_v48, %v10118_v17  ;;  %v1696_v21 = vsel %vm713_vm11, %v1512_v7, inf  ;;  %v1288_v23 = vmax.f32 %v1286_v32, %v1287_v12  ;;  %v1619_v44 = vmin.f32 %v1618_v56, %v1454_v55 }
 0x30c   :  { %v1514_v11 = vsel %vm10214_vm2, %v10212_v31, inf  ;;  %v1367_v18 = vmax.f32 %v1365_v52, %v1366_v62  ;;  %v1697_v14 = vmin.f32 %v1695_v6, %v1696_v21  ;;  %v1698_v25 = vsel %vm713_vm11, %v1513_v9, inf  ;;  %v10219_v9 = vld [vmem:[#allocation165_spill] sm:$0xff]  ;;  %v10220_v6 = vld [vmem:[#allocation28_spill] sm:$0xff] }
 0x30d   :  { %1289 = vmax.xlane.f32.xlu0 %v1288_v23  ;;  %vm10217_vm6 = vcmp.lt.s32.totalorder %v10216_v54, %v10118_v17  ;;  %v1620_v33 = vsel %vm9192_vm1, %v1455_v53, inf  ;;  %vm10218_vm5 = vcmp.lt.s32.totalorder %v10198_v57, %v10118_v17  ;;  %v1368_v56 = vsel %vm713_vm11, %v1160_v22, -inf  ;;  %v10223_v53 = vld [vmem:[#allocation29_spill] sm:$0xff] }
 0x30e   :  { %v1515_v41 = vsel %vm10217_vm6, %v10215_v0, inf  ;;  %v1699_v36 = vmin.f32 %v1697_v14, %v1698_v25  ;;  %v1161_v7 = vsel %vm10218_vm5, %v6126_v35, -inf  ;;  %v1700_v55 = vsel %vm713_vm11, %v1514_v11, inf  ;;  %v10222_v14 = vld [vmem:[#allocation166_spill] sm:$0xff] }
 0x30f   :  { %v1621_v52 = vmin.f32 %v1619_v44, %v1620_v33  ;;  %v1369_v32 = vmax.f32 %v1367_v18, %v1368_v56  ;;  %vm10221_vm4 = vcmp.lt.s32.totalorder %v10220_v6, %v10118_v17  ;;  %v1702_v25 = vsel %vm713_vm11, %v1515_v41, inf  ;;  %v10226_v44 = vld [vmem:[#allocation167_spill] sm:$0xff]  ;;  %v10227_v18 = vld [vmem:[#allocation30_spill] sm:$0xff]  ;;  %v10229_v33 = vld [vmem:[#allocation168_spill] sm:$0xff] }
 0x310   :  { %v1516_v12 = vsel %vm10221_vm4, %v10219_v9, inf  ;;  %v1701_v62 = vmin.f32 %v1699_v36, %v1700_v55  ;;  %vm10224_vm3 = vcmp.lt.s32.totalorder %v10223_v53, %v10118_v17  ;;  %vm10225_vm7 = vcmask 518144  }
 0x311   :  { %1622 = vmin.xlane.f32.xlu0 %v1621_v52  ;;  %v1517_v48 = vsel %vm10224_vm3, %v10222_v14, inf  ;;  %v1370_v22 = vsel %vm10225_vm7, %v1161_v7, -inf  ;;  %v1704_v11 = vsel %vm713_vm11, %v1516_v12, inf  ;;  %vm10228_vm10 = vcmp.lt.s32.totalorder %v10227_v18, %v10118_v17  ;;  %v10231_v52 = vld [vmem:[#allocation169_spill] sm:$0xff]  ;;  %v10239_v18 = vld [vmem:[#allocation171_spill] sm:$0xff] }
 0x312   :  { %v1703_v21 = vmin.f32 %v1701_v62, %v1702_v25  ;;  %v1371_v23 = vmax.f32 %v1369_v32, %v1370_v22  ;;  %v1518_v54 = vsel %vm10228_vm10, %v10226_v44, inf  ;;  %v1706_v41 = vsel %vm713_vm11, %v1517_v48, inf  ;;  %v10233_v62 = vld [vmem:[#allocation112_spill] sm:$0xff]  ;;  %v10234_v25 = vld [vmem:[#allocation34_spill] sm:$0xff]  ;;  %v10237_v22 = vld [vmem:[#allocation35_spill] sm:$0xff] }
 0x313   :  { %vm10230_vm12 = vcmp.lt.s32.totalorder %v10028_v46, %v10118_v17  ;;  %v1708_v7 = vsel %vm713_vm11, %v1518_v54, inf  ;;  %vm10232_vm9 = vcmp.lt.s32.totalorder %v10032_v61, %v10118_v17  ;;  %vm10235_vm8 = vcmp.lt.s32.totalorder %v10234_v25, %v10118_v17  ;;  %v10304_v44 = vld [vmem:[#allocation65_spill] sm:$0xff] }
 0x314   :  { %v1705_v36 = vmin.f32 %v1703_v21, %v1704_v11  ;;  %v1519_v56 = vsel %vm10230_vm12, %v10229_v33, inf  ;;  %v1520_v32 = vsel %vm10232_vm9, %v10231_v52, inf  ;;  %v1521_v53 = vsel %vm10235_vm8, %v10233_v62, inf  ;;  %v10236_v21 = vld [vmem:[#allocation170_spill] sm:$0xff]  ;;  %v10301_v62 = vld [vmem:[#allocation61_spill] sm:$0xff]  ;;  %v10303_v33 = vld [vmem:[#allocation63_spill] sm:$0xff] }
 0x315   :  { %1372 = vmax.xlane.f32.xlu0 %v1371_v23  ;;  %v1710_v12 = vsel %vm713_vm11, %v1519_v56, inf  ;;  %v1712_v46 = vsel %vm713_vm11, %v1520_v32, inf  ;;  %vm10238_vm14 = vcmp.lt.s32.totalorder %v10237_v22, %v10118_v17  ;;  %v1714_v61 = vsel %vm713_vm11, %v1521_v53, inf  ;;  %v10241_v56 = vld [vmem:[#allocation172_spill] sm:$0xff]  ;;  %v10245_v53 = vld [vmem:[#allocation174_spill] sm:$0xff]  ;;  %v10247_v22 = vld [vmem:[#allocation113_spill] sm:$0xff] }
 0x316   :  { %v1707_v55 = vmin.f32 %v1705_v36, %v1706_v41  ;;  %v1522_v11 = vsel %vm10238_vm14, %v10236_v21, inf  ;;  %vm10240_vm15 = vcmp.lt.s32.totalorder %v10047_v40, %v10118_v17  ;;  %vm10242_vm2 = vcmp.lt.s32.totalorder %v10054_v8, %v10118_v17  ;;  %v10300_v21 = vld [vmem:[#allocation60_spill] sm:$0xff]  ;;  %v10302_v52 = vld [vmem:[#allocation62_spill] sm:$0xff] }
 0x317   :  { %v1523_v54 = vsel %vm10240_vm15, %v10239_v18, inf  ;;  %v1716_v41 = vsel %vm713_vm11, %v1522_v11, inf  ;;  %vm10244_vm6 = vcmp.lt.s32.totalorder %v10059_v51, %v10118_v17  ;;  %vm10246_vm5 = vcmp.lt.s32.totalorder %v10062_v29, %v10118_v17  ;;  %v10299_v18 = vld [vmem:[#allocation59_spill] sm:$0xff] }
 0x318   :  { %v1709_v6 = vmin.f32 %v1707_v55, %v1708_v7  ;;  %v1524_v55 = vsel %vm10242_vm2, %v10241_v56, inf  ;;  %v1718_v32 = vsel %vm713_vm11, %v1523_v54, inf  ;;  %vm10248_vm4 = vcmp.lt.s32.totalorder %v10069_v27, %v10118_v17  ;;  %v10298_v56 = vld [vmem:[#allocation58_spill] sm:$0xff] }
 0x319   :  { %v1720_v40 = vsel %vm713_vm11, %v1524_v55, inf  ;;  %v1527_v11 = vsel %vm10248_vm4, %v10247_v22, inf  ;;  %vm10250_vm3 = vcmp.lt.s32.totalorder %v10072_v38, %v10118_v17  ;;  %vm10252_vm7 = vcmp.lt.s32.totalorder %v10075_v49, %v10118_v17  ;;  %v10295_v22 = vld [vmem:[#allocation56_spill] sm:$0xff] }
 0x31a   :  { %v1711_v48 = vmin.f32 %v1709_v6, %v1710_v12  ;;  %v10243_v6 = vld [vmem:[#allocation173_spill] sm:$0xff]  ;;  %v1726_v29 = vsel %vm713_vm11, %v1527_v11, inf  ;;  %vm10256_vm10 = vcmp.lt.s32.totalorder %v10088_v37, %v10118_v17  ;;  %vm10259_vm12 = vcmp.lt.s32.totalorder %v10102_v3, %v10118_v17 }
 0x31b   :  { %v1525_v12 = vsel %vm10244_vm6, %v10243_v6, inf  ;;  %vm10260_vm9 = vcmp.lt.s32.totalorder %v10106_v39, %v10118_v17  ;;  %vm10261_vm8 = vcmp.lt.s32.totalorder %v10198_v57, %v10118_v17  ;;  %vm10262_vm14 = vcmask 518144   ;;  %v10265_v57 = vld [vmem:[#allocation198_spill] sm:$0xff]  ;;  %v10297_v6 = vld [vmem:[#allocation57_spill] sm:$0xff] }
 0x31c   :  { %v1713_v23 = vmin.f32 %v1711_v48, %v1712_v46  ;;  %v1526_v48 = vsel %vm10246_vm5, %v10245_v53, inf  ;;  %v1722_v8 = vsel %vm713_vm11, %v1525_v12, inf  ;;  %v10296_v53 = vld [vmem:[#allocation128_spill] sm:$0xff]  ;;  %v9228_v14 = vmov 0.0  }
 0x31d   :  { %v1724_v51 = vsel %vm713_vm11, %v1526_v48, inf }
 0x31e   :  { %v1715_v36 = vmin.f32 %v1713_v23, %v1714_v61  ;;  %v10249_v61 = vld [vmem:[#allocation175_spill] sm:$0xff] }
 0x31f   :  { %v1528_v54 = vsel %vm10250_vm3, %v10249_v61, inf  ;;  %v10294_v61 = vld [vmem:[#allocation55_spill] sm:$0xff] }
 0x320   :  { %v1717_v7 = vmin.f32 %v1715_v36, %v1716_v41  ;;  %v10251_v41 = vld [vmem:[#allocation176_spill] sm:$0xff]  ;;  %v1728_v27 = vsel %vm713_vm11, %v1528_v54, inf }
 0x321   :  { %v1529_v55 = vsel %vm10252_vm7, %v10251_v41, inf  ;;  %v10293_v41 = vld [vmem:[#allocation54_spill] sm:$0xff] }
 0x322   :  { %v1719_v25 = vmin.f32 %v1717_v7, %v1718_v32  ;;  %v10253_v32 = vld [vmem:[#allocation177_spill] sm:$0xff]  ;;  %v1730_v38 = vsel %vm713_vm11, %v1529_v55, inf  ;;  %v1535_v55 = vsel %vm10259_vm12, %v6064_v58, inf  ;;  %v10287_v58 = vld [vmem:[#allocation224_spill] sm:$0xff] }
 0x323   :  { %v1530_v12 = vsel %vm407_vm0, %v10253_v32, inf  ;;  %vm10257_vm0 = vcmp.lt.s32.totalorder %v10092_v42, %v10118_v17  ;;  %v10292_v32 = vld [vmem:[#allocation53_spill] sm:$0xff] }
 0x324   :  { %v1721_v46 = vmin.f32 %v1719_v25, %v1720_v40  ;;  %v10254_v40 = vld [vmem:[#allocation178_spill] sm:$0xff]  ;;  %v1732_v49 = vsel %vm713_vm11, %v1530_v12, inf }
 0x325   :  { %v1531_v48 = vsel %vm408_vm13, %v10254_v40, inf  ;;  %vm10258_vm13 = vcmp.lt.s32.totalorder %v10178_v45, %v10118_v17  ;;  %v1742_v45 = vsel %vm713_vm11, %v1535_v55, inf  ;;  %v10264_v17 = vld [vmem:[#allocation197_spill] sm:$0xff]  ;;  %v10269_v55 = vld [vmem:[#allocation210_spill] sm:$0xff]  ;;  %v10291_v40 = vld [vmem:[#allocation127_spill] sm:$0xff] }
 0x326   :  { %v1723_v23 = vmin.f32 %v1721_v46, %v1722_v8  ;;  %v10255_v8 = vld [vmem:[#allocation179_spill] sm:$0xff]  ;;  %v1734_v15 = vsel %vm713_vm11, %v1531_v48, inf }
 0x327   :  { %v1532_v11 = vsel %vm10256_vm10, %v10255_v8, inf  ;;  %v10290_v8 = vld [vmem:[#allocation227_spill] sm:$0xff] }
 0x328   :  { %v1725_v36 = vmin.f32 %v1723_v23, %v1724_v51  ;;  %v1533_v51 = vsel %vm10257_vm0, %v10160_v19, inf  ;;  %v1736_v20 = vsel %vm713_vm11, %v1532_v11, inf  ;;  %v6268_v11 = vpop.xlane.xlu1 %1246  ;;  %v10289_v19 = vld [vmem:[#allocation226_spill] sm:$0xff] }
 0x329   :  { %v1738_v37 = vsel %vm713_vm11, %v1533_v51, inf  ;;  %10263 = vst [vmem:[#allocation130_spill] sm:$0xff] %v6268_v11 }
 0x32a   :  { %v1727_v7 = vmin.f32 %v1725_v36, %v1726_v29  ;;  %v1534_v36 = vsel %vm10258_vm13, %v6032_v28, inf  ;;  %v10288_v28 = vld [vmem:[#allocation225_spill] sm:$0xff] }
 0x32b   :  { %v1740_v42 = vsel %vm713_vm11, %v1534_v36, inf  ;;  %v10266_v36 = vld [vmem:[#allocation206_spill] sm:$0xff] }
 0x32c   :  { %v1729_v25 = vmin.f32 %v1727_v7, %v1728_v27  ;;  %v1536_v27 = vsel %vm10260_vm9, %v6091_v63, inf  ;;  %v10286_v63 = vld [vmem:[#allocation126_spill] sm:$0xff] }
 0x32d   :  { %v1744_v3 = vsel %vm713_vm11, %v1536_v27, inf  ;;  %v10272_v27 = vld [vmem:[#allocation212_spill] sm:$0xff] }
 0x32e   :  { %v1731_v46 = vmin.f32 %v1729_v25, %v1730_v38  ;;  %v1537_v25 = vsel %vm10261_vm8, %v6126_v35, inf  ;;  %v10285_v35 = vld [vmem:[#allocation223_spill] sm:$0xff] }
 0x330   :  { %v1733_v23 = vmin.f32 %v1731_v46, %v1732_v49  ;;  %v1746_v46 = vsel %vm10262_vm14, %v1537_v25, inf  ;;  %v10275_v25 = vld [vmem:[#allocation215_spill] sm:$0xff] }
 0x332   :  { %v1735_v54 = vmin.f32 %v1733_v23, %v1734_v15 }
 0x334   :  { %v1737_v29 = vmin.f32 %v1735_v54, %v1736_v20 }
 0x336   :  { %v1739_v7 = vmin.f32 %v1737_v29, %v1738_v37  ;;  %v10267_v29 = vld [vmem:[#allocation208_spill] sm:$0xff]  ;;  %v10268_v37 = vld [vmem:[#allocation209_spill] sm:$0xff] }
 0x338   :  { %v1741_v12 = vmin.f32 %v1739_v7, %v1740_v42  ;;  %v10270_v7 = vld [vmem:[#allocation211_spill] sm:$0xff] }
 0x339   :  { %v10271_v42 = vld [vmem:[#allocation123_spill] sm:$0xff] }
 0x33a   :  { %v1743_v38 = vmin.f32 %v1741_v12, %v1742_v45  ;;  %v10273_v12 = vld [vmem:[#allocation213_spill] sm:$0xff]  ;;  %v10274_v45 = vld [vmem:[#allocation214_spill] sm:$0xff] }
 0x33c   :  { %v1745_v48 = vmin.f32 %v1743_v38, %v1744_v3  ;;  %v10276_v38 = vld [vmem:[#allocation124_spill] sm:$0xff] }
 0x33d   :  { %v10277_v3 = vld [vmem:[#allocation216_spill] sm:$0xff] }
 0x33e   :  { %v1747_v49 = vmin.f32 %v1745_v48, %v1746_v46  ;;  %v10278_v48 = vld [vmem:[#allocation217_spill] sm:$0xff]  ;;  %v10279_v46 = vld [vmem:[#allocation218_spill] sm:$0xff] }
 0x340   :  { %1748 = vmin.xlane.f32.xlu0 %v1747_v49  ;;  %v10280_v49 = vld [vmem:[#allocation219_spill] sm:$0xff] }
 0x348   :  { %v1204_v39 = vpop.xlane.xlu0 %1203 }
 0x35b   :  { %v1580_v23 = vpop.xlane.xlu1 %1579 }
 0x35c   :  { %v1750_v15 = vsub.f32 %v1204_v39, %v1580_v23 }
 0x35e   :  { %v1755_v51 = vmul.f32 0.33333334, %v1750_v15  ;;  %v10283_v15 = vld [vmem:[#allocation221_spill] sm:$0xff] }
 0x360   :  { %v6270_v54 = vsub.f32 %v1204_v39, %v1755_v51  ;;  %v6272_v20 = vadd.f32 %v1755_v51, %v1580_v23  ;;  %v10281_v39 = vld [vmem:[#allocation125_spill] sm:$0xff]  ;;  %v10282_v23 = vld [vmem:[#allocation220_spill] sm:$0xff]  ;;  %v10284_v51 = vld [vmem:[#allocation222_spill] sm:$0xff] }
 0x362   :  { %vm1931_vm15 = vcmp.gt.f32.partialorder %v10264_v17, %v6270_v54  ;;  %vm1932_vm11 = vcmp.gt.f32.partialorder %v10265_v57, %v6270_v54  ;;  %vm1933_vm2 = vcmp.gt.f32.partialorder %v10266_v36, %v6270_v54  ;;  %vm1934_vm6 = vcmp.gt.f32.partialorder %v10267_v29, %v6270_v54 }
 0x363   :  { %vm1935_vm5 = vcmp.gt.f32.partialorder %v10268_v37, %v6270_v54  ;;  %vm1936_vm4 = vcmp.gt.f32.partialorder %v10269_v55, %v6270_v54  ;;  %vm1937_vm3 = vcmp.gt.f32.partialorder %v10270_v7, %v6270_v54  ;;  %vm1938_vm7 = vcmp.gt.f32.partialorder %v10271_v42, %v6270_v54 }
 0x364   :  { %vm1939_vm10 = vcmp.gt.f32.partialorder %v10272_v27, %v6270_v54  ;;  %vm1969_vm12 = vcmp.gt.f32.partialorder %v10302_v52, %v6270_v54  ;;  %vm1970_vm0 = vcmp.gt.f32.partialorder %v10303_v33, %v6270_v54  ;;  %vm1971_vm13 = vcmp.gt.f32.partialorder %v10304_v44, %v6270_v54 }
 0x365   :  { %v6370_v9 = vsel %vm1931_vm15, 1.0, %v9228_v14  ;;  %v6376_v0 = vsel %vm1932_vm11, 1.0, %v9228_v14  ;;  %vm1772_vm1 = vcmp.lt.f32.partialorder %v10269_v55, %v6272_v20  ;;  %vm1773_vm14 = vcmp.lt.f32.partialorder %v10270_v7, %v6272_v20  ;;  %v10368_v55 = vld [vmem:[#allocation225_spill] sm:$0xff] }
 0x366   :  { %vm1774_vm8 = vcmp.lt.f32.partialorder %v10271_v42, %v6272_v20  ;;  %vm1775_vm9 = vcmp.lt.f32.partialorder %v10272_v27, %v6272_v20  ;;  %v6390_v31 = vsel %vm1933_vm2, 1.0, %v9228_v14  ;;  %v6396_v26 = vsel %vm1934_vm6, 1.0, %v9228_v14  ;;  %v10371_v27 = vld [vmem:[#allocation226_spill] sm:$0xff] }
 0x367   :  { %v6402_v50 = vsel %vm1935_vm5, 1.0, %v9228_v14  ;;  %v6408_v60 = vsel %vm1936_vm4, 1.0, %v9228_v14  ;;  %vm1776_vm15 = vcmp.lt.f32.partialorder %v10273_v12, %v6272_v20  ;;  %vm1777_vm11 = vcmp.lt.f32.partialorder %v10274_v45, %v6272_v20 }
 0x368   :  { %vm1778_vm2 = vcmp.lt.f32.partialorder %v10275_v25, %v6272_v20  ;;  %v6422_v30 = vsel %vm1937_vm3, 1.0, %v9228_v14  ;;  %v6428_v47 = vsel %vm1938_vm7, 1.0, %v9228_v14  ;;  %v6434_v43 = vsel %vm1939_vm10, 1.0, %v9228_v14 }
 0x369   :  { %vm10305_vm5 = vcmp.gt.f32.partialorder %v10273_v12, %v6270_v54  ;;  %vm10306_vm10 = vcmp.gt.f32.partialorder %v10274_v45, %v6270_v54  ;;  %vm10308_vm3 = vcmp.gt.f32.partialorder %v10276_v38, %v6270_v54  ;;  %vm10309_vm6 = vcmp.gt.f32.partialorder %v10277_v3, %v6270_v54  ;;  %v10376_v45 = vld [vmem:[#allocation53_spill] sm:$0xff] }
 0x36a   :  { %v6440_v13 = vsel %vm10305_vm5, 1.0, %v9228_v14  ;;  %v6454_v4 = vsel %vm10306_vm10, 1.0, %v9228_v14  ;;  %vm10307_vm5 = vcmp.gt.f32.partialorder %v10275_v25, %v6270_v54  ;;  %v6466_v5 = vsel %vm10308_vm3, 1.0, %v9228_v14 }
 0x36b   :  { %v6460_v2 = vsel %vm10307_vm5, 1.0, %v9228_v14  ;;  %v6472_v10 = vsel %vm10309_vm6, 1.0, %v9228_v14  ;;  %vm10310_vm3 = vcmp.gt.f32.partialorder %v10278_v48, %v6270_v54  ;;  %vm10311_vm6 = vcmp.gt.f32.partialorder %v10279_v46, %v6270_v54 }
 0x36c   :  { %v6486_v59 = vsel %vm10310_vm3, 1.0, %v9228_v14  ;;  %v6492_v16 = vsel %vm10311_vm6, 1.0, %v9228_v14  ;;  %vm10312_vm7 = vcmp.gt.f32.partialorder %v10280_v49, %v6270_v54  ;;  %vm10313_vm4 = vcmp.gt.f32.partialorder %v10281_v39, %v6270_v54 }
 0x36d   :  { %v6498_v1 = vsel %vm10312_vm7, 1.0, %v9228_v14  ;;  %v6504_v34 = vsel %vm10313_vm4, 1.0, %v9228_v14  ;;  %vm10315_vm7 = vcmp.gt.f32.partialorder %v10282_v23, %v6270_v54  ;;  %vm10316_vm4 = vcmp.gt.f32.partialorder %v10283_v15, %v6270_v54 }
 0x36e   :  { %10314 = vst [vmem:[#allocation242_spill] sm:$0xff] %v6504_v34  ;;  %v6518_v24 = vsel %vm10315_vm7, 1.0, %v9228_v14  ;;  %v6524_v11 = vsel %vm10316_vm4, 1.0, %v9228_v14  ;;  %vm10317_vm5 = vcmp.gt.f32.partialorder %v10284_v51, %v6270_v54  ;;  %vm10319_vm10 = vcmp.gt.f32.partialorder %v10285_v35, %v6270_v54 }
 0x36f   :  { %v6530_v39 = vsel %vm10317_vm5, 1.0, %v9228_v14  ;;  %v6536_v34 = vsel %vm10319_vm10, 1.0, %v9228_v14  ;;  %vm10321_vm5 = vcmp.gt.f32.partialorder %v10286_v63, %v6270_v54  ;;  %vm10322_vm10 = vcmp.gt.f32.partialorder %v10287_v58, %v6270_v54 }
 0x370   :  { %10318 = vst [vmem:[#allocation202_spill] sm:$0xff] %v6530_v39  ;;  %10320 = vst [vmem:[#allocation131_spill] sm:$0xff] %v6536_v34  ;;  %v6550_v51 = vsel %vm10321_vm5, 1.0, %v9228_v14  ;;  %v6556_v35 = vsel %vm10322_vm10, 1.0, %v9228_v14  ;;  %vm10323_vm6 = vcmp.gt.f32.partialorder %v10288_v28, %v6270_v54  ;;  %vm10325_vm3 = vcmp.gt.f32.partialorder %v10289_v19, %v6270_v54 }
 0x371   :  { %v6562_v34 = vsel %vm10323_vm6, 1.0, %v9228_v14  ;;  %v6568_v39 = vsel %vm10325_vm3, 1.0, %v9228_v14  ;;  %vm10327_vm6 = vcmp.gt.f32.partialorder %v10290_v8, %v6270_v54  ;;  %vm10328_vm3 = vcmp.gt.f32.partialorder %v10291_v40, %v6270_v54 }
 0x372   :  { %10324 = vst [vmem:[#allocation243_spill] sm:$0xff] %v6562_v34  ;;  %10326 = vst [vmem:[#allocation203_spill] sm:$0xff] %v6568_v39  ;;  %v6582_v28 = vsel %vm10327_vm6, 1.0, %v9228_v14  ;;  %v6588_v19 = vsel %vm10328_vm3, 1.0, %v9228_v14  ;;  %vm10329_vm4 = vcmp.gt.f32.partialorder %v10292_v32, %v6270_v54  ;;  %vm10331_vm7 = vcmp.gt.f32.partialorder %v10293_v41, %v6270_v54 }
 0x373   :  { %v6594_v39 = vsel %vm10329_vm4, 1.0, %v9228_v14  ;;  %v6600_v34 = vsel %vm10331_vm7, 1.0, %v9228_v14  ;;  %vm10333_vm4 = vcmp.gt.f32.partialorder %v10294_v61, %v6270_v54  ;;  %vm10334_vm7 = vcmp.gt.f32.partialorder %v10295_v22, %v6270_v54 }
 0x374   :  { %10330 = vst [vmem:[#allocation132_spill] sm:$0xff] %v6594_v39  ;;  %10332 = vst [vmem:[#allocation244_spill] sm:$0xff] %v6600_v34  ;;  %v6612_v32 = vsel %vm10333_vm4, 1.0, %v9228_v14  ;;  %v6618_v41 = vsel %vm10334_vm7, 1.0, %v9228_v14  ;;  %vm10335_vm6 = vcmp.gt.f32.partialorder %v10296_v53, %v6270_v54  ;;  %vm10337_vm3 = vcmp.gt.f32.partialorder %v10297_v6, %v6270_v54 }
 0x375   :  { %v6624_v34 = vsel %vm10335_vm6, 1.0, %v9228_v14  ;;  %v6630_v39 = vsel %vm10337_vm3, 1.0, %v9228_v14  ;;  %vm1803_vm4 = vcmp.lt.f32.partialorder %v10300_v21, %v6272_v20  ;;  %vm1805_vm7 = vcmp.lt.f32.partialorder %v10302_v52, %v6272_v20 }
 0x376   :  { %10336 = vst [vmem:[#allocation121_spill] sm:$0xff] %v6624_v34  ;;  %10338 = vst [vmem:[#allocation245_spill] sm:$0xff] %v6630_v39  ;;  %vm10339_vm6 = vcmp.gt.f32.partialorder %v10298_v56, %v6270_v54  ;;  %vm10340_vm3 = vcmp.gt.f32.partialorder %v10299_v18, %v6270_v54  ;;  %vm10341_vm10 = vcmp.gt.f32.partialorder %v10300_v21, %v6270_v54  ;;  %v6670_v18 = vsel %vm1969_vm12, 1.0, %v9228_v14 }
 0x377   :  { %v6644_v53 = vsel %vm10339_vm6, 1.0, %v9228_v14  ;;  %v6650_v6 = vsel %vm10340_vm3, 1.0, %v9228_v14  ;;  %v6656_v39 = vsel %vm10341_vm10, 1.0, %v9228_v14  ;;  %vm10342_vm5 = vcmp.gt.f32.partialorder %v10301_v62, %v6270_v54 }
 0x378   :  { %v6662_v34 = vsel %vm10342_vm5, 1.0, %v9228_v14  ;;  %vm1807_vm6 = vcmp.lt.f32.partialorder %v10304_v44, %v6272_v20  ;;  %v6676_v21 = vsel %vm1970_vm0, 1.0, %v9228_v14  ;;  %v6682_v62 = vsel %vm1971_vm13, 1.0, %v9228_v14  ;;  %v10401_v44 = vld [vmem:[#allocation64_spill] sm:$0xff] }
 0x379   :  { %10343 = vst [vmem:[#allocation133_spill] sm:$0xff] %v6662_v34  ;;  %vm10344_vm5 = vcmp.lt.f32.partialorder %v10264_v17, %v6272_v20  ;;  %vm10345_vm12 = vcmp.lt.f32.partialorder %v10265_v57, %v6272_v20  ;;  %vm10346_vm0 = vcmp.lt.f32.partialorder %v10266_v36, %v6272_v20  ;;  %vm10347_vm13 = vcmp.lt.f32.partialorder %v10267_v29, %v6272_v20  ;;  %v10362_v57 = vld [vmem:[#allocation131_spill] sm:$0xff] }
 0x37a   :  { %v2259_v34 = vsel %vm10344_vm5, -1.0, %v6370_v9  ;;  %v2260_v52 = vsel %vm10345_vm12, -1.0, %v6376_v0  ;;  %v2261_v33 = vsel %vm10346_vm0, -1.0, %v6390_v31  ;;  %v2262_v54 = vsel %vm10347_vm13, -1.0, %v6396_v26  ;;  %v10363_v36 = vld [vmem:[#allocation223_spill] sm:$0xff] }
 0x37b   :  { %vm10348_vm10 = vcmp.lt.f32.partialorder %v10268_v37, %v6272_v20  ;;  %2423 = vst [vmem:[#allocation5] sm:$0xff] %v2259_v34  ;;  %v2264_v0 = vsel %vm1772_vm1, -1.0, %v6408_v60  ;;  %v2265_v31 = vsel %vm1773_vm14, -1.0, %v6422_v30  ;;  %v2266_v26 = vsel %vm1774_vm8, -1.0, %v6428_v47  ;;  %2424 = vst [vmem:[#allocation5 + $0x8] sm:$0xff] %v2260_v52  ;;  %v10355_v60 = vld [vmem:[#allocation125_spill] sm:$0xff] }
 0x37c   :  { %v2263_v9 = vsel %vm10348_vm10, -1.0, %v6402_v50  ;;  %v2267_v34 = vsel %vm1775_vm9, -1.0, %v6434_v43  ;;  %2425 = vst [vmem:[#allocation5 + $0x10] sm:$0xff] %v2261_v33  ;;  %2426 = vst [vmem:[#allocation5 + $0x18] sm:$0xff] %v2262_v54  ;;  %v2268_v50 = vsel %vm1776_vm15, -1.0, %v6440_v13  ;;  %v2269_v30 = vsel %vm1777_vm11, -1.0, %v6454_v4 }
 0x37d   :  { %2427 = vst [vmem:[#allocation5 + $0x20] sm:$0xff] %v2263_v9  ;;  %v2270_v47 = vsel %vm1778_vm2, -1.0, %v6460_v2  ;;  %vm10349_vm1 = vcmp.lt.f32.partialorder %v10276_v38, %v6272_v20  ;;  %2428 = vst [vmem:[#allocation5 + $0x28] sm:$0xff] %v2264_v0  ;;  %vm10350_vm9 = vcmp.lt.f32.partialorder %v10277_v3, %v6272_v20  ;;  %vm10351_vm8 = vcmp.lt.f32.partialorder %v10278_v48, %v6272_v20  ;;  %v10360_v52 = vld [vmem:[#allocation222_spill] sm:$0xff]  ;;  %v10367_v37 = vld [vmem:[#allocation243_spill] sm:$0xff] }
 0x37e   :  { %v2271_v43 = vsel %vm10349_vm1, -1.0, %v6466_v5  ;;  %2429 = vst [vmem:[#allocation5 + $0x30] sm:$0xff] %v2265_v31  ;;  %2430 = vst [vmem:[#allocation5 + $0x38] sm:$0xff] %v2266_v26  ;;  %v2272_v13 = vsel %vm10350_vm9, -1.0, %v6472_v10  ;;  %v2273_v4 = vsel %vm10351_vm8, -1.0, %v6486_v59  ;;  %vm10352_vm14 = vcmp.lt.f32.partialorder %v10279_v46, %v6272_v20  ;;  %v10354_v10 = vld [vmem:[#allocation242_spill] sm:$0xff]  ;;  %v1666_v26 = vpop.xlane.xlu1 %1665 }
 0x37f   :  { %2431 = vst [vmem:[#allocation5 + $0x40] sm:$0xff] %v2267_v34  ;;  %v2274_v2 = vsel %vm10352_vm14, -1.0, %v6492_v16  ;;  %vm10353_vm15 = vcmp.lt.f32.partialorder %v10280_v49, %v6272_v20  ;;  %2432 = vst [vmem:[#allocation5 + $0x48] sm:$0xff] %v2268_v50  ;;  %vm10356_vm11 = vcmp.lt.f32.partialorder %v10355_v60, %v6272_v20  ;;  %vm10357_vm2 = vcmp.lt.f32.partialorder %v10282_v23, %v6272_v20  ;;  %v10370_v42 = vld [vmem:[#allocation203_spill] sm:$0xff]  ;;  %v10375_v12 = vld [vmem:[#allocation132_spill] sm:$0xff] }
 0x380   :  { %v2275_v5 = vsel %vm10353_vm15, -1.0, %v6498_v1  ;;  %2433 = vst [vmem:[#allocation5 + $0x50] sm:$0xff] %v2269_v30  ;;  %2434 = vst [vmem:[#allocation5 + $0x58] sm:$0xff] %v2270_v47  ;;  %v2276_v33 = vsel %vm10356_vm11, -1.0, %v10354_v10  ;;  %v2277_v59 = vsel %vm10357_vm2, -1.0, %v6518_v24  ;;  %vm10358_vm3 = vcmp.lt.f32.partialorder %v10283_v15, %v6272_v20  ;;  %v10359_v1 = vld [vmem:[#allocation202_spill] sm:$0xff] }
 0x381   :  { %2435 = vst [vmem:[#allocation5 + $0x60] sm:$0xff] %v2271_v43  ;;  %v2278_v16 = vsel %vm10358_vm3, -1.0, %v6524_v11  ;;  %vm10361_vm5 = vcmp.lt.f32.partialorder %v10360_v52, %v6272_v20  ;;  %2436 = vst [vmem:[#allocation5 + $0x68] sm:$0xff] %v2272_v13  ;;  %vm10364_vm12 = vcmp.lt.f32.partialorder %v10363_v36, %v6272_v20  ;;  %vm10365_vm0 = vcmp.lt.f32.partialorder %v10286_v63, %v6272_v20  ;;  %v10378_v38 = vld [vmem:[#allocation244_spill] sm:$0xff]  ;;  %v10379_v3 = vld [vmem:[#allocation54_spill] sm:$0xff] }
 0x382   :  { %v2279_v17 = vsel %vm10361_vm5, -1.0, %v10359_v1  ;;  %2437 = vst [vmem:[#allocation5 + $0x70] sm:$0xff] %v2273_v4  ;;  %2438 = vst [vmem:[#allocation5 + $0x78] sm:$0xff] %v2274_v2  ;;  %v2280_v29 = vsel %vm10364_vm12, -1.0, %v10362_v57  ;;  %v2281_v24 = vsel %vm10365_vm0, -1.0, %v6550_v51  ;;  %vm10366_vm13 = vcmp.lt.f32.partialorder %v10287_v58, %v6272_v20  ;;  %v10384_v48 = vld [vmem:[#allocation128_spill] sm:$0xff] }
 0x383   :  { %2439 = vst [vmem:[#allocation5 + $0x80] sm:$0xff] %v2275_v5  ;;  %v2282_v11 = vsel %vm10366_vm13, -1.0, %v6556_v35  ;;  %vm10369_vm10 = vcmp.lt.f32.partialorder %v10368_v55, %v6272_v20  ;;  %2440 = vst [vmem:[#allocation5 + $0x88] sm:$0xff] %v2276_v33  ;;  %vm10372_vm1 = vcmp.lt.f32.partialorder %v10371_v27, %v6272_v20  ;;  %vm10373_vm9 = vcmp.lt.f32.partialorder %v10290_v8, %v6272_v20  ;;  %v10386_v49 = vld [vmem:[#allocation245_spill] sm:$0xff]  ;;  %v10400_v47 = vld [vmem:[#allocation130_spill] sm:$0xff] }
 0x384   :  { %v2283_v7 = vsel %vm10369_vm10, -1.0, %v10367_v37  ;;  %2441 = vst [vmem:[#allocation5 + $0x90] sm:$0xff] %v2277_v59  ;;  %2442 = vst [vmem:[#allocation5 + $0x98] sm:$0xff] %v2278_v16  ;;  %v2284_v63 = vsel %vm10372_vm1, -1.0, %v10370_v42  ;;  %v2285_v58 = vsel %vm10373_vm9, -1.0, %v6582_v28  ;;  %vm10374_vm8 = vcmp.lt.f32.partialorder %v10291_v40, %v6272_v20  ;;  %v10383_v40 = vld [vmem:[#allocation121_spill] sm:$0xff] }
 0x385   :  { %2443 = vst [vmem:[#allocation5 + $0xa0] sm:$0xff] %v2279_v17  ;;  %v2286_v35 = vsel %vm10374_vm8, -1.0, %v6588_v19  ;;  %vm10377_vm14 = vcmp.lt.f32.partialorder %v10376_v45, %v6272_v20  ;;  %2444 = vst [vmem:[#allocation5 + $0xa8] sm:$0xff] %v2280_v29  ;;  %vm10380_vm15 = vcmp.lt.f32.partialorder %v10379_v3, %v6272_v20  ;;  %vm10381_vm11 = vcmp.lt.f32.partialorder %v10294_v61, %v6272_v20  ;;  %v10387_v23 = vld [vmem:[#allocation57_spill] sm:$0xff]  ;;  %v10404_v4 = vld [vmem:[#allocation231_spill] sm:$0xff] }
 0x386   :  { %v2287_v25 = vsel %vm10377_vm14, -1.0, %v10375_v12  ;;  %2445 = vst [vmem:[#allocation5 + $0xb0] sm:$0xff] %v2281_v24  ;;  %2446 = vst [vmem:[#allocation5 + $0xb8] sm:$0xff] %v2282_v11  ;;  %v2288_v8 = vsel %vm10380_vm15, -1.0, %v10378_v38  ;;  %v2289_v28 = vsel %vm10381_vm11, -1.0, %v6612_v32  ;;  %vm10382_vm2 = vcmp.lt.f32.partialorder %v10295_v22, %v6272_v20  ;;  %v10393_v54 = vld [vmem:[#allocation133_spill] sm:$0xff] }
 0x387   :  { %2447 = vst [vmem:[#allocation5 + $0xc0] sm:$0xff] %v2283_v7  ;;  %v2290_v19 = vsel %vm10382_vm2, -1.0, %v6618_v41  ;;  %vm10385_vm3 = vcmp.lt.f32.partialorder %v10384_v48, %v6272_v20  ;;  %2448 = vst [vmem:[#allocation5 + $0xc8] sm:$0xff] %v2284_v63  ;;  %vm10388_vm5 = vcmp.lt.f32.partialorder %v10387_v23, %v6272_v20  ;;  %vm10389_vm12 = vcmp.lt.f32.partialorder %v10298_v56, %v6272_v20  ;;  %v10390_v41 = vld [vmem:[#allocation59_spill] sm:$0xff]  ;;  %v10394_v9 = vld [vmem:[#allocation61_spill] sm:$0xff] }
 0x388   :  { %v2291_v46 = vsel %vm10385_vm3, -1.0, %v10383_v40  ;;  %2449 = vst [vmem:[#allocation5 + $0xd0] sm:$0xff] %v2285_v58  ;;  %2450 = vst [vmem:[#allocation5 + $0xd8] sm:$0xff] %v2286_v35  ;;  %v2292_v61 = vsel %vm10388_vm5, -1.0, %v10386_v49  ;;  %v2293_v22 = vsel %vm10389_vm12, -1.0, %v6644_v53  ;;  %vm10391_vm0 = vcmp.lt.f32.partialorder %v10390_v41, %v6272_v20  ;;  %v10405_v2 = vld [vmem:[#allocation259_spill] sm:$0xff] }
 0x389   :  { %2451 = vst [vmem:[#allocation5 + $0xe0] sm:$0xff] %v2287_v25  ;;  %v2294_v32 = vsel %vm10391_vm0, -1.0, %v6650_v6  ;;  %2452 = vst [vmem:[#allocation5 + $0xe8] sm:$0xff] %v2288_v8  ;;  %v2295_v51 = vsel %vm1803_vm4, -1.0, %v6656_v39  ;;  %vm10395_vm13 = vcmp.lt.f32.partialorder %v10394_v9, %v6272_v20  ;;  %v2297_v0 = vsel %vm1805_vm7, -1.0, %v6670_v18  ;;  %v10397_v6 = vld [vmem:[#allocation63_spill] sm:$0xff] }
 0x38a   :  { %2453 = vst [vmem:[#allocation5 + $0xf0] sm:$0xff] %v2289_v28  ;;  %2454 = vst [vmem:[#allocation5 + $0xf8] sm:$0xff] %v2290_v19  ;;  %v2296_v56 = vsel %vm10395_vm13, -1.0, %v10393_v54  ;;  %vm10398_vm10 = vcmp.lt.f32.partialorder %v10397_v6, %v6272_v20  ;;  %v2299_v39 = vsel %vm1807_vm6, -1.0, %v6682_v62  ;;  %vm10399_vm4 = vcmask 523264   ;;  %v10402_v62 = vld [vmem:[#allocation228_spill] sm:$0xff] }
 0x38b   :  { %2455 = vst [vmem:[#allocation5 + $0x100] sm:$0xff] %v2291_v46  ;;  %v2298_v31 = vsel %vm10398_vm10, -1.0, %v6676_v21  ;;  %2456 = vst [vmem:[#allocation5 + $0x108] sm:$0xff] %v2292_v61  ;;  %v10403_v20 = vld [vmem:[#allocation256_spill] sm:$0xff]  ;;  %v10407_v10 = vld [vmem:[#allocation261_spill] sm:$0xff] }
 0x38c   :  { %2457 = vst [vmem:[#allocation5 + $0x110] sm:$0xff] %v2293_v22  ;;  %2458 = vst [vmem:[#allocation5 + $0x118] sm:$0xff] %v2294_v32  ;;  %v10406_v5 = vld [vmem:[#allocation260_spill] sm:$0xff]  ;;  %v10408_v60 = vld [vmem:[#allocation262_spill] sm:$0xff] }
 0x38d   :  { %2459 = vst [vmem:[#allocation5 + $0x120] sm:$0xff] %v2295_v51  ;;  %2460 = vst [vmem:[#allocation5 + $0x128] sm:$0xff] %v2296_v56  ;;  %v10409_v33 = vld [vmem:[#allocation232_spill] sm:$0xff]  ;;  %v10410_v59 = vld [vmem:[#allocation11_spill] sm:$0xff] }
 0x38e   :  { %2461 = vst [vmem:[#allocation5 + $0x130] sm:$0xff] %v2297_v0  ;;  %2462 = vst [vmem:[#allocation5 + $0x138] sm:$0xff] %v2298_v31  ;;  %v10411_v16 = vld [vmem:[#allocation263_spill] sm:$0xff]  ;;  %v10412_v1 = vld [vmem:[#allocation264_spill] sm:$0xff] }
 0x38f   :  { %2463 = vst.msk [vmem:[#allocation5 + $0x140] sm:$0xff] %vm10399_vm4, %v2299_v39  ;;  %v10413_v17 = vld [vmem:[#allocation233_spill] sm:$0xff]  ;;  %v10414_v57 = vld [vmem:[#allocation12_spill] sm:$0xff]  ;;  %v10416_v29 = vld [vmem:[#allocation266_spill] sm:$0xff] }
 0x390   :  { %v10415_v36 = vld [vmem:[#allocation265_spill] sm:$0xff]  ;;  %v10417_v24 = vld [vmem:[#allocation234_spill] sm:$0xff]  ;;  %v10419_v37 = vld [vmem:[#allocation267_spill] sm:$0xff] }
 0x391   :  { %v10418_v11 = vld [vmem:[#allocation13_spill] sm:$0xff]  ;;  %v10420_v55 = vld [vmem:[#allocation268_spill] sm:$0xff]  ;;  %v10421_v7 = vld [vmem:[#allocation235_spill] sm:$0xff] }
 0x392   :  { %v10422_v42 = vld [vmem:[#allocation14_spill] sm:$0xff]  ;;  %v10423_v27 = vld [vmem:[#allocation269_spill] sm:$0xff]  ;;  %v10425_v58 = vld [vmem:[#allocation236_spill] sm:$0xff] }
 0x393   :  { %v10424_v63 = vld [vmem:[#allocation270_spill] sm:$0xff]  ;;  %v10426_v35 = vld [vmem:[#allocation15_spill] sm:$0xff]  ;;  %v10428_v45 = vld [vmem:[#allocation272_spill] sm:$0xff] }
 0x394   :  { %v10427_v12 = vld [vmem:[#allocation271_spill] sm:$0xff]  ;;  %v10429_v38 = vld [vmem:[#allocation237_spill] sm:$0xff]  ;;  %v10431_v8 = vld [vmem:[#allocation274_spill] sm:$0xff] }
 0x395   :  { %v10430_v3 = vld [vmem:[#allocation273_spill] sm:$0xff]  ;;  %v10432_v28 = vld [vmem:[#allocation275_spill] sm:$0xff]  ;;  %v10436_v46 = vld [vmem:[#allocation238_spill] sm:$0xff] }
 0x396   :  { %v1290_v18 = vpop.xlane.xlu0 %1289  ;;  %v10437_v49 = vld [vmem:[#allocation276_spill] sm:$0xff]  ;;  %v10438_v23 = vld [vmem:[#allocation277_spill] sm:$0xff]  ;;  %v10439_v61 = vld [vmem:[#allocation239_spill] sm:$0xff] }
 0x397   :  { %v1752_v34 = vsub.f32 %v1290_v18, %v1666_v26  ;;  %v10443_v51 = vld [vmem:[#allocation278_spill] sm:$0xff]  ;;  %v10444_v54 = vld [vmem:[#allocation279_spill] sm:$0xff]  ;;  %v10445_v9 = vld [vmem:[#allocation240_spill] sm:$0xff] }
 0x398   :  { %v10446_v56 = vld [vmem:[#allocation129_spill] sm:$0xff]  ;;  %v10452_v39 = vld [vmem:[#allocation120_spill] sm:$0xff] }
 0x399   :  { %v1757_v50 = vmul.f32 0.33333334, %v1752_v34  ;;  %v10455_v34 = vld [vmem:[#allocation68_spill] sm:$0xff] }
 0x39a   :  { %v1623_v21 = vpop.xlane.xlu0 %1622 }
 0x39b   :  { %v6849_v30 = vsub.f32 %v1290_v18, %v1757_v50  ;;  %v1751_v43 = vsub.f32 %v10400_v47, %v1623_v21  ;;  %v6852_v13 = vadd.f32 %v1757_v50, %v1666_v26  ;;  %v10453_v18 = vld [vmem:[#allocation66_spill] sm:$0xff]  ;;  %v10454_v26 = vld [vmem:[#allocation67_spill] sm:$0xff] }
 0x39d   :  { %vm2013_vm7 = vcmp.gt.f32.partialorder %v10401_v44, %v6849_v30  ;;  %vm2014_vm6 = vcmp.gt.f32.partialorder %v10402_v62, %v6849_v30  ;;  %vm2015_vm1 = vcmp.gt.f32.partialorder %v10403_v20, %v6849_v30  ;;  %vm2016_vm9 = vcmp.gt.f32.partialorder %v10404_v4, %v6849_v30 }
 0x39e   :  { %vm2017_vm8 = vcmp.gt.f32.partialorder %v10405_v2, %v6849_v30  ;;  %vm2018_vm14 = vcmp.gt.f32.partialorder %v10406_v5, %v6849_v30  ;;  %vm2019_vm15 = vcmp.gt.f32.partialorder %v10407_v10, %v6849_v30  ;;  %vm2020_vm11 = vcmp.gt.f32.partialorder %v10408_v60, %v6849_v30 }
 0x39f   :  { %vm2021_vm2 = vcmp.gt.f32.partialorder %v10409_v33, %v6849_v30  ;;  %v1756_v52 = vmul.f32 0.33333334, %v1751_v43  ;;  %vm2034_vm10 = vcmp.gt.f32.partialorder %v10422_v42, %v6849_v30  ;;  %vm2039_vm0 = vcmp.gt.f32.partialorder %v10427_v12, %v6849_v30  ;;  %v10460_v43 = vld [vmem:[#allocation71_spill] sm:$0xff] }
 0x3a0   :  { %vm2040_vm13 = vcmp.gt.f32.partialorder %v10428_v45, %v6849_v30  ;;  %vm2041_vm4 = vcmp.gt.f32.partialorder %v10429_v38, %v6849_v30  ;;  %v6925_v19 = vsel %vm2013_vm7, 1.0, %v9228_v14  ;;  %v6931_v40 = vsel %vm2014_vm6, 1.0, %v9228_v14 }
 0x3a1   :  { %v6911_v25 = vsub.f32 %v10400_v47, %v1756_v52  ;;  %10433 = vst [vmem:[#allocation204_spill] sm:$0xff] %v6925_v19  ;;  %10434 = vst [vmem:[#allocation246_spill] sm:$0xff] %v6931_v40  ;;  %v6937_v48 = vsel %vm2015_vm1, 1.0, %v9228_v14  ;;  %vm2045_vm12 = vcmp.gt.f32.partialorder %v10436_v46, %v6849_v30  ;;  %vm2046_vm5 = vcmp.gt.f32.partialorder %v10437_v49, %v6849_v30  ;;  %v10459_v47 = vld [vmem:[#allocation70_spill] sm:$0xff]  ;;  %v10473_v40 = vld [vmem:[#allocation81_spill] sm:$0xff] }
 0x3a2   :  { %10435 = vst [vmem:[#allocation205_spill] sm:$0xff] %v6937_v48  ;;  %vm2047_vm7 = vcmp.gt.f32.partialorder %v10438_v23, %v6849_v30  ;;  %v6947_v22 = vadd.f32 %v1756_v52, %v1623_v21  ;;  %v6953_v41 = vsel %vm2016_vm9, 1.0, %v9228_v14  ;;  %v6959_v32 = vsel %vm2017_vm8, 1.0, %v9228_v14  ;;  %v10458_v21 = vld [vmem:[#allocation69_spill] sm:$0xff]  ;;  %v10461_v52 = vld [vmem:[#allocation72_spill] sm:$0xff] }
 0x3a3   :  { %10440 = vst [vmem:[#allocation247_spill] sm:$0xff] %v6953_v41  ;;  %10441 = vst [vmem:[#allocation250_spill] sm:$0xff] %v6959_v32  ;;  %v6965_v15 = vsel %vm2018_vm14, 1.0, %v9228_v14  ;;  %vm2049_vm6 = vcmp.gt.f32.partialorder %v10443_v51, %v6849_v30  ;;  %vm2050_vm1 = vcmp.gt.f32.partialorder %v10444_v54, %v6849_v30  ;;  %v6979_v53 = vsel %vm2019_vm15, 1.0, %v9228_v14  ;;  %v10469_v32 = vld [vmem:[#allocation80_spill] sm:$0xff] }
 0x3a4   :  { %10442 = vst [vmem:[#allocation134_spill] sm:$0xff] %v6965_v15  ;;  %10447 = vst [vmem:[#allocation51_spill] sm:$0xff] %v6979_v53  ;;  %v6985_v0 = vsel %vm2020_vm11, 1.0, %v9228_v14  ;;  %v6991_v6 = vsel %vm2021_vm2, 1.0, %v9228_v14  ;;  %vm10450_vm8 = vcmp.gt.f32.partialorder %v10410_v59, %v6849_v30  ;;  %vm10456_vm2 = vcmp.gt.f32.partialorder %v10411_v16, %v6849_v30  ;;  %v10467_v53 = vld [vmem:[#allocation78_spill] sm:$0xff]  ;;  %v10468_v15 = vld [vmem:[#allocation79_spill] sm:$0xff] }
 0x3a5   :  { %10448 = vst [vmem:[#allocation16_spill] sm:$0xff] %v6985_v0  ;;  %10449 = vst [vmem:[#allocation251_spill] sm:$0xff] %v6991_v6  ;;  %v6997_v31 = vsel %vm10450_vm8, 1.0, %v9228_v14  ;;  %v7011_v50 = vsel %vm10456_vm2, 1.0, %v9228_v14  ;;  %v10463_v6 = vld [vmem:[#allocation74_spill] sm:$0xff]  ;;  %v10464_v14 = vld [vmem:[#allocation75_spill] sm:$0xff]  ;;  %vm10471_vm9 = vcmp.gt.f32.partialorder %v10412_v1, %v6849_v30  ;;  %vm10474_vm3 = vcmp.gt.f32.partialorder %v10413_v17, %v6849_v30 }
 0x3a6   :  { %10451 = vst [vmem:[#allocation207_spill] sm:$0xff] %v6997_v31  ;;  %10457 = vst [vmem:[#allocation114_spill] sm:$0xff] %v7011_v50  ;;  %v10462_v31 = vld [vmem:[#allocation73_spill] sm:$0xff]  ;;  %vm1981_vm2 = vcmp.gt.f32.partialorder %v10464_v14, %v6911_v25  ;;  %v10465_v50 = vld [vmem:[#allocation76_spill] sm:$0xff]  ;;  %v10470_v41 = vmov 0.0   ;;  %vm10478_vm14 = vcmp.gt.f32.partialorder %v10415_v36, %v6849_v30  ;;  %vm10480_vm15 = vcmp.gt.f32.partialorder %v10416_v29, %v6849_v30 }
 0x3a7   :  { %v10466_v0 = vld [vmem:[#allocation77_spill] sm:$0xff]  ;;  %v7041_v48 = vsel %vm10471_vm9, 1.0, %v10470_v41  ;;  %v7055_v19 = vsel %vm10474_vm3, 1.0, %v10470_v41  ;;  %vm10476_vm9 = vcmp.gt.f32.partialorder %v10414_v57, %v6849_v30  ;;  %v7067_v20 = vsel %vm10478_vm14, 1.0, %v10470_v41 }
 0x3a8   :  { %10472 = vst [vmem:[#allocation248_spill] sm:$0xff] %v7041_v48  ;;  %10475 = vst [vmem:[#allocation252_spill] sm:$0xff] %v7055_v19  ;;  %v7061_v48 = vsel %vm10476_vm9, 1.0, %v10470_v41  ;;  %v7073_v62 = vsel %vm10480_vm15, 1.0, %v10470_v41  ;;  %vm10482_vm14 = vcmp.gt.f32.partialorder %v10417_v24, %v6849_v30  ;;  %vm10484_vm15 = vcmp.gt.f32.partialorder %v10418_v11, %v6849_v30 }
 0x3a9   :  { %10477 = vst [vmem:[#allocation135_spill] sm:$0xff] %v7061_v48  ;;  %10479 = vst [vmem:[#allocation115_spill] sm:$0xff] %v7067_v20  ;;  %v7087_v20 = vsel %vm10482_vm14, 1.0, %v10470_v41  ;;  %vm10486_vm8 = vcmp.gt.f32.partialorder %v10419_v37, %v6849_v30  ;;  %vm10488_vm11 = vcmp.gt.f32.partialorder %v10420_v55, %v6849_v30  ;;  %vm1856_vm14 = vcmp.lt.f32.partialorder %v10408_v60, %v6852_v13 }
 0x3aa   :  { %10481 = vst [vmem:[#allocation249_spill] sm:$0xff] %v7073_v62  ;;  %10483 = vst [vmem:[#allocation229_spill] sm:$0xff] %v7087_v20  ;;  %v7093_v62 = vsel %vm10484_vm15, 1.0, %v10470_v41  ;;  %v7099_v48 = vsel %vm10486_vm8, 1.0, %v10470_v41  ;;  %v7105_v19 = vsel %vm10488_vm11, 1.0, %v10470_v41  ;;  %vm10490_vm8 = vcmp.gt.f32.partialorder %v10421_v7, %v6849_v30 }
 0x3ab   :  { %10485 = vst [vmem:[#allocation116_spill] sm:$0xff] %v7093_v62  ;;  %10487 = vst [vmem:[#allocation253_spill] sm:$0xff] %v7099_v48  ;;  %v7119_v48 = vsel %vm10490_vm8, 1.0, %v10470_v41  ;;  %vm10493_vm11 = vcmp.gt.f32.partialorder %v10423_v27, %v6849_v30  ;;  %vm10495_vm3 = vcmp.gt.f32.partialorder %v10424_v63, %v6849_v30  ;;  %vm1860_vm8 = vcmp.lt.f32.partialorder %v10412_v1, %v6852_v13 }
 0x3ac   :  { %10489 = vst [vmem:[#allocation136_spill] sm:$0xff] %v7105_v19  ;;  %10491 = vst [vmem:[#allocation181_spill] sm:$0xff] %v7119_v48  ;;  %v7125_v19 = vsel %vm2034_vm10, 1.0, %v10470_v41  ;;  %v7131_v62 = vsel %vm10493_vm11, 1.0, %v10470_v41  ;;  %v7137_v20 = vsel %vm10495_vm3, 1.0, %v10470_v41  ;;  %vm1861_vm15 = vcmp.lt.f32.partialorder %v10413_v17, %v6852_v13 }
 0x3ad   :  { %10492 = vst [vmem:[#allocation254_spill] sm:$0xff] %v7125_v19  ;;  %10494 = vst [vmem:[#allocation31_spill] sm:$0xff] %v7131_v62  ;;  %vm10497_vm11 = vcmp.gt.f32.partialorder %v10425_v58, %v6849_v30  ;;  %vm10499_vm3 = vcmp.gt.f32.partialorder %v10426_v35, %v6849_v30  ;;  %v7163_v19 = vsel %vm2039_vm0, 1.0, %v10470_v41  ;;  %v7169_v48 = vsel %vm2040_vm13, 1.0, %v10470_v41 }
 0x3ae   :  { %10496 = vst [vmem:[#allocation32_spill] sm:$0xff] %v7137_v20  ;;  %v7151_v62 = vsel %vm10497_vm11, 1.0, %v10470_v41  ;;  %v7157_v20 = vsel %vm10499_vm3, 1.0, %v10470_v41  ;;  %10501 = vst [vmem:[#allocation137_spill] sm:$0xff] %v7163_v19  ;;  %vm1864_vm11 = vcmp.lt.f32.partialorder %v10416_v29, %v6852_v13  ;;  %v7183_v19 = vsel %vm2041_vm4, 1.0, %v10470_v41 }
 0x3af   :  { %10498 = vst [vmem:[#allocation182_spill] sm:$0xff] %v7151_v62  ;;  %10500 = vst [vmem:[#allocation255_spill] sm:$0xff] %v7157_v20  ;;  %vm10504_vm0 = vcmp.gt.f32.partialorder %v10430_v3, %v6849_v30  ;;  %vm10506_vm13 = vcmp.gt.f32.partialorder %v10431_v8, %v6849_v30  ;;  %vm10508_vm10 = vcmp.gt.f32.partialorder %v10432_v28, %v6849_v30  ;;  %v10578_v60 = vld [vmem:[#allocation248_spill] sm:$0xff] }
 0x3b0   :  { %10502 = vst [vmem:[#allocation183_spill] sm:$0xff] %v7169_v48  ;;  %10503 = vst [vmem:[#allocation230_spill] sm:$0xff] %v7183_v19  ;;  %v7189_v48 = vsel %vm10504_vm0, 1.0, %v10470_v41  ;;  %v7195_v20 = vsel %vm10506_vm13, 1.0, %v10470_v41  ;;  %v7201_v62 = vsel %vm10508_vm10, 1.0, %v10470_v41  ;;  %vm1868_vm4 = vcmp.lt.f32.partialorder %v10420_v55, %v6852_v13 }
 0x3b1   :  { %10505 = vst [vmem:[#allocation36_spill] sm:$0xff] %v7189_v48  ;;  %10507 = vst [vmem:[#allocation184_spill] sm:$0xff] %v7195_v20  ;;  %vm1869_vm3 = vcmp.lt.f32.partialorder %v10421_v7, %v6852_v13  ;;  %vm1870_vm0 = vcmp.lt.f32.partialorder %v10422_v42, %v6852_v13  ;;  %v7215_v20 = vsel %vm2045_vm12, 1.0, %v10470_v41  ;;  %v7227_v48 = vsel %vm2047_vm7, 1.0, %v10470_v41  ;;  %v10584_v1 = vld [vmem:[#allocation249_spill] sm:$0xff] }
 0x3b2   :  { %10509 = vst [vmem:[#allocation52_spill] sm:$0xff] %v7201_v62  ;;  %10510 = vst [vmem:[#allocation138_spill] sm:$0xff] %v7215_v20  ;;  %v7221_v62 = vsel %vm2046_vm5, 1.0, %v10470_v41  ;;  %vm10513_vm10 = vcmp.gt.f32.partialorder %v10439_v61, %v6849_v30  ;;  %vm1872_vm12 = vcmp.lt.f32.partialorder %v10424_v63, %v6852_v13  ;;  %vm1873_vm13 = vcmp.lt.f32.partialorder %v10425_v58, %v6852_v13 }
 0x3b3   :  { %10511 = vst [vmem:[#allocation37_spill] sm:$0xff] %v7221_v62  ;;  %10512 = vst [vmem:[#allocation185_spill] sm:$0xff] %v7227_v48  ;;  %v7233_v19 = vsel %vm10513_vm10, 1.0, %v10470_v41  ;;  %v7247_v48 = vsel %vm2049_vm6, 1.0, %v10470_v41  ;;  %vm10517_vm7 = vcmp.gt.f32.partialorder %v10445_v9, %v6849_v30  ;;  %vm10519_vm10 = vcmp.gt.f32.partialorder %v10446_v56, %v6849_v30  ;;  %v10591_v29 = vld [vmem:[#allocation136_spill] sm:$0xff] }
 0x3b4   :  { %10514 = vst [vmem:[#allocation257_spill] sm:$0xff] %v7233_v19  ;;  %10515 = vst [vmem:[#allocation38_spill] sm:$0xff] %v7247_v48  ;;  %v7253_v19 = vsel %vm2050_vm1, 1.0, %v10470_v41  ;;  %v7259_v62 = vsel %vm10517_vm7, 1.0, %v10470_v41  ;;  %v7265_v20 = vsel %vm10519_vm10, 1.0, %v10470_v41  ;;  %vm10521_vm7 = vcmp.gt.f32.partialorder %v10452_v39, %v6849_v30  ;;  %v10560_v39 = vld [vmem:[#allocation256_spill] sm:$0xff] }
 0x3b5   :  { %10516 = vst [vmem:[#allocation39_spill] sm:$0xff] %v7253_v19  ;;  %10518 = vst [vmem:[#allocation117_spill] sm:$0xff] %v7259_v62  ;;  %v7279_v62 = vsel %vm10521_vm7, 1.0, %v10470_v41  ;;  %vm10522_vm10 = vcmp.gt.f32.partialorder %v10453_v18, %v6911_v25  ;;  %vm10524_vm9 = vcmp.gt.f32.partialorder %v10454_v26, %v6911_v25  ;;  %vm10526_vm5 = vcmp.gt.f32.partialorder %v10455_v34, %v6911_v25  ;;  %v10557_v26 = vld [vmem:[#allocation228_spill] sm:$0xff] }
 0x3b6   :  { %10520 = vst [vmem:[#allocation258_spill] sm:$0xff] %v7265_v20  ;;  %v7285_v20 = vsel %vm10522_vm10, 1.0, %v10470_v41  ;;  %v7291_v19 = vsel %vm10524_vm9, 1.0, %v10470_v41  ;;  %v7297_v48 = vsel %vm10526_vm5, 1.0, %v10470_v41  ;;  %vm10528_vm9 = vcmp.gt.f32.partialorder %v10458_v21, %v6911_v25  ;;  %v10559_v21 = vld [vmem:[#allocation205_spill] sm:$0xff]  ;;  %v10596_v55 = vld [vmem:[#allocation32_spill] sm:$0xff] }
 0x3b7   :  { %10523 = vst [vmem:[#allocation139_spill] sm:$0xff] %v7285_v20  ;;  %10525 = vst [vmem:[#allocation40_spill] sm:$0xff] %v7291_v19  ;;  %v7311_v30 = vsel %vm10528_vm9, 1.0, %v10470_v41  ;;  %vm10530_vm5 = vcmp.gt.f32.partialorder %v10459_v47, %v6911_v25  ;;  %vm10532_vm1 = vcmp.gt.f32.partialorder %v10460_v43, %v6911_v25  ;;  %vm10534_vm6 = vcmp.gt.f32.partialorder %v10461_v52, %v6911_v25  ;;  %v10569_v52 = vld [vmem:[#allocation51_spill] sm:$0xff] }
 0x3b8   :  { %10527 = vst [vmem:[#allocation186_spill] sm:$0xff] %v7297_v48  ;;  %10529 = vst [vmem:[#allocation41_spill] sm:$0xff] %v7311_v30  ;;  %v7317_v48 = vsel %vm10530_vm5, 1.0, %v10470_v41  ;;  %v7323_v19 = vsel %vm10532_vm1, 1.0, %v10470_v41  ;;  %v7329_v20 = vsel %vm10534_vm6, 1.0, %v10470_v41  ;;  %vm1884_vm9 = vcmp.lt.f32.partialorder %v10439_v61, %v6852_v13  ;;  %v10602_v63 = vld [vmem:[#allocation183_spill] sm:$0xff]  ;;  %v7593_v61 = vpop.xlane.xlu0 %1372 }
 0x3b9   :  { %10531 = vst [vmem:[#allocation42_spill] sm:$0xff] %v7317_v48  ;;  %10533 = vst [vmem:[#allocation43_spill] sm:$0xff] %v7323_v19  ;;  %vm10536_vm1 = vcmp.gt.f32.partialorder %v10462_v31, %v6911_v25  ;;  %vm10538_vm6 = vcmp.gt.f32.partialorder %v10463_v6, %v6911_v25  ;;  %v7355_v48 = vsel %vm1981_vm2, 1.0, %v10470_v41  ;;  %vm10541_vm7 = vcmp.gt.f32.partialorder %v10465_v50, %v6911_v25 }
 0x3ba   :  { %10535 = vst [vmem:[#allocation187_spill] sm:$0xff] %v7329_v20  ;;  %v7343_v19 = vsel %vm10536_vm1, 1.0, %v10470_v41  ;;  %v7349_v20 = vsel %vm10538_vm6, 1.0, %v10470_v41  ;;  %10540 = vst [vmem:[#allocation188_spill] sm:$0xff] %v7355_v48  ;;  %v7361_v30 = vsel %vm10541_vm7, 1.0, %v10470_v41  ;;  %vm10544_vm2 = vcmp.gt.f32.partialorder %v10466_v0, %v6911_v25 }
 0x3bb   :  { %10537 = vst [vmem:[#allocation140_spill] sm:$0xff] %v7343_v19  ;;  %10539 = vst [vmem:[#allocation45_spill] sm:$0xff] %v7349_v20  ;;  %v10543_v20 = vld [vmem:[#allocation82_spill] sm:$0xff]  ;;  %v7375_v48 = vsel %vm10544_vm2, 1.0, %v10470_v41  ;;  %vm10546_vm7 = vcmp.gt.f32.partialorder %v10467_v53, %v6911_v25  ;;  %vm10548_vm5 = vcmp.gt.f32.partialorder %v10468_v15, %v6911_v25  ;;  %vm10550_vm6 = vcmp.gt.f32.partialorder %v10469_v32, %v6911_v25 }
 0x3bc   :  { %10542 = vst [vmem:[#allocation46_spill] sm:$0xff] %v7361_v30  ;;  %10545 = vst [vmem:[#allocation189_spill] sm:$0xff] %v7375_v48  ;;  %v7381_v30 = vsel %vm10546_vm7, 1.0, %v10470_v41  ;;  %v7387_v19 = vsel %vm10548_vm5, 1.0, %v10470_v41  ;;  %v7393_v18 = vsel %vm10550_vm6, 1.0, %v10470_v41  ;;  %vm10552_vm5 = vcmp.gt.f32.partialorder %v10473_v40, %v6911_v25  ;;  %v10556_v48 = vld [vmem:[#allocation246_spill] sm:$0xff] }
 0x3bd   :  { %10547 = vst [vmem:[#allocation48_spill] sm:$0xff] %v7381_v30  ;;  %10549 = vst [vmem:[#allocation107_spill] sm:$0xff] %v7387_v19  ;;  %v7407_v19 = vsel %vm10552_vm5, 1.0, %v10470_v41  ;;  %v10554_v30 = vld [vmem:[#allocation204_spill] sm:$0xff]  ;;  %vm10555_vm6 = vcmp.lt.f32.partialorder %v10401_v44, %v6852_v13  ;;  %vm10558_vm1 = vcmp.lt.f32.partialorder %v10557_v26, %v6852_v13  ;;  %vm10561_vm10 = vcmp.lt.f32.partialorder %v10560_v39, %v6852_v13  ;;  %v10562_v44 = vld [vmem:[#allocation83_spill] sm:$0xff] }
 0x3be   :  { %10551 = vst [vmem:[#allocation49_spill] sm:$0xff] %v7393_v18  ;;  %10553 = vst [vmem:[#allocation190_spill] sm:$0xff] %v7407_v19  ;;  %v2341_v18 = vsel %vm10555_vm6, -1.0, %v10554_v30  ;;  %v2342_v34 = vsel %vm10558_vm1, -1.0, %v10556_v48  ;;  %v2343_v47 = vsel %vm10561_vm10, -1.0, %v10559_v21  ;;  %vm1989_vm6 = vcmp.gt.f32.partialorder %v10562_v44, %v6911_v25  ;;  %v10563_v30 = vld [vmem:[#allocation247_spill] sm:$0xff] }
 0x3bf   :  { %vm10564_vm1 = vcmp.lt.f32.partialorder %v10404_v4, %v6852_v13  ;;  %v10565_v26 = vld [vmem:[#allocation250_spill] sm:$0xff]  ;;  %vm10566_vm10 = vcmp.lt.f32.partialorder %v10405_v2, %v6852_v13  ;;  %vm10568_vm5 = vcmp.lt.f32.partialorder %v10406_v5, %v6852_v13  ;;  %vm10570_vm2 = vcmp.lt.f32.partialorder %v10407_v10, %v6852_v13  ;;  %2505 = vst [vmem:[#allocation5 + $0x290] sm:$0xff] %v2341_v18  ;;  %v10571_v4 = vld [vmem:[#allocation16_spill] sm:$0xff]  ;;  %v10572_v5 = vld [vmem:[#allocation251_spill] sm:$0xff] }
 0x3c0   :  { %v2344_v48 = vsel %vm10564_vm1, -1.0, %v10563_v30  ;;  %v2345_v39 = vsel %vm10566_vm10, -1.0, %v10565_v26  ;;  %v10567_v21 = vld [vmem:[#allocation134_spill] sm:$0xff]  ;;  %v2347_v31 = vsel %vm10570_vm2, -1.0, %v10569_v52  ;;  %2506 = vst [vmem:[#allocation5 + $0x298] sm:$0xff] %v2342_v34  ;;  %2507 = vst [vmem:[#allocation5 + $0x2a0] sm:$0xff] %v2343_v47  ;;  %vm1816_vm1 = vcmp.lt.f32.partialorder %v10463_v6, %v6947_v22 }
 0x3c1   :  { %v2346_v19 = vsel %vm10568_vm5, -1.0, %v10567_v21  ;;  %vm1819_vm5 = vcmp.lt.f32.partialorder %v10466_v0, %v6947_v22  ;;  %v2348_v2 = vsel %vm1856_vm14, -1.0, %v10571_v4  ;;  %vm10573_vm2 = vcmp.lt.f32.partialorder %v10409_v33, %v6852_v13  ;;  %v10574_v18 = vld [vmem:[#allocation207_spill] sm:$0xff]  ;;  %v10576_v47 = vld [vmem:[#allocation114_spill] sm:$0xff]  ;;  %2508 = vst [vmem:[#allocation5 + $0x2a8] sm:$0xff] %v2344_v48  ;;  %2509 = vst [vmem:[#allocation5 + $0x2b0] sm:$0xff] %v2345_v39 }
 0x3c2   :  { %v2349_v10 = vsel %vm10573_vm2, -1.0, %v10572_v5  ;;  %vm10575_vm7 = vcmp.lt.f32.partialorder %v10410_v59, %v6852_v13  ;;  %vm10577_vm10 = vcmp.lt.f32.partialorder %v10411_v16, %v6852_v13  ;;  %2510 = vst [vmem:[#allocation5 + $0x2b8] sm:$0xff] %v2346_v19  ;;  %2511 = vst [vmem:[#allocation5 + $0x2c0] sm:$0xff] %v2347_v31  ;;  %vm1820_vm14 = vcmp.lt.f32.partialorder %v10467_v53, %v6947_v22  ;;  %v10579_v59 = vld [vmem:[#allocation252_spill] sm:$0xff]  ;;  %v10580_v30 = vld [vmem:[#allocation135_spill] sm:$0xff] }
 0x3c3   :  { %v2350_v34 = vsel %vm10575_vm7, -1.0, %v10574_v18  ;;  %v2351_v52 = vsel %vm10577_vm10, -1.0, %v10576_v47  ;;  %v2352_v33 = vsel %vm1860_vm8, -1.0, %v10578_v60  ;;  %v2353_v16 = vsel %vm1861_vm15, -1.0, %v10579_v59  ;;  %v10582_v31 = vld [vmem:[#allocation115_spill] sm:$0xff]  ;;  %2512 = vst [vmem:[#allocation5 + $0x2c8] sm:$0xff] %v2348_v2 }
 0x3c4   :  { %vm10581_vm7 = vcmp.lt.f32.partialorder %v10414_v57, %v6852_v13  ;;  %vm10583_vm10 = vcmp.lt.f32.partialorder %v10415_v36, %v6852_v13  ;;  %2513 = vst [vmem:[#allocation5 + $0x2d0] sm:$0xff] %v2349_v10  ;;  %2514 = vst [vmem:[#allocation5 + $0x2d8] sm:$0xff] %v2350_v34  ;;  %vm1822_vm8 = vcmp.lt.f32.partialorder %v10469_v32, %v6947_v22  ;;  %v2356_v17 = vsel %vm1864_vm11, -1.0, %v10584_v1  ;;  %v10585_v57 = vld [vmem:[#allocation229_spill] sm:$0xff]  ;;  %v10587_v26 = vld [vmem:[#allocation116_spill] sm:$0xff] }
 0x3c5   :  { %v2354_v19 = vsel %vm10581_vm7, -1.0, %v10580_v30  ;;  %v2355_v48 = vsel %vm10583_vm10, -1.0, %v10582_v31  ;;  %2515 = vst [vmem:[#allocation5 + $0x2e0] sm:$0xff] %v2351_v52  ;;  %vm1825_vm7 = vcmp.lt.f32.partialorder %v10562_v44, %v6947_v22  ;;  %vm10586_vm10 = vcmp.lt.f32.partialorder %v10417_v24, %v6852_v13  ;;  %v10589_v21 = vld [vmem:[#allocation253_spill] sm:$0xff]  ;;  %2516 = vst [vmem:[#allocation5 + $0x2e8] sm:$0xff] %v2352_v33  ;;  %v10593_v5 = vld [vmem:[#allocation254_spill] sm:$0xff] }
 0x3c6   :  { %v2357_v36 = vsel %vm10586_vm10, -1.0, %v10585_v57  ;;  %vm10588_vm15 = vcmp.lt.f32.partialorder %v10418_v11, %v6852_v13  ;;  %vm10590_vm2 = vcmp.lt.f32.partialorder %v10419_v37, %v6852_v13  ;;  %2517 = vst [vmem:[#allocation5 + $0x2f0] sm:$0xff] %v2353_v16  ;;  %2518 = vst [vmem:[#allocation5 + $0x2f8] sm:$0xff] %v2354_v19  ;;  %v2360_v24 = vsel %vm1868_vm4, -1.0, %v10591_v29  ;;  %v10592_v2 = vld [vmem:[#allocation181_spill] sm:$0xff]  ;;  %v10594_v10 = vld [vmem:[#allocation31_spill] sm:$0xff] }
 0x3c7   :  { %v2358_v39 = vsel %vm10588_vm15, -1.0, %v10587_v26  ;;  %v2359_v4 = vsel %vm10590_vm2, -1.0, %v10589_v21  ;;  %2519 = vst [vmem:[#allocation5 + $0x300] sm:$0xff] %v2355_v48  ;;  %v2361_v11 = vsel %vm1869_vm3, -1.0, %v10592_v2  ;;  %v2362_v37 = vsel %vm1870_vm0, -1.0, %v10593_v5  ;;  %2520 = vst [vmem:[#allocation5 + $0x308] sm:$0xff] %v2356_v17 }
 0x3c8   :  { %vm10595_vm11 = vcmp.lt.f32.partialorder %v10423_v27, %v6852_v13  ;;  %2521 = vst [vmem:[#allocation5 + $0x310] sm:$0xff] %v2357_v36  ;;  %2522 = vst [vmem:[#allocation5 + $0x318] sm:$0xff] %v2358_v39  ;;  %v2364_v7 = vsel %vm1872_vm12, -1.0, %v10596_v55  ;;  %v10597_v34 = vld [vmem:[#allocation182_spill] sm:$0xff]  ;;  %v10598_v47 = vld [vmem:[#allocation255_spill] sm:$0xff]  ;;  %vm10599_vm3 = vcmp.lt.f32.partialorder %v10426_v35, %v6852_v13  ;;  %vm10601_vm4 = vcmp.lt.f32.partialorder %v10427_v12, %v6852_v13 }
 0x3c9   :  { %v2363_v18 = vsel %vm10595_vm11, -1.0, %v10594_v10  ;;  %2523 = vst [vmem:[#allocation5 + $0x320] sm:$0xff] %v2359_v4  ;;  %v2365_v42 = vsel %vm1873_vm13, -1.0, %v10597_v34  ;;  %v2366_v27 = vsel %vm10599_vm3, -1.0, %v10598_v47  ;;  %v10600_v52 = vld [vmem:[#allocation137_spill] sm:$0xff]  ;;  %2524 = vst [vmem:[#allocation5 + $0x328] sm:$0xff] %v2360_v24  ;;  %vm10603_vm0 = vcmp.lt.f32.partialorder %v10428_v45, %v6852_v13 }
 0x3ca   :  { %v2367_v60 = vsel %vm10601_vm4, -1.0, %v10600_v52  ;;  %2525 = vst [vmem:[#allocation5 + $0x330] sm:$0xff] %v2361_v11  ;;  %2526 = vst [vmem:[#allocation5 + $0x338] sm:$0xff] %v2362_v37  ;;  %v2368_v58 = vsel %vm10603_vm0, -1.0, %v10602_v63  ;;  %v10604_v33 = vld [vmem:[#allocation230_spill] sm:$0xff]  ;;  %vm10605_vm12 = vcmp.lt.f32.partialorder %v10429_v38, %v6852_v13  ;;  %v10606_v59 = vld [vmem:[#allocation36_spill] sm:$0xff]  ;;  %vm10607_vm13 = vcmp.lt.f32.partialorder %v10430_v3, %v6852_v13 }
 0x3cb   :  { %2527 = vst [vmem:[#allocation5 + $0x340] sm:$0xff] %v2363_v18  ;;  %v2369_v35 = vsel %vm10605_vm12, -1.0, %v10604_v33  ;;  %v2370_v12 = vsel %vm10607_vm13, -1.0, %v10606_v59  ;;  %v10608_v16 = vld [vmem:[#allocation184_spill] sm:$0xff]  ;;  %vm10609_vm2 = vcmp.lt.f32.partialorder %v10431_v8, %v6852_v13  ;;  %2528 = vst [vmem:[#allocation5 + $0x348] sm:$0xff] %v2364_v7  ;;  %vm10611_vm15 = vcmp.lt.f32.partialorder %v10432_v28, %v6852_v13  ;;  %v10612_v19 = vld [vmem:[#allocation138_spill] sm:$0xff] }
 0x3cc   :  { %v2371_v30 = vsel %vm10609_vm2, -1.0, %v10608_v16  ;;  %2529 = vst [vmem:[#allocation5 + $0x350] sm:$0xff] %v2365_v42  ;;  %2530 = vst [vmem:[#allocation5 + $0x358] sm:$0xff] %v2366_v27  ;;  %v10610_v45 = vld [vmem:[#allocation52_spill] sm:$0xff]  ;;  %vm10613_vm10 = vcmp.lt.f32.partialorder %v10436_v46, %v6852_v13  ;;  %v10614_v31 = vld [vmem:[#allocation37_spill] sm:$0xff]  ;;  %vm10615_vm11 = vcmp.lt.f32.partialorder %v10437_v49, %v6852_v13  ;;  %vm10617_vm3 = vcmp.lt.f32.partialorder %v10438_v23, %v6852_v13 }
 0x3cd   :  { %2531 = vst [vmem:[#allocation5 + $0x360] sm:$0xff] %v2367_v60  ;;  %v2372_v38 = vsel %vm10611_vm15, -1.0, %v10610_v45  ;;  %v2373_v3 = vsel %vm10613_vm10, -1.0, %v10612_v19  ;;  %v2374_v8 = vsel %vm10615_vm11, -1.0, %v10614_v31  ;;  %v10616_v48 = vld [vmem:[#allocation185_spill] sm:$0xff]  ;;  %2532 = vst [vmem:[#allocation5 + $0x368] sm:$0xff] %v2368_v58  ;;  %vm10620_vm4 = vcmp.lt.f32.partialorder %v10443_v51, %v6852_v13 }
 0x3ce   :  { %v2375_v1 = vsel %vm10617_vm3, -1.0, %v10616_v48  ;;  %2533 = vst [vmem:[#allocation5 + $0x370] sm:$0xff] %v2369_v35  ;;  %2534 = vst [vmem:[#allocation5 + $0x378] sm:$0xff] %v2370_v12  ;;  %v10618_v28 = vld [vmem:[#allocation257_spill] sm:$0xff]  ;;  %v10619_v17 = vld [vmem:[#allocation38_spill] sm:$0xff]  ;;  %vm10622_vm0 = vcmp.lt.f32.partialorder %v10444_v54, %v6852_v13  ;;  %vm10624_vm12 = vcmp.lt.f32.partialorder %v10445_v9, %v6852_v13  ;;  %vm10627_vm13 = vcmp.lt.f32.partialorder %v10446_v56, %v6852_v13 }
 0x3cf   :  { %2535 = vst [vmem:[#allocation5 + $0x380] sm:$0xff] %v2371_v30  ;;  %v2376_v46 = vsel %vm1884_vm9, -1.0, %v10618_v28  ;;  %v2377_v49 = vsel %vm10620_vm4, -1.0, %v10619_v17  ;;  %v10621_v57 = vld [vmem:[#allocation39_spill] sm:$0xff]  ;;  %v10623_v36 = vld [vmem:[#allocation117_spill] sm:$0xff]  ;;  %2536 = vst [vmem:[#allocation5 + $0x388] sm:$0xff] %v2372_v38  ;;  %vm10625_vm9 = vcmp.gt.f32.partialorder %v10543_v20, %v6911_v25 }
 0x3d0   :  { %v2378_v23 = vsel %vm10622_vm0, -1.0, %v10621_v57  ;;  %v2379_v26 = vsel %vm10624_vm12, -1.0, %v10623_v36  ;;  %2537 = vst [vmem:[#allocation5 + $0x390] sm:$0xff] %v2373_v3  ;;  %2538 = vst [vmem:[#allocation5 + $0x398] sm:$0xff] %v2374_v8  ;;  %v2152_v51 = vsel %vm10625_vm9, 1.0, %v10470_v41  ;;  %v10626_v39 = vld [vmem:[#allocation258_spill] sm:$0xff]  ;;  %vm10647_vm12 = vcmp.lt.f32.partialorder %v10460_v43, %v6947_v22 }
 0x3d1   :  { %2539 = vst [vmem:[#allocation5 + $0x3a0] sm:$0xff] %v2375_v1  ;;  %v2380_v54 = vsel %vm10627_vm13, -1.0, %v10626_v39  ;;  %v10628_v21 = vld [vmem:[#allocation120_spill] sm:$0xff]  ;;  %v10630_v4 = vld [vmem:[#allocation139_spill] sm:$0xff]  ;;  %v10631_v29 = vld [vmem:[#allocation66_spill] sm:$0xff]  ;;  %vm10645_vm0 = vcmask 523264   ;;  %v7682_v1 = vpop.xlane.xlu0 %1748 }
 0x3d2   :  { %vm10629_vm2 = vcmp.lt.f32.partialorder %v10628_v21, %v6852_v13  ;;  %vm10632_vm15 = vcmp.lt.f32.partialorder %v10631_v29, %v6947_v22  ;;  %2540 = vst [vmem:[#allocation5 + $0x3a8] sm:$0xff] %v2376_v46  ;;  %2541 = vst [vmem:[#allocation5 + $0x3b0] sm:$0xff] %v2377_v49  ;;  %v10633_v2 = vld [vmem:[#allocation40_spill] sm:$0xff]  ;;  %v10634_v11 = vld [vmem:[#allocation67_spill] sm:$0xff]  ;;  %v2153_v42 = vsel %vm1989_vm6, 1.0, %v10470_v41  ;;  %vm10656_vm6 = vcmp.lt.f32.partialorder %v10464_v14, %v6947_v22 }
 0x3d3   :  { %v2381_v9 = vsel %vm10629_vm2, -1.0, %v7279_v62  ;;  %v2300_v24 = vsel %vm10632_vm15, -1.0, %v10630_v4  ;;  %2542 = vst [vmem:[#allocation5 + $0x3b8] sm:$0xff] %v2378_v23  ;;  %2543 = vst [vmem:[#allocation5 + $0x3c0] sm:$0xff] %v2379_v26  ;;  %vm10635_vm10 = vcmp.lt.f32.partialorder %v10634_v11, %v6947_v22  ;;  %v10636_v5 = vld [vmem:[#allocation186_spill] sm:$0xff]  ;;  %v10637_v37 = vld [vmem:[#allocation68_spill] sm:$0xff]  ;;  %vm10658_vm2 = vcmp.lt.f32.partialorder %v10465_v50, %v6947_v22 }
 0x3d4   :  { %v2301_v56 = vsel %vm10635_vm10, -1.0, %v10633_v2  ;;  %vm10638_vm11 = vcmp.lt.f32.partialorder %v10637_v37, %v6947_v22  ;;  %v10639_v62 = vld [vmem:[#allocation41_spill] sm:$0xff]  ;;  %v10642_v55 = vld [vmem:[#allocation42_spill] sm:$0xff]  ;;  %2544 = vst [vmem:[#allocation5 + $0x3c8] sm:$0xff] %v2380_v54  ;;  %2545 = vst.msk [vmem:[#allocation5 + $0x3d0] sm:$0xff] %vm10645_vm0, %v2381_v9  ;;  %v1753_v28 = vsub.f32 %v7593_v61, %v7682_v1 }
 0x3d5   :  { %v2302_v13 = vsel %vm10638_vm11, -1.0, %v10636_v5  ;;  %v10640_v10 = vld [vmem:[#allocation69_spill] sm:$0xff]  ;;  %v10643_v7 = vld [vmem:[#allocation70_spill] sm:$0xff]  ;;  %2464 = vst [vmem:[#allocation5 + $0x148] sm:$0xff] %v2300_v24  ;;  %v10646_v47 = vld [vmem:[#allocation43_spill] sm:$0xff] }
 0x3d6   :  { %vm10641_vm3 = vcmp.lt.f32.partialorder %v10640_v10, %v6947_v22  ;;  %vm10644_vm4 = vcmp.lt.f32.partialorder %v10643_v7, %v6947_v22  ;;  %v2305_v27 = vsel %vm10647_vm12, -1.0, %v10646_v47  ;;  %v10648_v52 = vld [vmem:[#allocation187_spill] sm:$0xff]  ;;  %v10649_v60 = vld [vmem:[#allocation72_spill] sm:$0xff]  ;;  %v10652_v33 = vld [vmem:[#allocation73_spill] sm:$0xff]  ;;  %2465 = vst [vmem:[#allocation5 + $0x150] sm:$0xff] %v2301_v56 }
 0x3d7   :  { %v2303_v18 = vsel %vm10641_vm3, -1.0, %v10639_v62  ;;  %v2304_v34 = vsel %vm10644_vm4, -1.0, %v10642_v55  ;;  %vm10650_vm9 = vcmp.lt.f32.partialorder %v10649_v60, %v6947_v22  ;;  %v10651_v58 = vld [vmem:[#allocation140_spill] sm:$0xff]  ;;  %vm10653_vm13 = vcmp.lt.f32.partialorder %v10652_v33, %v6947_v22  ;;  %2466 = vst [vmem:[#allocation5 + $0x158] sm:$0xff] %v2302_v13  ;;  %v10654_v59 = vld [vmem:[#allocation45_spill] sm:$0xff]  ;;  %v10657_v30 = vld [vmem:[#allocation46_spill] sm:$0xff] }
 0x3d8   :  { %v2306_v63 = vsel %vm10650_vm9, -1.0, %v10648_v52  ;;  %v2307_v35 = vsel %vm10653_vm13, -1.0, %v10651_v58  ;;  %2467 = vst [vmem:[#allocation5 + $0x160] sm:$0xff] %v2303_v18  ;;  %2468 = vst [vmem:[#allocation5 + $0x168] sm:$0xff] %v2304_v34  ;;  %v2308_v43 = vsel %vm1816_vm1, -1.0, %v10654_v59  ;;  %v10655_v12 = vld [vmem:[#allocation188_spill] sm:$0xff]  ;;  %vm10662_vm1 = vcmp.lt.f32.partialorder %v10468_v15, %v6947_v22 }
 0x3d9   :  { %v2309_v16 = vsel %vm10656_vm6, -1.0, %v10655_v12  ;;  %v2310_v45 = vsel %vm10658_vm2, -1.0, %v10657_v30  ;;  %v10659_v38 = vld [vmem:[#allocation189_spill] sm:$0xff]  ;;  %2469 = vst [vmem:[#allocation5 + $0x170] sm:$0xff] %v2305_v27  ;;  %2470 = vst [vmem:[#allocation5 + $0x178] sm:$0xff] %v2306_v63  ;;  %v10660_v6 = vld [vmem:[#allocation48_spill] sm:$0xff] }
 0x3da   :  { %v2311_v19 = vsel %vm1819_vm5, -1.0, %v10659_v38  ;;  %2471 = vst [vmem:[#allocation5 + $0x180] sm:$0xff] %v2307_v35  ;;  %v2312_v3 = vsel %vm1820_vm14, -1.0, %v10660_v6  ;;  %v10661_v14 = vld [vmem:[#allocation107_spill] sm:$0xff]  ;;  %2472 = vst [vmem:[#allocation5 + $0x188] sm:$0xff] %v2308_v43  ;;  %v10663_v50 = vld [vmem:[#allocation49_spill] sm:$0xff]  ;;  %vm10665_vm5 = vcmp.lt.f32.partialorder %v10473_v40, %v6947_v22  ;;  %vm10666_vm14 = vcmp.lt.f32.partialorder %v10543_v20, %v6947_v22 }
 0x3db   :  { %v2313_v31 = vsel %vm10662_vm1, -1.0, %v10661_v14  ;;  %2473 = vst [vmem:[#allocation5 + $0x190] sm:$0xff] %v2309_v16  ;;  %2474 = vst [vmem:[#allocation5 + $0x198] sm:$0xff] %v2310_v45  ;;  %v2314_v0 = vsel %vm1822_vm8, -1.0, %v10663_v50  ;;  %v10664_v8 = vld [vmem:[#allocation190_spill] sm:$0xff]  ;;  %v2316_v48 = vsel %vm10666_vm14, -1.0, %v2152_v51 }
 0x3dc   :  { %2475 = vst [vmem:[#allocation5 + $0x1a0] sm:$0xff] %v2311_v19  ;;  %v2315_v53 = vsel %vm10665_vm5, -1.0, %v10664_v8  ;;  %v2317_v15 = vsel %vm1825_vm7, -1.0, %v2153_v42  ;;  %2476 = vst [vmem:[#allocation5 + $0x1a8] sm:$0xff] %v2312_v3  ;;  %v10667_v32 = vld [vmem:[#allocation84_spill] sm:$0xff]  ;;  %v10668_v40 = vld [vmem:[#allocation85_spill] sm:$0xff] }
 0x3dd   :  { %2477 = vst [vmem:[#allocation5 + $0x1b0] sm:$0xff] %v2313_v31  ;;  %2478 = vst [vmem:[#allocation5 + $0x1b8] sm:$0xff] %v2314_v0  ;;  %vm1990_vm8 = vcmp.gt.f32.partialorder %v10667_v32, %v6911_v25  ;;  %vm1991_vm15 = vcmp.gt.f32.partialorder %v10668_v40, %v6911_v25  ;;  %v10669_v20 = vld [vmem:[#allocation86_spill] sm:$0xff]  ;;  %v10670_v44 = vld [vmem:[#allocation87_spill] sm:$0xff]  ;;  %v1758_v2 = vmul.f32 0.33333334, %v1753_v28 }
 0x3de   :  { %2479 = vst [vmem:[#allocation5 + $0x1c0] sm:$0xff] %v2315_v53  ;;  %2480 = vst [vmem:[#allocation5 + $0x1c8] sm:$0xff] %v2316_v48  ;;  %vm1992_vm10 = vcmp.gt.f32.partialorder %v10669_v20, %v6911_v25  ;;  %vm1993_vm7 = vcmp.gt.f32.partialorder %v10670_v44, %v6911_v25  ;;  %v10671_v46 = vld [vmem:[#allocation88_spill] sm:$0xff]  ;;  %v10672_v17 = vld [vmem:[#allocation89_spill] sm:$0xff]  ;;  %v7740_v13 = vsel %vm1990_vm8, 1.0, %v10470_v41  ;;  %v7746_v62 = vsel %vm1991_vm15, 1.0, %v10470_v41 }
 0x3df   :  { %2481 = vst [vmem:[#allocation5 + $0x1d0] sm:$0xff] %v2317_v15  ;;  %vm1994_vm11 = vcmp.gt.f32.partialorder %v10671_v46, %v6911_v25  ;;  %vm1995_vm3 = vcmp.gt.f32.partialorder %v10672_v17, %v6911_v25  ;;  %v10673_v49 = vld [vmem:[#allocation90_spill] sm:$0xff]  ;;  %v10674_v57 = vld [vmem:[#allocation91_spill] sm:$0xff]  ;;  %v10675_v23 = vld [vmem:[#allocation92_spill] sm:$0xff]  ;;  %v7752_v10 = vsel %vm1992_vm10, 1.0, %v10470_v41  ;;  %v7758_v18 = vsel %vm1993_vm7, 1.0, %v10470_v41 }
 0x3e0   :  { %vm1996_vm4 = vcmp.gt.f32.partialorder %v10673_v49, %v6911_v25  ;;  %vm1997_vm0 = vcmp.gt.f32.partialorder %v10674_v57, %v6911_v25  ;;  %vm1998_vm12 = vcmp.gt.f32.partialorder %v10675_v23, %v6911_v25  ;;  %v10676_v36 = vld [vmem:[#allocation93_spill] sm:$0xff]  ;;  %v10677_v26 = vld [vmem:[#allocation94_spill] sm:$0xff]  ;;  %v10678_v51 = vld [vmem:[#allocation95_spill] sm:$0xff]  ;;  %vm1828_vm8 = vcmp.lt.f32.partialorder %v10669_v20, %v6947_v22 }
 0x3e1   :  { %v10679_v39 = vld [vmem:[#allocation96_spill] sm:$0xff]  ;;  %v10680_v54 = vld [vmem:[#allocation97_spill] sm:$0xff]  ;;  %v10681_v21 = vld [vmem:[#allocation98_spill] sm:$0xff]  ;;  %vm1829_vm13 = vcmp.lt.f32.partialorder %v10670_v44, %v6947_v22  ;;  %vm1830_vm15 = vcmp.lt.f32.partialorder %v10671_v46, %v6947_v22  ;;  %vm1831_vm9 = vcmp.lt.f32.partialorder %v10672_v17, %v6947_v22  ;;  %v7772_v55 = vsel %vm1994_vm11, 1.0, %v10470_v41 }
 0x3e2   :  { %v10682_v9 = vld [vmem:[#allocation99_spill] sm:$0xff]  ;;  %v10683_v4 = vld [vmem:[#allocation100_spill] sm:$0xff]  ;;  %v10684_v29 = vld [vmem:[#allocation101_spill] sm:$0xff]  ;;  %v7778_v7 = vsel %vm1995_vm3, 1.0, %v10470_v41  ;;  %v7784_v34 = vsel %vm1996_vm4, 1.0, %v10470_v41  ;;  %v7790_v42 = vsel %vm1997_vm0, 1.0, %v10470_v41  ;;  %vm1832_vm10 = vcmp.lt.f32.partialorder %v10673_v49, %v6947_v22 }
 0x3e3   :  { %v10685_v24 = vld [vmem:[#allocation102_spill] sm:$0xff]  ;;  %v10686_v11 = vld [vmem:[#allocation103_spill] sm:$0xff]  ;;  %v10687_v56 = vld [vmem:[#allocation104_spill] sm:$0xff]  ;;  %v7804_v47 = vsel %vm1998_vm12, 1.0, %v10470_v41  ;;  %vm10690_vm4 = vcmp.gt.f32.partialorder %v10676_v36, %v6911_v25  ;;  %vm10691_vm0 = vcmp.gt.f32.partialorder %v10677_v26, %v6911_v25  ;;  %v7819_v60 = vsub.f32 %v7593_v61, %v1758_v2 }
 0x3e4   :  { %vm2008_vm6 = vcmp.gt.f32.partialorder %v10685_v24, %v6911_v25  ;;  %vm2009_vm2 = vcmp.gt.f32.partialorder %v10686_v11, %v6911_v25  ;;  %vm2010_vm1 = vcmp.gt.f32.partialorder %v10687_v56, %v6911_v25  ;;  %v10688_v5 = vld [vmem:[#allocation105_spill] sm:$0xff]  ;;  %v10689_v37 = vld [vmem:[#allocation106_spill] sm:$0xff]  ;;  %v7810_v27 = vsel %vm10690_vm4, 1.0, %v10470_v41  ;;  %v10701_v14 = vld [vmem:[#allocation151_spill] sm:$0xff] }
 0x3e5   :  { %vm2011_vm5 = vcmp.gt.f32.partialorder %v10688_v5, %v6911_v25  ;;  %vm2012_vm14 = vcmp.gt.f32.partialorder %v10689_v37, %v6911_v25  ;;  %v7816_v52 = vsel %vm10691_vm0, 1.0, %v10470_v41  ;;  %vm10692_vm0 = vcmp.gt.f32.partialorder %v10678_v51, %v6911_v25  ;;  %v10699_v6 = vld [vmem:[#allocation149_spill] sm:$0xff]  ;;  %v10700_v3 = vld [vmem:[#allocation150_spill] sm:$0xff]  ;;  %v10702_v31 = vld [vmem:[#allocation152_spill] sm:$0xff] }
 0x3e6   :  { %v7833_v63 = vsel %vm10692_vm0, 1.0, %v10470_v41  ;;  %vm10693_vm7 = vcmp.gt.f32.partialorder %v10679_v39, %v6911_v25  ;;  %vm10694_vm12 = vcmp.gt.f32.partialorder %v10680_v54, %v6911_v25  ;;  %vm10695_vm4 = vcmp.gt.f32.partialorder %v10681_v21, %v6911_v25  ;;  %v10704_v50 = vld [vmem:[#allocation153_spill] sm:$0xff]  ;;  %v10705_v0 = vld [vmem:[#allocation154_spill] sm:$0xff]  ;;  %v10715_v48 = vld [vmem:[#allocation163_spill] sm:$0xff] }
 0x3e7   :  { %v7839_v61 = vsel %vm10693_vm7, 1.0, %v10470_v41  ;;  %v7845_v58 = vsel %vm10694_vm12, 1.0, %v10470_v41  ;;  %v7851_v33 = vsel %vm10695_vm4, 1.0, %v10470_v41  ;;  %vm1840_vm0 = vcmp.lt.f32.partialorder %v10681_v21, %v6947_v22  ;;  %v10716_v15 = vld [vmem:[#allocation111_spill] sm:$0xff]  ;;  %v10724_v28 = vld [vmem:[#allocation169_spill] sm:$0xff]  ;;  %v10726_v8 = vld [vmem:[#allocation170_spill] sm:$0xff] }
 0x3e8   :  { %vm10696_vm12 = vcmp.gt.f32.partialorder %v10682_v9, %v6911_v25  ;;  %vm10697_vm4 = vcmp.gt.f32.partialorder %v10683_v4, %v6911_v25  ;;  %vm10698_vm11 = vcmp.gt.f32.partialorder %v10684_v29, %v6911_v25  ;;  %v7883_v12 = vsel %vm2008_vm6, 1.0, %v10470_v41  ;;  %v10703_v25 = vld [vmem:[#allocation109_spill] sm:$0xff]  ;;  %v10727_v53 = vld [vmem:[#allocation171_spill] sm:$0xff]  ;;  %v10728_v20 = vld [vmem:[#allocation172_spill] sm:$0xff] }
 0x3e9   :  { %v7865_v35 = vsel %vm10696_vm12, 1.0, %v10470_v41  ;;  %v7871_v59 = vsel %vm10697_vm4, 1.0, %v10470_v41  ;;  %v7877_v43 = vsel %vm10698_vm11, 1.0, %v10470_v41  ;;  %vm1844_vm12 = vcmp.lt.f32.partialorder %v10685_v24, %v6947_v22  ;;  %v10730_v44 = vld [vmem:[#allocation174_spill] sm:$0xff]  ;;  %v10735_v49 = vld [vmem:[#allocation175_spill] sm:$0xff]  ;;  %v10750_v21 = vld [vmem:[#allocation201_spill] sm:$0xff] }
 0x3ea   :  { %vm1845_vm3 = vcmp.lt.f32.partialorder %v10686_v11, %v6947_v22  ;;  %vm1846_vm4 = vcmp.lt.f32.partialorder %v10687_v56, %v6947_v22  ;;  %v7897_v16 = vsel %vm2009_vm2, 1.0, %v10470_v41  ;;  %v7903_v30 = vsel %vm2010_vm1, 1.0, %v10470_v41 }
 0x3eb   :  { %v7909_v45 = vsel %vm2011_vm5, 1.0, %v10470_v41  ;;  %v7915_v38 = vsel %vm2012_vm14, 1.0, %v10470_v41  ;;  %v7920_v19 = vadd.f32 %v1758_v2, %v7682_v1  ;;  %vm2071_vm11 = vcmp.gt.f32.partialorder %v10716_v15, %v7819_v60  ;;  %v10725_v2 = vld [vmem:[#allocation112_spill] sm:$0xff] }
 0x3ec   :  { %vm10722_vm5 = vcmp.lt.f32.partialorder %v10667_v32, %v6947_v22  ;;  %vm10723_vm14 = vcmp.lt.f32.partialorder %v10668_v40, %v6947_v22  ;;  %vm2077_vm6 = vcmp.gt.f32.partialorder %v10724_v28, %v7819_v60  ;;  %vm2078_vm7 = vcmp.gt.f32.partialorder %v10725_v2, %v7819_v60 }
 0x3ed   :  { %v2318_v15 = vsel %vm10722_vm5, -1.0, %v7740_v13  ;;  %v2319_v1 = vsel %vm10723_vm14, -1.0, %v7746_v62  ;;  %vm2079_vm2 = vcmp.gt.f32.partialorder %v10726_v8, %v7819_v60  ;;  %vm2080_vm1 = vcmp.gt.f32.partialorder %v10727_v53, %v7819_v60 }
 0x3ee   :  { %v2320_v32 = vsel %vm1828_vm8, -1.0, %v7752_v10  ;;  %v2321_v40 = vsel %vm1829_vm13, -1.0, %v7758_v18  ;;  %v2322_v13 = vsel %vm1830_vm15, -1.0, %v7772_v55  ;;  %v2323_v62 = vsel %vm1831_vm9, -1.0, %v7778_v7  ;;  %2482 = vst [vmem:[#allocation5 + $0x1d8] sm:$0xff] %v2318_v15  ;;  %2483 = vst [vmem:[#allocation5 + $0x1e0] sm:$0xff] %v2319_v1 }
 0x3ef   :  { %vm2081_vm8 = vcmp.gt.f32.partialorder %v10728_v20, %v7819_v60  ;;  %v10729_v10 = vld [vmem:[#allocation173_spill] sm:$0xff]  ;;  %v2324_v46 = vsel %vm1832_vm10, -1.0, %v7784_v34  ;;  %vm10732_vm9 = vcmp.lt.f32.partialorder %v10674_v57, %v6947_v22  ;;  %vm10733_vm15 = vcmp.lt.f32.partialorder %v10675_v23, %v6947_v22  ;;  %2484 = vst [vmem:[#allocation5 + $0x1e8] sm:$0xff] %v2320_v32  ;;  %2485 = vst [vmem:[#allocation5 + $0x1f0] sm:$0xff] %v2321_v40  ;;  %v10736_v57 = vld [vmem:[#allocation176_spill] sm:$0xff] }
 0x3f0   :  { %v10731_v18 = vld [vmem:[#allocation113_spill] sm:$0xff]  ;;  %v2325_v17 = vsel %vm10732_vm9, -1.0, %v7790_v42  ;;  %v2326_v55 = vsel %vm10733_vm15, -1.0, %v7804_v47  ;;  %vm10734_vm13 = vcmp.lt.f32.partialorder %v10676_v36, %v6947_v22  ;;  %2486 = vst [vmem:[#allocation5 + $0x1f8] sm:$0xff] %v2322_v13  ;;  %2487 = vst [vmem:[#allocation5 + $0x200] sm:$0xff] %v2323_v62  ;;  %vm2085_vm10 = vcmp.gt.f32.partialorder %v10735_v49, %v7819_v60  ;;  %v10738_v23 = vld [vmem:[#allocation178_spill] sm:$0xff] }
 0x3f1   :  { %v2327_v7 = vsel %vm10734_vm13, -1.0, %v7810_v27  ;;  %v10737_v34 = vld [vmem:[#allocation177_spill] sm:$0xff]  ;;  %vm10739_vm13 = vcmp.lt.f32.partialorder %v10677_v26, %v6947_v22  ;;  %vm10740_vm5 = vcmp.lt.f32.partialorder %v10678_v51, %v6947_v22  ;;  %vm10741_vm9 = vcmp.lt.f32.partialorder %v10679_v39, %v6947_v22  ;;  %2488 = vst [vmem:[#allocation5 + $0x208] sm:$0xff] %v2324_v46  ;;  %2489 = vst [vmem:[#allocation5 + $0x210] sm:$0xff] %v2325_v17  ;;  %v10743_v26 = vld [vmem:[#allocation179_spill] sm:$0xff] }
 0x3f2   :  { %v2328_v36 = vsel %vm10739_vm13, -1.0, %v7816_v52  ;;  %v2329_v42 = vsel %vm10740_vm5, -1.0, %v7833_v63  ;;  %v2330_v47 = vsel %vm10741_vm9, -1.0, %v7839_v61  ;;  %vm10742_vm14 = vcmp.lt.f32.partialorder %v10680_v54, %v6947_v22  ;;  %2490 = vst [vmem:[#allocation5 + $0x218] sm:$0xff] %v2326_v55  ;;  %2491 = vst [vmem:[#allocation5 + $0x220] sm:$0xff] %v2327_v7  ;;  %v10744_v51 = vld [vmem:[#allocation180_spill] sm:$0xff] }
 0x3f3   :  { %v2331_v27 = vsel %vm10742_vm14, -1.0, %v7845_v58  ;;  %vm2089_vm13 = vcmp.gt.f32.partialorder %v10743_v26, %v7819_v60  ;;  %v10745_v52 = vld [vmem:[#allocation18_spill] sm:$0xff]  ;;  %v10746_v39 = vld [vmem:[#allocation241_spill] sm:$0xff]  ;;  %v2332_v54 = vsel %vm1840_vm0, -1.0, %v7851_v33  ;;  %vm10747_vm14 = vcmp.lt.f32.partialorder %v10682_v9, %v6947_v22  ;;  %2492 = vst [vmem:[#allocation5 + $0x228] sm:$0xff] %v2328_v36  ;;  %2493 = vst [vmem:[#allocation5 + $0x230] sm:$0xff] %v2329_v42 }
 0x3f4   :  { %v2333_v63 = vsel %vm10747_vm14, -1.0, %v7865_v35  ;;  %vm10748_vm5 = vcmp.lt.f32.partialorder %v10683_v4, %v6947_v22  ;;  %vm10749_vm15 = vcmp.lt.f32.partialorder %v10684_v29, %v6947_v22  ;;  %2494 = vst [vmem:[#allocation5 + $0x238] sm:$0xff] %v2330_v47  ;;  %2495 = vst [vmem:[#allocation5 + $0x240] sm:$0xff] %v2331_v27  ;;  %vm2093_vm9 = vcmp.gt.f32.partialorder %v10750_v21, %v7819_v60  ;;  %v10751_v9 = vld [vmem:[#allocation122_spill] sm:$0xff]  ;;  %v10767_v15 = vld [vmem:[#allocation159_spill] sm:$0xff] }
 0x3f5   :  { %v2334_v61 = vsel %vm10748_vm5, -1.0, %v7871_v59  ;;  %v2335_v58 = vsel %vm10749_vm15, -1.0, %v7877_v43  ;;  %v2336_v4 = vsel %vm1844_vm12, -1.0, %v7883_v12  ;;  %v2337_v29 = vsel %vm1845_vm3, -1.0, %v7897_v16  ;;  %2496 = vst [vmem:[#allocation5 + $0x248] sm:$0xff] %v2332_v54  ;;  %2497 = vst [vmem:[#allocation5 + $0x250] sm:$0xff] %v2333_v63 }
 0x3f6   :  { %v2338_v33 = vsel %vm1846_vm4, -1.0, %v7903_v30  ;;  %vm10752_vm15 = vcmp.lt.f32.partialorder %v10688_v5, %v6947_v22  ;;  %2498 = vst [vmem:[#allocation5 + $0x258] sm:$0xff] %v2334_v61  ;;  %2499 = vst [vmem:[#allocation5 + $0x260] sm:$0xff] %v2335_v58  ;;  %vm10754_vm0 = vcmp.gt.f32.partialorder %v10699_v6, %v7819_v60  ;;  %vm10755_vm3 = vcmp.gt.f32.partialorder %v10700_v3, %v7819_v60  ;;  %v10759_v59 = vld [vmem:[#allocation157_spill] sm:$0xff]  ;;  %v10768_v1 = vld [vmem:[#allocation160_spill] sm:$0xff] }
 0x3f7   :  { %v2339_v35 = vsel %vm10752_vm15, -1.0, %v7909_v45  ;;  %vm10753_vm15 = vcmp.lt.f32.partialorder %v10689_v37, %v6947_v22  ;;  %v8112_v11 = vsel %vm10754_vm0, 1.0, %v10470_v41  ;;  %v8118_v56 = vsel %vm10755_vm3, 1.0, %v10470_v41  ;;  %2500 = vst [vmem:[#allocation5 + $0x268] sm:$0xff] %v2336_v4  ;;  %2501 = vst [vmem:[#allocation5 + $0x270] sm:$0xff] %v2337_v29  ;;  %v10757_v22 = vld [vmem:[#allocation155_spill] sm:$0xff] }
 0x3f8   :  { %v2340_v24 = vsel %vm10753_vm15, -1.0, %v7915_v38  ;;  %vm10756_vm4 = vcmp.gt.f32.partialorder %v10701_v14, %v7819_v60  ;;  %2502 = vst [vmem:[#allocation5 + $0x278] sm:$0xff] %v2338_v33  ;;  %2503 = vst [vmem:[#allocation5 + $0x280] sm:$0xff] %v2339_v35  ;;  %v10758_v37 = vld [vmem:[#allocation156_spill] sm:$0xff]  ;;  %vm10761_vm12 = vcmp.gt.f32.partialorder %v10703_v25, %v7819_v60  ;;  %vm10762_vm15 = vcmp.gt.f32.partialorder %v10704_v50, %v7819_v60  ;;  %v10765_v45 = vld [vmem:[#allocation158_spill] sm:$0xff] }
 0x3f9   :  { %v8124_v5 = vsel %vm10756_vm4, 1.0, %v10470_v41  ;;  %vm10760_vm4 = vcmp.gt.f32.partialorder %v10702_v31, %v7819_v60  ;;  %v8144_v12 = vsel %vm10761_vm12, 1.0, %v10470_v41  ;;  %v8150_v16 = vsel %vm10762_vm15, 1.0, %v10470_v41  ;;  %v10766_v38 = vld [vmem:[#allocation110_spill] sm:$0xff]  ;;  %v10773_v46 = vld [vmem:[#allocation161_spill] sm:$0xff]  ;;  %v10780_v27 = vld [vmem:[#allocation164_spill] sm:$0xff] }
 0x3fa   :  { %v8138_v43 = vsel %vm10760_vm4, 1.0, %v10470_v41  ;;  %vm10763_vm14 = vcmp.gt.f32.partialorder %v10705_v0, %v7819_v60  ;;  %vm10764_vm4 = vcmask 523264   ;;  %vm1900_vm3 = vcmp.lt.f32.partialorder %v10765_v45, %v7920_v19  ;;  %v10774_v17 = vld [vmem:[#allocation162_spill] sm:$0xff]  ;;  %v10781_v54 = vld [vmem:[#allocation165_spill] sm:$0xff]  ;;  %v10783_v61 = vld [vmem:[#allocation167_spill] sm:$0xff] }
 0x3fb   :  { %v8156_v30 = vsel %vm10763_vm14, 1.0, %v10470_v41  ;;  %2504 = vst.msk [vmem:[#allocation5 + $0x288] sm:$0xff] %vm10764_vm4, %v2340_v24  ;;  %vm10769_vm5 = vcmp.gt.f32.partialorder %v10757_v22, %v7819_v60  ;;  %vm10770_vm14 = vcmp.gt.f32.partialorder %v10758_v37, %v7819_v60  ;;  %vm10771_vm4 = vcmp.gt.f32.partialorder %v10759_v59, %v7819_v60  ;;  %v10782_v63 = vld [vmem:[#allocation166_spill] sm:$0xff]  ;;  %v10788_v35 = vld [vmem:[#allocation168_spill] sm:$0xff] }
 0x3fc   :  { %v8171_v32 = vsel %vm10769_vm5, 1.0, %v10470_v41  ;;  %v8177_v40 = vsel %vm10770_vm14, 1.0, %v10470_v41  ;;  %v8183_v13 = vsel %vm10771_vm4, 1.0, %v10470_v41  ;;  %vm10772_vm15 = vcmp.gt.f32.partialorder %v10765_v45, %v7819_v60 }
 0x3fd   :  { %v8189_v62 = vsel %vm10772_vm15, 1.0, %v10470_v41  ;;  %vm10776_vm4 = vcmp.gt.f32.partialorder %v10766_v38, %v7819_v60  ;;  %vm10777_vm15 = vcmp.gt.f32.partialorder %v10767_v15, %v7819_v60  ;;  %vm10778_vm0 = vcmp.gt.f32.partialorder %v10768_v1, %v7819_v60 }
 0x3fe   :  { %v8203_v7 = vsel %vm10776_vm4, 1.0, %v10470_v41  ;;  %v8209_v36 = vsel %vm10777_vm15, 1.0, %v10470_v41  ;;  %v8215_v42 = vsel %vm10778_vm0, 1.0, %v10470_v41  ;;  %vm10779_vm12 = vcmp.gt.f32.partialorder %v10773_v46, %v7819_v60 }
 0x3ff   :  { %v8221_v47 = vsel %vm10779_vm12, 1.0, %v10470_v41  ;;  %vm1908_vm4 = vcmp.lt.f32.partialorder %v10780_v27, %v7920_v19  ;;  %vm10784_vm0 = vcmp.gt.f32.partialorder %v10774_v17, %v7819_v60  ;;  %vm10785_vm12 = vcmp.gt.f32.partialorder %v10715_v48, %v7819_v60 }
 0x400   :  { %v8235_v58 = vsel %vm10784_vm0, 1.0, %v10470_v41  ;;  %v8241_v4 = vsel %vm10785_vm12, 1.0, %v10470_v41  ;;  %v8247_v29 = vsel %vm2071_vm11, 1.0, %v10470_v41  ;;  %vm10786_vm5 = vcmp.gt.f32.partialorder %v10780_v27, %v7819_v60 }
 0x401   :  { %v8253_v33 = vsel %vm10786_vm5, 1.0, %v10470_v41  ;;  %vm10789_vm11 = vcmp.gt.f32.partialorder %v10781_v54, %v7819_v60  ;;  %vm10790_vm5 = vcmp.gt.f32.partialorder %v10782_v63, %v7819_v60  ;;  %vm10791_vm15 = vcmp.gt.f32.partialorder %v10783_v61, %v7819_v60 }
 0x402   :  { %10787 = vst [vmem:[#allocation191_spill] sm:$0xff] %v8253_v33  ;;  %v8267_v24 = vsel %vm10789_vm11, 1.0, %v10470_v41  ;;  %v8273_v27 = vsel %vm10790_vm5, 1.0, %v10470_v41  ;;  %v8279_v33 = vsel %vm10791_vm15, 1.0, %v10470_v41  ;;  %vm10793_vm14 = vcmp.gt.f32.partialorder %v10788_v35, %v7819_v60 }
 0x403   :  { %10792 = vst [vmem:[#allocation142_spill] sm:$0xff] %v8279_v33  ;;  %v8285_v55 = vsel %vm10793_vm14, 1.0, %v10470_v41  ;;  %vm1916_vm11 = vcmp.lt.f32.partialorder %v10727_v53, %v7920_v19  ;;  %vm1917_vm12 = vcmp.lt.f32.partialorder %v10728_v20, %v7920_v19  ;;  %vm1918_vm5 = vcmp.lt.f32.partialorder %v10729_v10, %v7920_v19 }
 0x404   :  { %10794 = vst [vmem:[#allocation118_spill] sm:$0xff] %v8285_v55  ;;  %vm1919_vm0 = vcmp.lt.f32.partialorder %v10730_v44, %v7920_v19  ;;  %v8299_v61 = vsel %vm2077_vm6, 1.0, %v10470_v41  ;;  %v8305_v35 = vsel %vm2078_vm7, 1.0, %v10470_v41  ;;  %v8311_v55 = vsel %vm2079_vm2, 1.0, %v10470_v41 }
 0x405   :  { %10795 = vst [vmem:[#allocation8_spill] sm:$0xff] %v8311_v55  ;;  %v8317_v33 = vsel %vm2080_vm1, 1.0, %v10470_v41  ;;  %vm1920_vm6 = vcmp.lt.f32.partialorder %v10731_v18, %v7920_v19  ;;  %v8331_v8 = vsel %vm2081_vm8, 1.0, %v10470_v41  ;;  %vm10797_vm2 = vcmp.gt.f32.partialorder %v10729_v10, %v7819_v60 }
 0x406   :  { %10796 = vst [vmem:[#allocation33_spill] sm:$0xff] %v8317_v33  ;;  %v8337_v53 = vsel %vm10797_vm2, 1.0, %v10470_v41  ;;  %vm10798_vm1 = vcmp.gt.f32.partialorder %v10730_v44, %v7819_v60  ;;  %vm10800_vm15 = vcmp.gt.f32.partialorder %v10731_v18, %v7819_v60  ;;  %vm1924_vm8 = vcmp.lt.f32.partialorder %v10738_v23, %v7920_v19 }
 0x407   :  { %v8343_v33 = vsel %vm10798_vm1, 1.0, %v10470_v41  ;;  %v8349_v55 = vsel %vm10800_vm15, 1.0, %v10470_v41  ;;  %vm1925_vm7 = vcmp.lt.f32.partialorder %v10743_v26, %v7920_v19  ;;  %v8363_v44 = vsel %vm2085_vm10, 1.0, %v10470_v41 }
 0x408   :  { %10799 = vst [vmem:[#allocation9_spill] sm:$0xff] %v8343_v33  ;;  %10801 = vst [vmem:[#allocation192_spill] sm:$0xff] %v8349_v55  ;;  %vm10802_vm15 = vcmp.gt.f32.partialorder %v10736_v57, %v7819_v60  ;;  %vm10803_vm1 = vcmp.gt.f32.partialorder %v10737_v34, %v7819_v60  ;;  %vm10805_vm14 = vcmp.gt.f32.partialorder %v10738_v23, %v7819_v60  ;;  %v8393_v34 = vsel %vm2089_vm13, 1.0, %v10470_v41 }
 0x409   :  { %v8369_v18 = vsel %vm10802_vm15, 1.0, %v10470_v41  ;;  %v8375_v55 = vsel %vm10803_vm1, 1.0, %v10470_v41  ;;  %v8381_v33 = vsel %vm10805_vm14, 1.0, %v10470_v41  ;;  %vm1928_vm10 = vcmp.lt.f32.partialorder %v10746_v39, %v7920_v19 }
 0x40a   :  { %10804 = vst [vmem:[#allocation193_spill] sm:$0xff] %v8375_v55  ;;  %10806 = vst [vmem:[#allocation143_spill] sm:$0xff] %v8381_v33  ;;  %vm1929_vm2 = vcmp.lt.f32.partialorder %v10750_v21, %v7920_v19  ;;  %vm10807_vm14 = vcmp.gt.f32.partialorder %v10744_v51, %v7819_v60  ;;  %vm10808_vm1 = vcmp.gt.f32.partialorder %v10745_v52, %v7819_v60  ;;  %v8417_v26 = vsel %vm2093_vm9, 1.0, %v10470_v41 }
 0x40b   :  { %v8399_v23 = vsel %vm10807_vm14, 1.0, %v10470_v41  ;;  %v8405_v33 = vsel %vm10808_vm1, 1.0, %v10470_v41  ;;  %vm10809_vm15 = vcmp.gt.f32.partialorder %v10746_v39, %v7819_v60  ;;  %vm10810_vm13 = vcmp.gt.f32.partialorder %v10751_v9, %v7819_v60 }
 0x40c   :  { %v8411_v55 = vsel %vm10809_vm15, 1.0, %v10470_v41  ;;  %v8423_v51 = vsel %vm10810_vm13, 1.0, %v10470_v41  ;;  %vm10811_vm14 = vcmp.lt.f32.partialorder %v10699_v6, %v7920_v19  ;;  %vm10812_vm15 = vcmp.lt.f32.partialorder %v10700_v3, %v7920_v19 }
 0x40d   :  { %v2382_v52 = vsel %vm10811_vm14, -1.0, %v8112_v11  ;;  %v2383_v39 = vsel %vm10812_vm15, -1.0, %v8118_v56  ;;  %vm10813_vm9 = vcmp.lt.f32.partialorder %v10701_v14, %v7920_v19  ;;  %vm10814_vm1 = vcmp.lt.f32.partialorder %v10702_v31, %v7920_v19 }
 0x40e   :  { %v2384_v21 = vsel %vm10813_vm9, -1.0, %v8124_v5  ;;  %v2385_v41 = vsel %vm10814_vm1, -1.0, %v8138_v43  ;;  %vm10815_vm13 = vcmp.lt.f32.partialorder %v10703_v25, %v7920_v19  ;;  %vm10816_vm14 = vcmp.lt.f32.partialorder %v10704_v50, %v7920_v19  ;;  %2546 = vst [vmem:[#allocation5 + $0x3d8] sm:$0x7] %v2382_v52  ;;  %2547 = vst [vmem:[#allocation5 + $0x3e0] sm:$0x7] %v2383_v39 }
 0x40f   :  { %v2386_v60 = vsel %vm10815_vm13, -1.0, %v8144_v12  ;;  %v2387_v6 = vsel %vm10816_vm14, -1.0, %v8150_v16  ;;  %vm10817_vm15 = vcmp.lt.f32.partialorder %v10705_v0, %v7920_v19  ;;  %vm10818_vm9 = vcmp.lt.f32.partialorder %v10757_v22, %v7920_v19  ;;  %2548 = vst [vmem:[#allocation5 + $0x3e8] sm:$0x7] %v2384_v21  ;;  %2549 = vst [vmem:[#allocation5 + $0x3f0] sm:$0x7] %v2385_v41 }
 0x410   :  { %v2388_v3 = vsel %vm10817_vm15, -1.0, %v8156_v30  ;;  %v2389_v14 = vsel %vm10818_vm9, -1.0, %v8171_v32  ;;  %vm10819_vm1 = vcmp.lt.f32.partialorder %v10758_v37, %v7920_v19  ;;  %vm10820_vm13 = vcmp.lt.f32.partialorder %v10759_v59, %v7920_v19  ;;  %2550 = vst [vmem:[#allocation5 + $0x3f8] sm:$0x7] %v2386_v60  ;;  %2551 = vst [vmem:[#allocation5 + $0x400] sm:$0x7] %v2387_v6 }
 0x411   :  { %v2390_v31 = vsel %vm10819_vm1, -1.0, %v8177_v40  ;;  %v2391_v25 = vsel %vm10820_vm13, -1.0, %v8183_v13  ;;  %v2392_v50 = vsel %vm1900_vm3, -1.0, %v8189_v62  ;;  %vm10821_vm14 = vcmp.lt.f32.partialorder %v10766_v38, %v7920_v19  ;;  %2552 = vst [vmem:[#allocation5 + $0x408] sm:$0x7] %v2388_v3  ;;  %v10827_v5 = vld [vmem:[#allocation111_spill] sm:$0xff] }
 0x412   :  { %v2393_v0 = vsel %vm10821_vm14, -1.0, %v8203_v7  ;;  %vm10822_vm15 = vcmp.lt.f32.partialorder %v10767_v15, %v7920_v19  ;;  %vm10823_vm9 = vcmp.lt.f32.partialorder %v10768_v1, %v7920_v19  ;;  %2553 = vst [vmem:[#allocation5 + $0x410] sm:$0x7] %v2389_v14  ;;  %2554 = vst [vmem:[#allocation5 + $0x418] sm:$0x7] %v2390_v31  ;;  %vm10824_vm3 = vcmp.lt.f32.partialorder %v10773_v46, %v7920_v19  ;;  %v10829_v37 = vld [vmem:[#allocation191_spill] sm:$0xff] }
 0x413   :  { %v2394_v52 = vsel %vm10822_vm15, -1.0, %v8209_v36  ;;  %v2395_v39 = vsel %vm10823_vm9, -1.0, %v8215_v42  ;;  %2555 = vst [vmem:[#allocation5 + $0x420] sm:$0x7] %v2391_v25  ;;  %v2396_v21 = vsel %vm10824_vm3, -1.0, %v8221_v47  ;;  %vm10825_vm1 = vcmp.lt.f32.partialorder %v10774_v17, %v7920_v19  ;;  %v10833_v16 = vld [vmem:[#allocation142_spill] sm:$0xff] }
 0x414   :  { %v2397_v11 = vsel %vm10825_vm1, -1.0, %v8235_v58  ;;  %vm10826_vm13 = vcmp.lt.f32.partialorder %v10715_v48, %v7920_v19  ;;  %vm10828_vm14 = vcmp.lt.f32.partialorder %v10827_v5, %v7920_v19  ;;  %2556 = vst [vmem:[#allocation5 + $0x428] sm:$0x7] %v2392_v50  ;;  %2557 = vst [vmem:[#allocation5 + $0x430] sm:$0x7] %v2393_v0  ;;  %v2400_v43 = vsel %vm1908_vm4, -1.0, %v10829_v37 }
 0x415   :  { %v2398_v56 = vsel %vm10826_vm13, -1.0, %v8241_v4  ;;  %v2399_v22 = vsel %vm10828_vm14, -1.0, %v8247_v29  ;;  %2558 = vst [vmem:[#allocation5 + $0x438] sm:$0x7] %v2394_v52  ;;  %2559 = vst [vmem:[#allocation5 + $0x440] sm:$0x7] %v2395_v39  ;;  %vm10831_vm15 = vcmp.lt.f32.partialorder %v10781_v54, %v7920_v19  ;;  %vm10832_vm9 = vcmp.lt.f32.partialorder %v10782_v63, %v7920_v19 }
 0x416   :  { %v2401_v48 = vsel %vm10831_vm15, -1.0, %v8267_v24  ;;  %v2402_v12 = vsel %vm10832_vm9, -1.0, %v8273_v27  ;;  %v10834_v30 = vld [vmem:[#allocation167_spill] sm:$0xff]  ;;  %2560 = vst [vmem:[#allocation5 + $0x448] sm:$0x7] %v2396_v21  ;;  %v10836_v38 = vld [vmem:[#allocation118_spill] sm:$0xff]  ;;  %vm10839_vm1 = vcmp.lt.f32.partialorder %v10724_v28, %v7920_v19  ;;  %vm10840_vm13 = vcmp.lt.f32.partialorder %v10725_v2, %v7920_v19 }
 0x417   :  { %vm10835_vm3 = vcmp.lt.f32.partialorder %v10834_v30, %v7920_v19  ;;  %2561 = vst [vmem:[#allocation5 + $0x450] sm:$0x7] %v2397_v11  ;;  %2562 = vst [vmem:[#allocation5 + $0x458] sm:$0x7] %v2398_v56  ;;  %v10837_v15 = vld [vmem:[#allocation168_spill] sm:$0xff]  ;;  %v2405_v32 = vsel %vm10839_vm1, -1.0, %v8299_v61 }
 0x418   :  { %v2403_v45 = vsel %vm10835_vm3, -1.0, %v10833_v16  ;;  %2563 = vst [vmem:[#allocation5 + $0x460] sm:$0x7] %v2399_v22  ;;  %vm10838_vm4 = vcmp.lt.f32.partialorder %v10837_v15, %v7920_v19  ;;  %v2406_v40 = vsel %vm10840_vm13, -1.0, %v8305_v35  ;;  %v10841_v13 = vld [vmem:[#allocation8_spill] sm:$0xff]  ;;  %v10842_v62 = vld [vmem:[#allocation170_spill] sm:$0xff] }
 0x419   :  { %v2404_v1 = vsel %vm10838_vm4, -1.0, %v10836_v38  ;;  %vm10843_vm14 = vcmp.lt.f32.partialorder %v10842_v62, %v7920_v19  ;;  %2564 = vst [vmem:[#allocation5 + $0x468] sm:$0x7] %v2400_v43  ;;  %2565 = vst [vmem:[#allocation5 + $0x470] sm:$0x7] %v2401_v48  ;;  %v10844_v17 = vld [vmem:[#allocation33_spill] sm:$0xff] }
 0x41a   :  { %v2407_v46 = vsel %vm10843_vm14, -1.0, %v10841_v13  ;;  %2566 = vst [vmem:[#allocation5 + $0x478] sm:$0x7] %v2402_v12  ;;  %2567 = vst [vmem:[#allocation5 + $0x480] sm:$0x7] %v2403_v45  ;;  %v2408_v28 = vsel %vm1916_vm11, -1.0, %v10844_v17  ;;  %vm10851_vm11 = vcmp.lt.f32.partialorder %v10736_v57, %v7920_v19 }
 0x41b   :  { %v2409_v2 = vsel %vm1917_vm12, -1.0, %v8331_v8  ;;  %v2410_v36 = vsel %vm1918_vm5, -1.0, %v8337_v53  ;;  %v10846_v42 = vld [vmem:[#allocation9_spill] sm:$0xff]  ;;  %2568 = vst [vmem:[#allocation5 + $0x488] sm:$0x7] %v2404_v1  ;;  %v10848_v54 = vld [vmem:[#allocation192_spill] sm:$0xff]  ;;  %vm10850_vm12 = vcmp.lt.f32.partialorder %v10735_v49, %v7920_v19 }
 0x41c   :  { %v2411_v27 = vsel %vm1919_vm0, -1.0, %v10846_v42  ;;  %2569 = vst [vmem:[#allocation5 + $0x490] sm:$0x7] %v2405_v32  ;;  %2570 = vst [vmem:[#allocation5 + $0x498] sm:$0x7] %v2406_v40  ;;  %v2412_v20 = vsel %vm1920_vm6, -1.0, %v10848_v54 }
 0x41d   :  { %2571 = vst [vmem:[#allocation5 + $0x4a0] sm:$0x7] %v2407_v46  ;;  %v2413_v8 = vsel %vm10850_vm12, -1.0, %v8363_v44  ;;  %v2414_v53 = vsel %vm10851_vm11, -1.0, %v8369_v18  ;;  %v10852_v10 = vld [vmem:[#allocation193_spill] sm:$0xff]  ;;  %v10855_v4 = vld [vmem:[#allocation143_spill] sm:$0xff] }
 0x41e   :  { %v10853_v61 = vld [vmem:[#allocation177_spill] sm:$0xff]  ;;  %2572 = vst [vmem:[#allocation5 + $0x4a8] sm:$0x7] %v2408_v28  ;;  %2573 = vst [vmem:[#allocation5 + $0x4b0] sm:$0x7] %v2409_v2  ;;  %v2416_v49 = vsel %vm1924_vm8, -1.0, %v10855_v4 }
 0x41f   :  { %vm10854_vm0 = vcmp.lt.f32.partialorder %v10853_v61, %v7920_v19  ;;  %2574 = vst [vmem:[#allocation5 + $0x4b8] sm:$0x7] %v2410_v36  ;;  %2575 = vst [vmem:[#allocation5 + $0x4c0] sm:$0x7] %v2411_v27  ;;  %v2417_v57 = vsel %vm1925_vm7, -1.0, %v8393_v34  ;;  %v10858_v18 = vld [vmem:[#allocation180_spill] sm:$0xff]  ;;  %vm10864_vm7 = vcmp.lt.f32.partialorder %v10751_v9, %v7920_v19 }
 0x420   :  { %v2415_v58 = vsel %vm10854_vm0, -1.0, %v10852_v10  ;;  %vm10859_vm5 = vcmp.lt.f32.partialorder %v10858_v18, %v7920_v19  ;;  %v10860_v24 = vld [vmem:[#allocation18_spill] sm:$0xff]  ;;  %2576 = vst [vmem:[#allocation5 + $0x4c8] sm:$0x7] %v2412_v20  ;;  %2577 = vst [vmem:[#allocation5 + $0x4d0] sm:$0x7] %v2413_v8 }
 0x421   :  { %v2418_v35 = vsel %vm10859_vm5, -1.0, %v8399_v23  ;;  %vm10861_vm6 = vcmp.lt.f32.partialorder %v10860_v24, %v7920_v19  ;;  %2578 = vst [vmem:[#allocation5 + $0x4d8] sm:$0x7] %v2414_v53  ;;  %2579 = vst [vmem:[#allocation5 + $0x4e0] sm:$0x7] %v2415_v58  ;;  %v2420_v34 = vsel %vm1928_vm10, -1.0, %v8411_v55 }
 0x422   :  { %v2419_v41 = vsel %vm10861_vm6, -1.0, %v8405_v33  ;;  %v2421_v23 = vsel %vm1929_vm2, -1.0, %v8417_v26  ;;  %v2422_v33 = vsel %vm10864_vm7, -1.0, %v8423_v51  ;;  %2580 = vst [vmem:[#allocation5 + $0x4e8] sm:$0x7] %v2416_v49  ;;  %vm10865_vm8 = vcmask 518144  }
 0x423   :  { %2581 = vst [vmem:[#allocation5 + $0x4f0] sm:$0x7] %v2417_v57  ;;  %2582 = vst [vmem:[#allocation5 + $0x4f8] sm:$0x7] %v2418_v35 }
 0x424   :  { %2583 = vst [vmem:[#allocation5 + $0x500] sm:$0x7] %v2419_v41  ;;  %2584 = vst [vmem:[#allocation5 + $0x508] sm:$0x7] %v2420_v34 }
 0x425   :  { %2585 = vst [vmem:[#allocation5 + $0x510] sm:$0x7] %v2421_v23  ;;  %2586 = vst.msk [vmem:[#allocation5 + $0x518] sm:$0x7] %vm10865_vm8, %v2422_v33 }
 0x426   :  { %2806 = shalt.err (!%p2803_p9)
}
 0x427   :  { %2598 = dma.vmem_to_hbm [thread:$0]  %s2593_s2, 20992, %s8599_s3, [#allocation4], %s2820_s15, %s2820_s15, %s2821_s16  }
 0x428   :  { %2817 = dma.done.wait [#allocation4], 20992  }
 0x429   :  { %2818 = vsyncadd [#allocation4], 4294946304 }
 0x42a   :  { %2602 = vsyncpa [#allocation3], 1 }
 0x42b   :  { %2603 = vsyncpa [#allocation4], 1 }

</bundles_post_ra>
